<compile_context>
chip_gen: v5e
topology: v5e:2x2
jax: 0.10.0
libtpu: 0.0.40
codegen_flags: <defaults>
</compile_context>

<pallas_src>
import functools

import jax
import jax.numpy as jnp
import numpy as np
from jax.experimental import pallas as pl
from jax.experimental.pallas import tpu as pltpu

OBS_DIM = 10823
ACTION_DIM = 80

TK = 1024      # K tile for the streaming layers (4 MiB bb0 tile, 0.5 MiB hist0)
TN_BB0 = 512   # N split for bb0 -> 2 "parallel" grid steps (feeds v7x's 2 TCs)


def _round_up(x, m):
    return ((x + m - 1) // m) * m


# --------------------- streamed K-tiled linear (bb0/hist0) ------------------ #

def _stream_linear_kernel(x_ref, w_ref, b_ref, o_ref, *, apply_relu):
    """grid = (N_tiles ["parallel"], K_tiles ["arbitrary"]).

    Output block is resident across the K axis, so accumulate directly into
    o_ref (f32 output) and fuse bias + ReLU on the last K step.
    """
    k = pl.program_id(1)

    @pl.when(k == 0)
    def _():
        o_ref[...] = jnp.zeros_like(o_ref)

    o_ref[...] += jnp.dot(x_ref[...], w_ref[...],
                          preferred_element_type=jnp.float32)

    @pl.when(k == pl.num_programs(1) - 1)
    def _():
        out = o_ref[...] + b_ref[...]
        if apply_relu:
            out = jnp.maximum(out, 0.0)
        o_ref[...] = out


def stream_linear(x, w_padded, b2, *, relu, tk=TK, tn=None):
    """y = relu?(x @ w + b) with the K dimension tiled and streamed from HBM.

    `w_padded` already has its K dimension zero-padded to a multiple of `tk`
    (done once at prepare_params time); only the tiny activation pad happens
    here.  Zero weight rows make the padding exact.
    """
    B, K = x.shape
    Kp, N = w_padded.shape
    tn = N if tn is None else tn
    assert Kp % tk == 0 and N % tn == 0, (Kp, tk, N, tn)
    if K != Kp:
        x = jnp.pad(x, ((0, 0), (0, Kp - K)))   # B x Kp floats: negligible

    kernel = functools.partial(_stream_linear_kernel, apply_relu=relu)
    return pl.pallas_call(
        kernel,
        out_shape=jax.ShapeDtypeStruct((B, N), jnp.float32),
        grid=(N // tn, Kp // tk),
        in_specs=[
            pl.BlockSpec((B, tk), lambda n, k: (0, k)),    # activations
            pl.BlockSpec((tk, tn), lambda n, k: (k, n)),   # weights (streamed)
            pl.BlockSpec((1, tn), lambda n, k: (0, n)),    # bias
        ],
        out_specs=pl.BlockSpec((B, tn), lambda n, k: (0, n)),
        compiler_params=pltpu.CompilerParams(
            dimension_semantics=("parallel", "arbitrary")),
    )(x, w_padded, b2)


# ----------------- fused tail: all small layers in one kernel --------------- #

def _tail_kernel(x1_ref, hand_ref, cap_ref, stats_ref, h0_ref,
                 w_bb1, b_bb1, w_bb2, b_bb2, w_bb3, b_bb3,
                 w_hand, b_hand, w_cap, b_cap, w_stat, b_stat,
                 w_hist1, b_hist1,
                 wc_bb, wc_hand, wc_cap, wc_hist, wc_stat, b_comb,
                 w_head, b_head, o_ref):
    def dense(a, w_ref, b_ref, relu=True):
        y = jnp.dot(a, w_ref[...], preferred_element_type=jnp.float32) + b_ref[...]
        return jnp.maximum(y, 0.0) if relu else y

    x2 = dense(x1_ref[...], w_bb1, b_bb1)
    x3 = dense(x2, w_bb2, b_bb2)
    bb_f = dense(x3, w_bb3, b_bb3)

    hand_f = dense(hand_ref[...], w_hand, b_hand)
    cap_f = dense(cap_ref[...], w_cap, b_cap)
    stat_f = dense(stats_ref[...], w_stat, b_stat)
    hist_f = dense(h0_ref[...], w_hist1, b_hist1)

    # combiner: weight pre-split by input segment -> no in-kernel concat
    comb = (jnp.dot(bb_f,   wc_bb[...],   preferred_element_type=jnp.float32)
            + jnp.dot(hand_f, wc_hand[...], preferred_element_type=jnp.float32)
            + jnp.dot(cap_f,  wc_cap[...],  preferred_element_type=jnp.float32)
            + jnp.dot(hist_f, wc_hist[...], preferred_element_type=jnp.float32)
            + jnp.dot(stat_f, wc_stat[...], preferred_element_type=jnp.float32)
            + b_comb[...])
    comb = jnp.maximum(comb, 0.0)

    o_ref[...] = (jnp.dot(comb, w_head[...],
                          preferred_element_type=jnp.float32) + b_head[...])


def tail_forward(p, x1, hand, cap, stats, h0):
    B = x1.shape[0]
    wc_chunks, b_comb = p["comb"]
    args = (x1, hand, cap, stats, h0,
            *p["bb1"], *p["bb2"], *p["bb3"],
            *p["hand"], *p["cap"], *p["stats"], *p["hist1"],
            *wc_chunks, b_comb,
            *p["head"])
    # No grid: every operand (total ~3.4 MB of weights) lives fully in VMEM.
    return pl.pallas_call(
        _tail_kernel,
        out_shape=jax.ShapeDtypeStruct((B, ACTION_DIM), jnp.float32),
    )(*args)


# --------------------------- parameter creation ----------------------------- #

def _init_linear(key, fan_in, fan_out):
    """Deterministic PyTorch-style uniform(-1/sqrt(fan_in), 1/sqrt(fan_in))."""
    kw, kb = jax.random.split(key)
    bound = 1.0 / np.sqrt(fan_in)
    w = jax.random.uniform(kw, (fan_in, fan_out), jnp.float32, -bound, bound)
    b = jax.random.uniform(kb, (fan_out,), jnp.float32, -bound, bound)
    return w, b


def init_qnetwork_params(seed=0, obs_dim=OBS_DIM, action_dim=ACTION_DIM):
    keys = jax.random.split(jax.random.PRNGKey(seed), 11)
    return {
        "bb0":   _init_linear(keys[0], obs_dim, 1024),
        "bb1":   _init_linear(keys[1], 1024, 512),
        "bb2":   _init_linear(keys[2], 512, 256),
        "bb3":   _init_linear(keys[3], 256, 128),
        "hand":  _init_linear(keys[4], 83, 64),
        "cap":   _init_linear(keys[5], 82, 64),
        "stats": _init_linear(keys[6], 334, 64),
        "hist0": _init_linear(keys[7], 10320, 128),
        "hist1": _init_linear(keys[8], 128, 64),
        "comb":  _init_linear(keys[9], 128 + 64 * 4, 256),
        "head":  _init_linear(keys[10], 256, action_dim),
    }


def _pad_rows(w, mult):
    """Zero-pad the K (row) dimension of a [K, N] weight up to a multiple."""
    K, N = w.shape
    Kp = _round_up(K, mult)
    if Kp != K:
        w = jnp.pad(w, ((0, Kp - K), (0, 0)))
    return w


def prepare_params(params, tk=TK):
    """One-time (outside jit) conversion to forward-ready layout:
      * streamed weights (bb0, hist0) K-padded to a tile multiple,
      * hand/cap/stats weights K-padded to 128 (MXU-friendly small dots),
      * combiner weight split by input segment (bb/hand/cap/hist/stats),
      * biases reshaped to (1, N).
    Zero-row padding is exact: padded rows contribute nothing to the dot.
    """
    p = {}
    for name in ("bb0", "hist0"):
        w, b = params[name]
        p[name] = (_pad_rows(w, tk), b.reshape(1, -1))
    for name in ("hand", "cap", "stats"):
        w, b = params[name]
        p[name] = (_pad_rows(w, 128), b.reshape(1, -1))
    for name in ("bb1", "bb2", "bb3", "hist1", "head"):
        w, b = params[name]
        p[name] = (w, b.reshape(1, -1))
    wc, bc = params["comb"]  # rows ordered: bb(128), hand(64), cap(64), hist(64), stats(64)
    p["comb"] = ((wc[0:128], wc[128:192], wc[192:256], wc[256:320], wc[320:384]),
                 bc.reshape(1, -1))
    return p


# ------------------------------ forward pass -------------------------------- #

def qnetwork_forward(p, x):
    # The two HBM-streaming layers.
    x1 = stream_linear(x, *p["bb0"], relu=True, tn=TN_BB0)        # (B, 1024)
    h0 = stream_linear(x[:, 169:10489], *p["hist0"], relu=True)   # (B, 128)

    def pad_to(a, kp):
        return jnp.pad(a, ((0, 0), (0, kp - a.shape[1]))) if a.shape[1] != kp else a

    hand = pad_to(x[:, :83], p["hand"][0].shape[0])
    cap = pad_to(x[:, 83:165], p["cap"][0].shape[0])
    stats = pad_to(x[:, 10489:], p["stats"][0].shape[0])

    # All remaining small layers fused into one VMEM-resident Pallas kernel.
    return tail_forward(p, x1, hand, cap, stats, h0)


# --------------------------- pure-JAX reference ----------------------------- #

def _ref_linear(x, w, b, relu):
    y = x @ w + b
    return jnp.maximum(y, 0.0) if relu else y


def qnetwork_reference(params, x):
    p = params
    x1 = _ref_linear(x,  *p["bb0"], True)
    x2 = _ref_linear(x1, *p["bb1"], True)
    x3 = _ref_linear(x2, *p["bb2"], True)
    bb = _ref_linear(x3, *p["bb3"], True)
    hand = _ref_linear(x[:, :83], *p["hand"], True)
    cap = _ref_linear(x[:, 83:165], *p["cap"], True)
    hist = _ref_linear(x[:, 169:10489], *p["hist0"], True)
    hist = _ref_linear(hist, *p["hist1"], True)
    stats = _ref_linear(x[:, 10489:], *p["stats"], True)
    combined = jnp.concatenate([bb, hand, cap, hist, stats], axis=1)
    final = _ref_linear(combined, *p["comb"], True)
    return _ref_linear(final, *p["head"], False)


# ---------------------------------- main ------------------------------------ #

if __name__ == "__main__":
    batch = 2  # obs_dim is fixed at 10823 by the hard-coded slices
    params = init_qnetwork_params(seed=0)
    prepared = prepare_params(params)          # one-time, outside jit
    x = jax.random.normal(jax.random.PRNGKey(0), (batch, OBS_DIM), jnp.float32)

    fwd = jax.jit(qnetwork_forward)
    out = jax.block_until_ready(fwd(prepared, x))
    assert out.shape == (batch, ACTION_DIM), out.shape

    ref = jax.block_until_ready(qnetwork_reference(params, x))
    np.testing.assert_allclose(np.asarray(out), np.asarray(ref),
                               rtol=2e-3, atol=2e-3)

    print("KERNEL_OK")
</pallas_src>

<mosaic_0001>
module attributes {stable_mosaic.version = 11 : i64} {
  func.func @_stream_linear_kernel(%arg0: i32, %arg1: i32, %arg2: memref<2x1024xf32, #tpu.memory_space<vmem>>, %arg3: memref<1024x128xf32, #tpu.memory_space<vmem>>, %arg4: memref<1x128xf32, #tpu.memory_space<vmem>>, %arg5: memref<2x128xf32, #tpu.memory_space<vmem>>) attributes {dimension_semantics = [#tpu.dimension_semantics<parallel>, #tpu.dimension_semantics<arbitrary>], iteration_bounds = array<i64: 1, 11>, scalar_prefetch = 0 : i64, scratch_operands = 0 : i64, tpu.core_type = #tpu.core_type<tc>, window_params = [{transform_indices = @transform_0, window_bounds = array<i64: 2, 1024>}, {transform_indices = @transform_1, window_bounds = array<i64: 1024, 128>}, {transform_indices = @transform_2, window_bounds = array<i64: 1, 128>}, {transform_indices = @transform_3, window_bounds = array<i64: 2, 128>}]} {
    %c0_i32 = arith.constant 0 : i32
    %0 = arith.cmpi eq, %arg1, %c0_i32 : i32
    %1 = arith.extui %0 : i1 to i32
    %c0_i32_0 = arith.constant 0 : i32
    %2 = arith.cmpi ne, %1, %c0_i32_0 : i32
    scf.if %2 {
      %cst_9 = arith.constant 0.000000e+00 : f32
      %12 = vector.broadcast %cst_9 : f32 to vector<2x128xf32>
      %c0_10 = arith.constant 0 : index
      %c0_11 = arith.constant 0 : index
      %13 = vector.load %arg5[%c0_10, %c0_11] : memref<2x128xf32, #tpu.memory_space<vmem>>, vector<2x128xf32>
      tpu.vector_store %arg5[%c0_10, %c0_11], %12 {strides = array<i32>} : memref<2x128xf32, #tpu.memory_space<vmem>>, vector<2x128xf32>,
    } else {
    }
    %c0 = arith.constant 0 : index
    %c0_1 = arith.constant 0 : index
    %3 = vector.load %arg5[%c0, %c0_1] : memref<2x128xf32, #tpu.memory_space<vmem>>, vector<2x128xf32>
    %c0_2 = arith.constant 0 : index
    %c0_3 = arith.constant 0 : index
    %4 = vector.load %arg2[%c0_2, %c0_3] : memref<2x1024xf32, #tpu.memory_space<vmem>>, vector<2x1024xf32>
    %c0_4 = arith.constant 0 : index
    %c0_5 = arith.constant 0 : index
    %5 = vector.load %arg3[%c0_4, %c0_5] : memref<1024x128xf32, #tpu.memory_space<vmem>>, vector<1024x128xf32>
    %cst = arith.constant dense<0.000000e+00> : vector<2x128xf32>
    %6 = tpu.matmul %4, %5, %cst {dimension_numbers = #tpu.dot_dimension_numbers<[1], [0], [0], [1], [0, 0, 1, 1], [], []>} : vector<2x1024xf32>, vector<1024x128xf32>, vector<2x128xf32> -> vector<2x128xf32>
    %7 = arith.addf %3, %6 : vector<2x128xf32>
    %c0_6 = arith.constant 0 : index
    %c0_7 = arith.constant 0 : index
    %8 = vector.load %arg5[%c0_6, %c0_7] : memref<2x128xf32, #tpu.memory_space<vmem>>, vector<2x128xf32>
    tpu.vector_store %arg5[%c0_6, %c0_7], %7 {strides = array<i32>} : memref<2x128xf32, #tpu.memory_space<vmem>>, vector<2x128xf32>,
    %c10_i32 = arith.constant 10 : i32
    %9 = arith.cmpi eq, %arg1, %c10_i32 : i32
    %10 = arith.extui %9 : i1 to i32
    %c0_i32_8 = arith.constant 0 : i32
    %11 = arith.cmpi ne, %10, %c0_i32_8 : i32
    scf.if %11 {
      %c0_9 = arith.constant 0 : index
      %c0_10 = arith.constant 0 : index
      %12 = vector.load %arg5[%c0_9, %c0_10] : memref<2x128xf32, #tpu.memory_space<vmem>>, vector<2x128xf32>
      %c0_11 = arith.constant 0 : index
      %c0_12 = arith.constant 0 : index
      %13 = vector.load %arg4[%c0_11, %c0_12] : memref<1x128xf32, #tpu.memory_space<vmem>>, vector<1x128xf32>
      %14 = vector.broadcast %13 : vector<1x128xf32> to vector<2x128xf32>
      %15 = arith.addf %12, %14 : vector<2x128xf32>
      %cst_13 = arith.constant 0.000000e+00 : f32
      %16 = vector.broadcast %cst_13 : f32 to vector<2x128xf32>
      %17 = arith.maximumf %15, %16 : vector<2x128xf32>
      %c0_14 = arith.constant 0 : index
      %c0_15 = arith.constant 0 : index
      %18 = vector.load %arg5[%c0_14, %c0_15] : memref<2x128xf32, #tpu.memory_space<vmem>>, vector<2x128xf32>
      tpu.vector_store %arg5[%c0_14, %c0_15], %17 {strides = array<i32>} : memref<2x128xf32, #tpu.memory_space<vmem>>, vector<2x128xf32>,
    } else {
    }
    return
  }
  func.func @transform_0(%arg0: i32, %arg1: i32) -> (i32, i32) {
    %c0_i32 = arith.constant 0 : i32
    %c0_i32_0 = arith.constant 0 : i32
    return %c0_i32, %arg1 : i32, i32
  }
  func.func @transform_1(%arg0: i32, %arg1: i32) -> (i32, i32) {
    %c0_i32 = arith.constant 0 : i32
    return %arg1, %arg0 : i32, i32
  }
  func.func @transform_2(%arg0: i32, %arg1: i32) -> (i32, i32) {
    %c0_i32 = arith.constant 0 : i32
    %c0_i32_0 = arith.constant 0 : i32
    return %c0_i32, %arg0 : i32, i32
  }
  func.func @transform_3(%arg0: i32, %arg1: i32) -> (i32, i32) {
    %c0_i32 = arith.constant 0 : i32
    %c0_i32_0 = arith.constant 0 : i32
    return %c0_i32, %arg0 : i32, i32
  }
}

module attributes {stable_mosaic.version = 11 : i64} {
  func.func @_stream_linear_kernel(%arg0: i32, %arg1: i32, %arg2: memref<2x1024xf32, #tpu.memory_space<vmem>>, %arg3: memref<1024x512xf32, #tpu.memory_space<vmem>>, %arg4: memref<1x512xf32, #tpu.memory_space<vmem>>, %arg5: memref<2x512xf32, #tpu.memory_space<vmem>>) attributes {dimension_semantics = [#tpu.dimension_semantics<parallel>, #tpu.dimension_semantics<arbitrary>], iteration_bounds = array<i64: 2, 11>, scalar_prefetch = 0 : i64, scratch_operands = 0 : i64, tpu.core_type = #tpu.core_type<tc>, window_params = [{transform_indices = @transform_0, window_bounds = array<i64: 2, 1024>}, {transform_indices = @transform_1, window_bounds = array<i64: 1024, 512>}, {transform_indices = @transform_2, window_bounds = array<i64: 1, 512>}, {transform_indices = @transform_3, window_bounds = array<i64: 2, 512>}]} {
    %c0_i32 = arith.constant 0 : i32
    %0 = arith.cmpi eq, %arg1, %c0_i32 : i32
    %1 = arith.extui %0 : i1 to i32
    %c0_i32_0 = arith.constant 0 : i32
    %2 = arith.cmpi ne, %1, %c0_i32_0 : i32
    scf.if %2 {
      %cst_9 = arith.constant 0.000000e+00 : f32
      %12 = vector.broadcast %cst_9 : f32 to vector<2x512xf32>
      %c0_10 = arith.constant 0 : index
      %c0_11 = arith.constant 0 : index
      %13 = vector.load %arg5[%c0_10, %c0_11] : memref<2x512xf32, #tpu.memory_space<vmem>>, vector<2x512xf32>
      tpu.vector_store %arg5[%c0_10, %c0_11], %12 {strides = array<i32>} : memref<2x512xf32, #tpu.memory_space<vmem>>, vector<2x512xf32>,
    } else {
    }
    %c0 = arith.constant 0 : index
    %c0_1 = arith.constant 0 : index
    %3 = vector.load %arg5[%c0, %c0_1] : memref<2x512xf32, #tpu.memory_space<vmem>>, vector<2x512xf32>
    %c0_2 = arith.constant 0 : index
    %c0_3 = arith.constant 0 : index
    %4 = vector.load %arg2[%c0_2, %c0_3] : memref<2x1024xf32, #tpu.memory_space<vmem>>, vector<2x1024xf32>
    %c0_4 = arith.constant 0 : index
    %c0_5 = arith.constant 0 : index
    %5 = vector.load %arg3[%c0_4, %c0_5] : memref<1024x512xf32, #tpu.memory_space<vmem>>, vector<1024x512xf32>
    %cst = arith.constant dense<0.000000e+00> : vector<2x512xf32>
    %6 = tpu.matmul %4, %5, %cst {dimension_numbers = #tpu.dot_dimension_numbers<[1], [0], [0], [1], [0, 0, 1, 1], [], []>} : vector<2x1024xf32>, vector<1024x512xf32>, vector<2x512xf32> -> vector<2x512xf32>
    %7 = arith.addf %3, %6 : vector<2x512xf32>
    %c0_6 = arith.constant 0 : index
    %c0_7 = arith.constant 0 : index
    %8 = vector.load %arg5[%c0_6, %c0_7] : memref<2x512xf32, #tpu.memory_space<vmem>>, vector<2x512xf32>
    tpu.vector_store %arg5[%c0_6, %c0_7], %7 {strides = array<i32>} : memref<2x512xf32, #tpu.memory_space<vmem>>, vector<2x512xf32>,
    %c10_i32 = arith.constant 10 : i32
    %9 = arith.cmpi eq, %arg1, %c10_i32 : i32
    %10 = arith.extui %9 : i1 to i32
    %c0_i32_8 = arith.constant 0 : i32
    %11 = arith.cmpi ne, %10, %c0_i32_8 : i32
    scf.if %11 {
      %c0_9 = arith.constant 0 : index
      %c0_10 = arith.constant 0 : index
      %12 = vector.load %arg5[%c0_9, %c0_10] : memref<2x512xf32, #tpu.memory_space<vmem>>, vector<2x512xf32>
      %c0_11 = arith.constant 0 : index
      %c0_12 = arith.constant 0 : index
      %13 = vector.load %arg4[%c0_11, %c0_12] : memref<1x512xf32, #tpu.memory_space<vmem>>, vector<1x512xf32>
      %14 = vector.broadcast %13 : vector<1x512xf32> to vector<2x512xf32>
      %15 = arith.addf %12, %14 : vector<2x512xf32>
      %cst_13 = arith.constant 0.000000e+00 : f32
      %16 = vector.broadcast %cst_13 : f32 to vector<2x512xf32>
      %17 = arith.maximumf %15, %16 : vector<2x512xf32>
      %c0_14 = arith.constant 0 : index
      %c0_15 = arith.constant 0 : index
      %18 = vector.load %arg5[%c0_14, %c0_15] : memref<2x512xf32, #tpu.memory_space<vmem>>, vector<2x512xf32>
      tpu.vector_store %arg5[%c0_14, %c0_15], %17 {strides = array<i32>} : memref<2x512xf32, #tpu.memory_space<vmem>>, vector<2x512xf32>,
    } else {
    }
    return
  }
  func.func @transform_0(%arg0: i32, %arg1: i32) -> (i32, i32) {
    %c0_i32 = arith.constant 0 : i32
    %c0_i32_0 = arith.constant 0 : i32
    return %c0_i32, %arg1 : i32, i32
  }
  func.func @transform_1(%arg0: i32, %arg1: i32) -> (i32, i32) {
    %c0_i32 = arith.constant 0 : i32
    return %arg1, %arg0 : i32, i32
  }
  func.func @transform_2(%arg0: i32, %arg1: i32) -> (i32, i32) {
    %c0_i32 = arith.constant 0 : i32
    %c0_i32_0 = arith.constant 0 : i32
    return %c0_i32, %arg0 : i32, i32
  }
  func.func @transform_3(%arg0: i32, %arg1: i32) -> (i32, i32) {
    %c0_i32 = arith.constant 0 : i32
    %c0_i32_0 = arith.constant 0 : i32
    return %c0_i32, %arg0 : i32, i32
  }
}

module attributes {stable_mosaic.version = 11 : i64} {
  func.func @_tail_kernel(%arg0: memref<2x1024xf32, #tpu.memory_space<vmem>>, %arg1: memref<2x128xf32, #tpu.memory_space<vmem>>, %arg2: memref<2x128xf32, #tpu.memory_space<vmem>>, %arg3: memref<2x384xf32, #tpu.memory_space<vmem>>, %arg4: memref<2x128xf32, #tpu.memory_space<vmem>>, %arg5: memref<1024x512xf32, #tpu.memory_space<vmem>>, %arg6: memref<1x512xf32, #tpu.memory_space<vmem>>, %arg7: memref<512x256xf32, #tpu.memory_space<vmem>>, %arg8: memref<1x256xf32, #tpu.memory_space<vmem>>, %arg9: memref<256x128xf32, #tpu.memory_space<vmem>>, %arg10: memref<1x128xf32, #tpu.memory_space<vmem>>, %arg11: memref<128x64xf32, #tpu.memory_space<vmem>>, %arg12: memref<1x64xf32, #tpu.memory_space<vmem>>, %arg13: memref<128x64xf32, #tpu.memory_space<vmem>>, %arg14: memref<1x64xf32, #tpu.memory_space<vmem>>, %arg15: memref<384x64xf32, #tpu.memory_space<vmem>>, %arg16: memref<1x64xf32, #tpu.memory_space<vmem>>, %arg17: memref<128x64xf32, #tpu.memory_space<vmem>>, %arg18: memref<1x64xf32, #tpu.memory_space<vmem>>, %arg19: memref<128x256xf32, #tpu.memory_space<vmem>>, %arg20: memref<64x256xf32, #tpu.memory_space<vmem>>, %arg21: memref<64x256xf32, #tpu.memory_space<vmem>>, %arg22: memref<64x256xf32, #tpu.memory_space<vmem>>, %arg23: memref<64x256xf32, #tpu.memory_space<vmem>>, %arg24: memref<1x256xf32, #tpu.memory_space<vmem>>, %arg25: memref<256x80xf32, #tpu.memory_space<vmem>>, %arg26: memref<1x80xf32, #tpu.memory_space<vmem>>, %arg27: memref<2x80xf32, #tpu.memory_space<vmem>>) attributes {dimension_semantics = [], scalar_prefetch = 0 : i64, scratch_operands = 0 : i64, tpu.core_type = #tpu.core_type<tc>} {
    %c0 = arith.constant 0 : index
    %c0_0 = arith.constant 0 : index
    %0 = vector.load %arg0[%c0, %c0_0] : memref<2x1024xf32, #tpu.memory_space<vmem>>, vector<2x1024xf32>
    %c0_1 = arith.constant 0 : index
    %c0_2 = arith.constant 0 : index
    %1 = vector.load %arg5[%c0_1, %c0_2] : memref<1024x512xf32, #tpu.memory_space<vmem>>, vector<1024x512xf32>
    %cst = arith.constant dense<0.000000e+00> : vector<2x512xf32>
    %2 = tpu.matmul %0, %1, %cst {dimension_numbers = #tpu.dot_dimension_numbers<[1], [0], [0], [1], [0, 0, 1, 1], [], []>} : vector<2x1024xf32>, vector<1024x512xf32>, vector<2x512xf32> -> vector<2x512xf32>
    %c0_3 = arith.constant 0 : index
    %c0_4 = arith.constant 0 : index
    %3 = vector.load %arg6[%c0_3, %c0_4] : memref<1x512xf32, #tpu.memory_space<vmem>>, vector<1x512xf32>
    %4 = vector.broadcast %3 : vector<1x512xf32> to vector<2x512xf32>
    %5 = arith.addf %2, %4 : vector<2x512xf32>
    %cst_5 = arith.constant 0.000000e+00 : f32
    %6 = vector.broadcast %cst_5 : f32 to vector<2x512xf32>
    %7 = arith.maximumf %5, %6 : vector<2x512xf32>
    %c0_6 = arith.constant 0 : index
    %c0_7 = arith.constant 0 : index
    %8 = vector.load %arg7[%c0_6, %c0_7] : memref<512x256xf32, #tpu.memory_space<vmem>>, vector<512x256xf32>
    %cst_8 = arith.constant dense<0.000000e+00> : vector<2x256xf32>
    %9 = tpu.matmul %7, %8, %cst_8 {dimension_numbers = #tpu.dot_dimension_numbers<[1], [0], [0], [1], [0, 0, 1, 1], [], []>} : vector<2x512xf32>, vector<512x256xf32>, vector<2x256xf32> -> vector<2x256xf32>
    %c0_9 = arith.constant 0 : index
    %c0_10 = arith.constant 0 : index
    %10 = vector.load %arg8[%c0_9, %c0_10] : memref<1x256xf32, #tpu.memory_space<vmem>>, vector<1x256xf32>
    %11 = vector.broadcast %10 : vector<1x256xf32> to vector<2x256xf32>
    %12 = arith.addf %9, %11 : vector<2x256xf32>
    %cst_11 = arith.constant 0.000000e+00 : f32
    %13 = vector.broadcast %cst_11 : f32 to vector<2x256xf32>
    %14 = arith.maximumf %12, %13 : vector<2x256xf32>
    %c0_12 = arith.constant 0 : index
    %c0_13 = arith.constant 0 : index
    %15 = vector.load %arg9[%c0_12, %c0_13] : memref<256x128xf32, #tpu.memory_space<vmem>>, vector<256x128xf32>
    %cst_14 = arith.constant dense<0.000000e+00> : vector<2x128xf32>
    %16 = tpu.matmul %14, %15, %cst_14 {dimension_numbers = #tpu.dot_dimension_numbers<[1], [0], [0], [1], [0, 0, 1, 1], [], []>} : vector<2x256xf32>, vector<256x128xf32>, vector<2x128xf32> -> vector<2x128xf32>
    %c0_15 = arith.constant 0 : index
    %c0_16 = arith.constant 0 : index
    %17 = vector.load %arg10[%c0_15, %c0_16] : memref<1x128xf32, #tpu.memory_space<vmem>>, vector<1x128xf32>
    %18 = vector.broadcast %17 : vector<1x128xf32> to vector<2x128xf32>
    %19 = arith.addf %16, %18 : vector<2x128xf32>
    %cst_17 = arith.constant 0.000000e+00 : f32
    %20 = vector.broadcast %cst_17 : f32 to vector<2x128xf32>
    %21 = arith.maximumf %19, %20 : vector<2x128xf32>
    %c0_18 = arith.constant 0 : index
    %c0_19 = arith.constant 0 : index
    %22 = vector.load %arg1[%c0_18, %c0_19] : memref<2x128xf32, #tpu.memory_space<vmem>>, vector<2x128xf32>
    %c0_20 = arith.constant 0 : index
    %c0_21 = arith.constant 0 : index
    %23 = vector.load %arg11[%c0_20, %c0_21] : memref<128x64xf32, #tpu.memory_space<vmem>>, vector<128x64xf32>
    %cst_22 = arith.constant dense<0.000000e+00> : vector<2x64xf32>
    %24 = tpu.matmul %22, %23, %cst_22 {dimension_numbers = #tpu.dot_dimension_numbers<[1], [0], [0], [1], [0, 0, 1, 1], [], []>} : vector<2x128xf32>, vector<128x64xf32>, vector<2x64xf32> -> vector<2x64xf32>
    %c0_23 = arith.constant 0 : index
    %c0_24 = arith.constant 0 : index
    %25 = vector.load %arg12[%c0_23, %c0_24] : memref<1x64xf32, #tpu.memory_space<vmem>>, vector<1x64xf32>
    %26 = vector.broadcast %25 : vector<1x64xf32> to vector<2x64xf32>
    %27 = arith.addf %24, %26 : vector<2x64xf32>
    %cst_25 = arith.constant 0.000000e+00 : f32
    %28 = vector.broadcast %cst_25 : f32 to vector<2x64xf32>
    %29 = arith.maximumf %27, %28 : vector<2x64xf32>
    %c0_26 = arith.constant 0 : index
    %c0_27 = arith.constant 0 : index
    %30 = vector.load %arg2[%c0_26, %c0_27] : memref<2x128xf32, #tpu.memory_space<vmem>>, vector<2x128xf32>
    %c0_28 = arith.constant 0 : index
    %c0_29 = arith.constant 0 : index
    %31 = vector.load %arg13[%c0_28, %c0_29] : memref<128x64xf32, #tpu.memory_space<vmem>>, vector<128x64xf32>
    %cst_30 = arith.constant dense<0.000000e+00> : vector<2x64xf32>
    %32 = tpu.matmul %30, %31, %cst_30 {dimension_numbers = #tpu.dot_dimension_numbers<[1], [0], [0], [1], [0, 0, 1, 1], [], []>} : vector<2x128xf32>, vector<128x64xf32>, vector<2x64xf32> -> vector<2x64xf32>
    %c0_31 = arith.constant 0 : index
    %c0_32 = arith.constant 0 : index
    %33 = vector.load %arg14[%c0_31, %c0_32] : memref<1x64xf32, #tpu.memory_space<vmem>>, vector<1x64xf32>
    %34 = vector.broadcast %33 : vector<1x64xf32> to vector<2x64xf32>
    %35 = arith.addf %32, %34 : vector<2x64xf32>
    %cst_33 = arith.constant 0.000000e+00 : f32
    %36 = vector.broadcast %cst_33 : f32 to vector<2x64xf32>
    %37 = arith.maximumf %35, %36 : vector<2x64xf32>
    %c0_34 = arith.constant 0 : index
    %c0_35 = arith.constant 0 : index
    %38 = vector.load %arg3[%c0_34, %c0_35] : memref<2x384xf32, #tpu.memory_space<vmem>>, vector<2x384xf32>
    %c0_36 = arith.constant 0 : index
    %c0_37 = arith.constant 0 : index
    %39 = vector.load %arg15[%c0_36, %c0_37] : memref<384x64xf32, #tpu.memory_space<vmem>>, vector<384x64xf32>
    %cst_38 = arith.constant dense<0.000000e+00> : vector<2x64xf32>
    %40 = tpu.matmul %38, %39, %cst_38 {dimension_numbers = #tpu.dot_dimension_numbers<[1], [0], [0], [1], [0, 0, 1, 1], [], []>} : vector<2x384xf32>, vector<384x64xf32>, vector<2x64xf32> -> vector<2x64xf32>
    %c0_39 = arith.constant 0 : index
    %c0_40 = arith.constant 0 : index
    %41 = vector.load %arg16[%c0_39, %c0_40] : memref<1x64xf32, #tpu.memory_space<vmem>>, vector<1x64xf32>
    %42 = vector.broadcast %41 : vector<1x64xf32> to vector<2x64xf32>
    %43 = arith.addf %40, %42 : vector<2x64xf32>
    %cst_41 = arith.constant 0.000000e+00 : f32
    %44 = vector.broadcast %cst_41 : f32 to vector<2x64xf32>
    %45 = arith.maximumf %43, %44 : vector<2x64xf32>
    %c0_42 = arith.constant 0 : index
    %c0_43 = arith.constant 0 : index
    %46 = vector.load %arg4[%c0_42, %c0_43] : memref<2x128xf32, #tpu.memory_space<vmem>>, vector<2x128xf32>
    %c0_44 = arith.constant 0 : index
    %c0_45 = arith.constant 0 : index
    %47 = vector.load %arg17[%c0_44, %c0_45] : memref<128x64xf32, #tpu.memory_space<vmem>>, vector<128x64xf32>
    %cst_46 = arith.constant dense<0.000000e+00> : vector<2x64xf32>
    %48 = tpu.matmul %46, %47, %cst_46 {dimension_numbers = #tpu.dot_dimension_numbers<[1], [0], [0], [1], [0, 0, 1, 1], [], []>} : vector<2x128xf32>, vector<128x64xf32>, vector<2x64xf32> -> vector<2x64xf32>
    %c0_47 = arith.constant 0 : index
    %c0_48 = arith.constant 0 : index
    %49 = vector.load %arg18[%c0_47, %c0_48] : memref<1x64xf32, #tpu.memory_space<vmem>>, vector<1x64xf32>
    %50 = vector.broadcast %49 : vector<1x64xf32> to vector<2x64xf32>
    %51 = arith.addf %48, %50 : vector<2x64xf32>
    %cst_49 = arith.constant 0.000000e+00 : f32
    %52 = vector.broadcast %cst_49 : f32 to vector<2x64xf32>
    %53 = arith.maximumf %51, %52 : vector<2x64xf32>
    %c0_50 = arith.constant 0 : index
    %c0_51 = arith.constant 0 : index
    %54 = vector.load %arg19[%c0_50, %c0_51] : memref<128x256xf32, #tpu.memory_space<vmem>>, vector<128x256xf32>
    %cst_52 = arith.constant dense<0.000000e+00> : vector<2x256xf32>
    %55 = tpu.matmul %21, %54, %cst_52 {dimension_numbers = #tpu.dot_dimension_numbers<[1], [0], [0], [1], [0, 0, 1, 1], [], []>} : vector<2x128xf32>, vector<128x256xf32>, vector<2x256xf32> -> vector<2x256xf32>
    %c0_53 = arith.constant 0 : index
    %c0_54 = arith.constant 0 : index
    %56 = vector.load %arg20[%c0_53, %c0_54] : memref<64x256xf32, #tpu.memory_space<vmem>>, vector<64x256xf32>
    %cst_55 = arith.constant dense<0.000000e+00> : vector<2x256xf32>
    %57 = tpu.matmul %29, %56, %cst_55 {dimension_numbers = #tpu.dot_dimension_numbers<[1], [0], [0], [1], [0, 0, 1, 1], [], []>} : vector<2x64xf32>, vector<64x256xf32>, vector<2x256xf32> -> vector<2x256xf32>
    %58 = arith.addf %55, %57 : vector<2x256xf32>
    %c0_56 = arith.constant 0 : index
    %c0_57 = arith.constant 0 : index
    %59 = vector.load %arg21[%c0_56, %c0_57] : memref<64x256xf32, #tpu.memory_space<vmem>>, vector<64x256xf32>
    %cst_58 = arith.constant dense<0.000000e+00> : vector<2x256xf32>
    %60 = tpu.matmul %37, %59, %cst_58 {dimension_numbers = #tpu.dot_dimension_numbers<[1], [0], [0], [1], [0, 0, 1, 1], [], []>} : vector<2x64xf32>, vector<64x256xf32>, vector<2x256xf32> -> vector<2x256xf32>
    %61 = arith.addf %58, %60 : vector<2x256xf32>
    %c0_59 = arith.constant 0 : index
    %c0_60 = arith.constant 0 : index
    %62 = vector.load %arg22[%c0_59, %c0_60] : memref<64x256xf32, #tpu.memory_space<vmem>>, vector<64x256xf32>
    %cst_61 = arith.constant dense<0.000000e+00> : vector<2x256xf32>
    %63 = tpu.matmul %53, %62, %cst_61 {dimension_numbers = #tpu.dot_dimension_numbers<[1], [0], [0], [1], [0, 0, 1, 1], [], []>} : vector<2x64xf32>, vector<64x256xf32>, vector<2x256xf32> -> vector<2x256xf32>
    %64 = arith.addf %61, %63 : vector<2x256xf32>
    %c0_62 = arith.constant 0 : index
    %c0_63 = arith.constant 0 : index
    %65 = vector.load %arg23[%c0_62, %c0_63] : memref<64x256xf32, #tpu.memory_space<vmem>>, vector<64x256xf32>
    %cst_64 = arith.constant dense<0.000000e+00> : vector<2x256xf32>
    %66 = tpu.matmul %45, %65, %cst_64 {dimension_numbers = #tpu.dot_dimension_numbers<[1], [0], [0], [1], [0, 0, 1, 1], [], []>} : vector<2x64xf32>, vector<64x256xf32>, vector<2x256xf32> -> vector<2x256xf32>
    %67 = arith.addf %64, %66 : vector<2x256xf32>
    %c0_65 = arith.constant 0 : index
    %c0_66 = arith.constant 0 : index
    %68 = vector.load %arg24[%c0_65, %c0_66] : memref<1x256xf32, #tpu.memory_space<vmem>>, vector<1x256xf32>
    %69 = vector.broadcast %68 : vector<1x256xf32> to vector<2x256xf32>
    %70 = arith.addf %67, %69 : vector<2x256xf32>
    %cst_67 = arith.constant 0.000000e+00 : f32
    %71 = vector.broadcast %cst_67 : f32 to vector<2x256xf32>
    %72 = arith.maximumf %70, %71 : vector<2x256xf32>
    %c0_68 = arith.constant 0 : index
    %c0_69 = arith.constant 0 : index
    %73 = vector.load %arg25[%c0_68, %c0_69] : memref<256x80xf32, #tpu.memory_space<vmem>>, vector<256x80xf32>
    %cst_70 = arith.constant dense<0.000000e+00> : vector<2x80xf32>
    %74 = tpu.matmul %72, %73, %cst_70 {dimension_numbers = #tpu.dot_dimension_numbers<[1], [0], [0], [1], [0, 0, 1, 1], [], []>} : vector<2x256xf32>, vector<256x80xf32>, vector<2x80xf32> -> vector<2x80xf32>
    %c0_71 = arith.constant 0 : index
    %c0_72 = arith.constant 0 : index
    %75 = vector.load %arg26[%c0_71, %c0_72] : memref<1x80xf32, #tpu.memory_space<vmem>>, vector<1x80xf32>
    %76 = vector.broadcast %75 : vector<1x80xf32> to vector<2x80xf32>
    %77 = arith.addf %74, %76 : vector<2x80xf32>
    %c0_73 = arith.constant 0 : index
    %c0_74 = arith.constant 0 : index
    %78 = vector.load %arg27[%c0_73, %c0_74] : memref<2x80xf32, #tpu.memory_space<vmem>>, vector<2x80xf32>
    tpu.vector_store %arg27[%c0_73, %c0_74], %77 {strides = array<i32>} : memref<2x80xf32, #tpu.memory_space<vmem>>, vector<2x80xf32>,
    return
  }
}

</mosaic_0001>

<bundles_post_ra>
// kernel: qnetwork_forward.4
= control target key start
LH: loop header
LB: loop body
LE: loop exit
PB: predicated region body
PF: predicated region fallthrough
CT: control target
= control target key end

     0   :  { %8 = vsyncpa [#allocation3], 0  ;;  %s1173_s0 = inlined_call_operand.vmem [shape: f32[2,11264], index: 0, kind: input, shape index: {}]   ;;  %s1174_s1 = inlined_call_operand.hbm [shape: f32[11264,128], index: 1, kind: input, shape index: {}]   ;;  %s1175_s2 = inlined_call_operand.hbm [shape: f32[1,128], index: 2, kind: input, shape index: {}]   ;;  %s1176_s3 = inlined_call_operand.vmem [shape: f32[2,128], index: 3, kind: output, shape index: {}]  }
   0x1   :  { %10 = vsyncpa [#allocation3 + $0x1], 0 }
   0x2   :  { %11 = vsyncpa [#allocation5], 0  ;;  %s904_s12 = smov 0   ;;  %s906_s13 = smov 0  }
   0x3   :  { %s908_s14 = smov 0   ;;  %s910_s15 = smov 0  }
   0x4   :  { %s912_s16 = smov 0   ;;  %s914_s17 = smov 0  }
   0x5 LB: > { %s676_s18 = sadd.s32 4294967295, %s878_s17   ;;  %s64_s19 = sadd.s32 1, %s866_s14  ;;  %s878_s17 = sphi %s914_s17, %s17_s17   ;;  %s874_s16 = sphi %s912_s16, %s1186_s16   ;;  %s870_s15 = sphi %s910_s15, %s1185_s15   ;;  %s866_s14 = sphi %s908_s14, %s1184_s14   ;;  %s862_s13 = sphi %s906_s13, %s1183_s13   ;;  %s858_s12 = sphi %s904_s12, %s1182_s12  }
   0x6   : > { %p71_p0 = scmp.ne.s32.totalorder %s866_s14, %s862_s13  ;;  %p72_p1 = scmp.eq.s32.totalorder %s878_s17, 0 }
   0x7   : > { %p77_p2 = scmp.ne.s32.totalorder %s862_s13, %s858_s12  ;;  %p938_p3 = scmp.eq.s32.totalorder %s676_s18, 0 }
   0x8   : > { %p942_p4 = por %p72_p1, %p71_p0  ;;  %p677_p5 = scmp.ge.s32.totalorder %s878_s17, 1 }
   0x9   : > { %p949_p6 = por %p938_p3, %p77_p2  ;;  %p140_p7 = scmp.lt.s32.totalorder %s878_s17, 12 }
   0xa   : > { %s153_s25 = sshll.u32 %s1175_s2, 4  ;;  %s880_s27 = smov [#allocation4]   ;;  %s154_s25 = int_to_ptr.hbm [resolvable:$true] %s153_s25 }
   0xb   : > { %p957_p8 = pnand %p677_p5, %p140_p7  ;;  %s155_s28 = sshll.u32 %s880_s27, 4  ;;  %s156_s28 = int_to_ptr.vmem [resolvable:$true] %s155_s28 }
   0xc   : > { %p709_p10 = scmp.lt.s32.totalorder %s878_s17, 11  ;;  %s26_s30 = sadd.s32 1, %s874_s16 }
   0xd   : > { %p700_p9 = pneg %p957_p8  ;;  %p27_p13 = scmp.ge.s32.totalorder %s26_s30, 11 }
   0xe   : > { %p968_p12 = pnand %p709_p10, %p942_p4  ;;  %s175_s4 = sand.u32 1, %s866_s14  }
   0xf   : > { %p701_p11 = pnand %p700_p9, %p938_p3  ;;  %s693_s5 = sshll.u32 %s874_s16, 10 }
  0x10   : > { %s1188_s30 = smov (%p27_p13, %s26_s30), 0  ;;  %s680_s6 = sshll.u32 %s175_s4, 10 }
  0x11   : > { %703 = dma.hbm_to_vmem [thread:$0]  (!%p701_p11), %s154_s25, 16, %s156_s28, [#allocation5]  }
  0x12   : > { %s59_s7 = ssub.s32 %s874_s16, %s1188_s30  ;;  %s185_s10 = scalar_lea.hbm %s1174_s1, %s693_s5 }
  0x13   : > { %p62_p0 = scmp.eq.s32.totalorder %s59_s7, 0  ;;  %s186_s11 = sshll.u32 %s185_s10, 4  ;;  %s187_s11 = int_to_ptr.hbm [resolvable:$true] %s186_s11 }
  0x14   : > { %s179_s12 = scalar_lea.vmem [#allocation2], %s680_s6  ;;  %s176_s23 = scalar_lea.sflag [#allocation3], %s175_s4 }
  0x15   : > { %s188_s18 = sshll.u32 %s179_s12, 4  ;;  %s881_s24 = smov 128   ;;  %s189_s18 = int_to_ptr.vmem [resolvable:$true] %s188_s18 }
  0x16   : > { %s985_s21 = scalar_select %p62_p0, %s866_s14, %s64_s19  }
  0x17   : > { %s882_s25 = smov 8   ;;  %200 = sbr.rel (%p957_p8) target bundleno = 258 (0x102), region = 32 }
  0x18   : > { %707 = dma.hbm_to_vmem [thread:$0]  (!%p968_p12), %s187_s11, 16384, %s189_s18, %s176_s23, %s881_s24, %s881_s24, %s882_s25  }
  0x19   : > { %s202_s27 = sand.u32 (!%p957_p8), 1, %s862_s13  }
  0x1a   : > { %s684_s28 = sshll.u32 (!%p957_p8), %s202_s27, 10  ;;  %s203_s5 = scalar_lea.sflag (!%p957_p8), [#allocation3], %s202_s27 }
  0x1b   : > { %s992_s6 = scalar_lea.vmem (!%p957_p8), [#allocation2], %s684_s28 }
  0x1c   : > { %849 = dma.done.wait (%p949_p6), %s203_s5, 16384  }
  0x1d   : > { %851 = vsyncadd (%p949_p6), %s203_s5, 4294950912 }
  0x1e   : > { %853 = dma.done.wait (%p938_p3), [#allocation5], 16  }
  0x1f   : > { %855 = vsyncadd (%p938_p3), [#allocation5], 4294967280  ;;  %s686_s19 = sshll.u32 %s870_s15, 3  ;;  %p688_p2 = scmp.ne.s32.totalorder %s870_s15, 0 }
  0x20   : > { %p240_p1 = scmp.lt.s32.totalorder %s686_s19, 87 }
  0x21   : > { %253 = sbr.rel (%p688_p2) target bundleno = 40 (0x28), region = 44 }
  0x22   : > { %s1190_s19 = smov (!%p240_p1, %s686_s19), 87 }
  0x23   : > { %s687_s26 = sshll.u32 %s1190_s19, 1 }
  0x24   : > { %s1006_s7 = scalar_lea.vmem %s1173_s0, %s687_s26 }
  0x26   : > { %v883_v0 = vmov 0.0  }
  0x27   : > { %254 = vst [vmem:[%s1176_s3] sm:$0x3] %v883_v0 }
  0x28 PF: > { %v273_v1 = vld [vmem:[%s992_s6 + $0x78] sm:$0xff]  ;;  %v272_v3 = vld [vmem:[%s992_s6 + $0x70] sm:$0xff]  ;;  %v271_v7 = vld [vmem:[%s992_s6 + $0x68] sm:$0xff]  ;;  %p689_p3 = scmp.ne.s32.totalorder %s870_s15, 10 }
  0x29   : > { %v305_v2 = vld [vmem:[%s992_s6 + $0x178] sm:$0xff]  ;;  %407 = vmatpush.msra.mxu0 %v273_v1  ;;  %v304_v5 = vld [vmem:[%s992_s6 + $0x170] sm:$0xff]  ;;  %v303_v9 = vld [vmem:[%s992_s6 + $0x168] sm:$0xff] }
  0x2a   : > { %447 = vmatpush.msra.mxu2 %v305_v2  ;;  %v289_v4 = vld [vmem:[%s992_s6 + $0xf8] sm:$0xff]  ;;  %v288_v8 = vld [vmem:[%s992_s6 + $0xf0] sm:$0xff]  ;;  %v287_v11 = vld [vmem:[%s992_s6 + $0xe8] sm:$0xff] }
  0x2b   : > { %v321_v6 = vld [vmem:[%s992_s6 + $0x1f8] sm:$0xff]  ;;  %427 = vmatpush.msra.mxu1 %v289_v4  ;;  %408 = vmatpush.msra.mxu0 %v272_v3  ;;  %v320_v10 = vld [vmem:[%s992_s6 + $0x1f0] sm:$0xff]  ;;  %v270_v12 = vld [vmem:[%s992_s6 + $0x60] sm:$0xff] }
  0x2c   : > { %467 = vmatpush.msra.mxu3 %v321_v6  ;;  %448 = vmatpush.msra.mxu2 %v304_v5  ;;  %v302_v13 = vld [vmem:[%s992_s6 + $0x160] sm:$0xff]  ;;  %v319_v14 = vld [vmem:[%s992_s6 + $0x1e8] sm:$0xff]  ;;  %v269_v17 = vld [vmem:[%s992_s6 + $0x58] sm:$0xff] }
  0x2d   : > { %428 = vmatpush.msra.mxu1 %v288_v8  ;;  %409 = vmatpush.msra.mxu0 %v271_v7  ;;  %v286_v15 = vld [vmem:[%s992_s6 + $0xe0] sm:$0xff]  ;;  %v301_v18 = vld [vmem:[%s992_s6 + $0x158] sm:$0xff]  ;;  %v268_v21 = vld [vmem:[%s992_s6 + $0x50] sm:$0xff] }
  0x2e   : > { %468 = vmatpush.msra.mxu3 %v320_v10  ;;  %449 = vmatpush.msra.mxu2 %v303_v9  ;;  %v318_v16 = vld [vmem:[%s992_s6 + $0x1e0] sm:$0xff]  ;;  %v285_v19 = vld [vmem:[%s992_s6 + $0xd8] sm:$0xff]  ;;  %v300_v22 = vld [vmem:[%s992_s6 + $0x150] sm:$0xff] }
  0x2f   : > { %429 = vmatpush.msra.mxu1 %v287_v11  ;;  %410 = vmatpush.msra.mxu0 %v270_v12  ;;  %v317_v20 = vld [vmem:[%s992_s6 + $0x1d8] sm:$0xff]  ;;  %v284_v23 = vld [vmem:[%s992_s6 + $0xd0] sm:$0xff]  ;;  %v267_v25 = vld [vmem:[%s992_s6 + $0x48] sm:$0xff] }
  0x30   : > { %469 = vmatpush.msra.mxu3 %v319_v14  ;;  %450 = vmatpush.msra.mxu2 %v302_v13  ;;  %v316_v24 = vld [vmem:[%s992_s6 + $0x1d0] sm:$0xff]  ;;  %v299_v26 = vld [vmem:[%s992_s6 + $0x148] sm:$0xff]  ;;  %v266_v29 = vld [vmem:[%s992_s6 + $0x40] sm:$0xff] }
  0x31   : > { %430 = vmatpush.msra.mxu1 %v286_v15  ;;  %411 = vmatpush.msra.mxu0 %v269_v17  ;;  %v283_v27 = vld [vmem:[%s992_s6 + $0xc8] sm:$0xff]  ;;  %v298_v30 = vld [vmem:[%s992_s6 + $0x140] sm:$0xff]  ;;  %v265_v33 = vld [vmem:[%s992_s6 + $0x38] sm:$0xff] }
  0x32   : > { %470 = vmatpush.msra.mxu3 %v318_v16  ;;  %451 = vmatpush.msra.mxu2 %v301_v18  ;;  %v315_v28 = vld [vmem:[%s992_s6 + $0x1c8] sm:$0xff]  ;;  %v282_v31 = vld [vmem:[%s992_s6 + $0xc0] sm:$0xff]  ;;  %v297_v34 = vld [vmem:[%s992_s6 + $0x138] sm:$0xff] }
  0x33   : > { %431 = vmatpush.msra.mxu1 %v285_v19  ;;  %412 = vmatpush.msra.mxu0 %v268_v21  ;;  %v314_v32 = vld [vmem:[%s992_s6 + $0x1c0] sm:$0xff]  ;;  %v281_v35 = vld [vmem:[%s992_s6 + $0xb8] sm:$0xff]  ;;  %v264_v37 = vld [vmem:[%s992_s6 + $0x30] sm:$0xff] }
  0x34   : > { %471 = vmatpush.msra.mxu3 %v317_v20  ;;  %452 = vmatpush.msra.mxu2 %v300_v22  ;;  %v313_v36 = vld [vmem:[%s992_s6 + $0x1b8] sm:$0xff]  ;;  %v296_v38 = vld [vmem:[%s992_s6 + $0x130] sm:$0xff]  ;;  %v263_v41 = vld [vmem:[%s992_s6 + $0x28] sm:$0xff] }
  0x35   : > { %432 = vmatpush.msra.mxu1 %v284_v23  ;;  %413 = vmatpush.msra.mxu0 %v267_v25  ;;  %v280_v39 = vld [vmem:[%s992_s6 + $0xb0] sm:$0xff]  ;;  %v295_v42 = vld [vmem:[%s992_s6 + $0x128] sm:$0xff]  ;;  %v262_v45 = vld [vmem:[%s992_s6 + $0x20] sm:$0xff] }
  0x36   : > { %472 = vmatpush.msra.mxu3 %v316_v24  ;;  %453 = vmatpush.msra.mxu2 %v299_v26  ;;  %v312_v40 = vld [vmem:[%s992_s6 + $0x1b0] sm:$0xff]  ;;  %v279_v43 = vld [vmem:[%s992_s6 + $0xa8] sm:$0xff]  ;;  %v294_v46 = vld [vmem:[%s992_s6 + $0x120] sm:$0xff] }
  0x37   : > { %433 = vmatpush.msra.mxu1 %v283_v27  ;;  %414 = vmatpush.msra.mxu0 %v266_v29  ;;  %v311_v44 = vld [vmem:[%s992_s6 + $0x1a8] sm:$0xff]  ;;  %v278_v47 = vld [vmem:[%s992_s6 + $0xa0] sm:$0xff]  ;;  %v261_v49 = vld [vmem:[%s992_s6 + $0x18] sm:$0xff] }
  0x38   : > { %473 = vmatpush.msra.mxu3 %v315_v28  ;;  %454 = vmatpush.msra.mxu2 %v298_v30  ;;  %v310_v48 = vld [vmem:[%s992_s6 + $0x1a0] sm:$0xff]  ;;  %v293_v50 = vld [vmem:[%s992_s6 + $0x118] sm:$0xff]  ;;  %v260_v53 = vld [vmem:[%s992_s6 + $0x10] sm:$0xff] }
  0x39   : > { %434 = vmatpush.msra.mxu1 %v282_v31  ;;  %415 = vmatpush.msra.mxu0 %v265_v33  ;;  %v277_v51 = vld [vmem:[%s992_s6 + $0x98] sm:$0xff]  ;;  %v292_v54 = vld [vmem:[%s992_s6 + $0x110] sm:$0xff]  ;;  %v259_v57 = vld [vmem:[%s992_s6 + $0x8] sm:$0xff] }
  0x3a   : > { %474 = vmatpush.msra.mxu3 %v314_v32  ;;  %455 = vmatpush.msra.mxu2 %v297_v34  ;;  %v309_v52 = vld [vmem:[%s992_s6 + $0x198] sm:$0xff]  ;;  %v276_v55 = vld [vmem:[%s992_s6 + $0x90] sm:$0xff]  ;;  %v291_v58 = vld [vmem:[%s992_s6 + $0x108] sm:$0xff] }
  0x3b   : > { %435 = vmatpush.msra.mxu1 %v281_v35  ;;  %416 = vmatpush.msra.mxu0 %v264_v37  ;;  %v308_v56 = vld [vmem:[%s992_s6 + $0x190] sm:$0xff]  ;;  %v275_v59 = vld [vmem:[%s992_s6 + $0x88] sm:$0xff]  ;;  %v258_v61 = vld [vmem:[%s992_s6] sm:$0xff] }
  0x3c   : > { %475 = vmatpush.msra.mxu3 %v313_v36  ;;  %456 = vmatpush.msra.mxu2 %v296_v38  ;;  %v307_v60 = vld [vmem:[%s992_s6 + $0x188] sm:$0xff]  ;;  %v290_v62 = vld [vmem:[%s992_s6 + $0x100] sm:$0xff]  ;;  %v337_v63 = vld [vmem:[%s992_s6 + $0x278] sm:$0xff] }
  0x3d   : > { %436 = vmatpush.msra.mxu1 %v280_v39  ;;  %417 = vmatpush.msra.mxu0 %v263_v41  ;;  %v369_v0 = vld [vmem:[%s992_s6 + $0x378] sm:$0xff]  ;;  %v274_v1 = vld [vmem:[%s992_s6 + $0x80] sm:$0xff]  ;;  %v336_v3 = vld [vmem:[%s992_s6 + $0x270] sm:$0xff] }
  0x3e   : > { %476 = vmatpush.msra.mxu3 %v312_v40  ;;  %457 = vmatpush.msra.mxu2 %v295_v42  ;;  %v306_v2 = vld [vmem:[%s992_s6 + $0x180] sm:$0xff]  ;;  %v353_v4 = vld [vmem:[%s992_s6 + $0x2f8] sm:$0xff]  ;;  %v368_v5 = vld [vmem:[%s992_s6 + $0x370] sm:$0xff] }
  0x3f   : > { %437 = vmatpush.msra.mxu1 %v279_v43  ;;  %418 = vmatpush.msra.mxu0 %v262_v45  ;;  %v385_v6 = vld [vmem:[%s992_s6 + $0x3f8] sm:$0xff]  ;;  %v335_v7 = vld [vmem:[%s992_s6 + $0x268] sm:$0xff]  ;;  %v352_v8 = vld [vmem:[%s992_s6 + $0x2f0] sm:$0xff] }
  0x40   : > { %477 = vmatpush.msra.mxu3 %v311_v44  ;;  %458 = vmatpush.msra.mxu2 %v294_v46  ;;  %v367_v9 = vld [vmem:[%s992_s6 + $0x368] sm:$0xff]  ;;  %v384_v10 = vld [vmem:[%s992_s6 + $0x3f0] sm:$0xff]  ;;  %v334_v11 = vld [vmem:[%s992_s6 + $0x260] sm:$0xff] }
  0x41   : > { %438 = vmatpush.msra.mxu1 %v278_v47  ;;  %419 = vmatpush.msra.mxu0 %v261_v49  ;;  %v351_v12 = vld [vmem:[%s992_s6 + $0x2e8] sm:$0xff]  ;;  %v256_v13 = vld [vmem:[%s1006_s7] sm:$0xff]  ;;  %v366_v14 = vld [vmem:[%s992_s6 + $0x360] sm:$0xff] }
  0x42   : > { %478 = vmatpush.msra.mxu3 %v310_v48  ;;  %459 = vmatpush.msra.mxu2 %v293_v50  ;;  %v383_v15 = vld [vmem:[%s992_s6 + $0x3e8] sm:$0xff]  ;;  %388 = vst [vmem:[#allocation1] ss:$4 sm:$0xff] %v256_v13  ;;  %v333_v16 = vld [vmem:[%s992_s6 + $0x258] sm:$0xff]  ;;  %v350_v17 = vld [vmem:[%s992_s6 + $0x2e0] sm:$0xff] }
  0x43   : > { %439 = vmatpush.msra.mxu1 %v277_v51  ;;  %420 = vmatpush.msra.mxu0 %v260_v53  ;;  %v365_v18 = vld [vmem:[%s992_s6 + $0x358] sm:$0xff]  ;;  %v382_v19 = vld [vmem:[%s992_s6 + $0x3e0] sm:$0xff]  ;;  %v332_v20 = vld [vmem:[%s992_s6 + $0x250] sm:$0xff] }
  0x44   : > { %479 = vmatpush.msra.mxu3 %v309_v52  ;;  %460 = vmatpush.msra.mxu2 %v292_v54  ;;  %v349_v21 = vld [vmem:[%s992_s6 + $0x2d8] sm:$0xff]  ;;  %v364_v22 = vld [vmem:[%s992_s6 + $0x350] sm:$0xff]  ;;  %v331_v24 = vld [vmem:[%s992_s6 + $0x248] sm:$0xff] }
  0x45   : > { %440 = vmatpush.msra.mxu1 %v276_v55  ;;  %421 = vmatpush.msra.mxu0 %v259_v57  ;;  %v381_v23 = vld [vmem:[%s992_s6 + $0x3d8] sm:$0xff]  ;;  %v348_v25 = vld [vmem:[%s992_s6 + $0x2d0] sm:$0xff]  ;;  %v363_v26 = vld [vmem:[%s992_s6 + $0x348] sm:$0xff] }
  0x46   : > { %480 = vmatpush.msra.mxu3 %v308_v56  ;;  %461 = vmatpush.msra.mxu2 %v291_v58  ;;  %v380_v27 = vld [vmem:[%s992_s6 + $0x3d0] sm:$0xff]  ;;  %v257_v28 = vld [vmem:[%s1006_s7 + $0x8] sm:$0xff]  ;;  %v347_v30 = vld [vmem:[%s992_s6 + $0x2c8] sm:$0xff] }
  0x47   : > { %441 = vmatpush.msra.mxu1 %v275_v59  ;;  %422 = vmatpush.msra.mxu0 %v258_v61  ;;  %v330_v29 = vld [vmem:[%s992_s6 + $0x240] sm:$0xff]  ;;  %v379_v32 = vld [vmem:[%s992_s6 + $0x3c8] sm:$0xff]  ;;  %v329_v33 = vld [vmem:[%s992_s6 + $0x238] sm:$0xff]  ;;  %390 = vst [vmem:[#allocation1 + $0x20] ss:$4 sm:$0xff] %v257_v28 }
  0x48   : > { %481 = vmatpush.msra.mxu3 %v307_v60  ;;  %462 = vmatpush.msra.mxu2 %v290_v62  ;;  %v362_v31 = vld [vmem:[%s992_s6 + $0x340] sm:$0xff]  ;;  %v361_v35 = vld [vmem:[%s992_s6 + $0x338] sm:$0xff]  ;;  %v328_v37 = vld [vmem:[%s992_s6 + $0x230] sm:$0xff] }
  0x49   : > { %487 = vmatpush.msrb.mxu0 %v337_v63  ;;  %442 = vmatpush.msra.mxu1 %v274_v1  ;;  %v346_v34 = vld [vmem:[%s992_s6 + $0x2c0] sm:$0xff]  ;;  %v345_v38 = vld [vmem:[%s992_s6 + $0x2b8] sm:$0xff]  ;;  %v360_v39 = vld [vmem:[%s992_s6 + $0x330] sm:$0xff] }
  0x4a   : > { %527 = vmatpush.msrb.mxu2 %v369_v0  ;;  %482 = vmatpush.msra.mxu3 %v306_v2  ;;  %v378_v36 = vld [vmem:[%s992_s6 + $0x3c0] sm:$0xff]  ;;  %v377_v40 = vld [vmem:[%s992_s6 + $0x3b8] sm:$0xff]  ;;  %v327_v41 = vld [vmem:[%s992_s6 + $0x228] sm:$0xff] }
  0x4b   : > { %488 = vmatpush.msrb.mxu0 %v336_v3  ;;  %507 = vmatpush.msrb.mxu1 %v353_v4  ;;  %v344_v42 = vld [vmem:[%s992_s6 + $0x2b0] sm:$0xff]  ;;  %v359_v43 = vld [vmem:[%s992_s6 + $0x328] sm:$0xff]  ;;  %v326_v46 = vld [vmem:[%s992_s6 + $0x220] sm:$0xff] }
  0x4c   : > { %528 = vmatpush.msrb.mxu2 %v368_v5  ;;  %547 = vmatpush.msrb.mxu3 %v385_v6  ;;  %v376_v44 = vld [vmem:[%s992_s6 + $0x3b0] sm:$0xff]  ;;  %v393_v45 = vld.sshfl [vmem:[#allocation1 + $0x10] sm:$0xff pattern:$0x73625140]  ;;  %v358_v48 = vld [vmem:[%s992_s6 + $0x320] sm:$0xff] }
  0x4d   : > { %489 = vmatpush.msrb.mxu0 %v335_v7  ;;  %508 = vmatpush.msrb.mxu1 %v352_v8  ;;  %v343_v47 = vld [vmem:[%s992_s6 + $0x2a8] sm:$0xff]  ;;  %v391_v50 = vld.sshfl [vmem:[#allocation1] sm:$0xff pattern:$0x73625140]  ;;  %v342_v53 = vld [vmem:[%s992_s6 + $0x2a0] sm:$0xff] }
  0x4e   : > { %529 = vmatpush.msrb.mxu2 %v367_v9  ;;  %548 = vmatpush.msrb.mxu3 %v384_v10  ;;  %v375_v49 = vld [vmem:[%s992_s6 + $0x3a8] sm:$0xff]  ;;  %v394_v51 = vld.sshfl [vmem:[#allocation1 + $0x18] sm:$0xff pattern:$0x73625140]  ;;  %v325_v52 = vld [vmem:[%s992_s6 + $0x218] sm:$0xff] }
  0x4f   : > { %490 = vmatpush.msrb.mxu0 %v334_v11  ;;  %509 = vmatpush.msrb.mxu1 %v351_v12  ;;  %v357_v54 = vld [vmem:[%s992_s6 + $0x318] sm:$0xff]  ;;  %v374_v55 = vld [vmem:[%s992_s6 + $0x3a0] sm:$0xff]  ;;  %v324_v57 = vld [vmem:[%s992_s6 + $0x210] sm:$0xff] }
  0x50   : > { %530 = vmatpush.msrb.mxu2 %v366_v14  ;;  %549 = vmatpush.msrb.mxu3 %v383_v15  ;;  %v392_v56 = vld.sshfl [vmem:[#allocation1 + $0x8] sm:$0xff pattern:$0x73625140]  ;;  %v341_v58 = vld [vmem:[%s992_s6 + $0x298] sm:$0xff]  ;;  %v356_v59 = vld [vmem:[%s992_s6 + $0x310] sm:$0xff] }
  0x51   : > { %491 = vmatpush.msrb.mxu0 %v333_v16  ;;  %510 = vmatpush.msrb.mxu1 %v350_v17  ;;  %v373_v60 = vld [vmem:[%s992_s6 + $0x398] sm:$0xff]  ;;  %v323_v61 = vld [vmem:[%s992_s6 + $0x208] sm:$0xff]  ;;  %v340_v62 = vld [vmem:[%s992_s6 + $0x290] sm:$0xff] }
  0x52   : > { %531 = vmatpush.msrb.mxu2 %v365_v18  ;;  %550 = vmatpush.msrb.mxu3 %v382_v19  ;;  %v355_v63 = vld [vmem:[%s992_s6 + $0x308] sm:$0xff]  ;;  %v372_v0 = vld [vmem:[%s992_s6 + $0x390] sm:$0xff]  ;;  %v322_v1 = vld [vmem:[%s992_s6 + $0x200] sm:$0xff] }
  0x53   : > { %492 = vmatpush.msrb.mxu0 %v332_v20  ;;  %511 = vmatpush.msrb.mxu1 %v349_v21  ;;  %v339_v2 = vld [vmem:[%s992_s6 + $0x288] sm:$0xff]  ;;  %v354_v3 = vld [vmem:[%s992_s6 + $0x300] sm:$0xff]  ;;  %v395_v5 = vld.sshfl [vmem:[#allocation1 + $0x20] sm:$0xff pattern:$0x73625140] }
  0x54   : > { %532 = vmatpush.msrb.mxu2 %v364_v22  ;;  %551 = vmatpush.msrb.mxu3 %v381_v23  ;;  %v371_v4 = vld [vmem:[%s992_s6 + $0x388] sm:$0xff]  ;;  %v338_v7 = vld [vmem:[%s992_s6 + $0x280] sm:$0xff]  ;;  %v398_v10 = vld.sshfl [vmem:[#allocation1 + $0x38] sm:$0xff pattern:$0x73625140] }
  0x55   : > { %493 = vmatpush.msrb.mxu0 %v331_v24  ;;  %512 = vmatpush.msrb.mxu1 %v348_v25  ;;  %v397_v6 = vld.sshfl [vmem:[#allocation1 + $0x30] sm:$0xff pattern:$0x73625140]  ;;  %v370_v8 = vld [vmem:[%s992_s6 + $0x380] sm:$0xff]  ;;  %v255_v24 = vld [vmem:[%s1176_s3] sm:$0x3] }
  0x56   : > { %533 = vmatpush.msrb.mxu2 %v363_v26  ;;  %552 = vmatpush.msrb.mxu3 %v380_v27  ;;  %v396_v9 = vld.sshfl [vmem:[#allocation1 + $0x28] sm:$0xff pattern:$0x73625140] }
  0x57   : > { %494 = vmatpush.msrb.mxu0 %v330_v29  ;;  %513 = vmatpush.msrb.mxu1 %v347_v30 }
  0x58   : > { %534 = vmatpush.msrb.mxu2 %v362_v31  ;;  %553 = vmatpush.msrb.mxu3 %v379_v32 }
  0x59   : > { %495 = vmatpush.msrb.mxu0 %v329_v33  ;;  %514 = vmatpush.msrb.mxu1 %v346_v34 }
  0x5a   : > { %535 = vmatpush.msrb.mxu2 %v361_v35  ;;  %554 = vmatpush.msrb.mxu3 %v378_v36 }
  0x5b   : > { %496 = vmatpush.msrb.mxu0 %v328_v37  ;;  %515 = vmatpush.msrb.mxu1 %v345_v38 }
  0x5c   : > { %536 = vmatpush.msrb.mxu2 %v360_v39  ;;  %555 = vmatpush.msrb.mxu3 %v377_v40 }
  0x5d   : > { %497 = vmatpush.msrb.mxu0 %v327_v41  ;;  %516 = vmatpush.msrb.mxu1 %v344_v42 }
  0x5e   : > { %537 = vmatpush.msrb.mxu2 %v359_v43  ;;  %556 = vmatpush.msrb.mxu3 %v376_v44 }
  0x5f   : > { %463 = vmatmul.f32.vlgmr.msra.gmra.mxu2 %v393_v45  ;;  %498 = vmatpush.msrb.mxu0 %v326_v46 }
  0x60   : > { %517 = vmatpush.msrb.mxu1 %v343_v47  ;;  %538 = vmatpush.msrb.mxu2 %v358_v48 }
  0x61   : > { %557 = vmatpush.msrb.mxu3 %v375_v49  ;;  %423 = vmatmul.f32.vlgmr.msra.gmra.mxu0 %v391_v50 }
  0x62   : > { %483 = vmatmul.f32.vlgmr.msra.gmra.mxu3 %v394_v51  ;;  %499 = vmatpush.msrb.mxu0 %v325_v52 }
  0x63   : > { %518 = vmatpush.msrb.mxu1 %v342_v53  ;;  %539 = vmatpush.msrb.mxu2 %v357_v54 }
  0x64   : > { %558 = vmatpush.msrb.mxu3 %v374_v55  ;;  %443 = vmatmul.f32.vlgmr.msra.gmra.mxu1 %v392_v56 }
  0x65   : > { %500 = vmatpush.msrb.mxu0 %v324_v57  ;;  %519 = vmatpush.msrb.mxu1 %v341_v58 }
  0x66   : > { %540 = vmatpush.msrb.mxu2 %v356_v59  ;;  %559 = vmatpush.msrb.mxu3 %v373_v60 }
  0x67   : > { %501 = vmatpush.msrb.mxu0 %v323_v61  ;;  %520 = vmatpush.msrb.mxu1 %v340_v62 }
  0x68   : > { %541 = vmatpush.msrb.mxu2 %v355_v63  ;;  %560 = vmatpush.msrb.mxu3 %v372_v0 }
  0x69   : > { %502 = vmatpush.msrb.mxu0 %v322_v1  ;;  %521 = vmatpush.msrb.mxu1 %v339_v2 }
  0x6a   : > { %542 = vmatpush.msrb.mxu2 %v354_v3  ;;  %561 = vmatpush.msrb.mxu3 %v371_v4 }
  0x6b   : > { %503 = vmatmul.f32.vlgmr.msrb.gmra.mxu0 %v395_v5  ;;  %543 = vmatmul.f32.vlgmr.msrb.gmra.mxu2 %v397_v6 }
  0x6c   : > { %522 = vmatpush.msrb.mxu1 %v338_v7  ;;  %562 = vmatpush.msrb.mxu3 %v370_v8 }
  0x6d   : > { %523 = vmatmul.f32.vlgmr.msrb.gmra.mxu1 %v396_v9  ;;  %563 = vmatmul.f32.vlgmr.msrb.gmra.mxu3 %v398_v10 }
  0xde   : > { %v424_v11 = vpop.f32.mrf.mxu0 }
  0xe1   : > { %v444_v12 = vpop.f32.mrf.mxu1 }
  0xe2   : > { %v445_v13 = vadd.f32 %v444_v12, %v424_v11  ;;  %v464_v14 = vpop.f32.mrf.mxu2 }
  0xe4   : > { %v465_v15 = vadd.f32 %v464_v14, %v445_v13 }
  0xe5   : > { %v484_v16 = vpop.f32.mrf.mxu3 }
  0xe6   : > { %v485_v17 = vadd.f32 %v484_v16, %v465_v15 }
  0xe8   : > { %v504_v18 = vpop.f32.mrf.mxu0 }
  0xe9   : > { %v505_v19 = vadd.f32 %v504_v18, %v485_v17 }
  0xea   : > { %v524_v20 = vpop.f32.mrf.mxu1 }
  0xeb   : > { %v525_v21 = vadd.f32 %v524_v20, %v505_v19 }
  0xee   : > { %v544_v22 = vpop.f32.mrf.mxu2 }
  0xef   : > { %v545_v23 = vadd.f32 %v544_v22, %v525_v21 }
  0xf0   : > { %v564_v25 = vpop.f32.mrf.mxu3 }
  0xf1   : > { %v565_v26 = vadd.f32 %v564_v25, %v545_v23  ;;  %572 = sbr.rel (%p689_p3) target bundleno = 258 (0x102), region = 48 }
  0xf3   : > { %v567_v27 = vadd.f32 %v565_v26, %v255_v24 }
  0xf5   : > { %568 = vst [vmem:[%s1176_s3] sm:$0x3] %v567_v27 }
  0xf6   : > { %v763_v29 = vld [vmem:[#allocation4] ss:$0 sm:$0xff] }
  0xfc   : > { %v573_v28 = vld [vmem:[%s1176_s3] sm:$0x3] }
  0xfd   : > { %v578_v30 = vadd.f32 %v763_v29, %v573_v28 }
  0xff   : > { %v579_v31 = vmax.f32 %v578_v30, 0.0 }
 0x101   : > { %580 = vst [vmem:[%s1176_s3] sm:$0x3] %v579_v31 }
 0x102 PF: > { %s17_s17 = sadd.s32 1, %s878_s17   ;;  %s1182_s12 = smov %s862_s13 }
 0x103   : > { %p14_p4 = scmp.ge.s32.totalorder %s17_s17, 13   ;;  %s1183_s13 = smov %s866_s14 }
 0x104   : > { %s1184_s14 = smov %s985_s21  ;;  %s1185_s15 = smov %s874_s16 }
 0x105   : > { %s1186_s16 = smov %s1188_s30  ;;  %16 = sbr.rel (!%p14_p4) target bundleno = 5 (0x5), region = 89 }
 0x10a   :  { %600 = vsyncpa [#allocation3], 1 }
 0x10b   :  { %602 = vsyncpa [#allocation3 + $0x1], 1 }
 0x10c   :  { %603 = vsyncpa [#allocation5], 1 }

// kernel: qnetwork_forward.3
= control target key start
LH: loop header
LB: loop body
LE: loop exit
PB: predicated region body
PF: predicated region fallthrough
CT: control target
= control target key end

     0   :  { %s2707_s0 = inlined_call_operand.vmem [shape: f32[2,11264], index: 0, kind: input, shape index: {}]   ;;  %s2708_s1 = inlined_call_operand.hbm [shape: f32[11264,1024], index: 1, kind: input, shape index: {}]   ;;  %s2709_s2 = inlined_call_operand.hbm [shape: f32[1,1024], index: 2, kind: input, shape index: {}]   ;;  %s2710_s3 = inlined_call_operand.vmem [shape: f32[2,1024], index: 3, kind: output, shape index: {}]  }
   0x1   :  { %2713 = sst [smem:[#allocation10_spill]] %s2708_s1 }
   0x2   :  { %8 = vsyncpa [#allocation3], 0 }
   0x3   :  { %10 = vsyncpa [#allocation3 + $0x1], 0 }
   0x4   :  { %11 = vsyncpa [#allocation5], 0 }
   0x5   :  { %13 = vsyncpa [#allocation5 + $0x1], 0  ;;  %s1925_s12 = smov 0   ;;  %s1927_s13 = smov 0  }
   0x6   :  { %s1929_s14 = smov 0   ;;  %s1931_s15 = smov 0  }
   0x7   :  { %s1933_s16 = smov 0   ;;  %s1935_s17 = smov 0  }
   0x8   :  { %s1937_s18 = smov 0   ;;  %s1939_s19 = smov 0  }
   0x9   :  { %s1941_s20 = smov 0   ;;  %s1943_s21 = smov 0  }
   0xa   :  { %s1945_s22 = smov 0  }
   0xb LB: > { %s28_s23 = sadd.s32 1, %s1891_s20  ;;  %s31_s24 = sadd.s32 1, %s1895_s21  ;;  %s1899_s22 = sphi %s1945_s22, %s19_s22   ;;  %s1895_s21 = sphi %s1943_s21, %s2732_s21   ;;  %s1891_s20 = sphi %s1941_s20, %s2731_s20   ;;  %s1887_s19 = sphi %s1939_s19, %s2730_s19   ;;  %s1883_s18 = sphi %s1937_s18, %s2729_s18   ;;  %s1879_s17 = sphi %s1935_s17, %s2728_s17   ;;  %s1875_s16 = sphi %s1933_s16, %s2727_s16   ;;  %s1871_s15 = sphi %s1931_s15, %s2726_s15   ;;  %s1867_s14 = sphi %s1929_s14, %s2725_s14   ;;  %s1863_s13 = sphi %s1927_s13, %s2724_s13   ;;  %s1859_s12 = sphi %s1925_s12, %s2723_s12  }
   0xc   : > { %p29_p0 = scmp.ge.s32.totalorder %s28_s23, 11  ;;  %p73_p1 = scmp.ne.s32.totalorder %s1879_s17, %s1875_s16 }
   0xd   : > { %p74_p2 = scmp.eq.s32.totalorder %s1899_s22, 0  ;;  %s66_s25 = sadd.s32 1, %s1879_s17 }
   0xe   : > { %s2734_s23 = smov (%p29_p0, %s28_s23), 0  ;;  %s2736_s24 = smov (!%p29_p0, %s31_s24), %s1895_s21 }
   0xf   : > { %2714 = sst [smem:[#allocation8_spill]] %s2734_s23  ;;  %p75_p3 = por %p74_p2, %p73_p1 }
  0x10   : > { %p1644_p4 = scmp.lt.s32.totalorder %s1899_s22, 22  ;;  %s164_s26 = sand.u32 1, %s1879_s17  }
  0x11   : > { %s1616_s27 = sshll.u32 %s1895_s21, 2  ;;  %s1614_s28 = sshll.u32 %s164_s26, 12 }
  0x12   : > { %s1632_s29 = sshll.u32 %s1891_s20, 10  ;;  %s168_s4 = scalar_lea.vmem [#allocation2], %s1614_s28 }
  0x13   : > { %s174_s30 = sadd.s32 %s1632_s29, %s1616_s27  ;;  %s179_s5 = sshll.u32 %s168_s4, 4  ;;  %s180_s5 = int_to_ptr.vmem [resolvable:$true] %s179_s5 }
  0x14   : > { %s1618_s6 = sshll.u32 %s174_s30, 3  ;;  %s2715_s1 = sld [smem:[#allocation10_spill]] }
  0x15   : > { %p1638_p5 = pnand %p1644_p4, %p75_p3  ;;  %s165_s11 = scalar_lea.sflag [#allocation3], %s164_s26 }
  0x16   : > { %s1901_s28 = smov 1024   ;;  %s1902_s29 = smov 512  }
  0x17   : > { %s1903_s30 = smov 32   ;;  %p1621_p6 = scmp.ge.s32.totalorder %s1899_s22, 1 }
  0x18   : > { %p206_p7 = scmp.lt.s32.totalorder %s1899_s22, 23  ;;  %s61_s4 = ssub.s32 %s1891_s20, %s2734_s23 }
  0x19   : > { %s1610_s26 = sadd.s32 4294967295, %s1899_s22   ;;  %p33_p9 = scmp.ge.s32.totalorder %s2736_s24, 2 }
  0x1a   : > { %s176_s9 = scalar_lea.hbm %s2715_s1, %s1618_s6  ;;  %p2008_p8 = pnand %p1621_p6, %p206_p7 }
  0x1b   : > { %s177_s10 = sshll.u32 %s176_s9, 4  ;;  %p79_p10 = scmp.ne.s32.totalorder %s1875_s16, %s1871_s15  ;;  %s178_s10 = int_to_ptr.hbm [resolvable:$true] %s177_s10 }
  0x1c   : > { %1640 = dma.hbm_to_vmem [thread:$0]  (!%p1638_p5), %s178_s10, 65536, %s180_s5, %s165_s11, %s1901_s28, %s1902_s29, %s1903_s30  }
  0x1d   : > { %p80_p11 = scmp.eq.s32.totalorder %s1610_s26, 0  ;;  %s2738_s24 = smov (%p33_p9, %s2736_s24), 0 }
  0x1e   : > { %2717 = sst [smem:[#allocation9_spill]] %s2738_s24  ;;  %s92_s7 = sadd.s32 1, %s1867_s14 }
  0x1f   : > { %p2019_p12 = por %p80_p11, %p79_p10  ;;  %s62_s8 = ssub.s32 %s1895_s21, %s2738_s24 }
  0x20   : > { %p105_p13 = scmp.ne.s32.totalorder %s1863_s13, %s1859_s12  ;;  %s63_s9 = sor.u32 %s62_s8, %s61_s4 }
  0x21   : > { %p90_p0 = scmp.eq.s32.totalorder %s62_s8, 0  ;;  %p64_p1 = scmp.eq.s32.totalorder %s63_s9, 0 }
  0x22   : > { %p99_p3 = scmp.ne.s32.totalorder %s1867_s14, %s1863_s13  ;;  %p2038_p5 = por %p105_p13, %p80_p11 }
  0x23   : > { %s2031_s10 = scalar_select %p90_p0, %s1867_s14, %s92_s7  }
  0x24   : > { %s2036_s15 = scalar_select %p64_p1, %s1879_s17, %s66_s25  }
  0x25   : > { %s189_s28 = sand.u32 1, %s1867_s14   ;;  %p101_p6 = por %p99_p3, %p74_p2 }
  0x26   : > { %s1619_s29 = sshll.u32 %s189_s28, 2  ;;  %s197_s4 = scalar_lea.hbm %s2709_s2, %s1616_s27 }
  0x27   : > { %s199_s26 = sshll.u32 %s197_s4, 4  ;;  %s193_s8 = scalar_lea.vmem [#allocation4], %s1619_s29  ;;  %s200_s26 = int_to_ptr.hbm [resolvable:$true] %s199_s26 }
  0x28   : > { %s201_s7 = sshll.u32 %s193_s8, 4  ;;  %p1641_p7 = pnand %p1644_p4, %p101_p6  ;;  %s202_s7 = int_to_ptr.vmem [resolvable:$true] %s201_s7 }
  0x29   : > { %s190_s25 = scalar_lea.sflag [#allocation5], %s189_s28  ;;  %210 = sbr.rel (%p2008_p8) target bundleno = 583 (0x247), region = 32 }
  0x2a   : > { %1643 = dma.hbm_to_vmem [thread:$0]  (!%p1641_p7), %s200_s26, 64, %s202_s7, %s190_s25  }
  0x2b   : > { %s212_s9 = sand.u32 (!%p2008_p8), 1, %s1875_s16  }
  0x2c   : > { %s1622_s1 = sshll.u32 (!%p2008_p8), %s212_s9, 12  ;;  %s213_s24 = scalar_lea.sflag (!%p2008_p8), [#allocation3], %s212_s9 }
  0x2d   : > { %s2055_s23 = scalar_lea.vmem (!%p2008_p8), [#allocation2], %s1622_s1 }
  0x2e   : > { %1850 = dma.done.wait (%p2019_p12), %s213_s24, 65536  }
  0x2f   : > { %1852 = vsyncadd (%p2019_p12), %s213_s24, 4294901760  ;;  %s222_s27 = sand.u32 1, %s1863_s13  }
  0x30   : > { %s2062_s28 = sshll.u32 %s222_s27, 2  ;;  %s223_s6 = scalar_lea.sflag [#allocation5], %s222_s27 }
  0x31   : > { %s226_s29 = scalar_lea.vmem [#allocation4], %s2062_s28 }
  0x32   : > { %1854 = dma.done.wait (%p2038_p5), %s223_s6, 64  }
  0x33   : > { %1856 = vsyncadd (%p2038_p5), %s223_s6, 4294967232  ;;  %s1624_s1 = sshll.u32 %s1883_s18, 3  ;;  %s1626_s12 = sshll.u32 %s1887_s19, 2 }
  0x34   : > { %p261_p2 = scmp.lt.s32.totalorder %s1624_s1, 87  ;;  %p270_p4 = scmp.lt.s32.totalorder %s1626_s12, 7 }
  0x35   : > { %p1628_p8 = scmp.ne.s32.totalorder %s1883_s18, 0 }
  0x36   : > { %s2740_s1 = smov (!%p261_p2, %s1624_s1), 87  ;;  %s2742_s12 = smov (!%p270_p4, %s1626_s12), 7 }
  0x37   : > { %s1625_s24 = sshll.u32 %s2740_s1, 1  ;;  %s1627_s26 = sshll.u32 %s2742_s12, 1 }
  0x38   : > { %s2074_s4 = scalar_lea.vmem %s2707_s0, %s1625_s24  ;;  %s2079_s11 = scalar_lea.vmem %s2710_s3, %s1627_s26 }
  0x39   : > { %278 = sbr.rel (%p1628_p8) target bundleno = 64 (0x40), region = 44 }
  0x3e   : > { %v1904_v0 = vmov 0.0  }
  0x3f   : > { %279 = vst [vmem:[%s2079_s11] sm:$0xff] %v1904_v0 }
  0x40 PF: > { %v343_v1 = vld [vmem:[%s2055_s23 + $0x1e0] sm:$0xff]  ;;  %vm1463_vm0 = vcmask 1041408   ;;  %vm1465_vm1 = vcmask 1045508   ;;  %vm1467_vm2 = vcmask 1043456   ;;  %p1629_p9 = scmp.ne.s32.totalorder %s1883_s18, 10 }
  0x41   : > { %v471_v2 = vld [vmem:[%s2055_s23 + $0x5e0] sm:$0xff]  ;;  %816 = vmatpush.msra.mxu0 %v343_v1 }
  0x42   : > { %v339_v3 = vld [vmem:[%s2055_s23 + $0x1c0] sm:$0xff]  ;;  %856 = vmatpush.msra.mxu2 %v471_v2 }
  0x43   : > { %v407_v4 = vld [vmem:[%s2055_s23 + $0x3e0] sm:$0xff]  ;;  %817 = vmatpush.msra.mxu0 %v339_v3 }
  0x44   : > { %v467_v5 = vld [vmem:[%s2055_s23 + $0x5c0] sm:$0xff]  ;;  %836 = vmatpush.msra.mxu1 %v407_v4 }
  0x45   : > { %v535_v6 = vld [vmem:[%s2055_s23 + $0x7e0] sm:$0xff]  ;;  %857 = vmatpush.msra.mxu2 %v467_v5 }
  0x46   : > { %876 = vmatpush.msra.mxu3 %v535_v6  ;;  %v335_v7 = vld [vmem:[%s2055_s23 + $0x1a0] sm:$0xff] }
  0x47   : > { %v403_v8 = vld [vmem:[%s2055_s23 + $0x3c0] sm:$0xff]  ;;  %818 = vmatpush.msra.mxu0 %v335_v7 }
  0x48   : > { %v463_v9 = vld [vmem:[%s2055_s23 + $0x5a0] sm:$0xff]  ;;  %837 = vmatpush.msra.mxu1 %v403_v8 }
  0x49   : > { %v531_v10 = vld [vmem:[%s2055_s23 + $0x7c0] sm:$0xff]  ;;  %858 = vmatpush.msra.mxu2 %v463_v9 }
  0x4a   : > { %v399_v11 = vld [vmem:[%s2055_s23 + $0x3a0] sm:$0xff]  ;;  %877 = vmatpush.msra.mxu3 %v531_v10 }
  0x4b   : > { %v331_v12 = vld [vmem:[%s2055_s23 + $0x180] sm:$0xff]  ;;  %838 = vmatpush.msra.mxu1 %v399_v11 }
  0x4c   : > { %v459_v13 = vld [vmem:[%s2055_s23 + $0x580] sm:$0xff]  ;;  %819 = vmatpush.msra.mxu0 %v331_v12 }
  0x4d   : > { %v527_v14 = vld [vmem:[%s2055_s23 + $0x7a0] sm:$0xff]  ;;  %859 = vmatpush.msra.mxu2 %v459_v13 }
  0x4e   : > { %v395_v15 = vld [vmem:[%s2055_s23 + $0x380] sm:$0xff]  ;;  %878 = vmatpush.msra.mxu3 %v527_v14 }
  0x4f   : > { %v523_v16 = vld [vmem:[%s2055_s23 + $0x780] sm:$0xff]  ;;  %839 = vmatpush.msra.mxu1 %v395_v15 }
  0x50   : > { %v327_v17 = vld [vmem:[%s2055_s23 + $0x160] sm:$0xff]  ;;  %879 = vmatpush.msra.mxu3 %v523_v16 }
  0x51   : > { %v455_v18 = vld [vmem:[%s2055_s23 + $0x560] sm:$0xff]  ;;  %820 = vmatpush.msra.mxu0 %v327_v17 }
  0x52   : > { %v391_v19 = vld [vmem:[%s2055_s23 + $0x360] sm:$0xff]  ;;  %860 = vmatpush.msra.mxu2 %v455_v18 }
  0x53   : > { %v519_v20 = vld [vmem:[%s2055_s23 + $0x760] sm:$0xff]  ;;  %840 = vmatpush.msra.mxu1 %v391_v19 }
  0x54   : > { %v323_v21 = vld [vmem:[%s2055_s23 + $0x140] sm:$0xff]  ;;  %880 = vmatpush.msra.mxu3 %v519_v20 }
  0x55   : > { %v451_v22 = vld [vmem:[%s2055_s23 + $0x540] sm:$0xff]  ;;  %821 = vmatpush.msra.mxu0 %v323_v21 }
  0x56   : > { %v387_v23 = vld [vmem:[%s2055_s23 + $0x340] sm:$0xff]  ;;  %861 = vmatpush.msra.mxu2 %v451_v22 }
  0x57   : > { %v515_v24 = vld [vmem:[%s2055_s23 + $0x740] sm:$0xff]  ;;  %841 = vmatpush.msra.mxu1 %v387_v23  ;;  %v281_v23 = vld [vmem:[%s2074_s4] sm:$0xff] }
  0x58   : > { %v319_v25 = vld [vmem:[%s2055_s23 + $0x120] sm:$0xff]  ;;  %881 = vmatpush.msra.mxu3 %v515_v24  ;;  %797 = vst [vmem:[#allocation1] ss:$4 sm:$0xff] %v281_v23 }
  0x59   : > { %v447_v26 = vld [vmem:[%s2055_s23 + $0x520] sm:$0xff]  ;;  %822 = vmatpush.msra.mxu0 %v319_v25 }
  0x5a   : > { %v383_v27 = vld [vmem:[%s2055_s23 + $0x320] sm:$0xff]  ;;  %862 = vmatpush.msra.mxu2 %v447_v26 }
  0x5b   : > { %v511_v28 = vld [vmem:[%s2055_s23 + $0x720] sm:$0xff]  ;;  %842 = vmatpush.msra.mxu1 %v383_v27 }
  0x5c   : > { %v315_v29 = vld [vmem:[%s2055_s23 + $0x100] sm:$0xff]  ;;  %882 = vmatpush.msra.mxu3 %v511_v28 }
  0x5d   : > { %v443_v30 = vld [vmem:[%s2055_s23 + $0x500] sm:$0xff]  ;;  %823 = vmatpush.msra.mxu0 %v315_v29 }
  0x5e   : > { %v379_v31 = vld [vmem:[%s2055_s23 + $0x300] sm:$0xff]  ;;  %863 = vmatpush.msra.mxu2 %v443_v30 }
  0x5f   : > { %v507_v32 = vld [vmem:[%s2055_s23 + $0x700] sm:$0xff]  ;;  %843 = vmatpush.msra.mxu1 %v379_v31 }
  0x60   : > { %v311_v33 = vld [vmem:[%s2055_s23 + $0xe0] sm:$0xff]  ;;  %883 = vmatpush.msra.mxu3 %v507_v32 }
  0x61   : > { %v439_v34 = vld [vmem:[%s2055_s23 + $0x4e0] sm:$0xff]  ;;  %824 = vmatpush.msra.mxu0 %v311_v33 }
  0x62   : > { %v375_v35 = vld [vmem:[%s2055_s23 + $0x2e0] sm:$0xff]  ;;  %864 = vmatpush.msra.mxu2 %v439_v34 }
  0x63   : > { %v503_v36 = vld [vmem:[%s2055_s23 + $0x6e0] sm:$0xff]  ;;  %844 = vmatpush.msra.mxu1 %v375_v35 }
  0x64   : > { %v307_v37 = vld [vmem:[%s2055_s23 + $0xc0] sm:$0xff]  ;;  %884 = vmatpush.msra.mxu3 %v503_v36 }
  0x65   : > { %v435_v38 = vld [vmem:[%s2055_s23 + $0x4c0] sm:$0xff]  ;;  %825 = vmatpush.msra.mxu0 %v307_v37 }
  0x66   : > { %v371_v39 = vld [vmem:[%s2055_s23 + $0x2c0] sm:$0xff]  ;;  %865 = vmatpush.msra.mxu2 %v435_v38 }
  0x67   : > { %v499_v40 = vld [vmem:[%s2055_s23 + $0x6c0] sm:$0xff]  ;;  %845 = vmatpush.msra.mxu1 %v371_v39 }
  0x68   : > { %v303_v41 = vld [vmem:[%s2055_s23 + $0xa0] sm:$0xff]  ;;  %885 = vmatpush.msra.mxu3 %v499_v40 }
  0x69   : > { %v431_v42 = vld [vmem:[%s2055_s23 + $0x4a0] sm:$0xff]  ;;  %826 = vmatpush.msra.mxu0 %v303_v41 }
  0x6a   : > { %v367_v43 = vld [vmem:[%s2055_s23 + $0x2a0] sm:$0xff]  ;;  %866 = vmatpush.msra.mxu2 %v431_v42 }
  0x6b   : > { %v495_v44 = vld [vmem:[%s2055_s23 + $0x6a0] sm:$0xff]  ;;  %846 = vmatpush.msra.mxu1 %v367_v43 }
  0x6c   : > { %v299_v45 = vld [vmem:[%s2055_s23 + $0x80] sm:$0xff]  ;;  %886 = vmatpush.msra.mxu3 %v495_v44 }
  0x6d   : > { %v427_v46 = vld [vmem:[%s2055_s23 + $0x480] sm:$0xff]  ;;  %827 = vmatpush.msra.mxu0 %v299_v45 }
  0x6e   : > { %v363_v47 = vld [vmem:[%s2055_s23 + $0x280] sm:$0xff]  ;;  %867 = vmatpush.msra.mxu2 %v427_v46 }
  0x6f   : > { %v491_v48 = vld [vmem:[%s2055_s23 + $0x680] sm:$0xff]  ;;  %847 = vmatpush.msra.mxu1 %v363_v47 }
  0x70   : > { %v295_v49 = vld [vmem:[%s2055_s23 + $0x60] sm:$0xff]  ;;  %887 = vmatpush.msra.mxu3 %v491_v48 }
  0x71   : > { %v423_v50 = vld [vmem:[%s2055_s23 + $0x460] sm:$0xff]  ;;  %828 = vmatpush.msra.mxu0 %v295_v49 }
  0x72   : > { %v359_v51 = vld [vmem:[%s2055_s23 + $0x260] sm:$0xff]  ;;  %868 = vmatpush.msra.mxu2 %v423_v50 }
  0x73   : > { %v487_v52 = vld [vmem:[%s2055_s23 + $0x660] sm:$0xff]  ;;  %848 = vmatpush.msra.mxu1 %v359_v51 }
  0x74   : > { %v291_v53 = vld [vmem:[%s2055_s23 + $0x40] sm:$0xff]  ;;  %888 = vmatpush.msra.mxu3 %v487_v52 }
  0x75   : > { %v419_v54 = vld [vmem:[%s2055_s23 + $0x440] sm:$0xff]  ;;  %829 = vmatpush.msra.mxu0 %v291_v53 }
  0x76   : > { %v355_v55 = vld [vmem:[%s2055_s23 + $0x240] sm:$0xff]  ;;  %869 = vmatpush.msra.mxu2 %v419_v54 }
  0x77   : > { %v483_v56 = vld [vmem:[%s2055_s23 + $0x640] sm:$0xff]  ;;  %849 = vmatpush.msra.mxu1 %v355_v55 }
  0x78   : > { %v287_v57 = vld [vmem:[%s2055_s23 + $0x20] sm:$0xff]  ;;  %889 = vmatpush.msra.mxu3 %v483_v56 }
  0x79   : > { %v415_v58 = vld [vmem:[%s2055_s23 + $0x420] sm:$0xff]  ;;  %830 = vmatpush.msra.mxu0 %v287_v57 }
  0x7a   : > { %v351_v59 = vld [vmem:[%s2055_s23 + $0x220] sm:$0xff]  ;;  %870 = vmatpush.msra.mxu2 %v415_v58 }
  0x7b   : > { %v479_v60 = vld [vmem:[%s2055_s23 + $0x620] sm:$0xff]  ;;  %850 = vmatpush.msra.mxu1 %v351_v59 }
  0x7c   : > { %v283_v61 = vld [vmem:[%s2055_s23] sm:$0xff]  ;;  %890 = vmatpush.msra.mxu3 %v479_v60 }
  0x7d   : > { %v411_v62 = vld [vmem:[%s2055_s23 + $0x400] sm:$0xff]  ;;  %831 = vmatpush.msra.mxu0 %v283_v61  ;;  %v2207_v61 = vld.sshfl [vmem:[#allocation1 + $0x10] sm:$0xff pattern:$0x73625140] }
  0x7e   : > { %v599_v63 = vld [vmem:[%s2055_s23 + $0x9e0] sm:$0xff]  ;;  %871 = vmatpush.msra.mxu2 %v411_v62 }
  0x7f   : > { %v727_v0 = vld [vmem:[%s2055_s23 + $0xde0] sm:$0xff]  ;;  %896 = vmatpush.msrb.mxu0 %v599_v63  ;;  %872 = vmatmul.f32.vlgmr.msra.gmra.mxu2 %v2207_v61 }
  0x80   : > { %v347_v1 = vld [vmem:[%s2055_s23 + $0x200] sm:$0xff]  ;;  %936 = vmatpush.msrb.mxu2 %v727_v0 }
  0x81   : > { %v475_v2 = vld [vmem:[%s2055_s23 + $0x600] sm:$0xff]  ;;  %851 = vmatpush.msra.mxu1 %v347_v1 }
  0x82   : > { %v595_v3 = vld [vmem:[%s2055_s23 + $0x9c0] sm:$0xff]  ;;  %891 = vmatpush.msra.mxu3 %v475_v2  ;;  %v2213_v2 = vld.sshfl [vmem:[#allocation1] sm:$0xff pattern:$0x73625140] }
  0x83   : > { %v663_v4 = vld [vmem:[%s2055_s23 + $0xbe0] sm:$0xff]  ;;  %897 = vmatpush.msrb.mxu0 %v595_v3  ;;  %v2216_v3 = vld.sshfl [vmem:[#allocation1 + $0x18] sm:$0xff pattern:$0x73625140] }
  0x84   : > { %v723_v5 = vld [vmem:[%s2055_s23 + $0xdc0] sm:$0xff]  ;;  %916 = vmatpush.msrb.mxu1 %v663_v4  ;;  %v344_v4 = vld [vmem:[%s2055_s23 + $0x1e8] sm:$0xff]  ;;  %832 = vmatmul.f32.vlgmr.msra.gmra.mxu0 %v2213_v2 }
  0x85   : > { %v791_v6 = vld [vmem:[%s2055_s23 + $0xfe0] sm:$0xff]  ;;  %937 = vmatpush.msrb.mxu2 %v723_v5  ;;  %v472_v5 = vld [vmem:[%s2055_s23 + $0x5e8] sm:$0xff]  ;;  %892 = vmatmul.f32.vlgmr.msra.gmra.mxu3 %v2216_v3 }
  0x86   : > { %v591_v7 = vld [vmem:[%s2055_s23 + $0x9a0] sm:$0xff]  ;;  %956 = vmatpush.msrb.mxu3 %v791_v6 }
  0x87   : > { %v659_v8 = vld [vmem:[%s2055_s23 + $0xbc0] sm:$0xff]  ;;  %898 = vmatpush.msrb.mxu0 %v591_v7 }
  0x88   : > { %v719_v9 = vld [vmem:[%s2055_s23 + $0xda0] sm:$0xff]  ;;  %917 = vmatpush.msrb.mxu1 %v659_v8 }
  0x89   : > { %v787_v10 = vld [vmem:[%s2055_s23 + $0xfc0] sm:$0xff]  ;;  %938 = vmatpush.msrb.mxu2 %v719_v9  ;;  %v340_v9 = vld [vmem:[%s2055_s23 + $0x1c8] sm:$0xff] }
  0x8a   : > { %v587_v11 = vld [vmem:[%s2055_s23 + $0x980] sm:$0xff]  ;;  %957 = vmatpush.msrb.mxu3 %v787_v10  ;;  %v408_v10 = vld [vmem:[%s2055_s23 + $0x3e8] sm:$0xff] }
  0x8b   : > { %v655_v12 = vld [vmem:[%s2055_s23 + $0xba0] sm:$0xff]  ;;  %899 = vmatpush.msrb.mxu0 %v587_v11  ;;  %v468_v11 = vld [vmem:[%s2055_s23 + $0x5c8] sm:$0xff] }
  0x8c   : > { %v715_v13 = vld [vmem:[%s2055_s23 + $0xd80] sm:$0xff]  ;;  %918 = vmatpush.msrb.mxu1 %v655_v12  ;;  %v536_v12 = vld [vmem:[%s2055_s23 + $0x7e8] sm:$0xff] }
  0x8d   : > { %v783_v14 = vld [vmem:[%s2055_s23 + $0xfa0] sm:$0xff]  ;;  %939 = vmatpush.msrb.mxu2 %v715_v13  ;;  %v336_v13 = vld [vmem:[%s2055_s23 + $0x1a8] sm:$0xff] }
  0x8e   : > { %v583_v15 = vld [vmem:[%s2055_s23 + $0x960] sm:$0xff]  ;;  %958 = vmatpush.msrb.mxu3 %v783_v14  ;;  %v404_v14 = vld [vmem:[%s2055_s23 + $0x3c8] sm:$0xff] }
  0x8f   : > { %v651_v16 = vld [vmem:[%s2055_s23 + $0xb80] sm:$0xff]  ;;  %900 = vmatpush.msrb.mxu0 %v583_v15  ;;  %v464_v15 = vld [vmem:[%s2055_s23 + $0x5a8] sm:$0xff] }
  0x90   : > { %v711_v17 = vld [vmem:[%s2055_s23 + $0xd60] sm:$0xff]  ;;  %919 = vmatpush.msrb.mxu1 %v651_v16  ;;  %v532_v16 = vld [vmem:[%s2055_s23 + $0x7c8] sm:$0xff] }
  0x91   : > { %v779_v18 = vld [vmem:[%s2055_s23 + $0xf80] sm:$0xff]  ;;  %940 = vmatpush.msrb.mxu2 %v711_v17 }
  0x92   : > { %v579_v19 = vld [vmem:[%s2055_s23 + $0x940] sm:$0xff]  ;;  %959 = vmatpush.msrb.mxu3 %v779_v18  ;;  %v332_v18 = vld [vmem:[%s2055_s23 + $0x188] sm:$0xff] }
  0x93   : > { %v647_v20 = vld [vmem:[%s2055_s23 + $0xb60] sm:$0xff]  ;;  %901 = vmatpush.msrb.mxu0 %v579_v19  ;;  %v400_v19 = vld [vmem:[%s2055_s23 + $0x3a8] sm:$0xff] }
  0x94   : > { %v707_v21 = vld [vmem:[%s2055_s23 + $0xd40] sm:$0xff]  ;;  %920 = vmatpush.msrb.mxu1 %v647_v20  ;;  %v460_v20 = vld [vmem:[%s2055_s23 + $0x588] sm:$0xff] }
  0x95   : > { %v775_v22 = vld [vmem:[%s2055_s23 + $0xf60] sm:$0xff]  ;;  %941 = vmatpush.msrb.mxu2 %v707_v21  ;;  %v528_v21 = vld [vmem:[%s2055_s23 + $0x7a8] sm:$0xff] }
  0x96   : > { %v575_v24 = vld [vmem:[%s2055_s23 + $0x920] sm:$0xff]  ;;  %960 = vmatpush.msrb.mxu3 %v775_v22 }
  0x97   : > { %v643_v25 = vld [vmem:[%s2055_s23 + $0xb40] sm:$0xff]  ;;  %902 = vmatpush.msrb.mxu0 %v575_v24  ;;  %v328_v24 = vld [vmem:[%s2055_s23 + $0x168] sm:$0xff] }
  0x98   : > { %v703_v26 = vld [vmem:[%s2055_s23 + $0xd20] sm:$0xff]  ;;  %921 = vmatpush.msrb.mxu1 %v643_v25  ;;  %v396_v25 = vld [vmem:[%s2055_s23 + $0x388] sm:$0xff] }
  0x99   : > { %v771_v27 = vld [vmem:[%s2055_s23 + $0xf40] sm:$0xff]  ;;  %942 = vmatpush.msrb.mxu2 %v703_v26  ;;  %v456_v26 = vld [vmem:[%s2055_s23 + $0x568] sm:$0xff] }
  0x9a   : > { %v571_v28 = vld [vmem:[%s2055_s23 + $0x900] sm:$0xff]  ;;  %961 = vmatpush.msrb.mxu3 %v771_v27  ;;  %v524_v27 = vld [vmem:[%s2055_s23 + $0x788] sm:$0xff] }
  0x9b   : > { %v639_v29 = vld [vmem:[%s2055_s23 + $0xb20] sm:$0xff]  ;;  %903 = vmatpush.msrb.mxu0 %v571_v28 }
  0x9c   : > { %v699_v30 = vld [vmem:[%s2055_s23 + $0xd00] sm:$0xff]  ;;  %922 = vmatpush.msrb.mxu1 %v639_v29  ;;  %v324_v29 = vld [vmem:[%s2055_s23 + $0x148] sm:$0xff] }
  0x9d   : > { %v767_v31 = vld [vmem:[%s2055_s23 + $0xf20] sm:$0xff]  ;;  %943 = vmatpush.msrb.mxu2 %v699_v30  ;;  %v392_v30 = vld [vmem:[%s2055_s23 + $0x368] sm:$0xff] }
  0x9e   : > { %v567_v32 = vld [vmem:[%s2055_s23 + $0x8e0] sm:$0xff]  ;;  %962 = vmatpush.msrb.mxu3 %v767_v31  ;;  %v452_v31 = vld [vmem:[%s2055_s23 + $0x548] sm:$0xff] }
  0x9f   : > { %v635_v33 = vld [vmem:[%s2055_s23 + $0xb00] sm:$0xff]  ;;  %904 = vmatpush.msrb.mxu0 %v567_v32  ;;  %v520_v32 = vld [vmem:[%s2055_s23 + $0x768] sm:$0xff] }
  0xa0   : > { %v695_v34 = vld [vmem:[%s2055_s23 + $0xce0] sm:$0xff]  ;;  %923 = vmatpush.msrb.mxu1 %v635_v33  ;;  %v320_v33 = vld [vmem:[%s2055_s23 + $0x128] sm:$0xff] }
  0xa1   : > { %v763_v35 = vld [vmem:[%s2055_s23 + $0xf00] sm:$0xff]  ;;  %944 = vmatpush.msrb.mxu2 %v695_v34  ;;  %v388_v34 = vld [vmem:[%s2055_s23 + $0x348] sm:$0xff] }
  0xa2   : > { %v282_v36 = vld [vmem:[%s2074_s4 + $0x8] sm:$0xff]  ;;  %963 = vmatpush.msrb.mxu3 %v763_v35  ;;  %v448_v35 = vld [vmem:[%s2055_s23 + $0x528] sm:$0xff] }
  0xa3   : > { %v563_v37 = vld [vmem:[%s2055_s23 + $0x8c0] sm:$0xff]  ;;  %799 = vst [vmem:[#allocation1 + $0x20] ss:$4 sm:$0xff] %v282_v36  ;;  %v516_v36 = vld [vmem:[%s2055_s23 + $0x748] sm:$0xff] }
  0xa4   : > { %v631_v38 = vld [vmem:[%s2055_s23 + $0xae0] sm:$0xff]  ;;  %905 = vmatpush.msrb.mxu0 %v563_v37  ;;  %v316_v37 = vld [vmem:[%s2055_s23 + $0x108] sm:$0xff] }
  0xa5   : > { %v691_v39 = vld [vmem:[%s2055_s23 + $0xcc0] sm:$0xff]  ;;  %924 = vmatpush.msrb.mxu1 %v631_v38  ;;  %v384_v38 = vld [vmem:[%s2055_s23 + $0x328] sm:$0xff] }
  0xa6   : > { %v759_v40 = vld [vmem:[%s2055_s23 + $0xee0] sm:$0xff]  ;;  %945 = vmatpush.msrb.mxu2 %v691_v39  ;;  %v444_v39 = vld [vmem:[%s2055_s23 + $0x508] sm:$0xff] }
  0xa7   : > { %v559_v41 = vld [vmem:[%s2055_s23 + $0x8a0] sm:$0xff]  ;;  %964 = vmatpush.msrb.mxu3 %v759_v40  ;;  %v512_v40 = vld [vmem:[%s2055_s23 + $0x728] sm:$0xff] }
  0xa8   : > { %v627_v42 = vld [vmem:[%s2055_s23 + $0xac0] sm:$0xff]  ;;  %906 = vmatpush.msrb.mxu0 %v559_v41  ;;  %v312_v41 = vld [vmem:[%s2055_s23 + $0xe8] sm:$0xff] }
  0xa9   : > { %v687_v43 = vld [vmem:[%s2055_s23 + $0xca0] sm:$0xff]  ;;  %925 = vmatpush.msrb.mxu1 %v627_v42  ;;  %v380_v42 = vld [vmem:[%s2055_s23 + $0x308] sm:$0xff] }
  0xaa   : > { %v755_v44 = vld [vmem:[%s2055_s23 + $0xec0] sm:$0xff]  ;;  %946 = vmatpush.msrb.mxu2 %v687_v43  ;;  %v2235_v17 = vld.sshfl [vmem:[#allocation1 + $0x30] sm:$0xff pattern:$0x73625140] }
  0xab   : > { %v555_v45 = vld [vmem:[%s2055_s23 + $0x880] sm:$0xff]  ;;  %965 = vmatpush.msrb.mxu3 %v755_v44  ;;  %v2241_v22 = vld.sshfl [vmem:[#allocation1 + $0x20] sm:$0xff pattern:$0x73625140]  ;;  %v440_v43 = vld [vmem:[%s2055_s23 + $0x4e8] sm:$0xff] }
  0xac   : > { %v623_v46 = vld [vmem:[%s2055_s23 + $0xaa0] sm:$0xff]  ;;  %907 = vmatpush.msrb.mxu0 %v555_v45  ;;  %v2244_v23 = vld.sshfl [vmem:[#allocation1 + $0x38] sm:$0xff pattern:$0x73625140]  ;;  %v508_v44 = vld [vmem:[%s2055_s23 + $0x708] sm:$0xff] }
  0xad   : > { %v683_v47 = vld [vmem:[%s2055_s23 + $0xc80] sm:$0xff]  ;;  %926 = vmatpush.msrb.mxu1 %v623_v46  ;;  %v308_v45 = vld [vmem:[%s2055_s23 + $0xc8] sm:$0xff] }
  0xae   : > { %v751_v48 = vld [vmem:[%s2055_s23 + $0xea0] sm:$0xff]  ;;  %947 = vmatpush.msrb.mxu2 %v683_v47  ;;  %v376_v46 = vld [vmem:[%s2055_s23 + $0x2e8] sm:$0xff] }
  0xaf   : > { %v551_v49 = vld [vmem:[%s2055_s23 + $0x860] sm:$0xff]  ;;  %966 = vmatpush.msrb.mxu3 %v751_v48  ;;  %v436_v47 = vld [vmem:[%s2055_s23 + $0x4c8] sm:$0xff] }
  0xb0   : > { %v619_v50 = vld [vmem:[%s2055_s23 + $0xa80] sm:$0xff]  ;;  %908 = vmatpush.msrb.mxu0 %v551_v49  ;;  %v504_v48 = vld [vmem:[%s2055_s23 + $0x6e8] sm:$0xff] }
  0xb1   : > { %v679_v51 = vld [vmem:[%s2055_s23 + $0xc60] sm:$0xff]  ;;  %927 = vmatpush.msrb.mxu1 %v619_v50  ;;  %v304_v49 = vld [vmem:[%s2055_s23 + $0xa8] sm:$0xff] }
  0xb2   : > { %v747_v52 = vld [vmem:[%s2055_s23 + $0xe80] sm:$0xff]  ;;  %948 = vmatpush.msrb.mxu2 %v679_v51  ;;  %v372_v50 = vld [vmem:[%s2055_s23 + $0x2c8] sm:$0xff] }
  0xb3   : > { %v547_v53 = vld [vmem:[%s2055_s23 + $0x840] sm:$0xff]  ;;  %967 = vmatpush.msrb.mxu3 %v747_v52  ;;  %v432_v51 = vld [vmem:[%s2055_s23 + $0x4a8] sm:$0xff] }
  0xb4   : > { %v615_v54 = vld [vmem:[%s2055_s23 + $0xa60] sm:$0xff]  ;;  %909 = vmatpush.msrb.mxu0 %v547_v53  ;;  %v500_v52 = vld [vmem:[%s2055_s23 + $0x6c8] sm:$0xff] }
  0xb5   : > { %v675_v55 = vld [vmem:[%s2055_s23 + $0xc40] sm:$0xff]  ;;  %928 = vmatpush.msrb.mxu1 %v615_v54  ;;  %v300_v53 = vld [vmem:[%s2055_s23 + $0x88] sm:$0xff] }
  0xb6   : > { %v743_v56 = vld [vmem:[%s2055_s23 + $0xe60] sm:$0xff]  ;;  %949 = vmatpush.msrb.mxu2 %v675_v55  ;;  %v368_v54 = vld [vmem:[%s2055_s23 + $0x2a8] sm:$0xff] }
  0xb7   : > { %v543_v57 = vld [vmem:[%s2055_s23 + $0x820] sm:$0xff]  ;;  %968 = vmatpush.msrb.mxu3 %v743_v56  ;;  %v428_v55 = vld [vmem:[%s2055_s23 + $0x488] sm:$0xff] }
  0xb8   : > { %v611_v58 = vld [vmem:[%s2055_s23 + $0xa40] sm:$0xff]  ;;  %910 = vmatpush.msrb.mxu0 %v543_v57  ;;  %v496_v56 = vld [vmem:[%s2055_s23 + $0x6a8] sm:$0xff] }
  0xb9   : > { %v671_v59 = vld [vmem:[%s2055_s23 + $0xc20] sm:$0xff]  ;;  %929 = vmatpush.msrb.mxu1 %v611_v58  ;;  %v296_v57 = vld [vmem:[%s2055_s23 + $0x68] sm:$0xff] }
  0xba   : > { %v739_v60 = vld [vmem:[%s2055_s23 + $0xe40] sm:$0xff]  ;;  %950 = vmatpush.msrb.mxu2 %v671_v59  ;;  %v364_v58 = vld [vmem:[%s2055_s23 + $0x288] sm:$0xff] }
  0xbb   : > { %v539_v62 = vld [vmem:[%s2055_s23 + $0x800] sm:$0xff]  ;;  %969 = vmatpush.msrb.mxu3 %v739_v60  ;;  %v424_v59 = vld [vmem:[%s2055_s23 + $0x468] sm:$0xff] }
  0xbc   : > { %v607_v63 = vld [vmem:[%s2055_s23 + $0xa20] sm:$0xff]  ;;  %911 = vmatpush.msrb.mxu0 %v539_v62  ;;  %v492_v60 = vld [vmem:[%s2055_s23 + $0x688] sm:$0xff] }
  0xbd   : > { %v667_v0 = vld [vmem:[%s2055_s23 + $0xc00] sm:$0xff]  ;;  %930 = vmatpush.msrb.mxu1 %v607_v63  ;;  %912 = vmatmul.f32.vlgmr.msrb.gmra.mxu0 %v2241_v22  ;;  %v292_v62 = vld [vmem:[%s2055_s23 + $0x48] sm:$0xff] }
  0xbe   : > { %v735_v1 = vld [vmem:[%s2055_s23 + $0xe20] sm:$0xff]  ;;  %951 = vmatpush.msrb.mxu2 %v667_v0  ;;  %976 = vmatpush.msra.mxu0 %v344_v4  ;;  %v360_v63 = vld [vmem:[%s2055_s23 + $0x268] sm:$0xff] }
  0xbf   : > { %v603_v6 = vld [vmem:[%s2055_s23 + $0xa00] sm:$0xff]  ;;  %970 = vmatpush.msrb.mxu3 %v735_v1  ;;  %952 = vmatmul.f32.vlgmr.msrb.gmra.mxu2 %v2235_v17  ;;  %v420_v0 = vld [vmem:[%s2055_s23 + $0x448] sm:$0xff] }
  0xc0   : > { %v731_v7 = vld [vmem:[%s2055_s23 + $0xe00] sm:$0xff]  ;;  %1016 = vmatpush.msra.mxu2 %v472_v5  ;;  %931 = vmatpush.msrb.mxu1 %v603_v6  ;;  %v488_v1 = vld [vmem:[%s2055_s23 + $0x668] sm:$0xff] }
  0xc1   : > { %v2223_v8 = vld.sshfl [vmem:[#allocation1 + $0x8] sm:$0xff pattern:$0x73625140]  ;;  %971 = vmatpush.msrb.mxu3 %v731_v7  ;;  %977 = vmatpush.msra.mxu0 %v340_v9  ;;  %v288_v4 = vld [vmem:[%s2055_s23 + $0x28] sm:$0xff] }
  0xc2   : > { %852 = vmatmul.f32.vlgmr.msra.gmra.mxu1 %v2223_v8  ;;  %1017 = vmatpush.msra.mxu2 %v468_v11  ;;  %v2251_v28 = vld.sshfl [vmem:[#allocation1 + $0x28] sm:$0xff pattern:$0x73625140]  ;;  %v356_v5 = vld [vmem:[%s2055_s23 + $0x248] sm:$0xff] }
  0xc3   : > { %996 = vmatpush.msra.mxu1 %v408_v10  ;;  %1036 = vmatpush.msra.mxu3 %v536_v12  ;;  %v416_v6 = vld [vmem:[%s2055_s23 + $0x428] sm:$0xff] }
  0xc4   : > { %978 = vmatpush.msra.mxu0 %v336_v13  ;;  %1018 = vmatpush.msra.mxu2 %v464_v15  ;;  %v484_v7 = vld [vmem:[%s2055_s23 + $0x648] sm:$0xff] }
  0xc5   : > { %997 = vmatpush.msra.mxu1 %v404_v14  ;;  %1037 = vmatpush.msra.mxu3 %v532_v16  ;;  %v284_v9 = vld [vmem:[%s2055_s23 + $0x8] sm:$0xff] }
  0xc6   : > { %979 = vmatpush.msra.mxu0 %v332_v18  ;;  %1019 = vmatpush.msra.mxu2 %v460_v20  ;;  %v352_v10 = vld [vmem:[%s2055_s23 + $0x228] sm:$0xff] }
  0xc7   : > { %998 = vmatpush.msra.mxu1 %v400_v19  ;;  %1038 = vmatpush.msra.mxu3 %v528_v21  ;;  %v412_v11 = vld [vmem:[%s2055_s23 + $0x408] sm:$0xff] }
  0xc8   : > { %972 = vmatmul.f32.vlgmr.msrb.gmra.mxu3 %v2244_v23  ;;  %980 = vmatpush.msra.mxu0 %v328_v24  ;;  %v480_v12 = vld [vmem:[%s2055_s23 + $0x628] sm:$0xff] }
  0xc9   : > { %999 = vmatpush.msra.mxu1 %v396_v25  ;;  %1020 = vmatpush.msra.mxu2 %v456_v26  ;;  %v600_v13 = vld [vmem:[%s2055_s23 + $0x9e8] sm:$0xff] }
  0xca   : > { %1039 = vmatpush.msra.mxu3 %v524_v27  ;;  %932 = vmatmul.f32.vlgmr.msrb.gmra.mxu1 %v2251_v28  ;;  %v728_v14 = vld [vmem:[%s2055_s23 + $0xde8] sm:$0xff] }
  0xcb   : > { %981 = vmatpush.msra.mxu0 %v324_v29  ;;  %1000 = vmatpush.msra.mxu1 %v392_v30  ;;  %v348_v15 = vld [vmem:[%s2055_s23 + $0x208] sm:$0xff] }
  0xcc   : > { %1021 = vmatpush.msra.mxu2 %v452_v31  ;;  %1040 = vmatpush.msra.mxu3 %v520_v32  ;;  %v476_v16 = vld [vmem:[%s2055_s23 + $0x608] sm:$0xff] }
  0xcd   : > { %982 = vmatpush.msra.mxu0 %v320_v33  ;;  %1001 = vmatpush.msra.mxu1 %v388_v34  ;;  %v596_v18 = vld [vmem:[%s2055_s23 + $0x9c8] sm:$0xff] }
  0xce   : > { %1022 = vmatpush.msra.mxu2 %v448_v35  ;;  %1041 = vmatpush.msra.mxu3 %v516_v36  ;;  %v664_v19 = vld [vmem:[%s2055_s23 + $0xbe8] sm:$0xff] }
  0xcf   : > { %983 = vmatpush.msra.mxu0 %v316_v37  ;;  %1002 = vmatpush.msra.mxu1 %v384_v38  ;;  %v724_v20 = vld [vmem:[%s2055_s23 + $0xdc8] sm:$0xff] }
  0xd0   : > { %1023 = vmatpush.msra.mxu2 %v444_v39  ;;  %1042 = vmatpush.msra.mxu3 %v512_v40  ;;  %v792_v21 = vld [vmem:[%s2055_s23 + $0xfe8] sm:$0xff] }
  0xd1   : > { %984 = vmatpush.msra.mxu0 %v312_v41  ;;  %1003 = vmatpush.msra.mxu1 %v380_v42  ;;  %v592_v24 = vld [vmem:[%s2055_s23 + $0x9a8] sm:$0xff] }
  0xd2   : > { %1024 = vmatpush.msra.mxu2 %v440_v43  ;;  %1043 = vmatpush.msra.mxu3 %v508_v44  ;;  %v660_v25 = vld [vmem:[%s2055_s23 + $0xbc8] sm:$0xff] }
  0xd3   : > { %985 = vmatpush.msra.mxu0 %v308_v45  ;;  %1004 = vmatpush.msra.mxu1 %v376_v46  ;;  %v720_v26 = vld [vmem:[%s2055_s23 + $0xda8] sm:$0xff] }
  0xd4   : > { %1025 = vmatpush.msra.mxu2 %v436_v47  ;;  %1044 = vmatpush.msra.mxu3 %v504_v48  ;;  %v788_v27 = vld [vmem:[%s2055_s23 + $0xfc8] sm:$0xff] }
  0xd5   : > { %986 = vmatpush.msra.mxu0 %v304_v49  ;;  %1005 = vmatpush.msra.mxu1 %v372_v50  ;;  %v588_v29 = vld [vmem:[%s2055_s23 + $0x988] sm:$0xff] }
  0xd6   : > { %1026 = vmatpush.msra.mxu2 %v432_v51  ;;  %1045 = vmatpush.msra.mxu3 %v500_v52  ;;  %v656_v30 = vld [vmem:[%s2055_s23 + $0xba8] sm:$0xff] }
  0xd7   : > { %987 = vmatpush.msra.mxu0 %v300_v53  ;;  %1006 = vmatpush.msra.mxu1 %v368_v54  ;;  %v716_v31 = vld [vmem:[%s2055_s23 + $0xd88] sm:$0xff] }
  0xd8   : > { %1027 = vmatpush.msra.mxu2 %v428_v55  ;;  %1046 = vmatpush.msra.mxu3 %v496_v56  ;;  %v784_v32 = vld [vmem:[%s2055_s23 + $0xfa8] sm:$0xff] }
  0xd9   : > { %988 = vmatpush.msra.mxu0 %v296_v57  ;;  %1007 = vmatpush.msra.mxu1 %v364_v58  ;;  %v584_v33 = vld [vmem:[%s2055_s23 + $0x968] sm:$0xff] }
  0xda   : > { %1028 = vmatpush.msra.mxu2 %v424_v59  ;;  %1047 = vmatpush.msra.mxu3 %v492_v60  ;;  %v652_v34 = vld [vmem:[%s2055_s23 + $0xb88] sm:$0xff] }
  0xdb   : > { %989 = vmatpush.msra.mxu0 %v292_v62  ;;  %1008 = vmatpush.msra.mxu1 %v360_v63  ;;  %v712_v35 = vld [vmem:[%s2055_s23 + $0xd68] sm:$0xff] }
  0xdc   : > { %1029 = vmatpush.msra.mxu2 %v420_v0  ;;  %1048 = vmatpush.msra.mxu3 %v488_v1  ;;  %v780_v36 = vld [vmem:[%s2055_s23 + $0xf88] sm:$0xff] }
  0xdd   : > { %990 = vmatpush.msra.mxu0 %v288_v4  ;;  %1009 = vmatpush.msra.mxu1 %v356_v5  ;;  %v580_v37 = vld [vmem:[%s2055_s23 + $0x948] sm:$0xff] }
  0xde   : > { %1030 = vmatpush.msra.mxu2 %v416_v6  ;;  %1049 = vmatpush.msra.mxu3 %v484_v7  ;;  %v648_v38 = vld [vmem:[%s2055_s23 + $0xb68] sm:$0xff] }
  0xdf   : > { %991 = vmatpush.msra.mxu0 %v284_v9  ;;  %1010 = vmatpush.msra.mxu1 %v352_v10  ;;  %v708_v39 = vld [vmem:[%s2055_s23 + $0xd48] sm:$0xff] }
  0xe0   : > { %1031 = vmatpush.msra.mxu2 %v412_v11  ;;  %1050 = vmatpush.msra.mxu3 %v480_v12  ;;  %v776_v40 = vld [vmem:[%s2055_s23 + $0xf68] sm:$0xff] }
  0xe1   : > { %1056 = vmatpush.msrb.mxu0 %v600_v13  ;;  %1011 = vmatpush.msra.mxu1 %v348_v15  ;;  %v576_v41 = vld [vmem:[%s2055_s23 + $0x928] sm:$0xff] }
  0xe2   : > { %1096 = vmatpush.msrb.mxu2 %v728_v14  ;;  %1051 = vmatpush.msra.mxu3 %v476_v16  ;;  %v644_v42 = vld [vmem:[%s2055_s23 + $0xb48] sm:$0xff] }
  0xe3   : > { %1057 = vmatpush.msrb.mxu0 %v596_v18  ;;  %1076 = vmatpush.msrb.mxu1 %v664_v19  ;;  %v704_v43 = vld [vmem:[%s2055_s23 + $0xd28] sm:$0xff]  ;;  %v345_v19 = vld [vmem:[%s2055_s23 + $0x1f0] sm:$0xff] }
  0xe4   : > { %1097 = vmatpush.msrb.mxu2 %v724_v20  ;;  %1116 = vmatpush.msrb.mxu3 %v792_v21  ;;  %v772_v44 = vld [vmem:[%s2055_s23 + $0xf48] sm:$0xff]  ;;  %v473_v20 = vld [vmem:[%s2055_s23 + $0x5f0] sm:$0xff] }
  0xe5   : > { %1058 = vmatpush.msrb.mxu0 %v592_v24  ;;  %1077 = vmatpush.msrb.mxu1 %v660_v25  ;;  %v572_v45 = vld [vmem:[%s2055_s23 + $0x908] sm:$0xff]  ;;  %v341_v24 = vld [vmem:[%s2055_s23 + $0x1d0] sm:$0xff] }
  0xe6   : > { %1098 = vmatpush.msrb.mxu2 %v720_v26  ;;  %1117 = vmatpush.msrb.mxu3 %v788_v27  ;;  %v640_v46 = vld [vmem:[%s2055_s23 + $0xb28] sm:$0xff]  ;;  %v409_v25 = vld [vmem:[%s2055_s23 + $0x3f0] sm:$0xff] }
  0xe7   : > { %1059 = vmatpush.msrb.mxu0 %v588_v29  ;;  %1078 = vmatpush.msrb.mxu1 %v656_v30  ;;  %v700_v47 = vld [vmem:[%s2055_s23 + $0xd08] sm:$0xff]  ;;  %v469_v26 = vld [vmem:[%s2055_s23 + $0x5d0] sm:$0xff] }
  0xe8   : > { %1099 = vmatpush.msrb.mxu2 %v716_v31  ;;  %1118 = vmatpush.msrb.mxu3 %v784_v32  ;;  %v768_v48 = vld [vmem:[%s2055_s23 + $0xf28] sm:$0xff]  ;;  %v537_v27 = vld [vmem:[%s2055_s23 + $0x7f0] sm:$0xff] }
  0xe9   : > { %1060 = vmatpush.msrb.mxu0 %v584_v33  ;;  %1079 = vmatpush.msrb.mxu1 %v652_v34  ;;  %v568_v49 = vld [vmem:[%s2055_s23 + $0x8e8] sm:$0xff]  ;;  %v405_v29 = vld [vmem:[%s2055_s23 + $0x3d0] sm:$0xff] }
  0xea   : > { %1100 = vmatpush.msrb.mxu2 %v712_v35  ;;  %1119 = vmatpush.msrb.mxu3 %v780_v36  ;;  %v636_v50 = vld [vmem:[%s2055_s23 + $0xb08] sm:$0xff]  ;;  %v465_v30 = vld [vmem:[%s2055_s23 + $0x5b0] sm:$0xff] }
  0xeb   : > { %1061 = vmatpush.msrb.mxu0 %v580_v37  ;;  %1080 = vmatpush.msrb.mxu1 %v648_v38  ;;  %v696_v51 = vld [vmem:[%s2055_s23 + $0xce8] sm:$0xff]  ;;  %v533_v31 = vld [vmem:[%s2055_s23 + $0x7d0] sm:$0xff] }
  0xec   : > { %1101 = vmatpush.msrb.mxu2 %v708_v39  ;;  %1120 = vmatpush.msrb.mxu3 %v776_v40  ;;  %v764_v52 = vld [vmem:[%s2055_s23 + $0xf08] sm:$0xff]  ;;  %v401_v32 = vld [vmem:[%s2055_s23 + $0x3b0] sm:$0xff] }
  0xed   : > { %1062 = vmatpush.msrb.mxu0 %v576_v41  ;;  %1081 = vmatpush.msrb.mxu1 %v644_v42  ;;  %v564_v53 = vld [vmem:[%s2055_s23 + $0x8c8] sm:$0xff]  ;;  %v529_v33 = vld [vmem:[%s2055_s23 + $0x7b0] sm:$0xff] }
  0xee   : > { %1102 = vmatpush.msrb.mxu2 %v704_v43  ;;  %1121 = vmatpush.msrb.mxu3 %v772_v44  ;;  %v632_v54 = vld [vmem:[%s2055_s23 + $0xae8] sm:$0xff]  ;;  %v329_v34 = vld [vmem:[%s2055_s23 + $0x170] sm:$0xff] }
  0xef   : > { %1063 = vmatpush.msrb.mxu0 %v572_v45  ;;  %1082 = vmatpush.msrb.mxu1 %v640_v46  ;;  %v692_v55 = vld [vmem:[%s2055_s23 + $0xcc8] sm:$0xff]  ;;  %v397_v35 = vld [vmem:[%s2055_s23 + $0x390] sm:$0xff] }
  0xf0   : > { %1103 = vmatpush.msrb.mxu2 %v700_v47  ;;  %1122 = vmatpush.msrb.mxu3 %v768_v48  ;;  %v760_v56 = vld [vmem:[%s2055_s23 + $0xee8] sm:$0xff]  ;;  %v457_v36 = vld [vmem:[%s2055_s23 + $0x570] sm:$0xff] }
  0xf1   : > { %1064 = vmatpush.msrb.mxu0 %v568_v49  ;;  %1083 = vmatpush.msrb.mxu1 %v636_v50  ;;  %v560_v57 = vld [vmem:[%s2055_s23 + $0x8a8] sm:$0xff]  ;;  %v325_v37 = vld [vmem:[%s2055_s23 + $0x150] sm:$0xff] }
  0xf2   : > { %1104 = vmatpush.msrb.mxu2 %v696_v51  ;;  %1123 = vmatpush.msrb.mxu3 %v764_v52  ;;  %v628_v58 = vld [vmem:[%s2055_s23 + $0xac8] sm:$0xff]  ;;  %v393_v38 = vld [vmem:[%s2055_s23 + $0x370] sm:$0xff] }
  0xf3   : > { %1065 = vmatpush.msrb.mxu0 %v564_v53  ;;  %1084 = vmatpush.msrb.mxu1 %v632_v54  ;;  %v688_v59 = vld [vmem:[%s2055_s23 + $0xca8] sm:$0xff]  ;;  %v453_v39 = vld [vmem:[%s2055_s23 + $0x550] sm:$0xff] }
  0xf4   : > { %v756_v60 = vld [vmem:[%s2055_s23 + $0xec8] sm:$0xff]  ;;  %1105 = vmatpush.msrb.mxu2 %v692_v55  ;;  %1124 = vmatpush.msrb.mxu3 %v760_v56  ;;  %v521_v40 = vld [vmem:[%s2055_s23 + $0x770] sm:$0xff] }
  0xf5   : > { %v556_v62 = vld [vmem:[%s2055_s23 + $0x888] sm:$0xff]  ;;  %1066 = vmatpush.msrb.mxu0 %v560_v57  ;;  %1085 = vmatpush.msrb.mxu1 %v628_v58  ;;  %v321_v41 = vld [vmem:[%s2055_s23 + $0x130] sm:$0xff] }
  0xf6   : > { %v624_v63 = vld [vmem:[%s2055_s23 + $0xaa8] sm:$0xff]  ;;  %1106 = vmatpush.msrb.mxu2 %v688_v59  ;;  %1125 = vmatpush.msrb.mxu3 %v756_v60  ;;  %v389_v42 = vld [vmem:[%s2055_s23 + $0x350] sm:$0xff] }
  0xf7   : > { %v684_v0 = vld [vmem:[%s2055_s23 + $0xc88] sm:$0xff]  ;;  %1067 = vmatpush.msrb.mxu0 %v556_v62  ;;  %1086 = vmatpush.msrb.mxu1 %v624_v63  ;;  %v449_v43 = vld [vmem:[%s2055_s23 + $0x530] sm:$0xff] }
  0xf8   : > { %v752_v1 = vld [vmem:[%s2055_s23 + $0xea8] sm:$0xff]  ;;  %1107 = vmatpush.msrb.mxu2 %v684_v0  ;;  %992 = vmatmul.f32.vlgmr.msra.gmra.mxu0 %v2213_v2  ;;  %v517_v44 = vld [vmem:[%s2055_s23 + $0x750] sm:$0xff] }
  0xf9   : > { %v552_v4 = vld [vmem:[%s2055_s23 + $0x868] sm:$0xff]  ;;  %1126 = vmatpush.msrb.mxu3 %v752_v1  ;;  %1032 = vmatmul.f32.vlgmr.msra.gmra.mxu2 %v2207_v61  ;;  %v317_v45 = vld [vmem:[%s2055_s23 + $0x110] sm:$0xff] }
  0xfa   : > { %v620_v5 = vld [vmem:[%s2055_s23 + $0xa88] sm:$0xff]  ;;  %1068 = vmatpush.msrb.mxu0 %v552_v4  ;;  %1052 = vmatmul.f32.vlgmr.msra.gmra.mxu3 %v2216_v3  ;;  %v385_v46 = vld [vmem:[%s2055_s23 + $0x330] sm:$0xff] }
  0xfb   : > { %v680_v6 = vld [vmem:[%s2055_s23 + $0xc68] sm:$0xff]  ;;  %1087 = vmatpush.msrb.mxu1 %v620_v5  ;;  %v445_v47 = vld [vmem:[%s2055_s23 + $0x510] sm:$0xff] }
  0xfc   : > { %v748_v7 = vld [vmem:[%s2055_s23 + $0xe88] sm:$0xff]  ;;  %1108 = vmatpush.msrb.mxu2 %v680_v6  ;;  %1012 = vmatmul.f32.vlgmr.msra.gmra.mxu1 %v2223_v8  ;;  %v513_v48 = vld [vmem:[%s2055_s23 + $0x730] sm:$0xff] }
  0xfd   : > { %v548_v9 = vld [vmem:[%s2055_s23 + $0x848] sm:$0xff]  ;;  %1127 = vmatpush.msrb.mxu3 %v748_v7  ;;  %v313_v49 = vld [vmem:[%s2055_s23 + $0xf0] sm:$0xff] }
  0xfe   : > { %v616_v10 = vld [vmem:[%s2055_s23 + $0xa68] sm:$0xff]  ;;  %1069 = vmatpush.msrb.mxu0 %v548_v9  ;;  %v381_v50 = vld [vmem:[%s2055_s23 + $0x310] sm:$0xff] }
  0xff   : > { %v676_v11 = vld [vmem:[%s2055_s23 + $0xc48] sm:$0xff]  ;;  %1088 = vmatpush.msrb.mxu1 %v616_v10  ;;  %v441_v51 = vld [vmem:[%s2055_s23 + $0x4f0] sm:$0xff] }
 0x100   : > { %v744_v12 = vld [vmem:[%s2055_s23 + $0xe68] sm:$0xff]  ;;  %1109 = vmatpush.msrb.mxu2 %v676_v11  ;;  %v509_v52 = vld [vmem:[%s2055_s23 + $0x710] sm:$0xff] }
 0x101   : > { %v544_v61 = vld [vmem:[%s2055_s23 + $0x828] sm:$0xff]  ;;  %1128 = vmatpush.msrb.mxu3 %v744_v12  ;;  %v309_v53 = vld [vmem:[%s2055_s23 + $0xd0] sm:$0xff] }
 0x102   : > { %v612_v13 = vld [vmem:[%s2055_s23 + $0xa48] sm:$0xff]  ;;  %1070 = vmatpush.msrb.mxu0 %v544_v61  ;;  %v377_v54 = vld [vmem:[%s2055_s23 + $0x2f0] sm:$0xff] }
 0x103   : > { %v672_v14 = vld [vmem:[%s2055_s23 + $0xc28] sm:$0xff]  ;;  %1089 = vmatpush.msrb.mxu1 %v612_v13  ;;  %v437_v55 = vld [vmem:[%s2055_s23 + $0x4d0] sm:$0xff] }
 0x104   : > { %v740_v15 = vld [vmem:[%s2055_s23 + $0xe48] sm:$0xff]  ;;  %1110 = vmatpush.msrb.mxu2 %v672_v14  ;;  %v505_v56 = vld [vmem:[%s2055_s23 + $0x6f0] sm:$0xff] }
 0x105   : > { %v540_v2 = vld [vmem:[%s2055_s23 + $0x808] sm:$0xff]  ;;  %1129 = vmatpush.msrb.mxu3 %v740_v15  ;;  %v305_v57 = vld [vmem:[%s2055_s23 + $0xb0] sm:$0xff] }
 0x106   : > { %v608_v16 = vld [vmem:[%s2055_s23 + $0xa28] sm:$0xff]  ;;  %1071 = vmatpush.msrb.mxu0 %v540_v2  ;;  %v373_v58 = vld [vmem:[%s2055_s23 + $0x2d0] sm:$0xff] }
 0x107   : > { %v668_v3 = vld [vmem:[%s2055_s23 + $0xc08] sm:$0xff]  ;;  %1090 = vmatpush.msrb.mxu1 %v608_v16  ;;  %1072 = vmatmul.f32.vlgmr.msrb.gmra.mxu0 %v2241_v22  ;;  %v333_v22 = vld [vmem:[%s2055_s23 + $0x190] sm:$0xff] }
 0x108   : > { %v736_v18 = vld [vmem:[%s2055_s23 + $0xe28] sm:$0xff]  ;;  %1111 = vmatpush.msrb.mxu2 %v668_v3  ;;  %1136 = vmatpush.msra.mxu0 %v345_v19  ;;  %v433_v59 = vld [vmem:[%s2055_s23 + $0x4b0] sm:$0xff] }
 0x109   : > { %v604_v21 = vld [vmem:[%s2055_s23 + $0xa08] sm:$0xff]  ;;  %1130 = vmatpush.msrb.mxu3 %v736_v18  ;;  %1112 = vmatmul.f32.vlgmr.msrb.gmra.mxu2 %v2235_v17  ;;  %v337_v17 = vld [vmem:[%s2055_s23 + $0x1b0] sm:$0xff] }
 0x10a   : > { %v732_v8 = vld [vmem:[%s2055_s23 + $0xe08] sm:$0xff]  ;;  %1176 = vmatpush.msra.mxu2 %v473_v20  ;;  %1091 = vmatpush.msrb.mxu1 %v604_v21  ;;  %v501_v60 = vld [vmem:[%s2055_s23 + $0x6d0] sm:$0xff] }
 0x10b   : > { %1131 = vmatpush.msrb.mxu3 %v732_v8  ;;  %1137 = vmatpush.msra.mxu0 %v341_v24  ;;  %v301_v62 = vld [vmem:[%s2055_s23 + $0x90] sm:$0xff] }
 0x10c   : > { %1132 = vmatmul.f32.vlgmr.msrb.gmra.mxu3 %v2244_v23  ;;  %1156 = vmatpush.msra.mxu1 %v409_v25  ;;  %v461_v23 = vld [vmem:[%s2055_s23 + $0x590] sm:$0xff] }
 0x10d   : > { %1177 = vmatpush.msra.mxu2 %v469_v26  ;;  %1196 = vmatpush.msra.mxu3 %v537_v27  ;;  %v369_v63 = vld [vmem:[%s2055_s23 + $0x2b0] sm:$0xff] }
 0x10e   : > { %1092 = vmatmul.f32.vlgmr.msrb.gmra.mxu1 %v2251_v28  ;;  %1138 = vmatpush.msra.mxu0 %v337_v17  ;;  %v525_v28 = vld [vmem:[%s2055_s23 + $0x790] sm:$0xff] }
 0x10f   : > { %1157 = vmatpush.msra.mxu1 %v405_v29  ;;  %1178 = vmatpush.msra.mxu2 %v465_v30  ;;  %v429_v0 = vld [vmem:[%s2055_s23 + $0x490] sm:$0xff] }
 0x110   : > { %1197 = vmatpush.msra.mxu3 %v533_v31  ;;  %1139 = vmatpush.msra.mxu0 %v333_v22  ;;  %v497_v1 = vld [vmem:[%s2055_s23 + $0x6b0] sm:$0xff] }
 0x111   : > { %1158 = vmatpush.msra.mxu1 %v401_v32  ;;  %1179 = vmatpush.msra.mxu2 %v461_v23  ;;  %v297_v4 = vld [vmem:[%s2055_s23 + $0x70] sm:$0xff] }
 0x112   : > { %1198 = vmatpush.msra.mxu3 %v529_v33  ;;  %1140 = vmatpush.msra.mxu0 %v329_v34  ;;  %v365_v5 = vld [vmem:[%s2055_s23 + $0x290] sm:$0xff] }
 0x113   : > { %1159 = vmatpush.msra.mxu1 %v397_v35  ;;  %1180 = vmatpush.msra.mxu2 %v457_v36  ;;  %v425_v6 = vld [vmem:[%s2055_s23 + $0x470] sm:$0xff] }
 0x114   : > { %1199 = vmatpush.msra.mxu3 %v525_v28  ;;  %1141 = vmatpush.msra.mxu0 %v325_v37  ;;  %v493_v7 = vld [vmem:[%s2055_s23 + $0x690] sm:$0xff] }
 0x115   : > { %1160 = vmatpush.msra.mxu1 %v393_v38  ;;  %1181 = vmatpush.msra.mxu2 %v453_v39  ;;  %v293_v9 = vld [vmem:[%s2055_s23 + $0x50] sm:$0xff] }
 0x116   : > { %1200 = vmatpush.msra.mxu3 %v521_v40  ;;  %1142 = vmatpush.msra.mxu0 %v321_v41  ;;  %v361_v10 = vld [vmem:[%s2055_s23 + $0x270] sm:$0xff] }
 0x117   : > { %1161 = vmatpush.msra.mxu1 %v389_v42  ;;  %1182 = vmatpush.msra.mxu2 %v449_v43  ;;  %v421_v11 = vld [vmem:[%s2055_s23 + $0x450] sm:$0xff] }
 0x118   : > { %1201 = vmatpush.msra.mxu3 %v517_v44  ;;  %1143 = vmatpush.msra.mxu0 %v317_v45  ;;  %v489_v12 = vld [vmem:[%s2055_s23 + $0x670] sm:$0xff] }
 0x119   : > { %1162 = vmatpush.msra.mxu1 %v385_v46  ;;  %1183 = vmatpush.msra.mxu2 %v445_v47  ;;  %v289_v61 = vld [vmem:[%s2055_s23 + $0x30] sm:$0xff] }
 0x11a   : > { %1202 = vmatpush.msra.mxu3 %v513_v48  ;;  %1144 = vmatpush.msra.mxu0 %v313_v49  ;;  %v357_v13 = vld [vmem:[%s2055_s23 + $0x250] sm:$0xff] }
 0x11b   : > { %1163 = vmatpush.msra.mxu1 %v381_v50  ;;  %1184 = vmatpush.msra.mxu2 %v441_v51  ;;  %v417_v14 = vld [vmem:[%s2055_s23 + $0x430] sm:$0xff] }
 0x11c   : > { %1203 = vmatpush.msra.mxu3 %v509_v52  ;;  %1145 = vmatpush.msra.mxu0 %v309_v53  ;;  %v485_v15 = vld [vmem:[%s2055_s23 + $0x650] sm:$0xff] }
 0x11d   : > { %1164 = vmatpush.msra.mxu1 %v377_v54  ;;  %1185 = vmatpush.msra.mxu2 %v437_v55  ;;  %v285_v2 = vld [vmem:[%s2055_s23 + $0x10] sm:$0xff] }
 0x11e   : > { %1204 = vmatpush.msra.mxu3 %v505_v56  ;;  %1146 = vmatpush.msra.mxu0 %v305_v57  ;;  %v353_v16 = vld [vmem:[%s2055_s23 + $0x230] sm:$0xff] }
 0x11f   : > { %1165 = vmatpush.msra.mxu1 %v373_v58  ;;  %1186 = vmatpush.msra.mxu2 %v433_v59  ;;  %v413_v3 = vld [vmem:[%s2055_s23 + $0x410] sm:$0xff] }
 0x120   : > { %1205 = vmatpush.msra.mxu3 %v501_v60  ;;  %1147 = vmatpush.msra.mxu0 %v301_v62  ;;  %v481_v18 = vld [vmem:[%s2055_s23 + $0x630] sm:$0xff] }
 0x121   : > { %1166 = vmatpush.msra.mxu1 %v369_v63  ;;  %1187 = vmatpush.msra.mxu2 %v429_v0  ;;  %v601_v19 = vld [vmem:[%s2055_s23 + $0x9f0] sm:$0xff] }
 0x122   : > { %1206 = vmatpush.msra.mxu3 %v497_v1  ;;  %1148 = vmatpush.msra.mxu0 %v297_v4  ;;  %v729_v20 = vld [vmem:[%s2055_s23 + $0xdf0] sm:$0xff] }
 0x123   : > { %1167 = vmatpush.msra.mxu1 %v365_v5  ;;  %1188 = vmatpush.msra.mxu2 %v425_v6  ;;  %v349_v21 = vld [vmem:[%s2055_s23 + $0x210] sm:$0xff] }
 0x124   : > { %1207 = vmatpush.msra.mxu3 %v493_v7  ;;  %1149 = vmatpush.msra.mxu0 %v293_v9  ;;  %v477_v8 = vld [vmem:[%s2055_s23 + $0x610] sm:$0xff] }
 0x125   : > { %1168 = vmatpush.msra.mxu1 %v361_v10  ;;  %1189 = vmatpush.msra.mxu2 %v421_v11  ;;  %v597_v24 = vld [vmem:[%s2055_s23 + $0x9d0] sm:$0xff] }
 0x126   : > { %1208 = vmatpush.msra.mxu3 %v489_v12  ;;  %1150 = vmatpush.msra.mxu0 %v289_v61  ;;  %v665_v25 = vld [vmem:[%s2055_s23 + $0xbf0] sm:$0xff] }
 0x127   : > { %1169 = vmatpush.msra.mxu1 %v357_v13  ;;  %1190 = vmatpush.msra.mxu2 %v417_v14  ;;  %v725_v26 = vld [vmem:[%s2055_s23 + $0xdd0] sm:$0xff] }
 0x128   : > { %1209 = vmatpush.msra.mxu3 %v485_v15  ;;  %1151 = vmatpush.msra.mxu0 %v285_v2  ;;  %v793_v27 = vld [vmem:[%s2055_s23 + $0xff0] sm:$0xff] }
 0x129   : > { %1170 = vmatpush.msra.mxu1 %v353_v16  ;;  %1191 = vmatpush.msra.mxu2 %v413_v3  ;;  %v593_v17 = vld [vmem:[%s2055_s23 + $0x9b0] sm:$0xff] }
 0x12a   : > { %1210 = vmatpush.msra.mxu3 %v481_v18  ;;  %1216 = vmatpush.msrb.mxu0 %v601_v19  ;;  %v661_v29 = vld [vmem:[%s2055_s23 + $0xbd0] sm:$0xff]  ;;  %v2499_v19 = vld.sshfl [vmem:[#allocation1 + $0x10] sm:$0xff pattern:$0x73625140] }
 0x12b   : > { %1256 = vmatpush.msrb.mxu2 %v729_v20  ;;  %1171 = vmatpush.msra.mxu1 %v349_v21  ;;  %v721_v30 = vld [vmem:[%s2055_s23 + $0xdb0] sm:$0xff]  ;;  %v346_v20 = vld [vmem:[%s2055_s23 + $0x1f8] sm:$0xff] }
 0x12c   : > { %1211 = vmatpush.msra.mxu3 %v477_v8  ;;  %1217 = vmatpush.msrb.mxu0 %v597_v24  ;;  %v789_v31 = vld [vmem:[%s2055_s23 + $0xfd0] sm:$0xff]  ;;  %v474_v21 = vld [vmem:[%s2055_s23 + $0x5f8] sm:$0xff] }
 0x12d   : > { %1236 = vmatpush.msrb.mxu1 %v665_v25  ;;  %1257 = vmatpush.msrb.mxu2 %v725_v26  ;;  %v589_v22 = vld [vmem:[%s2055_s23 + $0x990] sm:$0xff]  ;;  %v2505_v24 = vld.sshfl [vmem:[#allocation1] sm:$0xff pattern:$0x73625140] }
 0x12e   : > { %1276 = vmatpush.msrb.mxu3 %v793_v27  ;;  %v657_v32 = vld [vmem:[%s2055_s23 + $0xbb0] sm:$0xff]  ;;  %1218 = vmatpush.msrb.mxu0 %v593_v17  ;;  %v342_v27 = vld [vmem:[%s2055_s23 + $0x1d8] sm:$0xff] }
 0x12f   : > { %1237 = vmatpush.msrb.mxu1 %v661_v29  ;;  %v717_v23 = vld [vmem:[%s2055_s23 + $0xd90] sm:$0xff]  ;;  %1258 = vmatpush.msrb.mxu2 %v721_v30  ;;  %v410_v17 = vld [vmem:[%s2055_s23 + $0x3f8] sm:$0xff] }
 0x130   : > { %v785_v33 = vld [vmem:[%s2055_s23 + $0xfb0] sm:$0xff]  ;;  %1277 = vmatpush.msrb.mxu3 %v789_v31  ;;  %1219 = vmatpush.msrb.mxu0 %v589_v22  ;;  %v470_v29 = vld [vmem:[%s2055_s23 + $0x5d8] sm:$0xff]  ;;  %v2516_v31 = vld.sshfl [vmem:[#allocation1 + $0x8] sm:$0xff pattern:$0x73625140] }
 0x131   : > { %v585_v34 = vld [vmem:[%s2055_s23 + $0x970] sm:$0xff]  ;;  %1238 = vmatpush.msrb.mxu1 %v657_v32  ;;  %1259 = vmatpush.msrb.mxu2 %v717_v23  ;;  %v538_v30 = vld [vmem:[%s2055_s23 + $0x7f8] sm:$0xff] }
 0x132   : > { %v653_v35 = vld [vmem:[%s2055_s23 + $0xb90] sm:$0xff]  ;;  %1278 = vmatpush.msrb.mxu3 %v785_v33  ;;  %1220 = vmatpush.msrb.mxu0 %v585_v34  ;;  %v338_v22 = vld [vmem:[%s2055_s23 + $0x1b8] sm:$0xff] }
 0x133   : > { %v713_v36 = vld [vmem:[%s2055_s23 + $0xd70] sm:$0xff]  ;;  %1239 = vmatpush.msrb.mxu1 %v653_v35  ;;  %1192 = vmatmul.f32.vlgmr.msra.gmra.mxu2 %v2499_v19  ;;  %v406_v32 = vld [vmem:[%s2055_s23 + $0x3d8] sm:$0xff] }
 0x134   : > { %v781_v28 = vld [vmem:[%s2055_s23 + $0xf90] sm:$0xff]  ;;  %1260 = vmatpush.msrb.mxu2 %v713_v36  ;;  %1152 = vmatmul.f32.vlgmr.msra.gmra.mxu0 %v2505_v24  ;;  %v466_v23 = vld [vmem:[%s2055_s23 + $0x5b8] sm:$0xff] }
 0x135   : > { %v581_v37 = vld [vmem:[%s2055_s23 + $0x950] sm:$0xff]  ;;  %1279 = vmatpush.msrb.mxu3 %v781_v28  ;;  %1172 = vmatmul.f32.vlgmr.msra.gmra.mxu1 %v2516_v31  ;;  %v534_v33 = vld [vmem:[%s2055_s23 + $0x7d8] sm:$0xff] }
 0x136   : > { %v649_v38 = vld [vmem:[%s2055_s23 + $0xb70] sm:$0xff]  ;;  %1221 = vmatpush.msrb.mxu0 %v581_v37  ;;  %v334_v34 = vld [vmem:[%s2055_s23 + $0x198] sm:$0xff]  ;;  %v2527_v37 = vld.sshfl [vmem:[#allocation1 + $0x30] sm:$0xff pattern:$0x73625140] }
 0x137   : > { %v709_v39 = vld [vmem:[%s2055_s23 + $0xd50] sm:$0xff]  ;;  %1240 = vmatpush.msrb.mxu1 %v649_v38  ;;  %v402_v35 = vld [vmem:[%s2055_s23 + $0x3b8] sm:$0xff] }
 0x138   : > { %v777_v40 = vld [vmem:[%s2055_s23 + $0xf70] sm:$0xff]  ;;  %1261 = vmatpush.msrb.mxu2 %v709_v39  ;;  %v462_v36 = vld [vmem:[%s2055_s23 + $0x598] sm:$0xff] }
 0x139   : > { %v577_v41 = vld [vmem:[%s2055_s23 + $0x930] sm:$0xff]  ;;  %1280 = vmatpush.msrb.mxu3 %v777_v40  ;;  %v530_v28 = vld [vmem:[%s2055_s23 + $0x7b8] sm:$0xff] }
 0x13a   : > { %v645_v42 = vld [vmem:[%s2055_s23 + $0xb50] sm:$0xff]  ;;  %1222 = vmatpush.msrb.mxu0 %v577_v41  ;;  %v330_v38 = vld [vmem:[%s2055_s23 + $0x178] sm:$0xff] }
 0x13b   : > { %v705_v43 = vld [vmem:[%s2055_s23 + $0xd30] sm:$0xff]  ;;  %1241 = vmatpush.msrb.mxu1 %v645_v42  ;;  %v398_v39 = vld [vmem:[%s2055_s23 + $0x398] sm:$0xff] }
 0x13c   : > { %v773_v44 = vld [vmem:[%s2055_s23 + $0xf50] sm:$0xff]  ;;  %1262 = vmatpush.msrb.mxu2 %v705_v43  ;;  %v458_v40 = vld [vmem:[%s2055_s23 + $0x578] sm:$0xff] }
 0x13d   : > { %v573_v45 = vld [vmem:[%s2055_s23 + $0x910] sm:$0xff]  ;;  %1281 = vmatpush.msrb.mxu3 %v773_v44  ;;  %v2533_v41 = vld.sshfl [vmem:[#allocation1 + $0x20] sm:$0xff pattern:$0x73625140] }
 0x13e   : > { %v641_v46 = vld [vmem:[%s2055_s23 + $0xb30] sm:$0xff]  ;;  %1223 = vmatpush.msrb.mxu0 %v573_v45  ;;  %v526_v42 = vld [vmem:[%s2055_s23 + $0x798] sm:$0xff] }
 0x13f   : > { %v701_v47 = vld [vmem:[%s2055_s23 + $0xd10] sm:$0xff]  ;;  %1242 = vmatpush.msrb.mxu1 %v641_v46  ;;  %v326_v44 = vld [vmem:[%s2055_s23 + $0x158] sm:$0xff] }
 0x140   : > { %v769_v48 = vld [vmem:[%s2055_s23 + $0xf30] sm:$0xff]  ;;  %1263 = vmatpush.msrb.mxu2 %v701_v47  ;;  %v394_v45 = vld [vmem:[%s2055_s23 + $0x378] sm:$0xff] }
 0x141   : > { %v569_v49 = vld [vmem:[%s2055_s23 + $0x8f0] sm:$0xff]  ;;  %1282 = vmatpush.msrb.mxu3 %v769_v48  ;;  %v454_v46 = vld [vmem:[%s2055_s23 + $0x558] sm:$0xff]  ;;  %v2544_v48 = vld.sshfl [vmem:[#allocation1 + $0x28] sm:$0xff pattern:$0x73625140] }
 0x142   : > { %v637_v50 = vld [vmem:[%s2055_s23 + $0xb10] sm:$0xff]  ;;  %1224 = vmatpush.msrb.mxu0 %v569_v49  ;;  %v522_v47 = vld [vmem:[%s2055_s23 + $0x778] sm:$0xff] }
 0x143   : > { %v697_v51 = vld [vmem:[%s2055_s23 + $0xcf0] sm:$0xff]  ;;  %1243 = vmatpush.msrb.mxu1 %v637_v50  ;;  %v322_v49 = vld [vmem:[%s2055_s23 + $0x138] sm:$0xff] }
 0x144   : > { %v765_v52 = vld [vmem:[%s2055_s23 + $0xf10] sm:$0xff]  ;;  %1264 = vmatpush.msrb.mxu2 %v697_v51  ;;  %v390_v50 = vld [vmem:[%s2055_s23 + $0x358] sm:$0xff] }
 0x145   : > { %v565_v53 = vld [vmem:[%s2055_s23 + $0x8d0] sm:$0xff]  ;;  %1283 = vmatpush.msrb.mxu3 %v765_v52  ;;  %v450_v51 = vld [vmem:[%s2055_s23 + $0x538] sm:$0xff] }
 0x146   : > { %v633_v54 = vld [vmem:[%s2055_s23 + $0xaf0] sm:$0xff]  ;;  %1225 = vmatpush.msrb.mxu0 %v565_v53  ;;  %v518_v52 = vld [vmem:[%s2055_s23 + $0x758] sm:$0xff] }
 0x147   : > { %v693_v55 = vld [vmem:[%s2055_s23 + $0xcd0] sm:$0xff]  ;;  %1244 = vmatpush.msrb.mxu1 %v633_v54  ;;  %v318_v53 = vld [vmem:[%s2055_s23 + $0x118] sm:$0xff] }
 0x148   : > { %v761_v56 = vld [vmem:[%s2055_s23 + $0xef0] sm:$0xff]  ;;  %1265 = vmatpush.msrb.mxu2 %v693_v55  ;;  %v386_v54 = vld [vmem:[%s2055_s23 + $0x338] sm:$0xff] }
 0x149   : > { %v561_v57 = vld [vmem:[%s2055_s23 + $0x8b0] sm:$0xff]  ;;  %1284 = vmatpush.msrb.mxu3 %v761_v56  ;;  %v446_v55 = vld [vmem:[%s2055_s23 + $0x518] sm:$0xff] }
 0x14a   : > { %v629_v58 = vld [vmem:[%s2055_s23 + $0xad0] sm:$0xff]  ;;  %1226 = vmatpush.msrb.mxu0 %v561_v57  ;;  %v514_v56 = vld [vmem:[%s2055_s23 + $0x738] sm:$0xff] }
 0x14b   : > { %v689_v59 = vld [vmem:[%s2055_s23 + $0xcb0] sm:$0xff]  ;;  %1245 = vmatpush.msrb.mxu1 %v629_v58  ;;  %v314_v57 = vld [vmem:[%s2055_s23 + $0xf8] sm:$0xff] }
 0x14c   : > { %v757_v60 = vld [vmem:[%s2055_s23 + $0xed0] sm:$0xff]  ;;  %1266 = vmatpush.msrb.mxu2 %v689_v59  ;;  %v382_v58 = vld [vmem:[%s2055_s23 + $0x318] sm:$0xff] }
 0x14d   : > { %v557_v62 = vld [vmem:[%s2055_s23 + $0x890] sm:$0xff]  ;;  %1285 = vmatpush.msrb.mxu3 %v757_v60  ;;  %v442_v59 = vld [vmem:[%s2055_s23 + $0x4f8] sm:$0xff] }
 0x14e   : > { %v625_v63 = vld [vmem:[%s2055_s23 + $0xab0] sm:$0xff]  ;;  %1227 = vmatpush.msrb.mxu0 %v557_v62  ;;  %v510_v60 = vld [vmem:[%s2055_s23 + $0x718] sm:$0xff] }
 0x14f   : > { %v685_v0 = vld [vmem:[%s2055_s23 + $0xc90] sm:$0xff]  ;;  %1246 = vmatpush.msrb.mxu1 %v625_v63  ;;  %v310_v62 = vld [vmem:[%s2055_s23 + $0xd8] sm:$0xff] }
 0x150   : > { %v753_v1 = vld [vmem:[%s2055_s23 + $0xeb0] sm:$0xff]  ;;  %1267 = vmatpush.msrb.mxu2 %v685_v0  ;;  %v378_v63 = vld [vmem:[%s2055_s23 + $0x2f8] sm:$0xff] }
 0x151   : > { %v553_v4 = vld [vmem:[%s2055_s23 + $0x870] sm:$0xff]  ;;  %1286 = vmatpush.msrb.mxu3 %v753_v1  ;;  %v438_v0 = vld [vmem:[%s2055_s23 + $0x4d8] sm:$0xff] }
 0x152   : > { %v621_v5 = vld [vmem:[%s2055_s23 + $0xa90] sm:$0xff]  ;;  %1228 = vmatpush.msrb.mxu0 %v553_v4  ;;  %v506_v1 = vld [vmem:[%s2055_s23 + $0x6f8] sm:$0xff] }
 0x153   : > { %v681_v6 = vld [vmem:[%s2055_s23 + $0xc70] sm:$0xff]  ;;  %1247 = vmatpush.msrb.mxu1 %v621_v5  ;;  %v306_v4 = vld [vmem:[%s2055_s23 + $0xb8] sm:$0xff] }
 0x154   : > { %v749_v7 = vld [vmem:[%s2055_s23 + $0xe90] sm:$0xff]  ;;  %1268 = vmatpush.msrb.mxu2 %v681_v6  ;;  %v374_v5 = vld [vmem:[%s2055_s23 + $0x2d8] sm:$0xff] }
 0x155   : > { %v549_v9 = vld [vmem:[%s2055_s23 + $0x850] sm:$0xff]  ;;  %1287 = vmatpush.msrb.mxu3 %v749_v7  ;;  %v434_v6 = vld [vmem:[%s2055_s23 + $0x4b8] sm:$0xff] }
 0x156   : > { %v617_v10 = vld [vmem:[%s2055_s23 + $0xa70] sm:$0xff]  ;;  %1229 = vmatpush.msrb.mxu0 %v549_v9  ;;  %v502_v7 = vld [vmem:[%s2055_s23 + $0x6d8] sm:$0xff] }
 0x157   : > { %v677_v11 = vld [vmem:[%s2055_s23 + $0xc50] sm:$0xff]  ;;  %1248 = vmatpush.msrb.mxu1 %v617_v10  ;;  %v302_v9 = vld [vmem:[%s2055_s23 + $0x98] sm:$0xff] }
 0x158   : > { %v745_v12 = vld [vmem:[%s2055_s23 + $0xe70] sm:$0xff]  ;;  %1269 = vmatpush.msrb.mxu2 %v677_v11  ;;  %v370_v10 = vld [vmem:[%s2055_s23 + $0x2b8] sm:$0xff] }
 0x159   : > { %v545_v61 = vld [vmem:[%s2055_s23 + $0x830] sm:$0xff]  ;;  %1288 = vmatpush.msrb.mxu3 %v745_v12  ;;  %v430_v11 = vld [vmem:[%s2055_s23 + $0x498] sm:$0xff] }
 0x15a   : > { %v613_v13 = vld [vmem:[%s2055_s23 + $0xa50] sm:$0xff]  ;;  %1230 = vmatpush.msrb.mxu0 %v545_v61  ;;  %v498_v12 = vld [vmem:[%s2055_s23 + $0x6b8] sm:$0xff] }
 0x15b   : > { %v673_v14 = vld [vmem:[%s2055_s23 + $0xc30] sm:$0xff]  ;;  %1249 = vmatpush.msrb.mxu1 %v613_v13  ;;  %v298_v61 = vld [vmem:[%s2055_s23 + $0x78] sm:$0xff] }
 0x15c   : > { %v741_v15 = vld [vmem:[%s2055_s23 + $0xe50] sm:$0xff]  ;;  %1270 = vmatpush.msrb.mxu2 %v673_v14  ;;  %v366_v13 = vld [vmem:[%s2055_s23 + $0x298] sm:$0xff] }
 0x15d   : > { %v541_v2 = vld [vmem:[%s2055_s23 + $0x810] sm:$0xff]  ;;  %1289 = vmatpush.msrb.mxu3 %v741_v15  ;;  %v426_v14 = vld [vmem:[%s2055_s23 + $0x478] sm:$0xff] }
 0x15e   : > { %v609_v16 = vld [vmem:[%s2055_s23 + $0xa30] sm:$0xff]  ;;  %1231 = vmatpush.msrb.mxu0 %v541_v2  ;;  %v494_v15 = vld [vmem:[%s2055_s23 + $0x698] sm:$0xff] }
 0x15f   : > { %v669_v3 = vld [vmem:[%s2055_s23 + $0xc10] sm:$0xff]  ;;  %1250 = vmatpush.msrb.mxu1 %v609_v16  ;;  %1232 = vmatmul.f32.vlgmr.msrb.gmra.mxu0 %v2533_v41  ;;  %v294_v2 = vld [vmem:[%s2055_s23 + $0x58] sm:$0xff] }
 0x160   : > { %v737_v18 = vld [vmem:[%s2055_s23 + $0xe30] sm:$0xff]  ;;  %1271 = vmatpush.msrb.mxu2 %v669_v3  ;;  %1296 = vmatpush.msra.mxu0 %v346_v20  ;;  %v362_v16 = vld [vmem:[%s2055_s23 + $0x278] sm:$0xff] }
 0x161   : > { %v605_v8 = vld [vmem:[%s2055_s23 + $0xa10] sm:$0xff]  ;;  %1290 = vmatpush.msrb.mxu3 %v737_v18  ;;  %1272 = vmatmul.f32.vlgmr.msrb.gmra.mxu2 %v2527_v37  ;;  %v422_v3 = vld [vmem:[%s2055_s23 + $0x458] sm:$0xff] }
 0x162   : > { %v733_v25 = vld [vmem:[%s2055_s23 + $0xe10] sm:$0xff]  ;;  %1336 = vmatpush.msra.mxu2 %v474_v21  ;;  %1251 = vmatpush.msrb.mxu1 %v605_v8  ;;  %v490_v18 = vld [vmem:[%s2055_s23 + $0x678] sm:$0xff] }
 0x163   : > { %v2509_v26 = vld.sshfl [vmem:[#allocation1 + $0x18] sm:$0xff pattern:$0x73625140]  ;;  %1291 = vmatpush.msrb.mxu3 %v733_v25  ;;  %1297 = vmatpush.msra.mxu0 %v342_v27  ;;  %v290_v20 = vld [vmem:[%s2055_s23 + $0x38] sm:$0xff] }
 0x164   : > { %1212 = vmatmul.f32.vlgmr.msra.gmra.mxu3 %v2509_v26  ;;  %1316 = vmatpush.msra.mxu1 %v410_v17  ;;  %v2537_v43 = vld.sshfl [vmem:[#allocation1 + $0x38] sm:$0xff pattern:$0x73625140]  ;;  %v358_v21 = vld [vmem:[%s2055_s23 + $0x258] sm:$0xff] }
 0x165   : > { %1337 = vmatpush.msra.mxu2 %v470_v29  ;;  %1356 = vmatpush.msra.mxu3 %v538_v30  ;;  %v418_v8 = vld [vmem:[%s2055_s23 + $0x438] sm:$0xff] }
 0x166   : > { %1298 = vmatpush.msra.mxu0 %v338_v22  ;;  %1317 = vmatpush.msra.mxu1 %v406_v32  ;;  %v486_v25 = vld [vmem:[%s2055_s23 + $0x658] sm:$0xff] }
 0x167   : > { %1338 = vmatpush.msra.mxu2 %v466_v23  ;;  %1357 = vmatpush.msra.mxu3 %v534_v33  ;;  %v286_v27 = vld [vmem:[%s2055_s23 + $0x18] sm:$0xff] }
 0x168   : > { %1299 = vmatpush.msra.mxu0 %v334_v34  ;;  %1318 = vmatpush.msra.mxu1 %v402_v35  ;;  %v354_v17 = vld [vmem:[%s2055_s23 + $0x238] sm:$0xff] }
 0x169   : > { %1339 = vmatpush.msra.mxu2 %v462_v36  ;;  %1358 = vmatpush.msra.mxu3 %v530_v28  ;;  %v414_v29 = vld [vmem:[%s2055_s23 + $0x418] sm:$0xff] }
 0x16a   : > { %1300 = vmatpush.msra.mxu0 %v330_v38  ;;  %1319 = vmatpush.msra.mxu1 %v398_v39  ;;  %v482_v30 = vld [vmem:[%s2055_s23 + $0x638] sm:$0xff] }
 0x16b   : > { %1340 = vmatpush.msra.mxu2 %v458_v40  ;;  %1359 = vmatpush.msra.mxu3 %v526_v42  ;;  %v602_v22 = vld [vmem:[%s2055_s23 + $0x9f8] sm:$0xff] }
 0x16c   : > { %1292 = vmatmul.f32.vlgmr.msrb.gmra.mxu3 %v2537_v43  ;;  %1252 = vmatmul.f32.vlgmr.msrb.gmra.mxu1 %v2544_v48  ;;  %v730_v32 = vld [vmem:[%s2055_s23 + $0xdf8] sm:$0xff] }
 0x16d   : > { %1301 = vmatpush.msra.mxu0 %v326_v44  ;;  %1320 = vmatpush.msra.mxu1 %v394_v45  ;;  %v350_v23 = vld [vmem:[%s2055_s23 + $0x218] sm:$0xff] }
 0x16e   : > { %1341 = vmatpush.msra.mxu2 %v454_v46  ;;  %1360 = vmatpush.msra.mxu3 %v522_v47  ;;  %v478_v33 = vld [vmem:[%s2055_s23 + $0x618] sm:$0xff] }
 0x16f   : > { %1302 = vmatpush.msra.mxu0 %v322_v49  ;;  %1321 = vmatpush.msra.mxu1 %v390_v50  ;;  %v598_v34 = vld [vmem:[%s2055_s23 + $0x9d8] sm:$0xff] }
 0x170   : > { %1342 = vmatpush.msra.mxu2 %v450_v51  ;;  %1361 = vmatpush.msra.mxu3 %v518_v52  ;;  %v666_v35 = vld [vmem:[%s2055_s23 + $0xbf8] sm:$0xff] }
 0x171   : > { %1303 = vmatpush.msra.mxu0 %v318_v53  ;;  %1322 = vmatpush.msra.mxu1 %v386_v54  ;;  %v726_v36 = vld [vmem:[%s2055_s23 + $0xdd8] sm:$0xff] }
 0x172   : > { %1343 = vmatpush.msra.mxu2 %v446_v55  ;;  %1362 = vmatpush.msra.mxu3 %v514_v56  ;;  %v794_v28 = vld [vmem:[%s2055_s23 + $0xff8] sm:$0xff] }
 0x173   : > { %1304 = vmatpush.msra.mxu0 %v314_v57  ;;  %1323 = vmatpush.msra.mxu1 %v382_v58  ;;  %v594_v38 = vld [vmem:[%s2055_s23 + $0x9b8] sm:$0xff] }
 0x174   : > { %1344 = vmatpush.msra.mxu2 %v442_v59  ;;  %1363 = vmatpush.msra.mxu3 %v510_v60  ;;  %v662_v39 = vld [vmem:[%s2055_s23 + $0xbd8] sm:$0xff] }
 0x175   : > { %1305 = vmatpush.msra.mxu0 %v310_v62  ;;  %1324 = vmatpush.msra.mxu1 %v378_v63  ;;  %v722_v40 = vld [vmem:[%s2055_s23 + $0xdb8] sm:$0xff] }
 0x176   : > { %1345 = vmatpush.msra.mxu2 %v438_v0  ;;  %1364 = vmatpush.msra.mxu3 %v506_v1  ;;  %v790_v42 = vld [vmem:[%s2055_s23 + $0xfd8] sm:$0xff] }
 0x177   : > { %1306 = vmatpush.msra.mxu0 %v306_v4  ;;  %1325 = vmatpush.msra.mxu1 %v374_v5  ;;  %v590_v44 = vld [vmem:[%s2055_s23 + $0x998] sm:$0xff] }
 0x178   : > { %1346 = vmatpush.msra.mxu2 %v434_v6  ;;  %1365 = vmatpush.msra.mxu3 %v502_v7  ;;  %v658_v45 = vld [vmem:[%s2055_s23 + $0xbb8] sm:$0xff] }
 0x179   : > { %1307 = vmatpush.msra.mxu0 %v302_v9  ;;  %1326 = vmatpush.msra.mxu1 %v370_v10  ;;  %v718_v46 = vld [vmem:[%s2055_s23 + $0xd98] sm:$0xff] }
 0x17a   : > { %1347 = vmatpush.msra.mxu2 %v430_v11  ;;  %1366 = vmatpush.msra.mxu3 %v498_v12  ;;  %v786_v47 = vld [vmem:[%s2055_s23 + $0xfb8] sm:$0xff] }
 0x17b   : > { %1308 = vmatpush.msra.mxu0 %v298_v61  ;;  %1327 = vmatpush.msra.mxu1 %v366_v13  ;;  %v586_v49 = vld [vmem:[%s2055_s23 + $0x978] sm:$0xff] }
 0x17c   : > { %1348 = vmatpush.msra.mxu2 %v426_v14  ;;  %1367 = vmatpush.msra.mxu3 %v494_v15  ;;  %v654_v50 = vld [vmem:[%s2055_s23 + $0xb98] sm:$0xff] }
 0x17d   : > { %1309 = vmatpush.msra.mxu0 %v294_v2  ;;  %1328 = vmatpush.msra.mxu1 %v362_v16  ;;  %v714_v51 = vld [vmem:[%s2055_s23 + $0xd78] sm:$0xff] }
 0x17e   : > { %1349 = vmatpush.msra.mxu2 %v422_v3  ;;  %1368 = vmatpush.msra.mxu3 %v490_v18  ;;  %v782_v52 = vld [vmem:[%s2055_s23 + $0xf98] sm:$0xff] }
 0x17f   : > { %1310 = vmatpush.msra.mxu0 %v290_v20  ;;  %1329 = vmatpush.msra.mxu1 %v358_v21  ;;  %v582_v53 = vld [vmem:[%s2055_s23 + $0x958] sm:$0xff] }
 0x180   : > { %1350 = vmatpush.msra.mxu2 %v418_v8  ;;  %1369 = vmatpush.msra.mxu3 %v486_v25  ;;  %v650_v54 = vld [vmem:[%s2055_s23 + $0xb78] sm:$0xff] }
 0x181   : > { %1311 = vmatpush.msra.mxu0 %v286_v27  ;;  %1330 = vmatpush.msra.mxu1 %v354_v17  ;;  %v710_v55 = vld [vmem:[%s2055_s23 + $0xd58] sm:$0xff] }
 0x182   : > { %1351 = vmatpush.msra.mxu2 %v414_v29  ;;  %1370 = vmatpush.msra.mxu3 %v482_v30  ;;  %v778_v56 = vld [vmem:[%s2055_s23 + $0xf78] sm:$0xff] }
 0x183   : > { %1376 = vmatpush.msrb.mxu0 %v602_v22  ;;  %1331 = vmatpush.msra.mxu1 %v350_v23  ;;  %v578_v57 = vld [vmem:[%s2055_s23 + $0x938] sm:$0xff] }
 0x184   : > { %1416 = vmatpush.msrb.mxu2 %v730_v32  ;;  %1371 = vmatpush.msra.mxu3 %v478_v33  ;;  %v646_v58 = vld [vmem:[%s2055_s23 + $0xb58] sm:$0xff] }
 0x185   : > { %1377 = vmatpush.msrb.mxu0 %v598_v34  ;;  %1396 = vmatpush.msrb.mxu1 %v666_v35  ;;  %v706_v59 = vld [vmem:[%s2055_s23 + $0xd38] sm:$0xff] }
 0x186   : > { %1417 = vmatpush.msrb.mxu2 %v726_v36  ;;  %1436 = vmatpush.msrb.mxu3 %v794_v28  ;;  %v774_v60 = vld [vmem:[%s2055_s23 + $0xf58] sm:$0xff]  ;;  %v833_v36 = vpop.f32.mrf.mxu0  ;;  %v853_v28 = vpop.f32.mrf.mxu1 }
 0x187   : > { %1378 = vmatpush.msrb.mxu0 %v594_v38  ;;  %1397 = vmatpush.msrb.mxu1 %v662_v39  ;;  %v574_v62 = vld [vmem:[%s2055_s23 + $0x918] sm:$0xff]  ;;  %v873_v38 = vpop.f32.mrf.mxu2  ;;  %v893_v39 = vpop.f32.mrf.mxu3 }
 0x188   : > { %1418 = vmatpush.msrb.mxu2 %v722_v40  ;;  %1437 = vmatpush.msrb.mxu3 %v790_v42  ;;  %v642_v63 = vld [vmem:[%s2055_s23 + $0xb38] sm:$0xff] }
 0x189   : > { %1379 = vmatpush.msrb.mxu0 %v590_v44  ;;  %1398 = vmatpush.msrb.mxu1 %v658_v45  ;;  %v702_v0 = vld [vmem:[%s2055_s23 + $0xd18] sm:$0xff] }
 0x18a   : > { %1419 = vmatpush.msrb.mxu2 %v718_v46  ;;  %1438 = vmatpush.msrb.mxu3 %v786_v47  ;;  %v770_v1 = vld [vmem:[%s2055_s23 + $0xf38] sm:$0xff] }
 0x18b   : > { %1380 = vmatpush.msrb.mxu0 %v586_v49  ;;  %1399 = vmatpush.msrb.mxu1 %v654_v50  ;;  %v570_v4 = vld [vmem:[%s2055_s23 + $0x8f8] sm:$0xff] }
 0x18c   : > { %1420 = vmatpush.msrb.mxu2 %v714_v51  ;;  %1439 = vmatpush.msrb.mxu3 %v782_v52  ;;  %v638_v5 = vld [vmem:[%s2055_s23 + $0xb18] sm:$0xff] }
 0x18d   : > { %1381 = vmatpush.msrb.mxu0 %v582_v53  ;;  %1400 = vmatpush.msrb.mxu1 %v650_v54  ;;  %v698_v6 = vld [vmem:[%s2055_s23 + $0xcf8] sm:$0xff] }
 0x18e   : > { %1421 = vmatpush.msrb.mxu2 %v710_v55  ;;  %1440 = vmatpush.msrb.mxu3 %v778_v56  ;;  %v766_v7 = vld [vmem:[%s2055_s23 + $0xf18] sm:$0xff]  ;;  %v913_v40 = vpop.f32.mrf.mxu0  ;;  %v933_v42 = vpop.f32.mrf.mxu1 }
 0x18f   : > { %1382 = vmatpush.msrb.mxu0 %v578_v57  ;;  %1401 = vmatpush.msrb.mxu1 %v646_v58  ;;  %v566_v9 = vld [vmem:[%s2055_s23 + $0x8d8] sm:$0xff]  ;;  %v953_v44 = vpop.f32.mrf.mxu2  ;;  %v973_v45 = vpop.f32.mrf.mxu3 }
 0x190   : > { %1422 = vmatpush.msrb.mxu2 %v706_v59  ;;  %1441 = vmatpush.msrb.mxu3 %v774_v60  ;;  %v634_v10 = vld [vmem:[%s2055_s23 + $0xaf8] sm:$0xff] }
 0x191   : > { %1383 = vmatpush.msrb.mxu0 %v574_v62  ;;  %1402 = vmatpush.msrb.mxu1 %v642_v63  ;;  %v694_v11 = vld [vmem:[%s2055_s23 + $0xcd8] sm:$0xff]  ;;  %v854_v62 = vadd.f32 %v853_v28, %v833_v36 }
 0x192   : > { %1423 = vmatpush.msrb.mxu2 %v702_v0  ;;  %1442 = vmatpush.msrb.mxu3 %v770_v1  ;;  %v762_v12 = vld [vmem:[%s2055_s23 + $0xef8] sm:$0xff] }
 0x193   : > { %1384 = vmatpush.msrb.mxu0 %v570_v4  ;;  %1403 = vmatpush.msrb.mxu1 %v638_v5  ;;  %v562_v61 = vld [vmem:[%s2055_s23 + $0x8b8] sm:$0xff]  ;;  %v874_v5 = vadd.f32 %v873_v38, %v854_v62 }
 0x194   : > { %1424 = vmatpush.msrb.mxu2 %v698_v6  ;;  %1443 = vmatpush.msrb.mxu3 %v766_v7  ;;  %v630_v13 = vld [vmem:[%s2055_s23 + $0xad8] sm:$0xff] }
 0x195   : > { %1385 = vmatpush.msrb.mxu0 %v566_v9  ;;  %1404 = vmatpush.msrb.mxu1 %v634_v10  ;;  %v690_v14 = vld [vmem:[%s2055_s23 + $0xcb8] sm:$0xff] }
 0x196   : > { %v758_v15 = vld [vmem:[%s2055_s23 + $0xed8] sm:$0xff]  ;;  %1425 = vmatpush.msrb.mxu2 %v694_v11  ;;  %1444 = vmatpush.msrb.mxu3 %v762_v12  ;;  %v993_v46 = vpop.f32.mrf.mxu0  ;;  %v1013_v47 = vpop.f32.mrf.mxu1  ;;  %v894_v12 = vadd.f32 %v893_v39, %v874_v5 }
 0x197   : > { %v558_v2 = vld [vmem:[%s2055_s23 + $0x898] sm:$0xff]  ;;  %1386 = vmatpush.msrb.mxu0 %v562_v61  ;;  %1405 = vmatpush.msrb.mxu1 %v630_v13  ;;  %v1033_v49 = vpop.f32.mrf.mxu2  ;;  %v1014_v55 = vadd.f32 %v1013_v47, %v993_v46 }
 0x198   : > { %v626_v16 = vld [vmem:[%s2055_s23 + $0xab8] sm:$0xff]  ;;  %1426 = vmatpush.msrb.mxu2 %v690_v14  ;;  %1445 = vmatpush.msrb.mxu3 %v758_v15 }
 0x199   : > { %v686_v3 = vld [vmem:[%s2055_s23 + $0xc98] sm:$0xff]  ;;  %1352 = vmatmul.f32.vlgmr.msra.gmra.mxu2 %v2499_v19  ;;  %1387 = vmatpush.msrb.mxu0 %v558_v2  ;;  %v1034_v58 = vadd.f32 %v1033_v49, %v1014_v55 }
 0x19a   : > { %v754_v18 = vld [vmem:[%s2055_s23 + $0xeb8] sm:$0xff]  ;;  %1406 = vmatpush.msrb.mxu1 %v626_v16  ;;  %1427 = vmatpush.msrb.mxu2 %v686_v3  ;;  %v914_v16 = vadd.f32 %v913_v40, %v894_v12 }
 0x19b   : > { %v554_v20 = vld [vmem:[%s2055_s23 + $0x878] sm:$0xff]  ;;  %1446 = vmatpush.msrb.mxu3 %v754_v18  ;;  %1312 = vmatmul.f32.vlgmr.msra.gmra.mxu0 %v2505_v24 }
 0x19c   : > { %v622_v21 = vld [vmem:[%s2055_s23 + $0xa98] sm:$0xff]  ;;  %1372 = vmatmul.f32.vlgmr.msra.gmra.mxu3 %v2509_v26  ;;  %1388 = vmatpush.msrb.mxu0 %v554_v20 }
 0x19d   : > { %v682_v8 = vld [vmem:[%s2055_s23 + $0xc78] sm:$0xff]  ;;  %1407 = vmatpush.msrb.mxu1 %v622_v21 }
 0x19e   : > { %v750_v25 = vld [vmem:[%s2055_s23 + $0xe98] sm:$0xff]  ;;  %1428 = vmatpush.msrb.mxu2 %v682_v8  ;;  %1332 = vmatmul.f32.vlgmr.msra.gmra.mxu1 %v2516_v31  ;;  %v1073_v50 = vpop.f32.mrf.mxu0 }
 0x19f   : > { %v550_v19 = vld [vmem:[%s2055_s23 + $0x858] sm:$0xff]  ;;  %1447 = vmatpush.msrb.mxu3 %v750_v25  ;;  %v1113_v51 = vpop.f32.mrf.mxu2  ;;  %v934_v25 = vadd.f32 %v933_v42, %v914_v16 }
 0x1a0   : > { %v618_v27 = vld [vmem:[%s2055_s23 + $0xa78] sm:$0xff]  ;;  %1389 = vmatpush.msrb.mxu0 %v550_v19 }
 0x1a1   : > { %v678_v17 = vld [vmem:[%s2055_s23 + $0xc58] sm:$0xff]  ;;  %1408 = vmatpush.msrb.mxu1 %v618_v27 }
 0x1a2   : > { %v746_v29 = vld [vmem:[%s2055_s23 + $0xe78] sm:$0xff]  ;;  %1429 = vmatpush.msrb.mxu2 %v678_v17 }
 0x1a3   : > { %v546_v24 = vld [vmem:[%s2055_s23 + $0x838] sm:$0xff]  ;;  %1448 = vmatpush.msrb.mxu3 %v746_v29 }
 0x1a4   : > { %v614_v30 = vld [vmem:[%s2055_s23 + $0xa58] sm:$0xff]  ;;  %1390 = vmatpush.msrb.mxu0 %v546_v24  ;;  %v954_v24 = vadd.f32 %v953_v44, %v934_v25 }
 0x1a5   : > { %v674_v26 = vld [vmem:[%s2055_s23 + $0xc38] sm:$0xff]  ;;  %1409 = vmatpush.msrb.mxu1 %v614_v30 }
 0x1a6   : > { %v742_v22 = vld [vmem:[%s2055_s23 + $0xe58] sm:$0xff]  ;;  %1430 = vmatpush.msrb.mxu2 %v674_v26 }
 0x1a7   : > { %v542_v32 = vld [vmem:[%s2055_s23 + $0x818] sm:$0xff]  ;;  %1449 = vmatpush.msrb.mxu3 %v742_v22 }
 0x1a8   : > { %v610_v23 = vld [vmem:[%s2055_s23 + $0xa38] sm:$0xff]  ;;  %1391 = vmatpush.msrb.mxu0 %v542_v32 }
 0x1a9   : > { %v670_v33 = vld [vmem:[%s2055_s23 + $0xc18] sm:$0xff]  ;;  %1410 = vmatpush.msrb.mxu1 %v610_v23  ;;  %1392 = vmatmul.f32.vlgmr.msrb.gmra.mxu0 %v2533_v41  ;;  %v1053_v41 = vpop.f32.mrf.mxu3 }
 0x1aa   : > { %v738_v34 = vld [vmem:[%s2055_s23 + $0xe38] sm:$0xff]  ;;  %1431 = vmatpush.msrb.mxu2 %v670_v33  ;;  %v1054_v0 = vadd.f32 %v1053_v41, %v1034_v58  ;;  %v974_v33 = vadd.f32 %v973_v45, %v954_v24 }
 0x1ab   : > { %v606_v31 = vld [vmem:[%s2055_s23 + $0xa18] sm:$0xff]  ;;  %1450 = vmatpush.msrb.mxu3 %v738_v34  ;;  %1432 = vmatmul.f32.vlgmr.msrb.gmra.mxu2 %v2527_v37  ;;  %v1093_v37 = vpop.f32.mrf.mxu1 }
 0x1ac   : > { %v734_v35 = vld [vmem:[%s2055_s23 + $0xe18] sm:$0xff]  ;;  %1411 = vmatpush.msrb.mxu1 %v606_v31  ;;  %v1074_v7 = vadd.f32 %v1073_v50, %v1054_v0 }
 0x1ad   : > { %1451 = vmatpush.msrb.mxu3 %v734_v35  ;;  %1412 = vmatmul.f32.vlgmr.msrb.gmra.mxu1 %v2544_v48  ;;  %v280_v35 = vld [vmem:[%s2079_s11] sm:$0xff] }
 0x1ae   : > { %1452 = vmatmul.f32.vlgmr.msrb.gmra.mxu3 %v2537_v43  ;;  %v1094_v14 = vadd.f32 %v1093_v37, %v1074_v7 }
 0x1b0   : > { %v1114_v20 = vadd.f32 %v1113_v51, %v1094_v14 }
 0x1b1   : > { %v1133_v52 = vpop.f32.mrf.mxu3  ;;  %v1153_v53 = vpop.f32.mrf.mxu0 }
 0x1b2   : > { %v1134_v27 = vadd.f32 %v1133_v52, %v1114_v20 }
 0x1b3   : > { %v1173_v48 = vpop.f32.mrf.mxu1 }
 0x1b4   : > { %v1174_v57 = vadd.f32 %v1173_v48, %v1153_v53  ;;  %v1460_v32 = vrot.slane %v1134_v27, 6 }
 0x1b6   : > { %v1193_v54 = vpop.f32.mrf.mxu2  ;;  %v1464_v36 = vsel %vm1463_vm0, %v974_v33, %v1460_v32 }
 0x1b7   : > { %v1194_v63 = vadd.f32 %v1193_v54, %v1174_v57 }
 0x1dc   : > { %v1233_v56 = vpop.f32.mrf.mxu0 }
 0x1e4   : > { %v1273_v60 = vpop.f32.mrf.mxu2 }
 0x1e7   : > { %v1213_v43 = vpop.f32.mrf.mxu3 }
 0x1e8   : > { %v1214_v6 = vadd.f32 %v1213_v43, %v1194_v63 }
 0x1e9   : > { %v1253_v59 = vpop.f32.mrf.mxu1 }
 0x1ea   : > { %v1234_v61 = vadd.f32 %v1233_v56, %v1214_v6 }
 0x1ec   : > { %v1254_v3 = vadd.f32 %v1253_v59, %v1234_v61 }
 0x1ee   : > { %v1274_v19 = vadd.f32 %v1273_v60, %v1254_v3 }
 0x1ef   : > { %v1293_v1 = vpop.f32.mrf.mxu3 }
 0x1f0   : > { %v1294_v30 = vadd.f32 %v1293_v1, %v1274_v19 }
 0x1f2   : > { %v1461_v34 = vrot.slane %v1294_v30, 4 }
 0x218   : > { %v1313_v4 = vpop.f32.mrf.mxu0 }
 0x21b   : > { %v1333_v9 = vpop.f32.mrf.mxu1 }
 0x21c   : > { %v1334_v10 = vadd.f32 %v1333_v9, %v1313_v4  ;;  %v1353_v11 = vpop.f32.mrf.mxu2 }
 0x21e   : > { %v1354_v13 = vadd.f32 %v1353_v11, %v1334_v10 }
 0x21f   : > { %v1373_v15 = vpop.f32.mrf.mxu3 }
 0x220   : > { %v1374_v2 = vadd.f32 %v1373_v15, %v1354_v13 }
 0x226   : > { %v1393_v18 = vpop.f32.mrf.mxu0 }
 0x227   : > { %v1394_v21 = vadd.f32 %v1393_v18, %v1374_v2 }
 0x22a   : > { %v1413_v8 = vpop.f32.mrf.mxu1 }
 0x22b   : > { %v1414_v17 = vadd.f32 %v1413_v8, %v1394_v21 }
 0x22e   : > { %v1433_v29 = vpop.f32.mrf.mxu2 }
 0x22f   : > { %v1434_v26 = vadd.f32 %v1433_v29, %v1414_v17 }
 0x231   : > { %v1453_v22 = vpop.f32.mrf.mxu3 }
 0x232   : > { %v1454_v23 = vadd.f32 %v1453_v22, %v1434_v26 }
 0x234   : > { %v1462_v31 = vrot.slane %v1454_v23, 2 }
 0x236   : > { %v1466_v28 = vsel %vm1465_vm1, %v1461_v34, %v1462_v31  ;;  %1475 = sbr.rel (%p1629_p9) target bundleno = 583 (0x247), region = 48 }
 0x237   : > { %v1468_v38 = vsel %vm1467_vm2, %v1464_v36, %v1466_v28 }
 0x238   : > { %v1470_v39 = vadd.f32 %v1468_v38, %v280_v35 }
 0x23a   : > { %1471 = vst [vmem:[%s2079_s11] sm:$0xff] %v1470_v39 }
 0x23b   : > { %v1477_v40 = vld [vmem:[%s226_s29] sm:$0xf] }
 0x23c   : > { %v1479_v42 = vperm.slane %v1477_v40, 0  ;;  %v1480_v44 = vperm.slane %v1477_v40, 1  ;;  %v1481_v45 = vperm.slane %v1477_v40, 2  ;;  %v1482_v46 = vperm.slane %v1477_v40, 3 }
 0x23e   : > { %v1483_v47 = vrot.slane %v1480_v44, 6  ;;  %v1484_v49 = vrot.slane %v1481_v45, 4  ;;  %v1485_v41 = vrot.slane %v1482_v46, 2 }
 0x240   : > { %v1486_v37 = vsel %vm1463_vm0, %v1479_v42, %v1483_v47  ;;  %v1487_v51 = vsel %vm1465_vm1, %v1484_v49, %v1485_v41 }
 0x241   : > { %v1476_v50 = vld [vmem:[%s2079_s11] sm:$0xff]  ;;  %v1488_v52 = vsel %vm1467_vm2, %v1486_v37, %v1487_v51 }
 0x242   : > { %v1490_v53 = vadd.f32 %v1488_v52, %v1476_v50 }
 0x244   : > { %v1491_v48 = vmax.f32 %v1490_v53, 0.0 }
 0x246   : > { %1492 = vst [vmem:[%s2079_s11] sm:$0xff] %v1491_v48 }
 0x247 PF: > { %s19_s22 = sadd.s32 1, %s1899_s22   ;;  %s2720_s18 = smov %s2036_s15 }
 0x248   : > { %p16_p10 = scmp.ge.s32.totalorder %s19_s22, 24   ;;  %s2721_s23 = sld [smem:[#allocation8_spill]] }
 0x249   : > { %s2722_s25 = sld [smem:[#allocation9_spill]]  ;;  %s2723_s12 = smov %s1863_s13 }
 0x24a   : > { %s2724_s13 = smov %s1867_s14  ;;  %s2725_s14 = smov %s2031_s10 }
 0x24b   : > { %s2726_s15 = smov %s1875_s16  ;;  %s2727_s16 = smov %s1879_s17 }
 0x24c   : > { %s2728_s17 = smov %s2720_s18  ;;  %s2729_s18 = smov %s1891_s20 }
 0x24d   : > { %s2730_s19 = smov %s1895_s21  ;;  %18 = sbr.rel (!%p16_p10) target bundleno = 11 (0xb), region = 97 }
 0x24e   : > { %s2731_s20 = smov %s2721_s23 }
 0x24f   : > { %s2732_s21 = smov %s2722_s25 }
 0x252   :  { %1515 = vsyncpa [#allocation3], 1 }
 0x253   :  { %1517 = vsyncpa [#allocation3 + $0x1], 1 }
 0x254   :  { %1518 = vsyncpa [#allocation5], 1 }
 0x255   :  { %1520 = vsyncpa [#allocation5 + $0x1], 1 }

// kernel: qnetwork_forward.5
= control target key start
LH: loop header
LB: loop body
LE: loop exit
PB: predicated region body
PF: predicated region fallthrough
CT: control target
= control target key end

     0   :  { %s3805_s0 = inlined_call_operand.vmem [shape: f32[2,1024], index: 0, kind: input, shape index: {}]   ;;  %s3806_s1 = inlined_call_operand.vmem [shape: f32[2,128], index: 1, kind: input, shape index: {}]   ;;  %s3807_s2 = inlined_call_operand.vmem [shape: f32[2,128], index: 2, kind: input, shape index: {}]   ;;  %s3808_s3 = inlined_call_operand.vmem [shape: f32[2,384], index: 3, kind: input, shape index: {}]   ;;  %s3809_s4 = inlined_call_operand.vmem [shape: f32[2,128], index: 4, kind: input, shape index: {}]   ;;  %s3810_s5 = inlined_call_operand.hbm [shape: f32[1024,512], index: 5, kind: input, shape index: {}]   ;;  %s3811_s6 = inlined_call_operand.hbm [shape: f32[1,512], index: 6, kind: input, shape index: {}]   ;;  %s3812_s7 = inlined_call_operand.hbm [shape: f32[512,256], index: 7, kind: input, shape index: {}]   ;;  %s3813_s8 = inlined_call_operand.hbm [shape: f32[1,256], index: 8, kind: input, shape index: {}]   ;;  %s3814_s9 = inlined_call_operand.hbm [shape: f32[256,128], index: 9, kind: input, shape index: {}]   ;;  %s3815_s10 = inlined_call_operand.hbm [shape: f32[1,128], index: 10, kind: input, shape index: {}]   ;;  %s3816_s11 = inlined_call_operand.vmem [shape: f32[128,64], index: 11, kind: input, shape index: {}]   ;;  %s3817_s12 = inlined_call_operand.hbm [shape: f32[1,64], index: 12, kind: input, shape index: {}]   ;;  %s3818_s13 = inlined_call_operand.vmem [shape: f32[128,64], index: 13, kind: input, shape index: {}]   ;;  %s3819_s14 = inlined_call_operand.hbm [shape: f32[1,64], index: 14, kind: input, shape index: {}]   ;;  %s3820_s15 = inlined_call_operand.vmem [shape: f32[384,64], index: 15, kind: input, shape index: {}]   ;;  %s3821_s16 = inlined_call_operand.hbm [shape: f32[1,64], index: 16, kind: input, shape index: {}]   ;;  %s3822_s17 = inlined_call_operand.vmem [shape: f32[128,64], index: 17, kind: input, shape index: {}]   ;;  %s3823_s18 = inlined_call_operand.hbm [shape: f32[1,64], index: 18, kind: input, shape index: {}]   ;;  %s3824_s19 = inlined_call_operand.hbm [shape: f32[128,256], index: 19, kind: input, shape index: {}]   ;;  %s3825_s20 = inlined_call_operand.hbm [shape: f32[64,256], index: 20, kind: input, shape index: {}]   ;;  %s3826_s21 = inlined_call_operand.hbm [shape: f32[64,256], index: 21, kind: input, shape index: {}]   ;;  %s3827_s22 = inlined_call_operand.hbm [shape: f32[64,256], index: 22, kind: input, shape index: {}]   ;;  %s3828_s23 = inlined_call_operand.hbm [shape: f32[64,256], index: 23, kind: input, shape index: {}]   ;;  %s3829_s24 = inlined_call_operand.hbm [shape: f32[1,256], index: 24, kind: input, shape index: {}]   ;;  %s3830_s25 = inlined_call_operand.vmem [shape: f32[256,80], index: 25, kind: input, shape index: {}]   ;;  %s3831_s26 = inlined_call_operand.hbm [shape: f32[1,80], index: 26, kind: input, shape index: {}]   ;;  %s3832_s27 = inlined_call_operand.hbm [shape: f32[2,80], index: 27, kind: output, shape index: {}]  }
   0x1   :  { %3836 = sst [smem:[#allocation40_spill]] %s3805_s0 }
   0x2   :  { %3837 = sst [smem:[#allocation41_spill]] %s3806_s1 }
   0x3   :  { %3838 = sst [smem:[#allocation42_spill]] %s3807_s2 }
   0x4   :  { %3839 = sst [smem:[#allocation43_spill]] %s3808_s3 }
   0x5   :  { %3840 = sst [smem:[#allocation44_spill]] %s3809_s4 }
   0x6   :  { %3841 = sst [smem:[#allocation45_spill]] %s3810_s5 }
   0x7   :  { %3842 = sst [smem:[#allocation46_spill]] %s3811_s6 }
   0x8   :  { %3843 = sst [smem:[#allocation47_spill]] %s3812_s7 }
   0x9   :  { %3844 = sst [smem:[#allocation48_spill]] %s3813_s8 }
   0xa   :  { %3845 = sst [smem:[#allocation49_spill]] %s3814_s9 }
   0xb   :  { %3846 = sst [smem:[#allocation50_spill]] %s3815_s10 }
   0xc   :  { %3847 = sst [smem:[#allocation51_spill]] %s3816_s11 }
   0xd   :  { %3848 = sst [smem:[#allocation52_spill]] %s3830_s25 }
   0xe   :  { %3849 = sst [smem:[#allocation53_spill]] %s3832_s27 }
   0xf   :  { %32 = vsyncpa [#allocation3], 0 }
  0x10   :  { %33 = vsyncpa [#allocation6], 0 }
  0x11   :  { %34 = vsyncpa [#allocation9], 0 }
  0x12   :  { %35 = vsyncpa [#allocation12], 0 }
  0x13   :  { %36 = vsyncpa [#allocation15], 0 }
  0x14   :  { %37 = vsyncpa [#allocation18], 0 }
  0x15   :  { %38 = vsyncpa [#allocation21], 0 }
  0x16   :  { %39 = vsyncpa [#allocation24], 0 }
  0x17   :  { %40 = vsyncpa [#allocation27], 0  ;;  %s3850_s8 = sld [smem:[#allocation46_spill]] }
  0x1d   :  { %s70_s30 = sshll.u32 %s3850_s8, 4  ;;  %s71_s30 = int_to_ptr.hbm [resolvable:$true] %s70_s30 }
  0x1e   :  { %41 = vsyncpa [#allocation4], 0  ;;  %s3065_s9 = smov [#allocation5]   ;;  %s3851_s10 = sld [smem:[#allocation48_spill]] }
  0x1f   :  { %s72_s5 = sshll.u32 %s3065_s9, 4  ;;  %s3066_s1 = smov [#allocation8]   ;;  %s73_s5 = int_to_ptr.vmem [resolvable:$true] %s72_s5 }
  0x20   :  { %75 = dma.hbm_to_vmem [thread:$0]  %s71_s30, 64, %s73_s5, [#allocation6]  }
  0x21   :  { %s96_s6 = sshll.u32 %s3066_s1, 4  ;;  %s3852_s3 = sld [smem:[#allocation50_spill]]  ;;  %s97_s6 = int_to_ptr.vmem [resolvable:$true] %s96_s6 }
  0x22   :  { %s144_s8 = sshll.u32 %s3819_s14, 4  ;;  %s3067_s9 = smov [#allocation11]   ;;  %s145_s8 = int_to_ptr.hbm [resolvable:$true] %s144_s8 }
  0x23   :  { %s120_s25 = sshll.u32 %s3067_s9, 4  ;;  %s3068_s30 = smov [#allocation14]   ;;  %s121_s25 = int_to_ptr.vmem [resolvable:$true] %s120_s25 }
  0x24   :  { %s94_s29 = sshll.u32 %s3851_s10, 4  ;;  %s146_s5 = sshll.u32 %s3068_s30, 4  ;;  %s95_s29 = int_to_ptr.hbm [resolvable:$true] %s94_s29  ;;  %s147_s5 = int_to_ptr.vmem [resolvable:$true] %s146_s5 }
  0x25   :  { %99 = dma.hbm_to_vmem [thread:$0]  %s95_s29, 32, %s97_s6, [#allocation9]  }
  0x26   :  { %s170_s10 = sshll.u32 %s3823_s18, 4  ;;  %s3069_s1 = smov [#allocation17]   ;;  %s171_s10 = int_to_ptr.hbm [resolvable:$true] %s170_s10 }
  0x27   :  { %s118_s27 = sshll.u32 %s3852_s3, 4  ;;  %s172_s29 = sshll.u32 %s3069_s1, 4  ;;  %s119_s27 = int_to_ptr.hbm [resolvable:$true] %s118_s27  ;;  %s173_s29 = int_to_ptr.vmem [resolvable:$true] %s172_s29 }
  0x28   :  { %123 = dma.hbm_to_vmem [thread:$0]  %s119_s27, 16, %s121_s25, [#allocation12]  }
  0x29   :  { %149 = dma.hbm_to_vmem [thread:$0]  %s145_s8, 16, %s147_s5, [#allocation15]  }
  0x2a   :  { %s193_s14 = sshll.u32 %s3825_s20, 4  ;;  %s3070_s2 = smov [#allocation20]   ;;  %s194_s14 = int_to_ptr.hbm [resolvable:$true] %s193_s14 }
  0x2b   :  { %175 = dma.hbm_to_vmem [thread:$0]  %s171_s10, 16, %s173_s29, [#allocation18]  }
  0x2c   :  { %s195_s25 = sshll.u32 %s3070_s2, 4  ;;  %s219_s7 = sshll.u32 %s3827_s22, 4  ;;  %s196_s25 = int_to_ptr.vmem [resolvable:$true] %s195_s25  ;;  %s220_s7 = int_to_ptr.hbm [resolvable:$true] %s219_s7 }
  0x2d   :  { %s3071_s18 = smov 256   ;;  %s3072_s4 = smov 16  }
  0x2e   :  { %201 = dma.hbm_to_vmem [thread:$0]  %s194_s14, 2048, %s196_s25, [#allocation21], %s3071_s18, %s3071_s18, %s3072_s4  }
  0x2f   :  { %s246_s20 = sshll.u32 %s3829_s24, 4  ;;  %s3073_s30 = smov [#allocation23]   ;;  %s247_s20 = int_to_ptr.hbm [resolvable:$true] %s246_s20 }
  0x30   :  { %s221_s5 = sshll.u32 %s3073_s30, 4  ;;  %s3074_s22 = smov [#allocation26]   ;;  %s222_s5 = int_to_ptr.vmem [resolvable:$true] %s221_s5 }
  0x31   :  { %227 = dma.hbm_to_vmem [thread:$0]  %s220_s7, 2048, %s222_s5, [#allocation24], %s3071_s18, %s3071_s18, %s3072_s4  }
  0x32   :  { %s248_s28 = sshll.u32 %s3074_s22, 4  ;;  %s3853_s1 = sld [smem:[#allocation45_spill]]  ;;  %s249_s28 = int_to_ptr.vmem [resolvable:$true] %s248_s28 }
  0x33   :  { %251 = dma.hbm_to_vmem [thread:$0]  %s247_s20, 32, %s249_s28, [#allocation27]  }
  0x34   :  { %s3075_s6 = smov [#allocation2]   ;;  %s3854_s2 = sld [smem:[#allocation47_spill]] }
  0x35   :  { %s58_s11 = sshll.u32 %s3075_s6, 4  ;;  %s3076_s27 = smov 512   ;;  %s59_s11 = int_to_ptr.vmem [resolvable:$true] %s58_s11 }
  0x36   :  { %s3077_s3 = smov 32   ;;  %s3078_s7 = smov [#allocation7]  }
  0x37   :  { %s82_s8 = sshll.u32 %s3078_s7, 4  ;;  %s3855_s5 = sld [smem:[#allocation49_spill]]  ;;  %s83_s8 = int_to_ptr.vmem [resolvable:$true] %s82_s8 }
  0x38   :  { %s56_s29 = sshll.u32 %s3853_s1, 4  ;;  %s3079_s20 = smov [#allocation10]   ;;  %s57_s29 = int_to_ptr.hbm [resolvable:$true] %s56_s29 }
  0x39   :  { %64 = dma.hbm_to_vmem [thread:$0]  %s57_s29, 65536, %s59_s11, [#allocation3], %s3076_s27, %s3076_s27, %s3077_s3  }
  0x3a   :  { %s80_s25 = sshll.u32 %s3854_s2, 4  ;;  %s106_s28 = sshll.u32 %s3079_s20, 4  ;;  %s81_s25 = int_to_ptr.hbm [resolvable:$true] %s80_s25  ;;  %s107_s28 = int_to_ptr.vmem [resolvable:$true] %s106_s28 }
  0x3b   :  { %88 = dma.hbm_to_vmem [thread:$0]  %s81_s25, 16384, %s83_s8, [#allocation6], %s3071_s18, %s3071_s18, %s3072_s4  }
  0x3c   :  { %s131_s1 = sshll.u32 %s3817_s12, 4  ;;  %s3080_s29 = smov 128   ;;  %s132_s1 = int_to_ptr.hbm [resolvable:$true] %s131_s1 }
  0x3d   :  { %s104_s22 = sshll.u32 %s3855_s5, 4  ;;  %s3081_s6 = smov 8   ;;  %s105_s22 = int_to_ptr.hbm [resolvable:$true] %s104_s22 }
  0x3e   :  { %112 = dma.hbm_to_vmem [thread:$0]  %s105_s22, 4096, %s107_s28, [#allocation9], %s3080_s29, %s3080_s29, %s3081_s6  }
  0x3f   :  { %s3082_s11 = smov [#allocation13]   ;;  %s157_s27 = sshll.u32 %s3821_s16, 4  ;;  %s158_s27 = int_to_ptr.hbm [resolvable:$true] %s157_s27 }
  0x40   :  { %s133_s24 = sshll.u32 %s3082_s11, 4  ;;  %s180_s7 = sshll.u32 %s3824_s19, 4  ;;  %s134_s24 = int_to_ptr.vmem [resolvable:$true] %s133_s24  ;;  %s181_s7 = int_to_ptr.hbm [resolvable:$true] %s180_s7 }
  0x41   :  { %136 = dma.hbm_to_vmem [thread:$0]  %s132_s1, 16, %s134_s24, [#allocation12]  }
  0x42   :  { %s3083_s8 = smov [#allocation16]   ;;  %s3084_s12 = smov [#allocation19]  }
  0x43   :  { %s159_s9 = sshll.u32 %s3083_s8, 4  ;;  %s182_s30 = sshll.u32 %s3084_s12, 4  ;;  %s160_s9 = int_to_ptr.vmem [resolvable:$true] %s159_s9  ;;  %s183_s30 = int_to_ptr.vmem [resolvable:$true] %s182_s30 }
  0x44   :  { %162 = dma.hbm_to_vmem [thread:$0]  %s158_s27, 16, %s160_s9, [#allocation15]  }
  0x45   :  { %s206_s20 = sshll.u32 %s3826_s21, 4  ;;  %s232_s19 = sshll.u32 %s3828_s23, 4  ;;  %s207_s20 = int_to_ptr.hbm [resolvable:$true] %s206_s20  ;;  %s233_s19 = int_to_ptr.hbm [resolvable:$true] %s232_s19 }
  0x46   :  { %188 = dma.hbm_to_vmem [thread:$0]  %s181_s7, 4096, %s183_s30, [#allocation18], %s3071_s18, %s3071_s18, %s3072_s4  }
  0x47   :  { %s3085_s0 = smov [#allocation22]   ;;  %s3086_s1 = smov [#allocation25]  }
  0x48   :  { %s208_s10 = sshll.u32 %s3085_s0, 4  ;;  %s234_s21 = sshll.u32 %s3086_s1, 4  ;;  %s209_s10 = int_to_ptr.vmem [resolvable:$true] %s208_s10  ;;  %s235_s21 = int_to_ptr.vmem [resolvable:$true] %s234_s21 }
  0x49   :  { %214 = dma.hbm_to_vmem [thread:$0]  %s207_s20, 2048, %s209_s10, [#allocation21], %s3071_s18, %s3071_s18, %s3072_s4  }
  0x4a   :  { %s259_s11 = sshll.u32 %s3831_s26, 4  ;;  %s3087_s23 = smov [#allocation28]   ;;  %s260_s11 = int_to_ptr.hbm [resolvable:$true] %s259_s11 }
  0x4b   :  { %240 = dma.hbm_to_vmem [thread:$0]  %s233_s19, 2048, %s235_s21, [#allocation24], %s3071_s18, %s3071_s18, %s3072_s4  }
  0x4c   :  { %s261_s24 = sshll.u32 %s3087_s23, 4  ;;  %s262_s24 = int_to_ptr.vmem [resolvable:$true] %s261_s24 }
  0x4d   :  { %264 = dma.hbm_to_vmem [thread:$0]  %s260_s11, 16, %s262_s24, [#allocation27]  }
  0x4e   :  { %3045 = dma.done.wait [#allocation3], 65536  }
  0x4f   :  { %3046 = vsyncadd [#allocation3], 4294901760 }
  0x50   :  { %3047 = dma.done.wait [#allocation6], 16448  }
  0x51   :  { %3048 = vsyncadd [#allocation6], 4294950848 }
  0x52   :  { %3049 = dma.done.wait [#allocation9], 4128  }
  0x53   :  { %3050 = vsyncadd [#allocation9], 4294963168 }
  0x54   :  { %3051 = dma.done.wait [#allocation12], 32  }
  0x55   :  { %3052 = vsyncadd [#allocation12], 4294967264 }
  0x56   :  { %3053 = dma.done.wait [#allocation15], 32  }
  0x57   :  { %3054 = vsyncadd [#allocation15], 4294967264 }
  0x58   :  { %3055 = dma.done.wait [#allocation18], 4112  }
  0x59   :  { %3056 = vsyncadd [#allocation18], 4294963184 }
  0x5a   :  { %3057 = dma.done.wait [#allocation21], 4096  }
  0x5b   :  { %3058 = vsyncadd [#allocation21], 4294963200 }
  0x5c   :  { %3059 = dma.done.wait [#allocation24], 4096  }
  0x5d   :  { %3060 = vsyncadd [#allocation24], 4294963200 }
  0x5e   :  { %3061 = dma.done.wait [#allocation27], 48  }
  0x5f   :  { %3062 = vsyncadd [#allocation27], 4294967248  ;;  %v395_v0 = vld [vmem:[#allocation2 + $0x1e0] sm:$0xff]  ;;  %s3856_s4 = sld [smem:[#allocation40_spill]]  ;;  %vm2191_vm0 = vcmask 523264   ;;  %vm2544_vm1 = vcmask 648192  }
  0x60   :  { %v459_v1 = vld [vmem:[#allocation2 + $0x3e0] sm:$0xff]  ;;  %878 = vmatpush.msra.mxu0 %v395_v0  ;;  %s3857_s3 = sld [smem:[#allocation43_spill]] }
  0x61   :  { %v523_v2 = vld [vmem:[#allocation2 + $0x5e0] sm:$0xff]  ;;  %898 = vmatpush.msra.mxu1 %v459_v1  ;;  %s3858_s9 = sld [smem:[#allocation51_spill]] }
  0x62   :  { %v391_v3 = vld [vmem:[#allocation2 + $0x1c0] sm:$0xff]  ;;  %918 = vmatpush.msra.mxu2 %v523_v2  ;;  %s3859_s5 = sld [smem:[#allocation41_spill]] }
  0x63   :  { %v455_v4 = vld [vmem:[#allocation2 + $0x3c0] sm:$0xff]  ;;  %879 = vmatpush.msra.mxu0 %v391_v3  ;;  %s3860_s11 = sld [smem:[#allocation42_spill]] }
  0x64   :  { %v519_v5 = vld [vmem:[#allocation2 + $0x5c0] sm:$0xff]  ;;  %899 = vmatpush.msra.mxu1 %v455_v4  ;;  %s3861_s14 = sld [smem:[#allocation44_spill]] }
  0x65   :  { %v587_v6 = vld [vmem:[#allocation2 + $0x7e0] sm:$0xff]  ;;  %919 = vmatpush.msra.mxu2 %v519_v5  ;;  %s3862_s12 = sld [smem:[#allocation52_spill]] }
  0x66   :  { %v387_v7 = vld [vmem:[#allocation2 + $0x1a0] sm:$0xff]  ;;  %938 = vmatpush.msra.mxu3 %v587_v6  ;;  %s3863_s28 = sld [smem:[#allocation53_spill]] }
  0x67   :  { %v451_v8 = vld [vmem:[#allocation2 + $0x3a0] sm:$0xff]  ;;  %880 = vmatpush.msra.mxu0 %v387_v7 }
  0x68   :  { %v515_v9 = vld [vmem:[#allocation2 + $0x5a0] sm:$0xff]  ;;  %900 = vmatpush.msra.mxu1 %v451_v8 }
  0x69   :  { %v583_v10 = vld [vmem:[#allocation2 + $0x7c0] sm:$0xff]  ;;  %920 = vmatpush.msra.mxu2 %v515_v9 }
  0x6a   :  { %v383_v11 = vld [vmem:[#allocation2 + $0x180] sm:$0xff]  ;;  %939 = vmatpush.msra.mxu3 %v583_v10 }
  0x6b   :  { %v447_v12 = vld [vmem:[#allocation2 + $0x380] sm:$0xff]  ;;  %881 = vmatpush.msra.mxu0 %v383_v11 }
  0x6c   :  { %v511_v13 = vld [vmem:[#allocation2 + $0x580] sm:$0xff]  ;;  %901 = vmatpush.msra.mxu1 %v447_v12  ;;  %s2553_s19 = sshll.u32 %s3863_s28, 4  ;;  %s2554_s19 = int_to_ptr.hbm [resolvable:$true] %s2553_s19 }
  0x6d   :  { %v579_v14 = vld [vmem:[#allocation2 + $0x7a0] sm:$0xff]  ;;  %921 = vmatpush.msra.mxu2 %v511_v13 }
  0x6e   :  { %v379_v15 = vld [vmem:[#allocation2 + $0x160] sm:$0xff]  ;;  %940 = vmatpush.msra.mxu3 %v579_v14 }
  0x6f   :  { %v443_v16 = vld [vmem:[#allocation2 + $0x360] sm:$0xff]  ;;  %882 = vmatpush.msra.mxu0 %v379_v15 }
  0x70   :  { %v507_v17 = vld [vmem:[#allocation2 + $0x560] sm:$0xff]  ;;  %902 = vmatpush.msra.mxu1 %v443_v16 }
  0x71   :  { %v575_v18 = vld [vmem:[#allocation2 + $0x780] sm:$0xff]  ;;  %922 = vmatpush.msra.mxu2 %v507_v17 }
  0x72   :  { %v375_v19 = vld [vmem:[#allocation2 + $0x140] sm:$0xff]  ;;  %941 = vmatpush.msra.mxu3 %v575_v18 }
  0x73   :  { %v439_v20 = vld [vmem:[#allocation2 + $0x340] sm:$0xff]  ;;  %883 = vmatpush.msra.mxu0 %v375_v19 }
  0x74   :  { %v503_v21 = vld [vmem:[#allocation2 + $0x540] sm:$0xff]  ;;  %903 = vmatpush.msra.mxu1 %v439_v20 }
  0x75   :  { %v571_v22 = vld [vmem:[#allocation2 + $0x760] sm:$0xff]  ;;  %923 = vmatpush.msra.mxu2 %v503_v21 }
  0x76   :  { %v371_v23 = vld [vmem:[#allocation2 + $0x120] sm:$0xff]  ;;  %942 = vmatpush.msra.mxu3 %v571_v22 }
  0x77   :  { %v435_v24 = vld [vmem:[#allocation2 + $0x320] sm:$0xff]  ;;  %884 = vmatpush.msra.mxu0 %v371_v23 }
  0x78   :  { %v499_v25 = vld [vmem:[#allocation2 + $0x520] sm:$0xff]  ;;  %904 = vmatpush.msra.mxu1 %v435_v24 }
  0x79   :  { %v567_v26 = vld [vmem:[#allocation2 + $0x740] sm:$0xff]  ;;  %924 = vmatpush.msra.mxu2 %v499_v25  ;;  %v333_v25 = vld [vmem:[%s3856_s4] sm:$0xff] }
  0x7a   :  { %v367_v27 = vld [vmem:[#allocation2 + $0x100] sm:$0xff]  ;;  %943 = vmatpush.msra.mxu3 %v567_v26  ;;  %859 = vst [vmem:[#allocation1] ss:$4 sm:$0xff] %v333_v25  ;;  %v508_v25 = vld [vmem:[#allocation2 + $0x568] sm:$0xff] }
  0x7b   :  { %v431_v28 = vld [vmem:[#allocation2 + $0x300] sm:$0xff]  ;;  %885 = vmatpush.msra.mxu0 %v367_v27 }
  0x7c   :  { %v495_v29 = vld [vmem:[#allocation2 + $0x500] sm:$0xff]  ;;  %905 = vmatpush.msra.mxu1 %v431_v28 }
  0x7d   :  { %v563_v30 = vld [vmem:[#allocation2 + $0x720] sm:$0xff]  ;;  %925 = vmatpush.msra.mxu2 %v495_v29 }
  0x7e   :  { %v363_v31 = vld [vmem:[#allocation2 + $0xe0] sm:$0xff]  ;;  %944 = vmatpush.msra.mxu3 %v563_v30 }
  0x7f   :  { %v427_v32 = vld [vmem:[#allocation2 + $0x2e0] sm:$0xff]  ;;  %886 = vmatpush.msra.mxu0 %v363_v31 }
  0x80   :  { %v491_v33 = vld [vmem:[#allocation2 + $0x4e0] sm:$0xff]  ;;  %906 = vmatpush.msra.mxu1 %v427_v32 }
  0x81   :  { %v559_v34 = vld [vmem:[#allocation2 + $0x700] sm:$0xff]  ;;  %926 = vmatpush.msra.mxu2 %v491_v33 }
  0x82   :  { %v359_v35 = vld [vmem:[#allocation2 + $0xc0] sm:$0xff]  ;;  %945 = vmatpush.msra.mxu3 %v559_v34 }
  0x83   :  { %v423_v36 = vld [vmem:[#allocation2 + $0x2c0] sm:$0xff]  ;;  %887 = vmatpush.msra.mxu0 %v359_v35 }
  0x84   :  { %v487_v37 = vld [vmem:[#allocation2 + $0x4c0] sm:$0xff]  ;;  %907 = vmatpush.msra.mxu1 %v423_v36 }
  0x85   :  { %v555_v38 = vld [vmem:[#allocation2 + $0x6e0] sm:$0xff]  ;;  %927 = vmatpush.msra.mxu2 %v487_v37 }
  0x86   :  { %v355_v39 = vld [vmem:[#allocation2 + $0xa0] sm:$0xff]  ;;  %946 = vmatpush.msra.mxu3 %v555_v38 }
  0x87   :  { %v419_v40 = vld [vmem:[#allocation2 + $0x2a0] sm:$0xff]  ;;  %888 = vmatpush.msra.mxu0 %v355_v39 }
  0x88   :  { %v483_v41 = vld [vmem:[#allocation2 + $0x4a0] sm:$0xff]  ;;  %908 = vmatpush.msra.mxu1 %v419_v40 }
  0x89   :  { %v551_v42 = vld [vmem:[#allocation2 + $0x6c0] sm:$0xff]  ;;  %928 = vmatpush.msra.mxu2 %v483_v41 }
  0x8a   :  { %v351_v43 = vld [vmem:[#allocation2 + $0x80] sm:$0xff]  ;;  %947 = vmatpush.msra.mxu3 %v551_v42 }
  0x8b   :  { %v415_v44 = vld [vmem:[#allocation2 + $0x280] sm:$0xff]  ;;  %889 = vmatpush.msra.mxu0 %v351_v43 }
  0x8c   :  { %v479_v45 = vld [vmem:[#allocation2 + $0x480] sm:$0xff]  ;;  %909 = vmatpush.msra.mxu1 %v415_v44 }
  0x8d   :  { %v547_v46 = vld [vmem:[#allocation2 + $0x6a0] sm:$0xff]  ;;  %929 = vmatpush.msra.mxu2 %v479_v45  ;;  %v1979_v45 = vld [vmem:[%s3857_s3] sm:$0x3f] }
  0x8e   :  { %v347_v47 = vld [vmem:[#allocation2 + $0x60] sm:$0xff]  ;;  %948 = vmatpush.msra.mxu3 %v547_v46  ;;  %v3307_v46 = vld.sshfl [vmem:[#allocation1] sm:$0xff pattern:$0x73625140] }
  0x8f   :  { %v411_v48 = vld [vmem:[#allocation2 + $0x260] sm:$0xff]  ;;  %890 = vmatpush.msra.mxu0 %v347_v47 }
  0x90   :  { %v475_v49 = vld [vmem:[#allocation2 + $0x460] sm:$0xff]  ;;  %910 = vmatpush.msra.mxu1 %v411_v48  ;;  %v3311_v48 = vld.sshfl [vmem:[#allocation1 + $0x10] sm:$0xff pattern:$0x73625140] }
  0x91   :  { %v543_v50 = vld [vmem:[#allocation2 + $0x680] sm:$0xff]  ;;  %930 = vmatpush.msra.mxu2 %v475_v49  ;;  %v3313_v49 = vld.sshfl [vmem:[#allocation1 + $0x18] sm:$0xff pattern:$0x73625140] }
  0x92   :  { %v343_v51 = vld [vmem:[#allocation2 + $0x40] sm:$0xff]  ;;  %949 = vmatpush.msra.mxu3 %v543_v50 }
  0x93   :  { %v407_v52 = vld [vmem:[#allocation2 + $0x240] sm:$0xff]  ;;  %891 = vmatpush.msra.mxu0 %v343_v51 }
  0x94   :  { %v471_v53 = vld [vmem:[#allocation2 + $0x440] sm:$0xff]  ;;  %911 = vmatpush.msra.mxu1 %v407_v52 }
  0x95   :  { %v539_v54 = vld [vmem:[#allocation2 + $0x660] sm:$0xff]  ;;  %931 = vmatpush.msra.mxu2 %v471_v53 }
  0x96   :  { %v339_v55 = vld [vmem:[#allocation2 + $0x20] sm:$0xff]  ;;  %950 = vmatpush.msra.mxu3 %v539_v54 }
  0x97   :  { %v403_v56 = vld [vmem:[#allocation2 + $0x220] sm:$0xff]  ;;  %892 = vmatpush.msra.mxu0 %v339_v55 }
  0x98   :  { %v467_v57 = vld [vmem:[#allocation2 + $0x420] sm:$0xff]  ;;  %912 = vmatpush.msra.mxu1 %v403_v56 }
  0x99   :  { %v535_v58 = vld [vmem:[#allocation2 + $0x640] sm:$0xff]  ;;  %932 = vmatpush.msra.mxu2 %v467_v57 }
  0x9a   :  { %v335_v59 = vld [vmem:[#allocation2] sm:$0xff]  ;;  %951 = vmatpush.msra.mxu3 %v535_v58 }
  0x9b   :  { %v399_v60 = vld [vmem:[#allocation2 + $0x200] sm:$0xff]  ;;  %893 = vmatpush.msra.mxu0 %v335_v59 }
  0x9c   :  { %v463_v61 = vld [vmem:[#allocation2 + $0x400] sm:$0xff]  ;;  %913 = vmatpush.msra.mxu1 %v399_v60  ;;  %894 = vmatmul.f32.vlgmr.msra.gmra.mxu0 %v3307_v46 }
  0x9d   :  { %v531_v62 = vld [vmem:[#allocation2 + $0x620] sm:$0xff]  ;;  %933 = vmatpush.msra.mxu2 %v463_v61 }
  0x9e   :  { %v651_v63 = vld [vmem:[#allocation2 + $0x9e0] sm:$0xff]  ;;  %952 = vmatpush.msra.mxu3 %v531_v62  ;;  %934 = vmatmul.f32.vlgmr.msra.gmra.mxu2 %v3311_v48 }
  0x9f   :  { %v715_v0 = vld [vmem:[#allocation2 + $0xbe0] sm:$0xff]  ;;  %958 = vmatpush.msrb.mxu0 %v651_v63 }
  0xa0   :  { %v779_v1 = vld [vmem:[#allocation2 + $0xde0] sm:$0xff]  ;;  %978 = vmatpush.msrb.mxu1 %v715_v0 }
  0xa1   :  { %v527_v2 = vld [vmem:[#allocation2 + $0x600] sm:$0xff]  ;;  %998 = vmatpush.msrb.mxu2 %v779_v1 }
  0xa2   :  { %v647_v3 = vld [vmem:[#allocation2 + $0x9c0] sm:$0xff]  ;;  %953 = vmatpush.msra.mxu3 %v527_v2 }
  0xa3   :  { %v711_v4 = vld [vmem:[#allocation2 + $0xbc0] sm:$0xff]  ;;  %959 = vmatpush.msrb.mxu0 %v647_v3  ;;  %954 = vmatmul.f32.vlgmr.msra.gmra.mxu3 %v3313_v49 }
  0xa4   :  { %v775_v5 = vld [vmem:[#allocation2 + $0xdc0] sm:$0xff]  ;;  %979 = vmatpush.msrb.mxu1 %v711_v4 }
  0xa5   :  { %v843_v6 = vld [vmem:[#allocation2 + $0xfe0] sm:$0xff]  ;;  %999 = vmatpush.msrb.mxu2 %v775_v5 }
  0xa6   :  { %v643_v7 = vld [vmem:[#allocation2 + $0x9a0] sm:$0xff]  ;;  %1018 = vmatpush.msrb.mxu3 %v843_v6  ;;  %v396_v6 = vld [vmem:[#allocation2 + $0x1e8] sm:$0xff] }
  0xa7   :  { %v707_v8 = vld [vmem:[#allocation2 + $0xba0] sm:$0xff]  ;;  %960 = vmatpush.msrb.mxu0 %v643_v7  ;;  %v460_v7 = vld [vmem:[#allocation2 + $0x3e8] sm:$0xff] }
  0xa8   :  { %v771_v9 = vld [vmem:[#allocation2 + $0xda0] sm:$0xff]  ;;  %980 = vmatpush.msrb.mxu1 %v707_v8  ;;  %v524_v8 = vld [vmem:[#allocation2 + $0x5e8] sm:$0xff] }
  0xa9   :  { %v839_v10 = vld [vmem:[#allocation2 + $0xfc0] sm:$0xff]  ;;  %1000 = vmatpush.msrb.mxu2 %v771_v9 }
  0xaa   :  { %v639_v11 = vld [vmem:[#allocation2 + $0x980] sm:$0xff]  ;;  %1019 = vmatpush.msrb.mxu3 %v839_v10  ;;  %v392_v10 = vld [vmem:[#allocation2 + $0x1c8] sm:$0xff] }
  0xab   :  { %v703_v12 = vld [vmem:[#allocation2 + $0xb80] sm:$0xff]  ;;  %961 = vmatpush.msrb.mxu0 %v639_v11  ;;  %v456_v11 = vld [vmem:[#allocation2 + $0x3c8] sm:$0xff] }
  0xac   :  { %v767_v13 = vld [vmem:[#allocation2 + $0xd80] sm:$0xff]  ;;  %981 = vmatpush.msrb.mxu1 %v703_v12  ;;  %v520_v12 = vld [vmem:[#allocation2 + $0x5c8] sm:$0xff] }
  0xad   :  { %v835_v14 = vld [vmem:[#allocation2 + $0xfa0] sm:$0xff]  ;;  %1001 = vmatpush.msrb.mxu2 %v767_v13  ;;  %v588_v13 = vld [vmem:[#allocation2 + $0x7e8] sm:$0xff] }
  0xae   :  { %v635_v15 = vld [vmem:[#allocation2 + $0x960] sm:$0xff]  ;;  %1020 = vmatpush.msrb.mxu3 %v835_v14  ;;  %v388_v14 = vld [vmem:[#allocation2 + $0x1a8] sm:$0xff] }
  0xaf   :  { %v699_v16 = vld [vmem:[#allocation2 + $0xb60] sm:$0xff]  ;;  %962 = vmatpush.msrb.mxu0 %v635_v15  ;;  %v452_v15 = vld [vmem:[#allocation2 + $0x3a8] sm:$0xff] }
  0xb0   :  { %v763_v17 = vld [vmem:[#allocation2 + $0xd60] sm:$0xff]  ;;  %982 = vmatpush.msrb.mxu1 %v699_v16  ;;  %v516_v16 = vld [vmem:[#allocation2 + $0x5a8] sm:$0xff] }
  0xb1   :  { %v831_v18 = vld [vmem:[#allocation2 + $0xf80] sm:$0xff]  ;;  %1002 = vmatpush.msrb.mxu2 %v763_v17  ;;  %v584_v17 = vld [vmem:[#allocation2 + $0x7c8] sm:$0xff] }
  0xb2   :  { %v631_v19 = vld [vmem:[#allocation2 + $0x940] sm:$0xff]  ;;  %1021 = vmatpush.msrb.mxu3 %v831_v18  ;;  %v384_v18 = vld [vmem:[#allocation2 + $0x188] sm:$0xff] }
  0xb3   :  { %v695_v20 = vld [vmem:[#allocation2 + $0xb40] sm:$0xff]  ;;  %963 = vmatpush.msrb.mxu0 %v631_v19  ;;  %v448_v19 = vld [vmem:[#allocation2 + $0x388] sm:$0xff] }
  0xb4   :  { %v759_v21 = vld [vmem:[#allocation2 + $0xd40] sm:$0xff]  ;;  %983 = vmatpush.msrb.mxu1 %v695_v20  ;;  %v512_v20 = vld [vmem:[#allocation2 + $0x588] sm:$0xff] }
  0xb5   :  { %v827_v22 = vld [vmem:[#allocation2 + $0xf60] sm:$0xff]  ;;  %1003 = vmatpush.msrb.mxu2 %v759_v21  ;;  %v580_v21 = vld [vmem:[#allocation2 + $0x7a8] sm:$0xff] }
  0xb6   :  { %v627_v23 = vld [vmem:[#allocation2 + $0x920] sm:$0xff]  ;;  %1022 = vmatpush.msrb.mxu3 %v827_v22 }
  0xb7   :  { %v691_v24 = vld [vmem:[#allocation2 + $0xb20] sm:$0xff]  ;;  %964 = vmatpush.msrb.mxu0 %v627_v23  ;;  %v380_v23 = vld [vmem:[#allocation2 + $0x168] sm:$0xff] }
  0xb8   :  { %v755_v26 = vld [vmem:[#allocation2 + $0xd20] sm:$0xff]  ;;  %984 = vmatpush.msrb.mxu1 %v691_v24  ;;  %v444_v24 = vld [vmem:[#allocation2 + $0x368] sm:$0xff] }
  0xb9   :  { %v823_v27 = vld [vmem:[#allocation2 + $0xf40] sm:$0xff]  ;;  %1004 = vmatpush.msrb.mxu2 %v755_v26 }
  0xba   :  { %v623_v28 = vld [vmem:[#allocation2 + $0x900] sm:$0xff]  ;;  %1023 = vmatpush.msrb.mxu3 %v823_v27  ;;  %v576_v27 = vld [vmem:[#allocation2 + $0x788] sm:$0xff] }
  0xbb   :  { %v687_v29 = vld [vmem:[#allocation2 + $0xb00] sm:$0xff]  ;;  %965 = vmatpush.msrb.mxu0 %v623_v28 }
  0xbc   :  { %v751_v30 = vld [vmem:[#allocation2 + $0xd00] sm:$0xff]  ;;  %985 = vmatpush.msrb.mxu1 %v687_v29  ;;  %v376_v29 = vld [vmem:[#allocation2 + $0x148] sm:$0xff] }
  0xbd   :  { %v819_v31 = vld [vmem:[#allocation2 + $0xf20] sm:$0xff]  ;;  %1005 = vmatpush.msrb.mxu2 %v751_v30  ;;  %v440_v30 = vld [vmem:[#allocation2 + $0x348] sm:$0xff] }
  0xbe   :  { %v619_v32 = vld [vmem:[#allocation2 + $0x8e0] sm:$0xff]  ;;  %1024 = vmatpush.msrb.mxu3 %v819_v31  ;;  %v504_v31 = vld [vmem:[#allocation2 + $0x548] sm:$0xff] }
  0xbf   :  { %v683_v33 = vld [vmem:[#allocation2 + $0xae0] sm:$0xff]  ;;  %966 = vmatpush.msrb.mxu0 %v619_v32  ;;  %v572_v32 = vld [vmem:[#allocation2 + $0x768] sm:$0xff] }
  0xc0   :  { %v747_v34 = vld [vmem:[#allocation2 + $0xce0] sm:$0xff]  ;;  %986 = vmatpush.msrb.mxu1 %v683_v33 }
  0xc1   :  { %v815_v35 = vld [vmem:[#allocation2 + $0xf00] sm:$0xff]  ;;  %1006 = vmatpush.msrb.mxu2 %v747_v34  ;;  %v372_v34 = vld [vmem:[#allocation2 + $0x128] sm:$0xff] }
  0xc2   :  { %v615_v36 = vld [vmem:[#allocation2 + $0x8c0] sm:$0xff]  ;;  %1025 = vmatpush.msrb.mxu3 %v815_v35  ;;  %v436_v35 = vld [vmem:[#allocation2 + $0x328] sm:$0xff] }
  0xc3   :  { %v679_v37 = vld [vmem:[#allocation2 + $0xac0] sm:$0xff]  ;;  %967 = vmatpush.msrb.mxu0 %v615_v36  ;;  %v500_v36 = vld [vmem:[#allocation2 + $0x528] sm:$0xff] }
  0xc4   :  { %v743_v38 = vld [vmem:[#allocation2 + $0xcc0] sm:$0xff]  ;;  %987 = vmatpush.msrb.mxu1 %v679_v37  ;;  %v568_v37 = vld [vmem:[#allocation2 + $0x748] sm:$0xff] }
  0xc5   :  { %v811_v39 = vld [vmem:[#allocation2 + $0xee0] sm:$0xff]  ;;  %1007 = vmatpush.msrb.mxu2 %v743_v38  ;;  %v368_v38 = vld [vmem:[#allocation2 + $0x108] sm:$0xff] }
  0xc6   :  { %v611_v40 = vld [vmem:[#allocation2 + $0x8a0] sm:$0xff]  ;;  %1026 = vmatpush.msrb.mxu3 %v811_v39  ;;  %v432_v39 = vld [vmem:[#allocation2 + $0x308] sm:$0xff] }
  0xc7   :  { %v675_v41 = vld [vmem:[#allocation2 + $0xaa0] sm:$0xff]  ;;  %968 = vmatpush.msrb.mxu0 %v611_v40  ;;  %v496_v40 = vld [vmem:[#allocation2 + $0x508] sm:$0xff] }
  0xc8   :  { %v334_v42 = vld [vmem:[%s3856_s4 + $0x8] sm:$0xff]  ;;  %988 = vmatpush.msrb.mxu1 %v675_v41  ;;  %v564_v41 = vld [vmem:[#allocation2 + $0x728] sm:$0xff] }
  0xc9   :  { %v739_v43 = vld [vmem:[#allocation2 + $0xca0] sm:$0xff]  ;;  %861 = vst [vmem:[#allocation1 + $0x20] ss:$4 sm:$0xff] %v334_v42  ;;  %v364_v42 = vld [vmem:[#allocation2 + $0xe8] sm:$0xff] }
  0xca   :  { %v807_v44 = vld [vmem:[#allocation2 + $0xec0] sm:$0xff]  ;;  %1008 = vmatpush.msrb.mxu2 %v739_v43  ;;  %v428_v43 = vld [vmem:[#allocation2 + $0x2e8] sm:$0xff] }
  0xcb   :  { %v3309_v47 = vld.sshfl [vmem:[#allocation1 + $0x8] sm:$0xff pattern:$0x73625140]  ;;  %1027 = vmatpush.msrb.mxu3 %v807_v44  ;;  %v492_v44 = vld [vmem:[#allocation2 + $0x4e8] sm:$0xff] }
  0xcc   :  { %v607_v50 = vld [vmem:[#allocation2 + $0x880] sm:$0xff]  ;;  %2033 = vst [vmem:[#allocation1] ss:$4 sm:$0xff] %v1979_v45  ;;  %914 = vmatmul.f32.vlgmr.msra.gmra.mxu1 %v3309_v47  ;;  %v560_v45 = vld [vmem:[#allocation2 + $0x708] sm:$0xff] }
  0xcd   :  { %v671_v51 = vld [vmem:[#allocation2 + $0xa80] sm:$0xff]  ;;  %969 = vmatpush.msrb.mxu0 %v607_v50  ;;  %v360_v50 = vld [vmem:[#allocation2 + $0xc8] sm:$0xff] }
  0xce   :  { %v735_v52 = vld [vmem:[#allocation2 + $0xc80] sm:$0xff]  ;;  %989 = vmatpush.msrb.mxu1 %v671_v51  ;;  %v424_v51 = vld [vmem:[#allocation2 + $0x2c8] sm:$0xff] }
  0xcf   :  { %v803_v53 = vld [vmem:[#allocation2 + $0xea0] sm:$0xff]  ;;  %1009 = vmatpush.msrb.mxu2 %v735_v52  ;;  %v488_v52 = vld [vmem:[#allocation2 + $0x4c8] sm:$0xff] }
  0xd0   :  { %v603_v54 = vld [vmem:[#allocation2 + $0x860] sm:$0xff]  ;;  %1028 = vmatpush.msrb.mxu3 %v803_v53  ;;  %v3319_v22 = vld.sshfl [vmem:[#allocation1 + $0x30] sm:$0xff pattern:$0x73625140] }
  0xd1   :  { %v667_v55 = vld [vmem:[#allocation2 + $0xa60] sm:$0xff]  ;;  %970 = vmatpush.msrb.mxu0 %v603_v54  ;;  %v3321_v26 = vld.sshfl [vmem:[#allocation1 + $0x20] sm:$0xff pattern:$0x73625140]  ;;  %v556_v53 = vld [vmem:[#allocation2 + $0x6e8] sm:$0xff] }
  0xd2   :  { %v731_v56 = vld [vmem:[#allocation2 + $0xc60] sm:$0xff]  ;;  %990 = vmatpush.msrb.mxu1 %v667_v55  ;;  %v3324_v28 = vld.sshfl [vmem:[#allocation1 + $0x38] sm:$0xff pattern:$0x73625140]  ;;  %v356_v54 = vld [vmem:[#allocation2 + $0xa8] sm:$0xff] }
  0xd3   :  { %v799_v57 = vld [vmem:[#allocation2 + $0xe80] sm:$0xff]  ;;  %1010 = vmatpush.msrb.mxu2 %v731_v56  ;;  %v420_v55 = vld [vmem:[#allocation2 + $0x2a8] sm:$0xff] }
  0xd4   :  { %v599_v58 = vld [vmem:[#allocation2 + $0x840] sm:$0xff]  ;;  %1029 = vmatpush.msrb.mxu3 %v799_v57  ;;  %v484_v56 = vld [vmem:[#allocation2 + $0x4a8] sm:$0xff] }
  0xd5   :  { %v663_v59 = vld [vmem:[#allocation2 + $0xa40] sm:$0xff]  ;;  %971 = vmatpush.msrb.mxu0 %v599_v58  ;;  %v552_v57 = vld [vmem:[#allocation2 + $0x6c8] sm:$0xff] }
  0xd6   :  { %v727_v60 = vld [vmem:[#allocation2 + $0xc40] sm:$0xff]  ;;  %991 = vmatpush.msrb.mxu1 %v663_v59  ;;  %v352_v58 = vld [vmem:[#allocation2 + $0x88] sm:$0xff] }
  0xd7   :  { %v795_v61 = vld [vmem:[#allocation2 + $0xe60] sm:$0xff]  ;;  %1011 = vmatpush.msrb.mxu2 %v727_v60  ;;  %v416_v59 = vld [vmem:[#allocation2 + $0x288] sm:$0xff] }
  0xd8   :  { %v595_v62 = vld [vmem:[#allocation2 + $0x820] sm:$0xff]  ;;  %1030 = vmatpush.msrb.mxu3 %v795_v61  ;;  %v480_v60 = vld [vmem:[#allocation2 + $0x488] sm:$0xff] }
  0xd9   :  { %v659_v63 = vld [vmem:[#allocation2 + $0xa20] sm:$0xff]  ;;  %972 = vmatpush.msrb.mxu0 %v595_v62  ;;  %v548_v61 = vld [vmem:[#allocation2 + $0x6a8] sm:$0xff] }
  0xda   :  { %v723_v0 = vld [vmem:[#allocation2 + $0xc20] sm:$0xff]  ;;  %992 = vmatpush.msrb.mxu1 %v659_v63  ;;  %v348_v62 = vld [vmem:[#allocation2 + $0x68] sm:$0xff] }
  0xdb   :  { %v791_v1 = vld [vmem:[#allocation2 + $0xe40] sm:$0xff]  ;;  %1012 = vmatpush.msrb.mxu2 %v723_v0  ;;  %v412_v63 = vld [vmem:[#allocation2 + $0x268] sm:$0xff] }
  0xdc   :  { %v591_v2 = vld [vmem:[#allocation2 + $0x800] sm:$0xff]  ;;  %1031 = vmatpush.msrb.mxu3 %v791_v1  ;;  %v476_v0 = vld [vmem:[#allocation2 + $0x468] sm:$0xff] }
  0xdd   :  { %v655_v3 = vld [vmem:[#allocation2 + $0xa00] sm:$0xff]  ;;  %973 = vmatpush.msrb.mxu0 %v591_v2  ;;  %v544_v1 = vld [vmem:[#allocation2 + $0x688] sm:$0xff] }
  0xde   :  { %v719_v4 = vld [vmem:[#allocation2 + $0xc00] sm:$0xff]  ;;  %993 = vmatpush.msrb.mxu1 %v655_v3  ;;  %974 = vmatmul.f32.vlgmr.msrb.gmra.mxu0 %v3321_v26  ;;  %v344_v2 = vld [vmem:[#allocation2 + $0x48] sm:$0xff] }
  0xdf   :  { %v787_v5 = vld [vmem:[#allocation2 + $0xe20] sm:$0xff]  ;;  %1013 = vmatpush.msrb.mxu2 %v719_v4  ;;  %1038 = vmatpush.msra.mxu0 %v396_v6  ;;  %v408_v3 = vld [vmem:[#allocation2 + $0x248] sm:$0xff] }
  0xe0   :  { %1032 = vmatpush.msrb.mxu3 %v787_v5  ;;  %v783_v9 = vld [vmem:[#allocation2 + $0xe00] sm:$0xff]  ;;  %1058 = vmatpush.msra.mxu1 %v460_v7  ;;  %v472_v4 = vld [vmem:[#allocation2 + $0x448] sm:$0xff] }
  0xe1   :  { %1078 = vmatpush.msra.mxu2 %v524_v8  ;;  %1039 = vmatpush.msra.mxu0 %v392_v10  ;;  %v3327_v33 = vld.sshfl [vmem:[#allocation1 + $0x28] sm:$0xff pattern:$0x73625140]  ;;  %v540_v5 = vld [vmem:[#allocation2 + $0x668] sm:$0xff] }
  0xe2   :  { %1033 = vmatpush.msrb.mxu3 %v783_v9  ;;  %1059 = vmatpush.msra.mxu1 %v456_v11  ;;  %v340_v6 = vld [vmem:[#allocation2 + $0x28] sm:$0xff] }
  0xe3   :  { %1079 = vmatpush.msra.mxu2 %v520_v12  ;;  %1040 = vmatpush.msra.mxu0 %v388_v14  ;;  %v404_v7 = vld [vmem:[#allocation2 + $0x228] sm:$0xff] }
  0xe4   :  { %1098 = vmatpush.msra.mxu3 %v588_v13  ;;  %1060 = vmatpush.msra.mxu1 %v452_v15  ;;  %v468_v8 = vld [vmem:[#allocation2 + $0x428] sm:$0xff] }
  0xe5   :  { %1080 = vmatpush.msra.mxu2 %v516_v16  ;;  %1041 = vmatpush.msra.mxu0 %v384_v18  ;;  %v536_v9 = vld [vmem:[#allocation2 + $0x648] sm:$0xff] }
  0xe6   :  { %1099 = vmatpush.msra.mxu3 %v584_v17  ;;  %1061 = vmatpush.msra.mxu1 %v448_v19  ;;  %v336_v10 = vld [vmem:[#allocation2 + $0x8] sm:$0xff] }
  0xe7   :  { %1081 = vmatpush.msra.mxu2 %v512_v20  ;;  %1042 = vmatpush.msra.mxu0 %v380_v23  ;;  %v400_v11 = vld [vmem:[#allocation2 + $0x208] sm:$0xff] }
  0xe8   :  { %1100 = vmatpush.msra.mxu3 %v580_v21  ;;  %1014 = vmatmul.f32.vlgmr.msrb.gmra.mxu2 %v3319_v22  ;;  %v464_v12 = vld [vmem:[#allocation2 + $0x408] sm:$0xff] }
  0xe9   :  { %1062 = vmatpush.msra.mxu1 %v444_v24  ;;  %1082 = vmatpush.msra.mxu2 %v508_v25  ;;  %v532_v13 = vld [vmem:[#allocation2 + $0x628] sm:$0xff] }
  0xea   :  { %1101 = vmatpush.msra.mxu3 %v576_v27  ;;  %1043 = vmatpush.msra.mxu0 %v376_v29  ;;  %v652_v14 = vld [vmem:[#allocation2 + $0x9e8] sm:$0xff] }
  0xeb   :  { %1034 = vmatmul.f32.vlgmr.msrb.gmra.mxu3 %v3324_v28  ;;  %1063 = vmatpush.msra.mxu1 %v440_v30  ;;  %v716_v15 = vld [vmem:[#allocation2 + $0xbe8] sm:$0xff] }
  0xec   :  { %1083 = vmatpush.msra.mxu2 %v504_v31  ;;  %1102 = vmatpush.msra.mxu3 %v572_v32  ;;  %v780_v16 = vld [vmem:[#allocation2 + $0xde8] sm:$0xff] }
  0xed   :  { %994 = vmatmul.f32.vlgmr.msrb.gmra.mxu1 %v3327_v33  ;;  %1044 = vmatpush.msra.mxu0 %v372_v34  ;;  %v528_v17 = vld [vmem:[#allocation2 + $0x608] sm:$0xff] }
  0xee   :  { %1064 = vmatpush.msra.mxu1 %v436_v35  ;;  %1084 = vmatpush.msra.mxu2 %v500_v36  ;;  %v648_v18 = vld [vmem:[#allocation2 + $0x9c8] sm:$0xff] }
  0xef   :  { %1103 = vmatpush.msra.mxu3 %v568_v37  ;;  %1045 = vmatpush.msra.mxu0 %v368_v38  ;;  %v712_v19 = vld [vmem:[#allocation2 + $0xbc8] sm:$0xff] }
  0xf0   :  { %1065 = vmatpush.msra.mxu1 %v432_v39  ;;  %1085 = vmatpush.msra.mxu2 %v496_v40  ;;  %v776_v20 = vld [vmem:[#allocation2 + $0xdc8] sm:$0xff] }
  0xf1   :  { %1104 = vmatpush.msra.mxu3 %v564_v41  ;;  %1046 = vmatpush.msra.mxu0 %v364_v42  ;;  %v844_v21 = vld [vmem:[#allocation2 + $0xfe8] sm:$0xff] }
  0xf2   :  { %1066 = vmatpush.msra.mxu1 %v428_v43  ;;  %1086 = vmatpush.msra.mxu2 %v492_v44  ;;  %v644_v23 = vld [vmem:[#allocation2 + $0x9a8] sm:$0xff] }
  0xf3   :  { %1105 = vmatpush.msra.mxu3 %v560_v45  ;;  %1047 = vmatpush.msra.mxu0 %v360_v50  ;;  %v708_v24 = vld [vmem:[#allocation2 + $0xba8] sm:$0xff] }
  0xf4   :  { %1067 = vmatpush.msra.mxu1 %v424_v51  ;;  %1087 = vmatpush.msra.mxu2 %v488_v52  ;;  %v772_v25 = vld [vmem:[#allocation2 + $0xda8] sm:$0xff] }
  0xf5   :  { %1106 = vmatpush.msra.mxu3 %v556_v53  ;;  %1048 = vmatpush.msra.mxu0 %v356_v54  ;;  %v840_v27 = vld [vmem:[#allocation2 + $0xfc8] sm:$0xff] }
  0xf6   :  { %1068 = vmatpush.msra.mxu1 %v420_v55  ;;  %1088 = vmatpush.msra.mxu2 %v484_v56  ;;  %v640_v29 = vld [vmem:[#allocation2 + $0x988] sm:$0xff] }
  0xf7   :  { %1107 = vmatpush.msra.mxu3 %v552_v57  ;;  %1049 = vmatpush.msra.mxu0 %v352_v58  ;;  %v704_v30 = vld [vmem:[#allocation2 + $0xb88] sm:$0xff] }
  0xf8   :  { %1069 = vmatpush.msra.mxu1 %v416_v59  ;;  %1089 = vmatpush.msra.mxu2 %v480_v60  ;;  %v768_v31 = vld [vmem:[#allocation2 + $0xd88] sm:$0xff] }
  0xf9   :  { %1108 = vmatpush.msra.mxu3 %v548_v61  ;;  %1050 = vmatpush.msra.mxu0 %v348_v62  ;;  %v836_v32 = vld [vmem:[#allocation2 + $0xfa8] sm:$0xff] }
  0xfa   :  { %1070 = vmatpush.msra.mxu1 %v412_v63  ;;  %1090 = vmatpush.msra.mxu2 %v476_v0  ;;  %v636_v34 = vld [vmem:[#allocation2 + $0x968] sm:$0xff] }
  0xfb   :  { %1109 = vmatpush.msra.mxu3 %v544_v1  ;;  %1051 = vmatpush.msra.mxu0 %v344_v2  ;;  %v700_v35 = vld [vmem:[#allocation2 + $0xb68] sm:$0xff] }
  0xfc   :  { %1071 = vmatpush.msra.mxu1 %v408_v3  ;;  %1091 = vmatpush.msra.mxu2 %v472_v4  ;;  %v764_v36 = vld [vmem:[#allocation2 + $0xd68] sm:$0xff] }
  0xfd   :  { %1110 = vmatpush.msra.mxu3 %v540_v5  ;;  %1052 = vmatpush.msra.mxu0 %v340_v6  ;;  %v832_v37 = vld [vmem:[#allocation2 + $0xf88] sm:$0xff] }
  0xfe   :  { %1072 = vmatpush.msra.mxu1 %v404_v7  ;;  %1092 = vmatpush.msra.mxu2 %v468_v8  ;;  %v632_v38 = vld [vmem:[#allocation2 + $0x948] sm:$0xff] }
  0xff   :  { %1111 = vmatpush.msra.mxu3 %v536_v9  ;;  %1053 = vmatpush.msra.mxu0 %v336_v10  ;;  %v696_v39 = vld [vmem:[#allocation2 + $0xb48] sm:$0xff] }
 0x100   :  { %1073 = vmatpush.msra.mxu1 %v400_v11  ;;  %1093 = vmatpush.msra.mxu2 %v464_v12  ;;  %v760_v40 = vld [vmem:[#allocation2 + $0xd48] sm:$0xff] }
 0x101   :  { %1112 = vmatpush.msra.mxu3 %v532_v13  ;;  %1118 = vmatpush.msrb.mxu0 %v652_v14  ;;  %v828_v41 = vld [vmem:[#allocation2 + $0xf68] sm:$0xff] }
 0x102   :  { %1138 = vmatpush.msrb.mxu1 %v716_v15  ;;  %1158 = vmatpush.msrb.mxu2 %v780_v16  ;;  %v628_v42 = vld [vmem:[#allocation2 + $0x928] sm:$0xff] }
 0x103   :  { %1113 = vmatpush.msra.mxu3 %v528_v17  ;;  %1119 = vmatpush.msrb.mxu0 %v648_v18  ;;  %v692_v43 = vld [vmem:[#allocation2 + $0xb28] sm:$0xff] }
 0x104   :  { %1139 = vmatpush.msrb.mxu1 %v712_v19  ;;  %1159 = vmatpush.msrb.mxu2 %v776_v20  ;;  %v756_v44 = vld [vmem:[#allocation2 + $0xd28] sm:$0xff] }
 0x105   :  { %1178 = vmatpush.msrb.mxu3 %v844_v21  ;;  %1120 = vmatpush.msrb.mxu0 %v644_v23  ;;  %v824_v45 = vld [vmem:[#allocation2 + $0xf48] sm:$0xff]  ;;  %v397_v23 = vld [vmem:[#allocation2 + $0x1f0] sm:$0xff] }
 0x106   :  { %1140 = vmatpush.msrb.mxu1 %v708_v24  ;;  %1160 = vmatpush.msrb.mxu2 %v772_v25  ;;  %v624_v50 = vld [vmem:[#allocation2 + $0x908] sm:$0xff]  ;;  %v461_v24 = vld [vmem:[#allocation2 + $0x3f0] sm:$0xff] }
 0x107   :  { %1179 = vmatpush.msrb.mxu3 %v840_v27  ;;  %1121 = vmatpush.msrb.mxu0 %v640_v29  ;;  %v688_v51 = vld [vmem:[#allocation2 + $0xb08] sm:$0xff]  ;;  %v525_v25 = vld [vmem:[#allocation2 + $0x5f0] sm:$0xff] }
 0x108   :  { %1141 = vmatpush.msrb.mxu1 %v704_v30  ;;  %1161 = vmatpush.msrb.mxu2 %v768_v31  ;;  %v752_v52 = vld [vmem:[#allocation2 + $0xd08] sm:$0xff]  ;;  %v393_v29 = vld [vmem:[#allocation2 + $0x1d0] sm:$0xff] }
 0x109   :  { %1180 = vmatpush.msrb.mxu3 %v836_v32  ;;  %1122 = vmatpush.msrb.mxu0 %v636_v34  ;;  %v820_v53 = vld [vmem:[#allocation2 + $0xf28] sm:$0xff]  ;;  %v457_v30 = vld [vmem:[#allocation2 + $0x3d0] sm:$0xff] }
 0x10a   :  { %1142 = vmatpush.msrb.mxu1 %v700_v35  ;;  %1162 = vmatpush.msrb.mxu2 %v764_v36  ;;  %v620_v54 = vld [vmem:[#allocation2 + $0x8e8] sm:$0xff]  ;;  %v521_v31 = vld [vmem:[#allocation2 + $0x5d0] sm:$0xff] }
 0x10b   :  { %1181 = vmatpush.msrb.mxu3 %v832_v37  ;;  %1123 = vmatpush.msrb.mxu0 %v632_v38  ;;  %v684_v55 = vld [vmem:[#allocation2 + $0xae8] sm:$0xff]  ;;  %v589_v32 = vld [vmem:[#allocation2 + $0x7f0] sm:$0xff] }
 0x10c   :  { %1143 = vmatpush.msrb.mxu1 %v696_v39  ;;  %1163 = vmatpush.msrb.mxu2 %v760_v40  ;;  %v748_v56 = vld [vmem:[#allocation2 + $0xce8] sm:$0xff]  ;;  %v389_v34 = vld [vmem:[#allocation2 + $0x1b0] sm:$0xff] }
 0x10d   :  { %1182 = vmatpush.msrb.mxu3 %v828_v41  ;;  %1124 = vmatpush.msrb.mxu0 %v628_v42  ;;  %v816_v57 = vld [vmem:[#allocation2 + $0xf08] sm:$0xff]  ;;  %v453_v35 = vld [vmem:[#allocation2 + $0x3b0] sm:$0xff] }
 0x10e   :  { %1144 = vmatpush.msrb.mxu1 %v692_v43  ;;  %1164 = vmatpush.msrb.mxu2 %v756_v44  ;;  %v616_v58 = vld [vmem:[#allocation2 + $0x8c8] sm:$0xff]  ;;  %v517_v36 = vld [vmem:[#allocation2 + $0x5b0] sm:$0xff] }
 0x10f   :  { %1183 = vmatpush.msrb.mxu3 %v824_v45  ;;  %1125 = vmatpush.msrb.mxu0 %v624_v50  ;;  %v680_v59 = vld [vmem:[#allocation2 + $0xac8] sm:$0xff]  ;;  %v585_v37 = vld [vmem:[#allocation2 + $0x7d0] sm:$0xff] }
 0x110   :  { %1145 = vmatpush.msrb.mxu1 %v688_v51  ;;  %1165 = vmatpush.msrb.mxu2 %v752_v52  ;;  %v744_v60 = vld [vmem:[#allocation2 + $0xcc8] sm:$0xff]  ;;  %v385_v38 = vld [vmem:[#allocation2 + $0x190] sm:$0xff] }
 0x111   :  { %1184 = vmatpush.msrb.mxu3 %v820_v53  ;;  %1126 = vmatpush.msrb.mxu0 %v620_v54  ;;  %v812_v61 = vld [vmem:[#allocation2 + $0xee8] sm:$0xff]  ;;  %v449_v39 = vld [vmem:[#allocation2 + $0x390] sm:$0xff] }
 0x112   :  { %1146 = vmatpush.msrb.mxu1 %v684_v55  ;;  %1166 = vmatpush.msrb.mxu2 %v748_v56  ;;  %v612_v62 = vld [vmem:[#allocation2 + $0x8a8] sm:$0xff]  ;;  %v513_v40 = vld [vmem:[#allocation2 + $0x590] sm:$0xff] }
 0x113   :  { %1185 = vmatpush.msrb.mxu3 %v816_v57  ;;  %v676_v63 = vld [vmem:[#allocation2 + $0xaa8] sm:$0xff]  ;;  %1127 = vmatpush.msrb.mxu0 %v616_v58  ;;  %v581_v41 = vld [vmem:[#allocation2 + $0x7b0] sm:$0xff] }
 0x114   :  { %1147 = vmatpush.msrb.mxu1 %v680_v59  ;;  %v740_v0 = vld [vmem:[#allocation2 + $0xca8] sm:$0xff]  ;;  %1167 = vmatpush.msrb.mxu2 %v744_v60  ;;  %v381_v42 = vld [vmem:[#allocation2 + $0x170] sm:$0xff] }
 0x115   :  { %v808_v1 = vld [vmem:[#allocation2 + $0xec8] sm:$0xff]  ;;  %1186 = vmatpush.msrb.mxu3 %v812_v61  ;;  %1128 = vmatpush.msrb.mxu0 %v612_v62  ;;  %v445_v43 = vld [vmem:[#allocation2 + $0x370] sm:$0xff] }
 0x116   :  { %v608_v2 = vld [vmem:[#allocation2 + $0x888] sm:$0xff]  ;;  %1148 = vmatpush.msrb.mxu1 %v676_v63  ;;  %1168 = vmatpush.msrb.mxu2 %v740_v0  ;;  %v509_v44 = vld [vmem:[#allocation2 + $0x570] sm:$0xff] }
 0x117   :  { %v672_v3 = vld [vmem:[#allocation2 + $0xa88] sm:$0xff]  ;;  %1187 = vmatpush.msrb.mxu3 %v808_v1  ;;  %1129 = vmatpush.msrb.mxu0 %v608_v2  ;;  %v577_v45 = vld [vmem:[#allocation2 + $0x790] sm:$0xff] }
 0x118   :  { %v736_v4 = vld [vmem:[#allocation2 + $0xc88] sm:$0xff]  ;;  %1149 = vmatpush.msrb.mxu1 %v672_v3  ;;  %1054 = vmatmul.f32.vlgmr.msra.gmra.mxu0 %v3307_v46  ;;  %v377_v50 = vld [vmem:[#allocation2 + $0x150] sm:$0xff] }
 0x119   :  { %v804_v5 = vld [vmem:[#allocation2 + $0xea8] sm:$0xff]  ;;  %1169 = vmatpush.msrb.mxu2 %v736_v4  ;;  %1074 = vmatmul.f32.vlgmr.msra.gmra.mxu1 %v3309_v47  ;;  %v441_v51 = vld [vmem:[#allocation2 + $0x350] sm:$0xff] }
 0x11a   :  { %v604_v6 = vld [vmem:[#allocation2 + $0x868] sm:$0xff]  ;;  %1188 = vmatpush.msrb.mxu3 %v804_v5  ;;  %1094 = vmatmul.f32.vlgmr.msra.gmra.mxu2 %v3311_v48  ;;  %v505_v52 = vld [vmem:[#allocation2 + $0x550] sm:$0xff] }
 0x11b   :  { %v668_v7 = vld [vmem:[#allocation2 + $0xa68] sm:$0xff]  ;;  %1130 = vmatpush.msrb.mxu0 %v604_v6  ;;  %1114 = vmatmul.f32.vlgmr.msra.gmra.mxu3 %v3313_v49  ;;  %v573_v53 = vld [vmem:[#allocation2 + $0x770] sm:$0xff] }
 0x11c   :  { %v732_v8 = vld [vmem:[#allocation2 + $0xc68] sm:$0xff]  ;;  %1150 = vmatpush.msrb.mxu1 %v668_v7  ;;  %v373_v54 = vld [vmem:[#allocation2 + $0x130] sm:$0xff] }
 0x11d   :  { %v800_v9 = vld [vmem:[#allocation2 + $0xe88] sm:$0xff]  ;;  %1170 = vmatpush.msrb.mxu2 %v732_v8  ;;  %v437_v55 = vld [vmem:[#allocation2 + $0x330] sm:$0xff] }
 0x11e   :  { %v600_v10 = vld [vmem:[#allocation2 + $0x848] sm:$0xff]  ;;  %1189 = vmatpush.msrb.mxu3 %v800_v9  ;;  %v501_v56 = vld [vmem:[#allocation2 + $0x530] sm:$0xff] }
 0x11f   :  { %v664_v11 = vld [vmem:[#allocation2 + $0xa48] sm:$0xff]  ;;  %1131 = vmatpush.msrb.mxu0 %v600_v10  ;;  %v569_v57 = vld [vmem:[#allocation2 + $0x750] sm:$0xff] }
 0x120   :  { %v728_v12 = vld [vmem:[#allocation2 + $0xc48] sm:$0xff]  ;;  %1151 = vmatpush.msrb.mxu1 %v664_v11  ;;  %v433_v58 = vld [vmem:[#allocation2 + $0x310] sm:$0xff] }
 0x121   :  { %v796_v13 = vld [vmem:[#allocation2 + $0xe68] sm:$0xff]  ;;  %1171 = vmatpush.msrb.mxu2 %v728_v12  ;;  %v497_v59 = vld [vmem:[#allocation2 + $0x510] sm:$0xff] }
 0x122   :  { %v596_v14 = vld [vmem:[#allocation2 + $0x828] sm:$0xff]  ;;  %1190 = vmatpush.msrb.mxu3 %v796_v13  ;;  %v565_v60 = vld [vmem:[#allocation2 + $0x730] sm:$0xff] }
 0x123   :  { %v660_v15 = vld [vmem:[#allocation2 + $0xa28] sm:$0xff]  ;;  %1132 = vmatpush.msrb.mxu0 %v596_v14  ;;  %v429_v61 = vld [vmem:[#allocation2 + $0x2f0] sm:$0xff] }
 0x124   :  { %v724_v16 = vld [vmem:[#allocation2 + $0xc28] sm:$0xff]  ;;  %1152 = vmatpush.msrb.mxu1 %v660_v15  ;;  %v493_v62 = vld [vmem:[#allocation2 + $0x4f0] sm:$0xff] }
 0x125   :  { %v792_v17 = vld [vmem:[#allocation2 + $0xe48] sm:$0xff]  ;;  %1172 = vmatpush.msrb.mxu2 %v724_v16  ;;  %v561_v63 = vld [vmem:[#allocation2 + $0x710] sm:$0xff] }
 0x126   :  { %v592_v18 = vld [vmem:[#allocation2 + $0x808] sm:$0xff]  ;;  %1191 = vmatpush.msrb.mxu3 %v792_v17  ;;  %v361_v0 = vld [vmem:[#allocation2 + $0xd0] sm:$0xff] }
 0x127   :  { %v656_v19 = vld [vmem:[#allocation2 + $0xa08] sm:$0xff]  ;;  %1133 = vmatpush.msrb.mxu0 %v592_v18  ;;  %v425_v1 = vld [vmem:[#allocation2 + $0x2d0] sm:$0xff] }
 0x128   :  { %v720_v20 = vld [vmem:[#allocation2 + $0xc08] sm:$0xff]  ;;  %1153 = vmatpush.msrb.mxu1 %v656_v19  ;;  %1134 = vmatmul.f32.vlgmr.msrb.gmra.mxu0 %v3321_v26  ;;  %v365_v26 = vld [vmem:[#allocation2 + $0xf0] sm:$0xff] }
 0x129   :  { %v788_v21 = vld [vmem:[#allocation2 + $0xe28] sm:$0xff]  ;;  %1173 = vmatpush.msrb.mxu2 %v720_v20  ;;  %1198 = vmatpush.msra.mxu0 %v397_v23  ;;  %v489_v2 = vld [vmem:[#allocation2 + $0x4d0] sm:$0xff] }
 0x12a   :  { %1192 = vmatpush.msrb.mxu3 %v788_v21  ;;  %v784_v27 = vld [vmem:[#allocation2 + $0xe08] sm:$0xff]  ;;  %1218 = vmatpush.msra.mxu1 %v461_v24  ;;  %v557_v3 = vld [vmem:[#allocation2 + $0x6f0] sm:$0xff] }
 0x12b   :  { %1238 = vmatpush.msra.mxu2 %v525_v25  ;;  %1199 = vmatpush.msra.mxu0 %v393_v29  ;;  %v357_v4 = vld [vmem:[#allocation2 + $0xb0] sm:$0xff] }
 0x12c   :  { %1193 = vmatpush.msrb.mxu3 %v784_v27  ;;  %1219 = vmatpush.msra.mxu1 %v457_v30  ;;  %v421_v5 = vld [vmem:[#allocation2 + $0x2b0] sm:$0xff] }
 0x12d   :  { %1239 = vmatpush.msra.mxu2 %v521_v31  ;;  %1200 = vmatpush.msra.mxu0 %v389_v34  ;;  %v485_v6 = vld [vmem:[#allocation2 + $0x4b0] sm:$0xff] }
 0x12e   :  { %1258 = vmatpush.msra.mxu3 %v589_v32  ;;  %1220 = vmatpush.msra.mxu1 %v453_v35  ;;  %v553_v7 = vld [vmem:[#allocation2 + $0x6d0] sm:$0xff] }
 0x12f   :  { %1240 = vmatpush.msra.mxu2 %v517_v36  ;;  %1201 = vmatpush.msra.mxu0 %v385_v38  ;;  %v353_v8 = vld [vmem:[#allocation2 + $0x90] sm:$0xff] }
 0x130   :  { %1259 = vmatpush.msra.mxu3 %v585_v37  ;;  %1221 = vmatpush.msra.mxu1 %v449_v39  ;;  %v417_v9 = vld [vmem:[#allocation2 + $0x290] sm:$0xff] }
 0x131   :  { %1241 = vmatpush.msra.mxu2 %v513_v40  ;;  %1202 = vmatpush.msra.mxu0 %v381_v42  ;;  %v481_v10 = vld [vmem:[#allocation2 + $0x490] sm:$0xff] }
 0x132   :  { %1260 = vmatpush.msra.mxu3 %v581_v41  ;;  %1174 = vmatmul.f32.vlgmr.msrb.gmra.mxu2 %v3319_v22  ;;  %v369_v22 = vld [vmem:[#allocation2 + $0x110] sm:$0xff] }
 0x133   :  { %1222 = vmatpush.msra.mxu1 %v445_v43  ;;  %1242 = vmatpush.msra.mxu2 %v509_v44  ;;  %v549_v11 = vld [vmem:[#allocation2 + $0x6b0] sm:$0xff] }
 0x134   :  { %1261 = vmatpush.msra.mxu3 %v577_v45  ;;  %1203 = vmatpush.msra.mxu0 %v377_v50  ;;  %v349_v12 = vld [vmem:[#allocation2 + $0x70] sm:$0xff] }
 0x135   :  { %1194 = vmatmul.f32.vlgmr.msrb.gmra.mxu3 %v3324_v28  ;;  %1223 = vmatpush.msra.mxu1 %v441_v51  ;;  %v413_v13 = vld [vmem:[#allocation2 + $0x270] sm:$0xff] }
 0x136   :  { %1243 = vmatpush.msra.mxu2 %v505_v52  ;;  %1262 = vmatpush.msra.mxu3 %v573_v53  ;;  %v477_v14 = vld [vmem:[#allocation2 + $0x470] sm:$0xff] }
 0x137   :  { %1154 = vmatmul.f32.vlgmr.msrb.gmra.mxu1 %v3327_v33  ;;  %1204 = vmatpush.msra.mxu0 %v373_v54  ;;  %v545_v15 = vld [vmem:[#allocation2 + $0x690] sm:$0xff] }
 0x138   :  { %1224 = vmatpush.msra.mxu1 %v437_v55  ;;  %1244 = vmatpush.msra.mxu2 %v501_v56  ;;  %v345_v16 = vld [vmem:[#allocation2 + $0x50] sm:$0xff] }
 0x139   :  { %1263 = vmatpush.msra.mxu3 %v569_v57  ;;  %1205 = vmatpush.msra.mxu0 %v369_v22  ;;  %v409_v17 = vld [vmem:[#allocation2 + $0x250] sm:$0xff] }
 0x13a   :  { %1225 = vmatpush.msra.mxu1 %v433_v58  ;;  %1245 = vmatpush.msra.mxu2 %v497_v59  ;;  %v473_v18 = vld [vmem:[#allocation2 + $0x450] sm:$0xff] }
 0x13b   :  { %1264 = vmatpush.msra.mxu3 %v565_v60  ;;  %1206 = vmatpush.msra.mxu0 %v365_v26  ;;  %v541_v19 = vld [vmem:[#allocation2 + $0x670] sm:$0xff] }
 0x13c   :  { %1226 = vmatpush.msra.mxu1 %v429_v61  ;;  %1246 = vmatpush.msra.mxu2 %v493_v62  ;;  %v341_v20 = vld [vmem:[#allocation2 + $0x30] sm:$0xff] }
 0x13d   :  { %1265 = vmatpush.msra.mxu3 %v561_v63  ;;  %1207 = vmatpush.msra.mxu0 %v361_v0  ;;  %v405_v21 = vld [vmem:[#allocation2 + $0x230] sm:$0xff] }
 0x13e   :  { %1227 = vmatpush.msra.mxu1 %v425_v1  ;;  %1247 = vmatpush.msra.mxu2 %v489_v2  ;;  %v469_v23 = vld [vmem:[#allocation2 + $0x430] sm:$0xff] }
 0x13f   :  { %1266 = vmatpush.msra.mxu3 %v557_v3  ;;  %1208 = vmatpush.msra.mxu0 %v357_v4  ;;  %v537_v24 = vld [vmem:[#allocation2 + $0x650] sm:$0xff] }
 0x140   :  { %1228 = vmatpush.msra.mxu1 %v421_v5  ;;  %1248 = vmatpush.msra.mxu2 %v485_v6  ;;  %v337_v25 = vld [vmem:[#allocation2 + $0x10] sm:$0xff] }
 0x141   :  { %1267 = vmatpush.msra.mxu3 %v553_v7  ;;  %1209 = vmatpush.msra.mxu0 %v353_v8  ;;  %v401_v27 = vld [vmem:[#allocation2 + $0x210] sm:$0xff] }
 0x142   :  { %1229 = vmatpush.msra.mxu1 %v417_v9  ;;  %1249 = vmatpush.msra.mxu2 %v481_v10  ;;  %v465_v29 = vld [vmem:[#allocation2 + $0x410] sm:$0xff] }
 0x143   :  { %1268 = vmatpush.msra.mxu3 %v549_v11  ;;  %1210 = vmatpush.msra.mxu0 %v349_v12  ;;  %v533_v30 = vld [vmem:[#allocation2 + $0x630] sm:$0xff] }
 0x144   :  { %1230 = vmatpush.msra.mxu1 %v413_v13  ;;  %1250 = vmatpush.msra.mxu2 %v477_v14  ;;  %v653_v31 = vld [vmem:[#allocation2 + $0x9f0] sm:$0xff] }
 0x145   :  { %1269 = vmatpush.msra.mxu3 %v545_v15  ;;  %1211 = vmatpush.msra.mxu0 %v345_v16  ;;  %v717_v32 = vld [vmem:[#allocation2 + $0xbf0] sm:$0xff] }
 0x146   :  { %1231 = vmatpush.msra.mxu1 %v409_v17  ;;  %1251 = vmatpush.msra.mxu2 %v473_v18  ;;  %v781_v34 = vld [vmem:[#allocation2 + $0xdf0] sm:$0xff] }
 0x147   :  { %1270 = vmatpush.msra.mxu3 %v541_v19  ;;  %1212 = vmatpush.msra.mxu0 %v341_v20  ;;  %v529_v35 = vld [vmem:[#allocation2 + $0x610] sm:$0xff] }
 0x148   :  { %1232 = vmatpush.msra.mxu1 %v405_v21  ;;  %1252 = vmatpush.msra.mxu2 %v469_v23  ;;  %v649_v36 = vld [vmem:[#allocation2 + $0x9d0] sm:$0xff] }
 0x149   :  { %1271 = vmatpush.msra.mxu3 %v537_v24  ;;  %1213 = vmatpush.msra.mxu0 %v337_v25  ;;  %v713_v37 = vld [vmem:[#allocation2 + $0xbd0] sm:$0xff] }
 0x14a   :  { %1233 = vmatpush.msra.mxu1 %v401_v27  ;;  %1253 = vmatpush.msra.mxu2 %v465_v29  ;;  %v777_v38 = vld [vmem:[#allocation2 + $0xdd0] sm:$0xff] }
 0x14b   :  { %1272 = vmatpush.msra.mxu3 %v533_v30  ;;  %1278 = vmatpush.msrb.mxu0 %v653_v31  ;;  %v845_v39 = vld [vmem:[#allocation2 + $0xff0] sm:$0xff] }
 0x14c   :  { %1298 = vmatpush.msrb.mxu1 %v717_v32  ;;  %1318 = vmatpush.msrb.mxu2 %v781_v34  ;;  %v645_v40 = vld [vmem:[#allocation2 + $0x9b0] sm:$0xff] }
 0x14d   :  { %1273 = vmatpush.msra.mxu3 %v529_v35  ;;  %v709_v41 = vld [vmem:[#allocation2 + $0xbb0] sm:$0xff]  ;;  %1279 = vmatpush.msrb.mxu0 %v649_v36 }
 0x14e   :  { %1299 = vmatpush.msrb.mxu1 %v713_v37  ;;  %v773_v42 = vld [vmem:[#allocation2 + $0xdb0] sm:$0xff]  ;;  %1319 = vmatpush.msrb.mxu2 %v777_v38  ;;  %v398_v38 = vld [vmem:[#allocation2 + $0x1f8] sm:$0xff] }
 0x14f   :  { %v841_v43 = vld [vmem:[#allocation2 + $0xfd0] sm:$0xff]  ;;  %1338 = vmatpush.msrb.mxu3 %v845_v39  ;;  %1280 = vmatpush.msrb.mxu0 %v645_v40  ;;  %v462_v39 = vld [vmem:[#allocation2 + $0x3f8] sm:$0xff] }
 0x150   :  { %v641_v44 = vld [vmem:[#allocation2 + $0x990] sm:$0xff]  ;;  %1300 = vmatpush.msrb.mxu1 %v709_v41  ;;  %1320 = vmatpush.msrb.mxu2 %v773_v42  ;;  %v526_v40 = vld [vmem:[#allocation2 + $0x5f8] sm:$0xff]  ;;  %v3343_v42 = vld.sshfl [vmem:[#allocation1 + $0x30] sm:$0xff pattern:$0x73625140] }
 0x151   :  { %v705_v45 = vld [vmem:[#allocation2 + $0xb90] sm:$0xff]  ;;  %1339 = vmatpush.msrb.mxu3 %v841_v43  ;;  %1281 = vmatpush.msrb.mxu0 %v641_v44  ;;  %v394_v43 = vld [vmem:[#allocation2 + $0x1d8] sm:$0xff] }
 0x152   :  { %v769_v50 = vld [vmem:[#allocation2 + $0xd90] sm:$0xff]  ;;  %1301 = vmatpush.msrb.mxu1 %v705_v45  ;;  %1254 = vmatmul.f32.vlgmr.msra.gmra.mxu2 %v3311_v48  ;;  %v458_v44 = vld [vmem:[#allocation2 + $0x3d8] sm:$0xff] }
 0x153   :  { %v837_v51 = vld [vmem:[#allocation2 + $0xfb0] sm:$0xff]  ;;  %1321 = vmatpush.msrb.mxu2 %v769_v50  ;;  %1214 = vmatmul.f32.vlgmr.msra.gmra.mxu0 %v3307_v46  ;;  %v522_v45 = vld [vmem:[#allocation2 + $0x5d8] sm:$0xff] }
 0x154   :  { %v637_v52 = vld [vmem:[#allocation2 + $0x970] sm:$0xff]  ;;  %1340 = vmatpush.msrb.mxu3 %v837_v51  ;;  %1234 = vmatmul.f32.vlgmr.msra.gmra.mxu1 %v3309_v47  ;;  %v3346_v50 = vld.sshfl [vmem:[#allocation1 + $0x20] sm:$0xff pattern:$0x73625140] }
 0x155   :  { %v701_v53 = vld [vmem:[#allocation2 + $0xb70] sm:$0xff]  ;;  %1282 = vmatpush.msrb.mxu0 %v637_v52  ;;  %1274 = vmatmul.f32.vlgmr.msra.gmra.mxu3 %v3313_v49  ;;  %v590_v51 = vld [vmem:[#allocation2 + $0x7f8] sm:$0xff] }
 0x156   :  { %v765_v54 = vld [vmem:[#allocation2 + $0xd70] sm:$0xff]  ;;  %1302 = vmatpush.msrb.mxu1 %v701_v53  ;;  %v390_v52 = vld [vmem:[#allocation2 + $0x1b8] sm:$0xff] }
 0x157   :  { %v833_v55 = vld [vmem:[#allocation2 + $0xf90] sm:$0xff]  ;;  %1322 = vmatpush.msrb.mxu2 %v765_v54  ;;  %v454_v53 = vld [vmem:[#allocation2 + $0x3b8] sm:$0xff] }
 0x158   :  { %v633_v56 = vld [vmem:[#allocation2 + $0x950] sm:$0xff]  ;;  %1341 = vmatpush.msrb.mxu3 %v833_v55  ;;  %v518_v54 = vld [vmem:[#allocation2 + $0x5b8] sm:$0xff] }
 0x159   :  { %v697_v57 = vld [vmem:[#allocation2 + $0xb50] sm:$0xff]  ;;  %1283 = vmatpush.msrb.mxu0 %v633_v56  ;;  %v586_v55 = vld [vmem:[#allocation2 + $0x7d8] sm:$0xff] }
 0x15a   :  { %v761_v22 = vld [vmem:[#allocation2 + $0xd50] sm:$0xff]  ;;  %1303 = vmatpush.msrb.mxu1 %v697_v57  ;;  %v386_v56 = vld [vmem:[#allocation2 + $0x198] sm:$0xff] }
 0x15b   :  { %v829_v58 = vld [vmem:[#allocation2 + $0xf70] sm:$0xff]  ;;  %1323 = vmatpush.msrb.mxu2 %v761_v22  ;;  %v450_v57 = vld [vmem:[#allocation2 + $0x398] sm:$0xff] }
 0x15c   :  { %v629_v59 = vld [vmem:[#allocation2 + $0x930] sm:$0xff]  ;;  %1342 = vmatpush.msrb.mxu3 %v829_v58  ;;  %v514_v22 = vld [vmem:[#allocation2 + $0x598] sm:$0xff] }
 0x15d   :  { %v693_v60 = vld [vmem:[#allocation2 + $0xb30] sm:$0xff]  ;;  %1284 = vmatpush.msrb.mxu0 %v629_v59  ;;  %v582_v58 = vld [vmem:[#allocation2 + $0x7b8] sm:$0xff] }
 0x15e   :  { %v757_v26 = vld [vmem:[#allocation2 + $0xd30] sm:$0xff]  ;;  %1304 = vmatpush.msrb.mxu1 %v693_v60  ;;  %v382_v59 = vld [vmem:[#allocation2 + $0x178] sm:$0xff] }
 0x15f   :  { %v825_v61 = vld [vmem:[#allocation2 + $0xf50] sm:$0xff]  ;;  %1324 = vmatpush.msrb.mxu2 %v757_v26  ;;  %v510_v60 = vld [vmem:[#allocation2 + $0x578] sm:$0xff] }
 0x160   :  { %v625_v62 = vld [vmem:[#allocation2 + $0x910] sm:$0xff]  ;;  %1343 = vmatpush.msrb.mxu3 %v825_v61  ;;  %v578_v26 = vld [vmem:[#allocation2 + $0x798] sm:$0xff] }
 0x161   :  { %v689_v63 = vld [vmem:[#allocation2 + $0xb10] sm:$0xff]  ;;  %1285 = vmatpush.msrb.mxu0 %v625_v62  ;;  %v378_v61 = vld [vmem:[#allocation2 + $0x158] sm:$0xff] }
 0x162   :  { %v753_v0 = vld [vmem:[#allocation2 + $0xd10] sm:$0xff]  ;;  %1305 = vmatpush.msrb.mxu1 %v689_v63  ;;  %v442_v62 = vld [vmem:[#allocation2 + $0x358] sm:$0xff] }
 0x163   :  { %v821_v1 = vld [vmem:[#allocation2 + $0xf30] sm:$0xff]  ;;  %1325 = vmatpush.msrb.mxu2 %v753_v0  ;;  %v574_v63 = vld [vmem:[#allocation2 + $0x778] sm:$0xff] }
 0x164   :  { %v621_v2 = vld [vmem:[#allocation2 + $0x8f0] sm:$0xff]  ;;  %1344 = vmatpush.msrb.mxu3 %v821_v1  ;;  %v374_v0 = vld [vmem:[#allocation2 + $0x138] sm:$0xff] }
 0x165   :  { %v685_v3 = vld [vmem:[#allocation2 + $0xaf0] sm:$0xff]  ;;  %1286 = vmatpush.msrb.mxu0 %v621_v2  ;;  %v438_v1 = vld [vmem:[#allocation2 + $0x338] sm:$0xff] }
 0x166   :  { %v749_v4 = vld [vmem:[#allocation2 + $0xcf0] sm:$0xff]  ;;  %1306 = vmatpush.msrb.mxu1 %v685_v3  ;;  %v502_v2 = vld [vmem:[#allocation2 + $0x538] sm:$0xff] }
 0x167   :  { %v817_v5 = vld [vmem:[#allocation2 + $0xf10] sm:$0xff]  ;;  %1326 = vmatpush.msrb.mxu2 %v749_v4  ;;  %v570_v3 = vld [vmem:[#allocation2 + $0x758] sm:$0xff] }
 0x168   :  { %v617_v6 = vld [vmem:[#allocation2 + $0x8d0] sm:$0xff]  ;;  %1345 = vmatpush.msrb.mxu3 %v817_v5  ;;  %v370_v4 = vld [vmem:[#allocation2 + $0x118] sm:$0xff] }
 0x169   :  { %v681_v7 = vld [vmem:[#allocation2 + $0xad0] sm:$0xff]  ;;  %1287 = vmatpush.msrb.mxu0 %v617_v6  ;;  %v434_v5 = vld [vmem:[#allocation2 + $0x318] sm:$0xff] }
 0x16a   :  { %v745_v8 = vld [vmem:[#allocation2 + $0xcd0] sm:$0xff]  ;;  %1307 = vmatpush.msrb.mxu1 %v681_v7  ;;  %v498_v6 = vld [vmem:[#allocation2 + $0x518] sm:$0xff] }
 0x16b   :  { %v813_v9 = vld [vmem:[#allocation2 + $0xef0] sm:$0xff]  ;;  %1327 = vmatpush.msrb.mxu2 %v745_v8  ;;  %v566_v7 = vld [vmem:[#allocation2 + $0x738] sm:$0xff] }
 0x16c   :  { %v613_v10 = vld [vmem:[#allocation2 + $0x8b0] sm:$0xff]  ;;  %1346 = vmatpush.msrb.mxu3 %v813_v9  ;;  %v366_v8 = vld [vmem:[#allocation2 + $0xf8] sm:$0xff] }
 0x16d   :  { %v677_v11 = vld [vmem:[#allocation2 + $0xab0] sm:$0xff]  ;;  %1288 = vmatpush.msrb.mxu0 %v613_v10  ;;  %v430_v9 = vld [vmem:[#allocation2 + $0x2f8] sm:$0xff] }
 0x16e   :  { %v741_v12 = vld [vmem:[#allocation2 + $0xcb0] sm:$0xff]  ;;  %1308 = vmatpush.msrb.mxu1 %v677_v11  ;;  %v494_v10 = vld [vmem:[#allocation2 + $0x4f8] sm:$0xff] }
 0x16f   :  { %v809_v13 = vld [vmem:[#allocation2 + $0xed0] sm:$0xff]  ;;  %1328 = vmatpush.msrb.mxu2 %v741_v12  ;;  %v562_v11 = vld [vmem:[#allocation2 + $0x718] sm:$0xff] }
 0x170   :  { %v609_v14 = vld [vmem:[#allocation2 + $0x890] sm:$0xff]  ;;  %1347 = vmatpush.msrb.mxu3 %v809_v13  ;;  %v362_v12 = vld [vmem:[#allocation2 + $0xd8] sm:$0xff] }
 0x171   :  { %v673_v15 = vld [vmem:[#allocation2 + $0xa90] sm:$0xff]  ;;  %1289 = vmatpush.msrb.mxu0 %v609_v14  ;;  %v426_v13 = vld [vmem:[#allocation2 + $0x2d8] sm:$0xff] }
 0x172   :  { %v737_v16 = vld [vmem:[#allocation2 + $0xc90] sm:$0xff]  ;;  %1309 = vmatpush.msrb.mxu1 %v673_v15  ;;  %v490_v14 = vld [vmem:[#allocation2 + $0x4d8] sm:$0xff] }
 0x173   :  { %v805_v17 = vld [vmem:[#allocation2 + $0xeb0] sm:$0xff]  ;;  %1329 = vmatpush.msrb.mxu2 %v737_v16  ;;  %v558_v15 = vld [vmem:[#allocation2 + $0x6f8] sm:$0xff] }
 0x174   :  { %v605_v18 = vld [vmem:[#allocation2 + $0x870] sm:$0xff]  ;;  %1348 = vmatpush.msrb.mxu3 %v805_v17  ;;  %v358_v16 = vld [vmem:[#allocation2 + $0xb8] sm:$0xff] }
 0x175   :  { %v669_v19 = vld [vmem:[#allocation2 + $0xa70] sm:$0xff]  ;;  %1290 = vmatpush.msrb.mxu0 %v605_v18  ;;  %v422_v17 = vld [vmem:[#allocation2 + $0x2b8] sm:$0xff] }
 0x176   :  { %v733_v20 = vld [vmem:[#allocation2 + $0xc70] sm:$0xff]  ;;  %1310 = vmatpush.msrb.mxu1 %v669_v19  ;;  %v486_v18 = vld [vmem:[#allocation2 + $0x4b8] sm:$0xff] }
 0x177   :  { %v801_v21 = vld [vmem:[#allocation2 + $0xe90] sm:$0xff]  ;;  %1330 = vmatpush.msrb.mxu2 %v733_v20  ;;  %v554_v19 = vld [vmem:[#allocation2 + $0x6d8] sm:$0xff] }
 0x178   :  { %v601_v23 = vld [vmem:[#allocation2 + $0x850] sm:$0xff]  ;;  %1349 = vmatpush.msrb.mxu3 %v801_v21  ;;  %v354_v20 = vld [vmem:[#allocation2 + $0x98] sm:$0xff] }
 0x179   :  { %v665_v24 = vld [vmem:[#allocation2 + $0xa50] sm:$0xff]  ;;  %1291 = vmatpush.msrb.mxu0 %v601_v23  ;;  %v418_v21 = vld [vmem:[#allocation2 + $0x298] sm:$0xff] }
 0x17a   :  { %v729_v25 = vld [vmem:[#allocation2 + $0xc50] sm:$0xff]  ;;  %1311 = vmatpush.msrb.mxu1 %v665_v24  ;;  %v482_v23 = vld [vmem:[#allocation2 + $0x498] sm:$0xff] }
 0x17b   :  { %v797_v27 = vld [vmem:[#allocation2 + $0xe70] sm:$0xff]  ;;  %1331 = vmatpush.msrb.mxu2 %v729_v25  ;;  %v550_v24 = vld [vmem:[#allocation2 + $0x6b8] sm:$0xff] }
 0x17c   :  { %v597_v29 = vld [vmem:[#allocation2 + $0x830] sm:$0xff]  ;;  %1350 = vmatpush.msrb.mxu3 %v797_v27  ;;  %v350_v25 = vld [vmem:[#allocation2 + $0x78] sm:$0xff] }
 0x17d   :  { %v661_v30 = vld [vmem:[#allocation2 + $0xa30] sm:$0xff]  ;;  %1292 = vmatpush.msrb.mxu0 %v597_v29  ;;  %v414_v27 = vld [vmem:[#allocation2 + $0x278] sm:$0xff] }
 0x17e   :  { %v725_v31 = vld [vmem:[#allocation2 + $0xc30] sm:$0xff]  ;;  %1312 = vmatpush.msrb.mxu1 %v661_v30  ;;  %v478_v29 = vld [vmem:[#allocation2 + $0x478] sm:$0xff] }
 0x17f   :  { %v793_v32 = vld [vmem:[#allocation2 + $0xe50] sm:$0xff]  ;;  %1332 = vmatpush.msrb.mxu2 %v725_v31  ;;  %v546_v30 = vld [vmem:[#allocation2 + $0x698] sm:$0xff] }
 0x180   :  { %v593_v34 = vld [vmem:[#allocation2 + $0x810] sm:$0xff]  ;;  %1351 = vmatpush.msrb.mxu3 %v793_v32  ;;  %v346_v31 = vld [vmem:[#allocation2 + $0x58] sm:$0xff] }
 0x181   :  { %v657_v35 = vld [vmem:[#allocation2 + $0xa10] sm:$0xff]  ;;  %1293 = vmatpush.msrb.mxu0 %v593_v34  ;;  %v410_v32 = vld [vmem:[#allocation2 + $0x258] sm:$0xff] }
 0x182   :  { %v721_v36 = vld [vmem:[#allocation2 + $0xc10] sm:$0xff]  ;;  %1313 = vmatpush.msrb.mxu1 %v657_v35  ;;  %1294 = vmatmul.f32.vlgmr.msrb.gmra.mxu0 %v3346_v50  ;;  %v474_v34 = vld [vmem:[#allocation2 + $0x458] sm:$0xff] }
 0x183   :  { %v789_v37 = vld [vmem:[#allocation2 + $0xe30] sm:$0xff]  ;;  %1333 = vmatpush.msrb.mxu2 %v721_v36  ;;  %1358 = vmatpush.msra.mxu0 %v398_v38  ;;  %v542_v35 = vld [vmem:[#allocation2 + $0x678] sm:$0xff] }
 0x184   :  { %1352 = vmatpush.msrb.mxu3 %v789_v37  ;;  %v785_v41 = vld [vmem:[#allocation2 + $0xe10] sm:$0xff]  ;;  %1334 = vmatmul.f32.vlgmr.msrb.gmra.mxu2 %v3343_v42  ;;  %v342_v36 = vld [vmem:[#allocation2 + $0x38] sm:$0xff] }
 0x185   :  { %1378 = vmatpush.msra.mxu1 %v462_v39  ;;  %1398 = vmatpush.msra.mxu2 %v526_v40  ;;  %v406_v37 = vld [vmem:[#allocation2 + $0x238] sm:$0xff] }
 0x186   :  { %1353 = vmatpush.msrb.mxu3 %v785_v41  ;;  %1359 = vmatpush.msra.mxu0 %v394_v43  ;;  %v470_v38 = vld [vmem:[#allocation2 + $0x438] sm:$0xff] }
 0x187   :  { %1354 = vmatmul.f32.vlgmr.msrb.gmra.mxu3 %v3324_v28  ;;  %1379 = vmatpush.msra.mxu1 %v458_v44  ;;  %v446_v28 = vld [vmem:[#allocation2 + $0x378] sm:$0xff] }
 0x188   :  { %1399 = vmatpush.msra.mxu2 %v522_v45  ;;  %1418 = vmatpush.msra.mxu3 %v590_v51  ;;  %v538_v39 = vld [vmem:[#allocation2 + $0x658] sm:$0xff] }
 0x189   :  { %1314 = vmatmul.f32.vlgmr.msrb.gmra.mxu1 %v3327_v33  ;;  %1360 = vmatpush.msra.mxu0 %v390_v52  ;;  %v506_v33 = vld [vmem:[#allocation2 + $0x558] sm:$0xff] }
 0x18a   :  { %1380 = vmatpush.msra.mxu1 %v454_v53  ;;  %1400 = vmatpush.msra.mxu2 %v518_v54  ;;  %v338_v40 = vld [vmem:[#allocation2 + $0x18] sm:$0xff] }
 0x18b   :  { %1419 = vmatpush.msra.mxu3 %v586_v55  ;;  %1361 = vmatpush.msra.mxu0 %v386_v56  ;;  %v402_v41 = vld [vmem:[#allocation2 + $0x218] sm:$0xff] }
 0x18c   :  { %1381 = vmatpush.msra.mxu1 %v450_v57  ;;  %1401 = vmatpush.msra.mxu2 %v514_v22  ;;  %v466_v43 = vld [vmem:[#allocation2 + $0x418] sm:$0xff] }
 0x18d   :  { %1420 = vmatpush.msra.mxu3 %v582_v58  ;;  %1362 = vmatpush.msra.mxu0 %v382_v59  ;;  %v534_v44 = vld [vmem:[#allocation2 + $0x638] sm:$0xff] }
 0x18e   :  { %1382 = vmatpush.msra.mxu1 %v446_v28  ;;  %1402 = vmatpush.msra.mxu2 %v510_v60  ;;  %v654_v45 = vld [vmem:[#allocation2 + $0x9f8] sm:$0xff] }
 0x18f   :  { %1421 = vmatpush.msra.mxu3 %v578_v26  ;;  %1363 = vmatpush.msra.mxu0 %v378_v61  ;;  %v718_v51 = vld [vmem:[#allocation2 + $0xbf8] sm:$0xff] }
 0x190   :  { %1383 = vmatpush.msra.mxu1 %v442_v62  ;;  %1403 = vmatpush.msra.mxu2 %v506_v33  ;;  %v782_v52 = vld [vmem:[#allocation2 + $0xdf8] sm:$0xff] }
 0x191   :  { %1422 = vmatpush.msra.mxu3 %v574_v63  ;;  %1364 = vmatpush.msra.mxu0 %v374_v0  ;;  %v530_v53 = vld [vmem:[#allocation2 + $0x618] sm:$0xff] }
 0x192   :  { %1384 = vmatpush.msra.mxu1 %v438_v1  ;;  %1404 = vmatpush.msra.mxu2 %v502_v2  ;;  %v650_v54 = vld [vmem:[#allocation2 + $0x9d8] sm:$0xff] }
 0x193   :  { %1423 = vmatpush.msra.mxu3 %v570_v3  ;;  %1365 = vmatpush.msra.mxu0 %v370_v4  ;;  %v714_v55 = vld [vmem:[#allocation2 + $0xbd8] sm:$0xff] }
 0x194   :  { %1385 = vmatpush.msra.mxu1 %v434_v5  ;;  %1405 = vmatpush.msra.mxu2 %v498_v6  ;;  %v778_v56 = vld [vmem:[#allocation2 + $0xdd8] sm:$0xff] }
 0x195   :  { %1424 = vmatpush.msra.mxu3 %v566_v7  ;;  %1366 = vmatpush.msra.mxu0 %v366_v8  ;;  %v846_v57 = vld [vmem:[#allocation2 + $0xff8] sm:$0xff] }
 0x196   :  { %1386 = vmatpush.msra.mxu1 %v430_v9  ;;  %1406 = vmatpush.msra.mxu2 %v494_v10  ;;  %v646_v22 = vld [vmem:[#allocation2 + $0x9b8] sm:$0xff]  ;;  %v3351_v10 = vpop.f32.mrf.mxu0 }
 0x197   :  { %1425 = vmatpush.msra.mxu3 %v562_v11  ;;  %1367 = vmatpush.msra.mxu0 %v362_v12  ;;  %v710_v58 = vld [vmem:[#allocation2 + $0xbb8] sm:$0xff] }
 0x198   :  { %1387 = vmatpush.msra.mxu1 %v426_v13  ;;  %1407 = vmatpush.msra.mxu2 %v490_v14  ;;  %v774_v59 = vld [vmem:[#allocation2 + $0xdb8] sm:$0xff] }
 0x199   :  { %1426 = vmatpush.msra.mxu3 %v558_v15  ;;  %1368 = vmatpush.msra.mxu0 %v358_v16  ;;  %v842_v28 = vld [vmem:[#allocation2 + $0xfd8] sm:$0xff] }
 0x19a   :  { %1388 = vmatpush.msra.mxu1 %v422_v17  ;;  %1408 = vmatpush.msra.mxu2 %v486_v18  ;;  %v642_v60 = vld [vmem:[#allocation2 + $0x998] sm:$0xff] }
 0x19b   :  { %1427 = vmatpush.msra.mxu3 %v554_v19  ;;  %1369 = vmatpush.msra.mxu0 %v354_v20  ;;  %v706_v26 = vld [vmem:[#allocation2 + $0xb98] sm:$0xff]  ;;  %v3353_v19 = vpop.f32.mrf.mxu1 }
 0x19c   :  { %1389 = vmatpush.msra.mxu1 %v418_v21  ;;  %1409 = vmatpush.msra.mxu2 %v482_v23  ;;  %v770_v61 = vld [vmem:[#allocation2 + $0xd98] sm:$0xff] }
 0x19d   :  { %1428 = vmatpush.msra.mxu3 %v550_v24  ;;  %1370 = vmatpush.msra.mxu0 %v350_v25  ;;  %v838_v62 = vld [vmem:[#allocation2 + $0xfb8] sm:$0xff] }
 0x19e   :  { %1390 = vmatpush.msra.mxu1 %v414_v27  ;;  %1410 = vmatpush.msra.mxu2 %v478_v29  ;;  %v638_v33 = vld [vmem:[#allocation2 + $0x978] sm:$0xff] }
 0x19f   :  { %1429 = vmatpush.msra.mxu3 %v546_v30  ;;  %1371 = vmatpush.msra.mxu0 %v346_v31  ;;  %v702_v63 = vld [vmem:[#allocation2 + $0xb78] sm:$0xff]  ;;  %v3355_v31 = vpop.f32.mrf.mxu2 }
 0x1a0   :  { %1391 = vmatpush.msra.mxu1 %v410_v32  ;;  %1411 = vmatpush.msra.mxu2 %v474_v34  ;;  %v766_v0 = vld [vmem:[#allocation2 + $0xd78] sm:$0xff] }
 0x1a1   :  { %1430 = vmatpush.msra.mxu3 %v542_v35  ;;  %1372 = vmatpush.msra.mxu0 %v342_v36  ;;  %v834_v1 = vld [vmem:[#allocation2 + $0xf98] sm:$0xff] }
 0x1a2   :  { %1392 = vmatpush.msra.mxu1 %v406_v37  ;;  %1412 = vmatpush.msra.mxu2 %v470_v38  ;;  %v634_v2 = vld [vmem:[#allocation2 + $0x958] sm:$0xff]  ;;  %v3357_v37 = vpop.f32.mrf.mxu0 }
 0x1a3   :  { %1431 = vmatpush.msra.mxu3 %v538_v39  ;;  %1373 = vmatpush.msra.mxu0 %v338_v40  ;;  %v698_v3 = vld [vmem:[#allocation2 + $0xb58] sm:$0xff] }
 0x1a4   :  { %1393 = vmatpush.msra.mxu1 %v402_v41  ;;  %1413 = vmatpush.msra.mxu2 %v466_v43  ;;  %v762_v4 = vld [vmem:[#allocation2 + $0xd58] sm:$0xff]  ;;  %v3359_v41 = vpop.f32.mrf.mxu3 }
 0x1a5   :  { %1432 = vmatpush.msra.mxu3 %v534_v44  ;;  %1438 = vmatpush.msrb.mxu0 %v654_v45  ;;  %v830_v5 = vld [vmem:[#allocation2 + $0xf78] sm:$0xff]  ;;  %v3362_v45 = vld [vmem:[#allocation5] sm:$0xf] }
 0x1a6   :  { %1458 = vmatpush.msrb.mxu1 %v718_v51  ;;  %1478 = vmatpush.msrb.mxu2 %v782_v52  ;;  %v630_v6 = vld [vmem:[#allocation2 + $0x938] sm:$0xff]  ;;  %v3364_v51 = vpop.f32.mrf.mxu1 }
 0x1a7   :  { %1433 = vmatpush.msra.mxu3 %v530_v53  ;;  %1439 = vmatpush.msrb.mxu0 %v650_v54  ;;  %v694_v7 = vld [vmem:[#allocation2 + $0xb38] sm:$0xff] }
 0x1a8   :  { %1459 = vmatpush.msrb.mxu1 %v714_v55  ;;  %1479 = vmatpush.msrb.mxu2 %v778_v56  ;;  %v758_v8 = vld [vmem:[#allocation2 + $0xd38] sm:$0xff] }
 0x1a9   :  { %1498 = vmatpush.msrb.mxu3 %v846_v57  ;;  %1440 = vmatpush.msrb.mxu0 %v646_v22  ;;  %v826_v9 = vld [vmem:[#allocation2 + $0xf58] sm:$0xff] }
 0x1aa   :  { %1460 = vmatpush.msrb.mxu1 %v710_v58  ;;  %1480 = vmatpush.msrb.mxu2 %v774_v59  ;;  %v626_v11 = vld [vmem:[#allocation2 + $0x918] sm:$0xff]  ;;  %v850_v58 = vperm.slane %v3362_v45, 1  ;;  %v3370_v59 = vpop.f32.mrf.mxu2 }
 0x1ab   :  { %1499 = vmatpush.msrb.mxu3 %v842_v28  ;;  %1441 = vmatpush.msrb.mxu0 %v642_v60  ;;  %v690_v12 = vld [vmem:[#allocation2 + $0xb18] sm:$0xff]  ;;  %v1055_v60 = vpop.f32.mrf.mxu0 }
 0x1ac   :  { %1461 = vmatpush.msrb.mxu1 %v706_v26  ;;  %1481 = vmatpush.msrb.mxu2 %v770_v61  ;;  %v754_v13 = vld [vmem:[#allocation2 + $0xd18] sm:$0xff] }
 0x1ad   :  { %1500 = vmatpush.msrb.mxu3 %v838_v62  ;;  %1442 = vmatpush.msrb.mxu0 %v638_v33  ;;  %v822_v14 = vld [vmem:[#allocation2 + $0xf38] sm:$0xff] }
 0x1ae   :  { %1462 = vmatpush.msrb.mxu1 %v702_v63  ;;  %1482 = vmatpush.msrb.mxu2 %v766_v0  ;;  %v622_v15 = vld [vmem:[#allocation2 + $0x8f8] sm:$0xff]  ;;  %v1056_v0 = vadd.f32 %v1055_v60, %v850_v58  ;;  %v1562_v58 = vld [vmem:[#allocation7 + $0x140] sm:$0xff] }
 0x1af   :  { %1501 = vmatpush.msrb.mxu3 %v834_v1  ;;  %1443 = vmatpush.msrb.mxu0 %v634_v2  ;;  %v686_v16 = vld [vmem:[#allocation2 + $0xaf8] sm:$0xff]  ;;  %v3374_v1 = vpop.f32.mrf.mxu3  ;;  %v1550_v2 = vld [vmem:[#allocation7 + $0xe0] sm:$0xff] }
 0x1b0   :  { %1463 = vmatpush.msrb.mxu1 %v698_v3  ;;  %1483 = vmatpush.msrb.mxu2 %v762_v4  ;;  %v750_v17 = vld [vmem:[#allocation2 + $0xcf8] sm:$0xff]  ;;  %v1582_v3 = vld [vmem:[#allocation7 + $0x1e0] sm:$0xff] }
 0x1b1   :  { %1502 = vmatpush.msrb.mxu3 %v830_v5  ;;  %1444 = vmatpush.msrb.mxu0 %v630_v6  ;;  %v818_v18 = vld [vmem:[#allocation2 + $0xf18] sm:$0xff]  ;;  %v2611_v6 = vld.sshfl [vmem:[#allocation1 + $0x38] sm:$0xff pattern:$0x73625140] }
 0x1b2   :  { %1464 = vmatpush.msrb.mxu1 %v694_v7  ;;  %1484 = vmatpush.msrb.mxu2 %v758_v8  ;;  %v618_v20 = vld [vmem:[#allocation2 + $0x8d8] sm:$0xff] }
 0x1b3   :  { %1503 = vmatpush.msrb.mxu3 %v826_v9  ;;  %1445 = vmatpush.msrb.mxu0 %v626_v11  ;;  %v682_v21 = vld [vmem:[#allocation2 + $0xad8] sm:$0xff]  ;;  %v1614_v11 = vld [vmem:[#allocation7 + $0x2e0] sm:$0xff] }
 0x1b4   :  { %1465 = vmatpush.msrb.mxu1 %v690_v12  ;;  %1485 = vmatpush.msrb.mxu2 %v754_v13  ;;  %v746_v23 = vld [vmem:[#allocation2 + $0xcd8] sm:$0xff]  ;;  %v1546_v12 = vld [vmem:[#allocation7 + $0xc0] sm:$0xff] }
 0x1b5   :  { %1504 = vmatpush.msrb.mxu3 %v822_v14  ;;  %1446 = vmatpush.msrb.mxu0 %v622_v15  ;;  %v814_v24 = vld [vmem:[#allocation2 + $0xef8] sm:$0xff]  ;;  %v1578_v13 = vld [vmem:[#allocation7 + $0x1c0] sm:$0xff] }
 0x1b6   :  { %1466 = vmatpush.msrb.mxu1 %v686_v16  ;;  %1486 = vmatpush.msrb.mxu2 %v750_v17  ;;  %v614_v25 = vld [vmem:[#allocation2 + $0x8b8] sm:$0xff] }
 0x1b7   :  { %1505 = vmatpush.msrb.mxu3 %v818_v18  ;;  %v678_v27 = vld [vmem:[#allocation2 + $0xab8] sm:$0xff]  ;;  %1447 = vmatpush.msrb.mxu0 %v618_v20  ;;  %v1115_v18 = vpop.f32.mrf.mxu3  ;;  %v1542_v20 = vld [vmem:[#allocation7 + $0xa0] sm:$0xff] }
 0x1b8   :  { %1467 = vmatpush.msrb.mxu1 %v682_v21  ;;  %v742_v29 = vld [vmem:[#allocation2 + $0xcb8] sm:$0xff]  ;;  %1487 = vmatpush.msrb.mxu2 %v746_v23  ;;  %v1574_v21 = vld [vmem:[#allocation7 + $0x1a0] sm:$0xff] }
 0x1b9   :  { %v810_v30 = vld [vmem:[#allocation2 + $0xed8] sm:$0xff]  ;;  %1506 = vmatpush.msrb.mxu3 %v814_v24  ;;  %1448 = vmatpush.msrb.mxu0 %v614_v25 }
 0x1ba   :  { %v610_v32 = vld [vmem:[#allocation2 + $0x898] sm:$0xff]  ;;  %1468 = vmatpush.msrb.mxu1 %v678_v27  ;;  %1488 = vmatpush.msrb.mxu2 %v742_v29 }
 0x1bb   :  { %v674_v34 = vld [vmem:[#allocation2 + $0xa98] sm:$0xff]  ;;  %1507 = vmatpush.msrb.mxu3 %v810_v30  ;;  %1449 = vmatpush.msrb.mxu0 %v610_v32  ;;  %v1135_v30 = vpop.f32.mrf.mxu0  ;;  %v1538_v32 = vld [vmem:[#allocation7 + $0x80] sm:$0xff] }
 0x1bc   :  { %v738_v35 = vld [vmem:[#allocation2 + $0xc98] sm:$0xff]  ;;  %1469 = vmatpush.msrb.mxu1 %v674_v34  ;;  %1414 = vmatmul.f32.vlgmr.msra.gmra.mxu2 %v3311_v48  ;;  %v849_v48 = vperm.slane %v3362_v45, 0  ;;  %v1570_v34 = vld [vmem:[#allocation7 + $0x180] sm:$0xff] }
 0x1bd   :  { %v806_v36 = vld [vmem:[#allocation2 + $0xeb8] sm:$0xff]  ;;  %1489 = vmatpush.msrb.mxu2 %v738_v35  ;;  %1374 = vmatmul.f32.vlgmr.msra.gmra.mxu0 %v3307_v46 }
 0x1be   :  { %v606_v38 = vld [vmem:[#allocation2 + $0x878] sm:$0xff]  ;;  %1508 = vmatpush.msrb.mxu3 %v806_v36  ;;  %1394 = vmatmul.f32.vlgmr.msra.gmra.mxu1 %v3309_v47  ;;  %v896_v62 = vadd.f32 %v3351_v10, %v849_v48  ;;  %v1075_v47 = vpop.f32.mrf.mxu1  ;;  %v1095_v10 = vpop.f32.mrf.mxu2 }
 0x1bf   :  { %v670_v39 = vld [vmem:[#allocation2 + $0xa78] sm:$0xff]  ;;  %1450 = vmatpush.msrb.mxu0 %v606_v38  ;;  %1434 = vmatmul.f32.vlgmr.msra.gmra.mxu3 %v3313_v49  ;;  %v1076_v9 = vadd.f32 %v1075_v47, %v1056_v0 }
 0x1c0   :  { %v734_v40 = vld [vmem:[#allocation2 + $0xc78] sm:$0xff]  ;;  %1470 = vmatpush.msrb.mxu1 %v670_v39  ;;  %v916_v5 = vadd.f32 %v3353_v19, %v896_v62  ;;  %v1610_v19 = vld [vmem:[#allocation7 + $0x2c0] sm:$0xff] }
 0x1c1   :  { %v802_v43 = vld [vmem:[#allocation2 + $0xe98] sm:$0xff]  ;;  %1490 = vmatpush.msrb.mxu2 %v734_v40  ;;  %v1526_v62 = vld [vmem:[#allocation7 + $0x20] sm:$0xff] }
 0x1c2   :  { %v602_v44 = vld [vmem:[#allocation2 + $0x858] sm:$0xff]  ;;  %1509 = vmatpush.msrb.mxu3 %v802_v43  ;;  %v936_v15 = vadd.f32 %v3355_v31, %v916_v5  ;;  %v1606_v31 = vld [vmem:[#allocation7 + $0x2a0] sm:$0xff] }
 0x1c3   :  { %v666_v52 = vld [vmem:[#allocation2 + $0xa58] sm:$0xff]  ;;  %1451 = vmatpush.msrb.mxu0 %v602_v44  ;;  %v1602_v43 = vld [vmem:[#allocation7 + $0x280] sm:$0xff] }
 0x1c4   :  { %v730_v53 = vld [vmem:[#allocation2 + $0xc58] sm:$0xff]  ;;  %1471 = vmatpush.msrb.mxu1 %v666_v52  ;;  %v956_v24 = vadd.f32 %v3359_v41, %v936_v15  ;;  %v1534_v44 = vld [vmem:[#allocation7 + $0x60] sm:$0xff]  ;;  %v1547_v15 = vld [vmem:[#allocation7 + $0xc8] sm:$0xff] }
 0x1c5   :  { %v798_v54 = vld [vmem:[#allocation2 + $0xe78] sm:$0xff]  ;;  %1491 = vmatpush.msrb.mxu2 %v730_v53  ;;  %v1566_v52 = vld [vmem:[#allocation7 + $0x160] sm:$0xff] }
 0x1c6   :  { %v598_v55 = vld [vmem:[#allocation2 + $0x838] sm:$0xff]  ;;  %1510 = vmatpush.msrb.mxu3 %v798_v54  ;;  %v976_v36 = vadd.f32 %v3357_v37, %v956_v24  ;;  %v1155_v41 = vpop.f32.mrf.mxu1  ;;  %v1175_v37 = vpop.f32.mrf.mxu2  ;;  %v1554_v5 = vld [vmem:[#allocation7 + $0x100] sm:$0xff]  ;;  %v1611_v24 = vld [vmem:[#allocation7 + $0x2c8] sm:$0xff] }
 0x1c7   :  { %v662_v56 = vld [vmem:[#allocation2 + $0xa38] sm:$0xff]  ;;  %1452 = vmatpush.msrb.mxu0 %v598_v55 }
 0x1c8   :  { %v726_v57 = vld [vmem:[#allocation2 + $0xc38] sm:$0xff]  ;;  %1472 = vmatpush.msrb.mxu1 %v662_v56  ;;  %v996_v54 = vadd.f32 %v3364_v51, %v976_v36  ;;  %v1195_v51 = vpop.f32.mrf.mxu3  ;;  %v851_v36 = vperm.slane %v3362_v45, 2 }
 0x1c9   :  { %v794_v22 = vld [vmem:[#allocation2 + $0xe58] sm:$0xff]  ;;  %1492 = vmatpush.msrb.mxu2 %v726_v57  ;;  %v1598_v57 = vld [vmem:[#allocation7 + $0x260] sm:$0xff] }
 0x1ca   :  { %v594_v46 = vld [vmem:[#allocation2 + $0x818] sm:$0xff]  ;;  %1511 = vmatpush.msrb.mxu3 %v794_v22  ;;  %v1530_v22 = vld [vmem:[#allocation7 + $0x40] sm:$0xff] }
 0x1cb   :  { %v658_v28 = vld [vmem:[#allocation2 + $0xa18] sm:$0xff]  ;;  %1453 = vmatpush.msrb.mxu0 %v594_v46 }
 0x1cc   :  { %v722_v49 = vld [vmem:[#allocation2 + $0xc18] sm:$0xff]  ;;  %1473 = vmatpush.msrb.mxu1 %v658_v28  ;;  %1454 = vmatmul.f32.vlgmr.msrb.gmra.mxu0 %v3346_v50  ;;  %v1096_v50 = vadd.f32 %v1095_v10, %v1076_v9  ;;  %v1016_v28 = vadd.f32 %v3370_v59, %v996_v54  ;;  %v1551_v10 = vld [vmem:[#allocation7 + $0xe8] sm:$0xff] }
 0x1cd   :  { %v790_v26 = vld [vmem:[#allocation2 + $0xe38] sm:$0xff]  ;;  %1493 = vmatpush.msrb.mxu2 %v722_v49 }
 0x1ce   :  { %v1552_v61 = vld [vmem:[#allocation7 + $0xf0] sm:$0xff]  ;;  %1512 = vmatpush.msrb.mxu3 %v790_v26  ;;  %1494 = vmatmul.f32.vlgmr.msrb.gmra.mxu2 %v3343_v42  ;;  %v2612_v42 = vld.sshfl [vmem:[#allocation1 + $0x28] sm:$0xff pattern:$0x73625140]  ;;  %v1116_v25 = vadd.f32 %v1115_v18, %v1096_v50  ;;  %v3385_v0 = vadd.f32 %v3374_v1, %v1016_v28  ;;  %v1579_v50 = vld [vmem:[#allocation7 + $0x1c8] sm:$0xff] }
 0x1cf   :  { %v1584_v33 = vld [vmem:[#allocation7 + $0x1f0] sm:$0xff]  ;;  %1656 = vmatpush.msra.mxu0 %v1552_v61  ;;  %1474 = vmatmul.f32.vlgmr.msrb.gmra.mxu1 %v2612_v42  ;;  %v1594_v61 = vld [vmem:[#allocation7 + $0x240] sm:$0xff]  ;;  %v1585_v1 = vld [vmem:[#allocation7 + $0x1f8] sm:$0xff] }
 0x1d0   :  { %v786_v63 = vld [vmem:[#allocation2 + $0xe18] sm:$0xff]  ;;  %1676 = vmatpush.msra.mxu1 %v1584_v33  ;;  %v1136_v38 = vadd.f32 %v1135_v30, %v1116_v25  ;;  %v1558_v33 = vld [vmem:[#allocation7 + $0x120] sm:$0xff]  ;;  %v1539_v30 = vld [vmem:[#allocation7 + $0x88] sm:$0xff] }
 0x1d1   :  { %1513 = vmatpush.msrb.mxu3 %v786_v63  ;;  %v1616_v4 = vld [vmem:[#allocation7 + $0x2f0] sm:$0xff]  ;;  %1657 = vmatpush.msra.mxu0 %v1550_v2  ;;  %v1586_v42 = vld [vmem:[#allocation7 + $0x200] sm:$0xff]  ;;  %v1577_v18 = vld [vmem:[#allocation7 + $0x1b8] sm:$0xff] }
 0x1d2   :  { %1514 = vmatmul.f32.vlgmr.msrb.gmra.mxu3 %v2611_v6  ;;  %v1548_v7 = vld [vmem:[#allocation7 + $0xd0] sm:$0xff]  ;;  %1677 = vmatpush.msra.mxu1 %v1582_v3  ;;  %v1156_v55 = vadd.f32 %v1155_v41, %v1136_v38  ;;  %v1590_v3 = vld [vmem:[#allocation7 + $0x220] sm:$0xff]  ;;  %v1518_v6 = vmax.f32 %v3385_v0, 0.0  ;;  %v1541_v25 = vld [vmem:[#allocation7 + $0x98] sm:$0xff] }
 0x1d3   :  { %v1580_v8 = vld [vmem:[#allocation7 + $0x1d0] sm:$0xff]  ;;  %1696 = vmatpush.msra.mxu2 %v1616_v4  ;;  %1658 = vmatpush.msra.mxu0 %v1548_v7  ;;  %v1522_v4 = vld [vmem:[#allocation7] sm:$0xff]  ;;  %v1605_v38 = vld [vmem:[#allocation7 + $0x298] sm:$0xff] }
 0x1d4   :  { %1678 = vmatpush.msra.mxu1 %v1580_v8  ;;  %v1612_v14 = vld [vmem:[#allocation7 + $0x2d0] sm:$0xff]  ;;  %v1176_v60 = vadd.f32 %v1175_v37, %v1156_v55  ;;  %v1553_v8 = vld [vmem:[#allocation7 + $0xf8] sm:$0xff]  ;;  %v1535_v41 = vld [vmem:[#allocation7 + $0x68] sm:$0xff] }
 0x1d5   :  { %v1544_v16 = vld [vmem:[#allocation7 + $0xb0] sm:$0xff]  ;;  %1697 = vmatpush.msra.mxu2 %v1614_v11  ;;  %1659 = vmatpush.msra.mxu0 %v1546_v12  ;;  %v1583_v11 = vld [vmem:[#allocation7 + $0x1e8] sm:$0xff]  ;;  %v1549_v12 = vld [vmem:[#allocation7 + $0xd8] sm:$0xff]  ;;  %v1255_v28 = vpop.f32.mrf.mxu2 }
 0x1d6   :  { %v1576_v17 = vld [vmem:[#allocation7 + $0x1b0] sm:$0xff]  ;;  %1679 = vmatpush.msra.mxu1 %v1578_v13  ;;  %v3387_v47 = vadd.f32 %v1195_v51, %v1176_v60  ;;  %v1581_v13 = vld [vmem:[#allocation7 + $0x1d8] sm:$0xff]  ;;  %v1599_v60 = vld [vmem:[#allocation7 + $0x268] sm:$0xff] }
 0x1d7   :  { %1698 = vmatpush.msra.mxu2 %v1612_v14  ;;  %1660 = vmatpush.msra.mxu0 %v1544_v16  ;;  %v1608_v23 = vld [vmem:[#allocation7 + $0x2b0] sm:$0xff]  ;;  %v1617_v14 = vld [vmem:[#allocation7 + $0x2f8] sm:$0xff]  ;;  %v1615_v16 = vld [vmem:[#allocation7 + $0x2e8] sm:$0xff] }
 0x1d8   :  { %1680 = vmatpush.msra.mxu1 %v1576_v17  ;;  %v1540_v27 = vld [vmem:[#allocation7 + $0x90] sm:$0xff]  ;;  %v1519_v7 = vmax.f32 %v3387_v47, 0.0  ;;  %v1545_v17 = vld [vmem:[#allocation7 + $0xb8] sm:$0xff]  ;;  %v1622_v0 = vld [vmem:[#allocation7 + $0x320] sm:$0xff] }
 0x1d9   :  { %v1572_v29 = vld [vmem:[#allocation7 + $0x190] sm:$0xff]  ;;  %1699 = vmatpush.msra.mxu2 %v1610_v19  ;;  %1661 = vmatpush.msra.mxu0 %v1542_v20  ;;  %v1613_v19 = vld [vmem:[#allocation7 + $0x2d8] sm:$0xff]  ;;  %v1543_v20 = vld [vmem:[#allocation7 + $0xa8] sm:$0xff] }
 0x1da   :  { %1681 = vmatpush.msra.mxu1 %v1574_v21  ;;  %v1604_v35 = vld [vmem:[#allocation7 + $0x290] sm:$0xff]  ;;  %v1575_v21 = vld [vmem:[#allocation7 + $0x1a8] sm:$0xff]  ;;  %v1533_v54 = vld [vmem:[#allocation7 + $0x58] sm:$0xff] }
 0x1db   :  { %1700 = vmatpush.msra.mxu2 %v1608_v23  ;;  %1662 = vmatpush.msra.mxu0 %v1540_v27  ;;  %v1536_v39 = vld [vmem:[#allocation7 + $0x70] sm:$0xff]  ;;  %v1573_v27 = vld [vmem:[#allocation7 + $0x198] sm:$0xff] }
 0x1dc   :  { %1682 = vmatpush.msra.mxu1 %v1572_v29  ;;  %v1568_v40 = vld [vmem:[#allocation7 + $0x170] sm:$0xff]  ;;  %v1609_v29 = vld [vmem:[#allocation7 + $0x2b8] sm:$0xff] }
 0x1dd   :  { %1701 = vmatpush.msra.mxu2 %v1606_v31  ;;  %1663 = vmatpush.msra.mxu0 %v1538_v32  ;;  %v1600_v53 = vld [vmem:[#allocation7 + $0x270] sm:$0xff]  ;;  %v1571_v31 = vld [vmem:[#allocation7 + $0x188] sm:$0xff]  ;;  %v1565_v55 = vld [vmem:[#allocation7 + $0x158] sm:$0xff] }
 0x1de   :  { %1683 = vmatpush.msra.mxu1 %v1570_v34  ;;  %v1532_v56 = vld [vmem:[#allocation7 + $0x50] sm:$0xff]  ;;  %v1607_v32 = vld [vmem:[#allocation7 + $0x2a8] sm:$0xff]  ;;  %v1537_v34 = vld [vmem:[#allocation7 + $0x78] sm:$0xff] }
 0x1df   :  { %1702 = vmatpush.msra.mxu2 %v1604_v35  ;;  %1664 = vmatpush.msra.mxu0 %v1536_v39  ;;  %v1564_v48 = vld [vmem:[#allocation7 + $0x150] sm:$0xff]  ;;  %v1569_v35 = vld [vmem:[#allocation7 + $0x178] sm:$0xff]  ;;  %v1646_v39 = vld [vmem:[#allocation7 + $0x3e0] sm:$0xff] }
 0x1e0   :  { %1684 = vmatpush.msra.mxu1 %v1568_v40  ;;  %v1596_v46 = vld [vmem:[#allocation7 + $0x250] sm:$0xff]  ;;  %v1561_v51 = vld [vmem:[#allocation7 + $0x138] sm:$0xff] }
 0x1e1   :  { %1703 = vmatpush.msra.mxu2 %v1602_v43  ;;  %1665 = vmatpush.msra.mxu0 %v1534_v44  ;;  %v1528_v49 = vld [vmem:[#allocation7 + $0x30] sm:$0xff]  ;;  %v1567_v43 = vld [vmem:[#allocation7 + $0x168] sm:$0xff]  ;;  %v1215_v44 = vpop.f32.mrf.mxu0 }
 0x1e2   :  { %1685 = vmatpush.msra.mxu1 %v1566_v52  ;;  %v1560_v26 = vld [vmem:[#allocation7 + $0x130] sm:$0xff]  ;;  %v1603_v52 = vld [vmem:[#allocation7 + $0x288] sm:$0xff] }
 0x1e3   :  { %1704 = vmatpush.msra.mxu2 %v1600_v53  ;;  %1666 = vmatpush.msra.mxu0 %v1532_v56  ;;  %v1592_v63 = vld [vmem:[#allocation7 + $0x230] sm:$0xff]  ;;  %v1642_v53 = vld [vmem:[#allocation7 + $0x3c0] sm:$0xff]  ;;  %v1216_v56 = vadd.f32 %v1215_v44, %v851_v36  ;;  %v1637_v36 = vld [vmem:[#allocation7 + $0x398] sm:$0xff] }
 0x1e4   :  { %1686 = vmatpush.msra.mxu1 %v1564_v48  ;;  %v1524_v59 = vld [vmem:[#allocation7 + $0x10] sm:$0xff]  ;;  %v1601_v48 = vld [vmem:[#allocation7 + $0x278] sm:$0xff] }
 0x1e5   :  { %1705 = vmatpush.msra.mxu2 %v1598_v57  ;;  %1667 = vmatpush.msra.mxu0 %v1530_v22  ;;  %v1556_v2 = vld [vmem:[#allocation7 + $0x110] sm:$0xff]  ;;  %v1531_v57 = vld [vmem:[#allocation7 + $0x48] sm:$0xff]  ;;  %v1625_v44 = vld [vmem:[#allocation7 + $0x338] sm:$0xff] }
 0x1e6   :  { %1687 = vmatpush.msra.mxu1 %v1562_v58  ;;  %v1588_v9 = vld [vmem:[#allocation7 + $0x210] sm:$0xff]  ;;  %v1563_v22 = vld [vmem:[#allocation7 + $0x148] sm:$0xff]  ;;  %v1235_v58 = vpop.f32.mrf.mxu1 }
 0x1e7   :  { %1706 = vmatpush.msra.mxu2 %v1596_v46  ;;  %1668 = vmatpush.msra.mxu0 %v1528_v49  ;;  %v1648_v23 = vld [vmem:[#allocation7 + $0x3f0] sm:$0xff]  ;;  %v1236_v46 = vadd.f32 %v1235_v58, %v1216_v56  ;;  %v1638_v49 = vld [vmem:[#allocation7 + $0x3a0] sm:$0xff] }
 0x1e8   :  { %1688 = vmatpush.msra.mxu1 %v1560_v26  ;;  %1716 = vmatpush.msra.mxu3 %v1648_v23  ;;  %v1644_v40 = vld [vmem:[#allocation7 + $0x3d0] sm:$0xff]  ;;  %v1529_v26 = vld [vmem:[#allocation7 + $0x38] sm:$0xff]  ;;  %v1587_v23 = vld [vmem:[#allocation7 + $0x208] sm:$0xff] }
 0x1e9   :  { %1707 = vmatpush.msra.mxu2 %v1594_v61  ;;  %1669 = vmatpush.msra.mxu0 %v1526_v62  ;;  %v1640_v37 = vld [vmem:[#allocation7 + $0x3b0] sm:$0xff]  ;;  %v1256_v61 = vadd.f32 %v1255_v28, %v1236_v46  ;;  %v1597_v62 = vld [vmem:[#allocation7 + $0x258] sm:$0xff] }
 0x1ea   :  { %1689 = vmatpush.msra.mxu1 %v1558_v33  ;;  %1717 = vmatpush.msra.mxu3 %v1646_v39  ;;  %v1636_v33 = vld [vmem:[#allocation7 + $0x390] sm:$0xff]  ;;  %v1633_v39 = vld [vmem:[#allocation7 + $0x378] sm:$0xff] }
 0x1eb   :  { %1708 = vmatpush.msra.mxu2 %v1592_v63  ;;  %1670 = vmatpush.msra.mxu0 %v1524_v59  ;;  %v1527_v63 = vld [vmem:[#allocation7 + $0x28] sm:$0xff]  ;;  %v1620_v47 = vld [vmem:[#allocation7 + $0x310] sm:$0xff] }
 0x1ec   :  { %1690 = vmatpush.msra.mxu1 %v1556_v2  ;;  %1718 = vmatpush.msra.mxu3 %v1644_v40  ;;  %v1559_v59 = vld [vmem:[#allocation7 + $0x128] sm:$0xff]  ;;  %v1275_v2 = vpop.f32.mrf.mxu3 }
 0x1ed   :  { %1709 = vmatpush.msra.mxu2 %v1590_v3  ;;  %1671 = vmatpush.msra.mxu0 %v1522_v4  ;;  %v1276_v3 = vadd.f32 %v1275_v2, %v1256_v61  ;;  %v1595_v4 = vld [vmem:[#allocation7 + $0x248] sm:$0xff] }
 0x1ee   :  { %1691 = vmatpush.msra.mxu1 %v1554_v5  ;;  %1672 = vmatmul.f32.vlgmr.msra.gmra.mxu0 %v1518_v6  ;;  %v1634_v5 = vld [vmem:[#allocation7 + $0x380] sm:$0xff]  ;;  %v1631_v40 = vld [vmem:[#allocation7 + $0x368] sm:$0xff] }
 0x1ef   :  { %1692 = vmatmul.f32.vlgmr.msra.gmra.mxu1 %v1519_v7  ;;  %1736 = vmatpush.msrb.mxu0 %v1553_v8  ;;  %v1525_v8 = vld [vmem:[#allocation7 + $0x18] sm:$0xff]  ;;  %v1953_v2 = vld [vmem:[%s3818_s13 + $0x78] sm:$0xff] }
 0x1f0   :  { %1756 = vmatpush.msrb.mxu1 %v1585_v1  ;;  %1710 = vmatpush.msra.mxu2 %v1588_v9  ;;  %v1557_v1 = vld [vmem:[#allocation7 + $0x118] sm:$0xff] }
 0x1f1   :  { %1737 = vmatpush.msrb.mxu0 %v1551_v10  ;;  %1719 = vmatpush.msra.mxu3 %v1642_v53  ;;  %v1593_v10 = vld [vmem:[#allocation7 + $0x238] sm:$0xff] }
 0x1f2   :  { %1757 = vmatpush.msrb.mxu1 %v1583_v11  ;;  %1711 = vmatpush.msra.mxu2 %v1586_v42  ;;  %v1632_v11 = vld [vmem:[#allocation7 + $0x370] sm:$0xff]  ;;  %v1523_v42 = vld [vmem:[#allocation7 + $0x8] sm:$0xff]  ;;  %v1621_v53 = vld [vmem:[#allocation7 + $0x318] sm:$0xff] }
 0x1f3   :  { %1738 = vmatpush.msrb.mxu0 %v1549_v12  ;;  %1720 = vmatpush.msra.mxu3 %v1640_v37  ;;  %v1555_v12 = vld [vmem:[#allocation7 + $0x108] sm:$0xff] }
 0x1f4   :  { %1758 = vmatpush.msrb.mxu1 %v1581_v13  ;;  %1776 = vmatpush.msrb.mxu2 %v1617_v14 }
 0x1f5   :  { %1739 = vmatpush.msrb.mxu0 %v1547_v15  ;;  %1721 = vmatpush.msra.mxu3 %v1638_v49  ;;  %v1591_v15 = vld [vmem:[#allocation7 + $0x228] sm:$0xff] }
 0x1f6   :  { %1759 = vmatpush.msrb.mxu1 %v1579_v50  ;;  %1777 = vmatpush.msrb.mxu2 %v1615_v16  ;;  %v1630_v50 = vld [vmem:[#allocation7 + $0x360] sm:$0xff] }
 0x1f7   :  { %1740 = vmatpush.msrb.mxu0 %v1545_v17  ;;  %1722 = vmatpush.msra.mxu3 %v1636_v33 }
 0x1f8   :  { %1760 = vmatpush.msrb.mxu1 %v1577_v18  ;;  %1778 = vmatpush.msrb.mxu2 %v1613_v19  ;;  %v1589_v18 = vld [vmem:[#allocation7 + $0x218] sm:$0xff]  ;;  %v1628_v19 = vld [vmem:[#allocation7 + $0x350] sm:$0xff] }
 0x1f9   :  { %1741 = vmatpush.msrb.mxu0 %v1543_v20  ;;  %1723 = vmatpush.msra.mxu3 %v1634_v5  ;;  %v1952_v5 = vld [vmem:[%s3818_s13 + $0x70] sm:$0xff] }
 0x1fa   :  { %1761 = vmatpush.msrb.mxu1 %v1575_v21  ;;  %1779 = vmatpush.msrb.mxu2 %v1611_v24  ;;  %v1626_v24 = vld [vmem:[#allocation7 + $0x340] sm:$0xff] }
 0x1fb   :  { %1742 = vmatpush.msrb.mxu0 %v1541_v25  ;;  %1724 = vmatpush.msra.mxu3 %v1632_v11  ;;  %v1831_v11 = vld [vmem:[#allocation10 + $0x68] sm:$0xff] }
 0x1fc   :  { %1762 = vmatpush.msrb.mxu1 %v1573_v27  ;;  %1780 = vmatpush.msrb.mxu2 %v1609_v29  ;;  %v1624_v27 = vld [vmem:[#allocation7 + $0x330] sm:$0xff] }
 0x1fd   :  { %1743 = vmatpush.msrb.mxu0 %v1539_v30  ;;  %1725 = vmatpush.msra.mxu3 %v1630_v50  ;;  %v1647_v30 = vld [vmem:[#allocation7 + $0x3e8] sm:$0xff] }
 0x1fe   :  { %1763 = vmatpush.msrb.mxu1 %v1571_v31  ;;  %1781 = vmatpush.msrb.mxu2 %v1607_v32  ;;  %v1645_v31 = vld [vmem:[#allocation7 + $0x3d8] sm:$0xff]  ;;  %v1643_v32 = vld [vmem:[#allocation7 + $0x3c8] sm:$0xff] }
 0x1ff   :  { %1744 = vmatpush.msrb.mxu0 %v1537_v34  ;;  %v1295_v9 = vpop.f32.mrf.mxu0  ;;  %1726 = vmatpush.msra.mxu3 %v1628_v19  ;;  %v1641_v34 = vld [vmem:[#allocation7 + $0x3b8] sm:$0xff]  ;;  %v1907_v50 = vld [vmem:[%s3858_s9 + $0x58] sm:$0xff]  ;;  %v1906_v19 = vld [vmem:[%s3858_s9 + $0x50] sm:$0xff] }
 0x200   :  { %1764 = vmatpush.msrb.mxu1 %v1569_v35  ;;  %1782 = vmatpush.msrb.mxu2 %v1605_v38  ;;  %v1296_v13 = vadd.f32 %v1295_v9, %v1276_v3  ;;  %v1639_v35 = vld [vmem:[#allocation7 + $0x3a8] sm:$0xff]  ;;  %v1833_v3 = vld [vmem:[#allocation10 + $0x78] sm:$0xff] }
 0x201   :  { %1745 = vmatpush.msrb.mxu0 %v1535_v41  ;;  %1727 = vmatpush.msra.mxu3 %v1626_v24  ;;  %v1635_v38 = vld [vmem:[#allocation7 + $0x388] sm:$0xff]  ;;  %v1629_v41 = vld [vmem:[#allocation7 + $0x358] sm:$0xff] }
 0x202   :  { %1765 = vmatpush.msrb.mxu1 %v1567_v43  ;;  %1783 = vmatpush.msrb.mxu2 %v1603_v52  ;;  %v1627_v43 = vld [vmem:[#allocation7 + $0x348] sm:$0xff]  ;;  %v1909_v9 = vld [vmem:[%s3858_s9 + $0x68] sm:$0xff] }
 0x203   :  { %1746 = vmatpush.msrb.mxu0 %v1533_v54  ;;  %1728 = vmatpush.msra.mxu3 %v1624_v27  ;;  %v1623_v52 = vld [vmem:[#allocation7 + $0x328] sm:$0xff]  ;;  %v1905_v24 = vld [vmem:[%s3858_s9 + $0x48] sm:$0xff] }
 0x204   :  { %1766 = vmatpush.msrb.mxu1 %v1565_v55  ;;  %1784 = vmatpush.msrb.mxu2 %v1601_v48  ;;  %v1619_v54 = vld [vmem:[#allocation7 + $0x308] sm:$0xff]  ;;  %v852_v55 = vperm.slane %v3362_v45, 3 }
 0x205   :  { %1747 = vmatpush.msrb.mxu0 %v1531_v57  ;;  %1729 = vmatpush.msra.mxu3 %v1622_v0  ;;  %v1911_v45 = vld [vmem:[%s3858_s9 + $0x78] sm:$0xff]  ;;  %v1904_v0 = vld [vmem:[%s3858_s9 + $0x40] sm:$0xff] }
 0x206   :  { %1767 = vmatpush.msrb.mxu1 %v1563_v22  ;;  %1785 = vmatpush.msrb.mxu2 %v1599_v60  ;;  %v1315_v14 = vpop.f32.mrf.mxu1  ;;  %v1827_v27 = vld [vmem:[#allocation10 + $0x48] sm:$0xff] }
 0x207   :  { %1748 = vmatpush.msrb.mxu0 %v1529_v26  ;;  %v1316_v16 = vadd.f32 %v1315_v14, %v1296_v13  ;;  %v1335_v17 = vpop.f32.mrf.mxu2  ;;  %1730 = vmatpush.msra.mxu3 %v1620_v47  ;;  %v1950_v13 = vld [vmem:[%s3818_s13 + $0x60] sm:$0xff]  ;;  %v1830_v14 = vld [vmem:[#allocation10 + $0x60] sm:$0xff] }
 0x208   :  { %1768 = vmatpush.msrb.mxu1 %v1561_v51  ;;  %1786 = vmatpush.msrb.mxu2 %v1597_v62  ;;  %v1946_v47 = vld [vmem:[%s3818_s13 + $0x40] sm:$0xff] }
 0x209   :  { %1749 = vmatpush.msrb.mxu0 %v1527_v63  ;;  %v1336_v20 = vadd.f32 %v1335_v17, %v1316_v16  ;;  %v1949_v16 = vld [vmem:[%s3818_s13 + $0x58] sm:$0xff]  ;;  %v1829_v17 = vld [vmem:[#allocation10 + $0x58] sm:$0xff] }
 0x20a   :  { %1769 = vmatpush.msrb.mxu1 %v1559_v59  ;;  %1787 = vmatpush.msrb.mxu2 %v1595_v4  ;;  %v1355_v21 = vpop.f32.mrf.mxu3  ;;  %v1910_v4 = vld [vmem:[%s3858_s9 + $0x70] sm:$0xff] }
 0x20b   :  { %1750 = vmatpush.msrb.mxu0 %v1525_v8  ;;  %v1356_v25 = vadd.f32 %v1355_v21, %v1336_v20  ;;  %v1832_v8 = vld [vmem:[#allocation10 + $0x70] sm:$0xff]  ;;  %v1948_v20 = vld [vmem:[%s3818_s13 + $0x50] sm:$0xff] }
 0x20c   :  { %1770 = vmatpush.msrb.mxu1 %v1557_v1  ;;  %1788 = vmatpush.msrb.mxu2 %v1593_v10  ;;  %v1849_v1 = vld [vmem:[#allocation10 + $0xf8] sm:$0xff]  ;;  %v1828_v21 = vld [vmem:[#allocation10 + $0x50] sm:$0xff] }
 0x20d   :  { %1751 = vmatpush.msrb.mxu0 %v1523_v42  ;;  %v1520_v29 = vmax.f32 %v1356_v25, 0.0  ;;  %v1951_v10 = vld [vmem:[%s3818_s13 + $0x68] sm:$0xff]  ;;  %v1848_v42 = vld [vmem:[#allocation10 + $0xf0] sm:$0xff] }
 0x20e   :  { %1771 = vmatpush.msrb.mxu1 %v1555_v12  ;;  %1752 = vmatmul.f32.vlgmr.msrb.gmra.mxu0 %v1518_v6  ;;  %v1618_v6 = vld [vmem:[#allocation7 + $0x300] sm:$0xff]  ;;  %v1908_v12 = vld [vmem:[%s3858_s9 + $0x60] sm:$0xff] }
 0x20f   :  { %1772 = vmatmul.f32.vlgmr.msrb.gmra.mxu1 %v1519_v7  ;;  %1789 = vmatpush.msrb.mxu2 %v1591_v15  ;;  %v1649_v7 = vld [vmem:[#allocation7 + $0x3f8] sm:$0xff]  ;;  %v1847_v15 = vld [vmem:[#allocation10 + $0xe8] sm:$0xff] }
 0x210   :  { %1712 = vmatmul.f32.vlgmr.msra.gmra.mxu2 %v1520_v29  ;;  %1731 = vmatpush.msra.mxu3 %v1618_v6  ;;  %v1947_v25 = vld [vmem:[%s3818_s13 + $0x48] sm:$0xff] }
 0x211   :  { %1790 = vmatpush.msrb.mxu2 %v1589_v18  ;;  %1854 = vmatpush.msra.mxu0 %v1833_v3  ;;  %v1846_v18 = vld [vmem:[#allocation10 + $0xe0] sm:$0xff] }
 0x212   :  { %1796 = vmatpush.msrb.mxu3 %v1649_v7  ;;  %1874 = vmatpush.msra.mxu1 %v1849_v1  ;;  %v1826_v6 = vld [vmem:[#allocation10 + $0x40] sm:$0xff]  ;;  %v1843_v7 = vld [vmem:[#allocation10 + $0xc8] sm:$0xff] }
 0x213   :  { %1791 = vmatpush.msrb.mxu2 %v1587_v23  ;;  %1855 = vmatpush.msra.mxu0 %v1832_v8  ;;  %v1845_v23 = vld [vmem:[#allocation10 + $0xd8] sm:$0xff]  ;;  %v2026_v3 = vld [vmem:[%s3820_s15 + $0x170] sm:$0xff]  ;;  %v2011_v1 = vld [vmem:[%s3820_s15 + $0xf8] sm:$0xff] }
 0x214   :  { %1797 = vmatpush.msrb.mxu3 %v1647_v30  ;;  %1875 = vmatpush.msra.mxu1 %v1848_v42  ;;  %v1903_v30 = vld [vmem:[%s3858_s9 + $0x38] sm:$0xff]  ;;  %v1994_v8 = vld [vmem:[%s3820_s15 + $0x70] sm:$0xff] }
 0x215   :  { %1916 = vmatpush.msra.mxu2 %v1911_v45  ;;  %1856 = vmatpush.msra.mxu0 %v1831_v11  ;;  %v1835_v45 = vld [vmem:[#allocation10 + $0x88] sm:$0xff]  ;;  %v1993_v11 = vld [vmem:[%s3820_s15 + $0x68] sm:$0xff] }
 0x216   :  { %1798 = vmatpush.msrb.mxu3 %v1645_v31  ;;  %1876 = vmatpush.msra.mxu1 %v1847_v15  ;;  %v1945_v31 = vld [vmem:[%s3818_s13 + $0x38] sm:$0xff]  ;;  %v2010_v42 = vld [vmem:[%s3820_s15 + $0xf0] sm:$0xff]  ;;  %v2009_v15 = vld [vmem:[%s3820_s15 + $0xe8] sm:$0xff] }
 0x217   :  { %1917 = vmatpush.msra.mxu2 %v1910_v4  ;;  %1857 = vmatpush.msra.mxu0 %v1830_v14  ;;  %v2116_v4 = vld [vmem:[%s3822_s17 + $0x70] sm:$0xff]  ;;  %v1992_v14 = vld [vmem:[%s3820_s15 + $0x60] sm:$0xff] }
 0x218   :  { %1792 = vmatmul.f32.vlgmr.msrb.gmra.mxu2 %v1520_v29  ;;  %1799 = vmatpush.msrb.mxu3 %v1643_v32  ;;  %v1844_v29 = vld [vmem:[#allocation10 + $0xd0] sm:$0xff]  ;;  %v1825_v32 = vld [vmem:[#allocation10 + $0x38] sm:$0xff] }
 0x219   :  { %1918 = vmatpush.msra.mxu2 %v1909_v9  ;;  %1858 = vmatpush.msra.mxu0 %v1829_v17  ;;  %v2025_v9 = vld [vmem:[%s3820_s15 + $0x168] sm:$0xff]  ;;  %v1991_v17 = vld [vmem:[%s3820_s15 + $0x58] sm:$0xff] }
 0x21a   :  { %1800 = vmatpush.msrb.mxu3 %v1641_v34  ;;  %1877 = vmatpush.msra.mxu1 %v1846_v18  ;;  %v1842_v34 = vld [vmem:[#allocation10 + $0xc0] sm:$0xff]  ;;  %v2008_v18 = vld [vmem:[%s3820_s15 + $0xe0] sm:$0xff] }
 0x21b   :  { %1919 = vmatpush.msra.mxu2 %v1908_v12  ;;  %1859 = vmatpush.msra.mxu0 %v1828_v21  ;;  %v2024_v12 = vld [vmem:[%s3820_s15 + $0x160] sm:$0xff]  ;;  %v1990_v21 = vld [vmem:[%s3820_s15 + $0x50] sm:$0xff] }
 0x21c   :  { %1801 = vmatpush.msrb.mxu3 %v1639_v35  ;;  %1878 = vmatpush.msra.mxu1 %v1845_v23  ;;  %v1902_v35 = vld [vmem:[%s3858_s9 + $0x30] sm:$0xff]  ;;  %v2007_v23 = vld [vmem:[%s3820_s15 + $0xd8] sm:$0xff] }
 0x21d   :  { %1920 = vmatpush.msra.mxu2 %v1907_v50  ;;  %1860 = vmatpush.msra.mxu0 %v1827_v27  ;;  %v2023_v50 = vld [vmem:[%s3820_s15 + $0x158] sm:$0xff]  ;;  %v1895_v27 = vld [vmem:[%s3859_s5] sm:$0x3] }
 0x21e   :  { %1802 = vmatpush.msrb.mxu3 %v1637_v36  ;;  %1879 = vmatpush.msra.mxu1 %v1844_v29  ;;  %v1944_v36 = vld [vmem:[%s3818_s13 + $0x30] sm:$0xff]  ;;  %v1989_v29 = vld [vmem:[%s3820_s15 + $0x48] sm:$0xff] }
 0x21f   :  { %1921 = vmatpush.msra.mxu2 %v1906_v19  ;;  %1861 = vmatpush.msra.mxu0 %v1826_v6  ;;  %v2022_v19 = vld [vmem:[%s3820_s15 + $0x150] sm:$0xff]  ;;  %v2110_v6 = vld [vmem:[%s3822_s17 + $0x40] sm:$0xff] }
 0x220   :  { %1803 = vmatpush.msrb.mxu3 %v1635_v38  ;;  %1880 = vmatpush.msra.mxu1 %v1843_v7  ;;  %v1824_v38 = vld [vmem:[#allocation10 + $0x30] sm:$0xff] }
 0x221   :  { %1922 = vmatpush.msra.mxu2 %v1905_v24  ;;  %1862 = vmatpush.msra.mxu0 %v1825_v32  ;;  %v2021_v24 = vld [vmem:[%s3820_s15 + $0x148] sm:$0xff]  ;;  %v1988_v7 = vld [vmem:[%s3820_s15 + $0x40] sm:$0xff]  ;;  %v2109_v32 = vld [vmem:[%s3822_s17 + $0x38] sm:$0xff] }
 0x222   :  { %1804 = vmatpush.msrb.mxu3 %v1633_v39  ;;  %v1841_v39 = vld [vmem:[#allocation10 + $0xb8] sm:$0xff]  ;;  %1881 = vmatpush.msra.mxu1 %v1842_v34  ;;  %v1987_v34 = vld [vmem:[%s3820_s15 + $0x38] sm:$0xff] }
 0x223   :  { %1923 = vmatpush.msra.mxu2 %v1904_v0  ;;  %1863 = vmatpush.msra.mxu0 %v1824_v38  ;;  %v2006_v0 = vld [vmem:[%s3820_s15 + $0xd0] sm:$0xff] }
 0x224   :  { %1805 = vmatpush.msrb.mxu3 %v1631_v40  ;;  %v1901_v40 = vld [vmem:[%s3858_s9 + $0x28] sm:$0xff]  ;;  %1882 = vmatpush.msra.mxu1 %v1841_v39  ;;  %v2108_v38 = vld [vmem:[%s3822_s17 + $0x30] sm:$0xff] }
 0x225   :  { %1924 = vmatpush.msra.mxu2 %v1903_v30  ;;  %v2005_v30 = vld [vmem:[%s3820_s15 + $0xc8] sm:$0xff]  ;;  %v1986_v39 = vld [vmem:[%s3820_s15 + $0x30] sm:$0xff] }
 0x226   :  { %1806 = vmatpush.msrb.mxu3 %v1629_v41  ;;  %v1943_v41 = vld [vmem:[%s3818_s13 + $0x28] sm:$0xff] }
 0x227   :  { %1925 = vmatpush.msra.mxu2 %v1902_v35  ;;  %v2004_v35 = vld [vmem:[%s3820_s15 + $0xc0] sm:$0xff] }
 0x228   :  { %1807 = vmatpush.msrb.mxu3 %v1627_v43  ;;  %v1823_v43 = vld [vmem:[#allocation10 + $0x28] sm:$0xff] }
 0x229   :  { %1926 = vmatpush.msra.mxu2 %v1901_v40  ;;  %1864 = vmatpush.msra.mxu0 %v1823_v43  ;;  %v2003_v40 = vld [vmem:[%s3820_s15 + $0xb8] sm:$0xff]  ;;  %v2107_v43 = vld [vmem:[%s3822_s17 + $0x28] sm:$0xff] }
 0x22a   :  { %1808 = vmatpush.msrb.mxu3 %v1625_v44  ;;  %v1840_v44 = vld [vmem:[#allocation10 + $0xb0] sm:$0xff] }
 0x22b   :  { %1883 = vmatpush.msra.mxu1 %v1840_v44  ;;  %v1985_v44 = vld [vmem:[%s3820_s15 + $0x28] sm:$0xff] }
 0x22c   :  { %1809 = vmatpush.msrb.mxu3 %v1623_v52  ;;  %v1900_v52 = vld [vmem:[%s3858_s9 + $0x20] sm:$0xff] }
 0x22d   :  { %1927 = vmatpush.msra.mxu2 %v1900_v52  ;;  %v2002_v52 = vld [vmem:[%s3820_s15 + $0xb0] sm:$0xff] }
 0x22e   :  { %1810 = vmatpush.msrb.mxu3 %v1621_v53  ;;  %v1942_v53 = vld [vmem:[%s3818_s13 + $0x20] sm:$0xff] }
 0x230   :  { %1811 = vmatpush.msrb.mxu3 %v1619_v54  ;;  %v1822_v54 = vld [vmem:[#allocation10 + $0x20] sm:$0xff] }
 0x231   :  { %1865 = vmatpush.msra.mxu0 %v1822_v54  ;;  %v2106_v54 = vld [vmem:[%s3822_s17 + $0x20] sm:$0xff] }
 0x23a   :  { %v1375_v56 = vpop.f32.mrf.mxu0 }
 0x23b   :  { %v1376_v48 = vadd.f32 %v1375_v56, %v852_v55  ;;  %v1395_v37 = vpop.f32.mrf.mxu1  ;;  %v1839_v55 = vld [vmem:[#allocation10 + $0xa8] sm:$0xff] }
 0x23c   :  { %v1899_v56 = vld [vmem:[%s3858_s9 + $0x18] sm:$0xff]  ;;  %1884 = vmatpush.msra.mxu1 %v1839_v55  ;;  %v1937_v55 = vld [vmem:[%s3860_s11] sm:$0x3] }
 0x23d   :  { %v1396_v57 = vadd.f32 %v1395_v37, %v1376_v48  ;;  %v1941_v48 = vld [vmem:[%s3818_s13 + $0x18] sm:$0xff]  ;;  %v1821_v37 = vld [vmem:[#allocation10 + $0x18] sm:$0xff]  ;;  %1928 = vmatpush.msra.mxu2 %v1899_v56 }
 0x23e   :  { %1866 = vmatpush.msra.mxu0 %v1821_v37  ;;  %v1984_v56 = vld [vmem:[%s3820_s15 + $0x20] sm:$0xff]  ;;  %v2015_v37 = vld [vmem:[%s3820_s15 + $0x118] sm:$0xff] }
 0x23f   :  { %v1415_v22 = vpop.f32.mrf.mxu2 }
 0x240   :  { %v1416_v58 = vadd.f32 %v1415_v22, %v1396_v57  ;;  %v1838_v57 = vld [vmem:[#allocation10 + $0xa0] sm:$0xff] }
 0x241   :  { %v1898_v22 = vld [vmem:[%s3858_s9 + $0x10] sm:$0xff]  ;;  %1885 = vmatpush.msra.mxu1 %v1838_v57  ;;  %v2105_v57 = vld [vmem:[%s3822_s17 + $0x18] sm:$0xff] }
 0x242   :  { %v1435_v46 = vpop.f32.mrf.mxu3  ;;  %1929 = vmatpush.msra.mxu2 %v1898_v22  ;;  %v1983_v22 = vld [vmem:[%s3820_s15 + $0x18] sm:$0xff] }
 0x243   :  { %v1436_v28 = vadd.f32 %v1435_v46, %v1416_v58  ;;  %v1940_v58 = vld [vmem:[%s3818_s13 + $0x10] sm:$0xff]  ;;  %v1820_v46 = vld [vmem:[#allocation10 + $0x10] sm:$0xff] }
 0x244   :  { %1867 = vmatpush.msra.mxu0 %v1820_v46  ;;  %v2014_v46 = vld [vmem:[%s3820_s15 + $0x110] sm:$0xff] }
 0x249   :  { %v1455_v60 = vpop.f32.mrf.mxu0 }
 0x24a   :  { %v1456_v49 = vadd.f32 %v1455_v60, %v1436_v28  ;;  %v1837_v28 = vld [vmem:[#allocation10 + $0x98] sm:$0xff] }
 0x24b   :  { %v1897_v60 = vld [vmem:[%s3858_s9 + $0x8] sm:$0xff]  ;;  %1886 = vmatpush.msra.mxu1 %v1837_v28  ;;  %v2104_v28 = vld [vmem:[%s3822_s17 + $0x10] sm:$0xff] }
 0x24c   :  { %v1475_v26 = vpop.f32.mrf.mxu1  ;;  %1930 = vmatpush.msra.mxu2 %v1897_v60  ;;  %v1982_v60 = vld [vmem:[%s3820_s15 + $0x10] sm:$0xff] }
 0x24d   :  { %v1476_v51 = vadd.f32 %v1475_v26, %v1456_v49  ;;  %v1939_v49 = vld [vmem:[%s3818_s13 + $0x8] sm:$0xff]  ;;  %v1819_v26 = vld [vmem:[#allocation10 + $0x8] sm:$0xff] }
 0x24e   :  { %1868 = vmatpush.msra.mxu0 %v1819_v26  ;;  %v2013_v26 = vld [vmem:[%s3820_s15 + $0x108] sm:$0xff] }
 0x251   :  { %v1495_v61 = vpop.f32.mrf.mxu2 }
 0x252   :  { %v1496_v62 = vadd.f32 %v1495_v61, %v1476_v51  ;;  %v1836_v51 = vld [vmem:[#allocation10 + $0x90] sm:$0xff] }
 0x253   :  { %v1896_v61 = vld [vmem:[%s3858_s9] sm:$0xff]  ;;  %1887 = vmatpush.msra.mxu1 %v1836_v51  ;;  %v2103_v51 = vld [vmem:[%s3822_s17 + $0x8] sm:$0xff] }
 0x254   :  { %1931 = vmatpush.msra.mxu2 %v1896_v61  ;;  %v1981_v61 = vld [vmem:[%s3820_s15 + $0x8] sm:$0xff] }
 0x255   :  { %v1515_v33 = vpop.f32.mrf.mxu3  ;;  %1888 = vmatpush.msra.mxu1 %v1835_v45  ;;  %1932 = vmatmul.f32.vlgmr.msra.gmra.mxu2 %v1895_v27  ;;  %v1650_v45 = vld [vmem:[#allocation8] sm:$0x3] }
 0x256   :  { %v1516_v63 = vadd.f32 %v1515_v33, %v1496_v62  ;;  %v1938_v62 = vld [vmem:[%s3818_s13] sm:$0xff]  ;;  %v2027_v33 = vld [vmem:[%s3820_s15 + $0x178] sm:$0xff] }
 0x257   :  { %2080 = vmatpush.msrb.mxu2 %v2027_v33  ;;  %v2012_v33 = vld [vmem:[%s3820_s15 + $0x100] sm:$0xff] }
 0x258   :  { %v1521_v59 = vmax.f32 %v1516_v63, 0.0  ;;  %v2117_v63 = vld [vmem:[%s3822_s17 + $0x78] sm:$0xff] }
 0x259   :  { %2081 = vmatpush.msrb.mxu2 %v2026_v3  ;;  %v1980_v3 = vld [vmem:[%s3820_s15] sm:$0xff] }
 0x25a   :  { %1732 = vmatmul.f32.vlgmr.msra.gmra.mxu3 %v1521_v59 }
 0x25b   :  { %1958 = vmatpush.msra.mxu3 %v1953_v2  ;;  %v1995_v2 = vld [vmem:[%s3820_s15 + $0x78] sm:$0xff]  ;;  %2082 = vmatpush.msrb.mxu2 %v2025_v9  ;;  %v2190_v9 = vld [vmem:[#allocation20 + $0x78] sm:$0xff] }
 0x25d   :  { %1959 = vmatpush.msra.mxu3 %v1952_v5  ;;  %v1834_v5 = vld [vmem:[#allocation10 + $0x80] sm:$0xff]  ;;  %2083 = vmatpush.msrb.mxu2 %v2024_v12 }
 0x25e   :  { %1889 = vmatpush.msra.mxu1 %v1834_v5  ;;  %v1996_v5 = vld [vmem:[%s3820_s15 + $0x80] sm:$0xff]  ;;  %v2185_v12 = vld [vmem:[#allocation20 + $0x50] sm:$0xff] }
 0x25f   :  { %1960 = vmatpush.msra.mxu3 %v1951_v10  ;;  %v2115_v10 = vld [vmem:[%s3822_s17 + $0x68] sm:$0xff]  ;;  %2084 = vmatpush.msrb.mxu2 %v2023_v50 }
 0x260   :  { %2060 = vmatpush.msrb.mxu1 %v2011_v1  ;;  %v2189_v1 = vld [vmem:[#allocation20 + $0x70] sm:$0xff] }
 0x261   :  { %1961 = vmatpush.msra.mxu3 %v1950_v13  ;;  %v2114_v13 = vld [vmem:[%s3822_s17 + $0x60] sm:$0xff]  ;;  %2085 = vmatpush.msrb.mxu2 %v2022_v19  ;;  %v2182_v19 = vld [vmem:[#allocation20 + $0x38] sm:$0xff] }
 0x262   :  { %1812 = vmatmul.f32.vlgmr.msrb.gmra.mxu3 %v1521_v59  ;;  %v1818_v59 = vld [vmem:[#allocation10] sm:$0xff]  ;;  %2061 = vmatpush.msrb.mxu1 %v2010_v42  ;;  %v2188_v42 = vld [vmem:[#allocation20 + $0x68] sm:$0xff] }
 0x263   :  { %1962 = vmatpush.msra.mxu3 %v1949_v16  ;;  %1869 = vmatpush.msra.mxu0 %v1818_v59  ;;  %v2113_v16 = vld [vmem:[%s3822_s17 + $0x58] sm:$0xff]  ;;  %v2036_v59 = vld.sshfl [vmem:[#allocation1 + $0x10] sm:$0xff pattern:$0x73625140] }
 0x264   :  { %2062 = vmatpush.msrb.mxu1 %v2009_v15  ;;  %2086 = vmatpush.msrb.mxu2 %v2021_v24  ;;  %v2183_v15 = vld [vmem:[#allocation20 + $0x40] sm:$0xff] }
 0x265   :  { %1963 = vmatpush.msra.mxu3 %v1948_v20  ;;  %2040 = vmatpush.msrb.mxu0 %v1995_v2  ;;  %v2112_v20 = vld [vmem:[%s3822_s17 + $0x50] sm:$0xff]  ;;  %v2101_v2 = vld [vmem:[%s3861_s14] sm:$0x3] }
 0x266   :  { %2063 = vmatpush.msrb.mxu1 %v2008_v18 }
 0x267   :  { %1964 = vmatpush.msra.mxu3 %v1947_v25  ;;  %2041 = vmatpush.msrb.mxu0 %v1994_v8  ;;  %v2111_v25 = vld [vmem:[%s3822_s17 + $0x48] sm:$0xff]  ;;  %v1652_v8 = vperm.slane %v1650_v45, 0 }
 0x268   :  { %2064 = vmatpush.msrb.mxu1 %v2007_v23  ;;  %v2179_v23 = vld [vmem:[#allocation20 + $0x20] sm:$0xff] }
 0x269   :  { %1965 = vmatpush.msra.mxu3 %v1946_v47  ;;  %2042 = vmatpush.msrb.mxu0 %v1993_v11  ;;  %v2020_v47 = vld [vmem:[%s3820_s15 + $0x140] sm:$0xff] }
 0x26a   :  { %2065 = vmatpush.msrb.mxu1 %v2006_v0  ;;  %2087 = vmatpush.msrb.mxu2 %v2020_v47  ;;  %v2178_v47 = vld [vmem:[#allocation20 + $0x18] sm:$0xff] }
 0x26b   :  { %1966 = vmatpush.msra.mxu3 %v1945_v31  ;;  %2043 = vmatpush.msrb.mxu0 %v1992_v14  ;;  %v2019_v31 = vld [vmem:[%s3820_s15 + $0x138] sm:$0xff]  ;;  %v1673_v11 = vpop.f32.mrf.mxu0 }
 0x26c   :  { %2066 = vmatpush.msrb.mxu1 %v2005_v30  ;;  %2088 = vmatpush.msrb.mxu2 %v2019_v31  ;;  %v1674_v14 = vadd.f32 %v1673_v11, %v1652_v8  ;;  %v1693_v18 = vpop.f32.mrf.mxu1  ;;  %v2175_v30 = vld [vmem:[#allocation20] sm:$0xff]  ;;  %v2176_v31 = vld [vmem:[#allocation20 + $0x8] sm:$0xff] }
 0x26d   :  { %1967 = vmatpush.msra.mxu3 %v1944_v36  ;;  %2044 = vmatpush.msrb.mxu0 %v1991_v17  ;;  %v2018_v36 = vld [vmem:[%s3820_s15 + $0x130] sm:$0xff]  ;;  %v2181_v17 = vld [vmem:[#allocation20 + $0x30] sm:$0xff]  ;;  %v2155_v8 = vld [vmem:[#allocation19 + $0x60] sm:$0xff] }
 0x26e   :  { %2067 = vmatpush.msrb.mxu1 %v2004_v35  ;;  %2089 = vmatpush.msrb.mxu2 %v2018_v36  ;;  %v2174_v35 = vld [vmem:[#allocation19 + $0xf8] sm:$0xff]  ;;  %v2151_v11 = vld [vmem:[#allocation19 + $0x40] sm:$0xff] }
 0x26f   :  { %1968 = vmatpush.msra.mxu3 %v1943_v41  ;;  %2045 = vmatpush.msrb.mxu0 %v1990_v21  ;;  %v2017_v41 = vld [vmem:[%s3820_s15 + $0x128] sm:$0xff]  ;;  %v1653_v21 = vperm.slane %v1650_v45, 1  ;;  %v2160_v45 = vld [vmem:[#allocation19 + $0x88] sm:$0xff] }
 0x270   :  { %2068 = vmatpush.msrb.mxu1 %v2003_v40  ;;  %2090 = vmatpush.msrb.mxu2 %v2017_v41  ;;  %v2171_v41 = vld [vmem:[#allocation19 + $0xe0] sm:$0xff] }
 0x271   :  { %1969 = vmatpush.msra.mxu3 %v1942_v53  ;;  %2046 = vmatpush.msrb.mxu0 %v1989_v29  ;;  %v2016_v53 = vld [vmem:[%s3820_s15 + $0x120] sm:$0xff]  ;;  %v2177_v29 = vld [vmem:[#allocation20 + $0x10] sm:$0xff] }
 0x272   :  { %2069 = vmatpush.msrb.mxu1 %v2002_v52  ;;  %2091 = vmatpush.msrb.mxu2 %v2016_v53  ;;  %v2169_v53 = vld [vmem:[#allocation19 + $0xd0] sm:$0xff] }
 0x273   :  { %1970 = vmatpush.msra.mxu3 %v1941_v48  ;;  %2047 = vmatpush.msrb.mxu0 %v1988_v7  ;;  %v2001_v48 = vld [vmem:[%s3820_s15 + $0xa8] sm:$0xff] }
 0x274   :  { %2070 = vmatpush.msrb.mxu1 %v2001_v48  ;;  %2092 = vmatpush.msrb.mxu2 %v2015_v37  ;;  %v2167_v37 = vld [vmem:[#allocation19 + $0xc0] sm:$0xff] }
 0x275   :  { %1971 = vmatpush.msra.mxu3 %v1940_v58  ;;  %2048 = vmatpush.msrb.mxu0 %v1987_v34  ;;  %v2000_v58 = vld [vmem:[%s3820_s15 + $0xa0] sm:$0xff]  ;;  %v2173_v34 = vld [vmem:[#allocation19 + $0xf0] sm:$0xff] }
 0x276   :  { %2071 = vmatpush.msrb.mxu1 %v2000_v58  ;;  %2093 = vmatpush.msrb.mxu2 %v2014_v46  ;;  %v2165_v46 = vld [vmem:[#allocation19 + $0xb0] sm:$0xff] }
 0x277   :  { %1972 = vmatpush.msra.mxu3 %v1939_v49  ;;  %2049 = vmatpush.msrb.mxu0 %v1986_v39  ;;  %v1999_v49 = vld [vmem:[%s3820_s15 + $0x98] sm:$0xff]  ;;  %v2289_v39 = vld [vmem:[#allocation22 + $0x70] sm:$0xff] }
 0x278   :  { %2072 = vmatpush.msrb.mxu1 %v1999_v49  ;;  %2094 = vmatpush.msrb.mxu2 %v2013_v26  ;;  %v2283_v49 = vld [vmem:[#allocation22 + $0x40] sm:$0xff] }
 0x279   :  { %1973 = vmatpush.msra.mxu3 %v1938_v62  ;;  %2050 = vmatpush.msrb.mxu0 %v1985_v44  ;;  %v1998_v62 = vld [vmem:[%s3820_s15 + $0x90] sm:$0xff]  ;;  %v2287_v44 = vld [vmem:[#allocation22 + $0x60] sm:$0xff] }
 0x27a   :  { %1974 = vmatmul.f32.vlgmr.msra.gmra.mxu3 %v1937_v55  ;;  %2073 = vmatpush.msrb.mxu1 %v1998_v62  ;;  %v2163_v26 = vld [vmem:[#allocation19 + $0xa0] sm:$0xff]  ;;  %v2161_v62 = vld [vmem:[#allocation19 + $0x90] sm:$0xff] }
 0x27b   :  { %2122 = vmatpush.msrb.mxu3 %v2117_v63  ;;  %2051 = vmatpush.msrb.mxu0 %v1984_v56  ;;  %v2102_v63 = vld [vmem:[%s3822_s17] sm:$0xff]  ;;  %v2285_v56 = vld [vmem:[#allocation22 + $0x50] sm:$0xff] }
 0x27c   :  { %2095 = vmatpush.msrb.mxu2 %v2012_v33  ;;  %v2162_v33 = vld [vmem:[#allocation19 + $0x98] sm:$0xff] }
 0x27d   :  { %2123 = vmatpush.msrb.mxu3 %v2116_v4  ;;  %2052 = vmatpush.msrb.mxu0 %v1983_v22  ;;  %v1997_v4 = vld [vmem:[%s3820_s15 + $0x88] sm:$0xff]  ;;  %v2034_v22 = vld.sshfl [vmem:[#allocation1] sm:$0xff pattern:$0x73625140] }
 0x27e   :  { %2096 = vmatmul.f32.vlgmr.msrb.gmra.mxu2 %v2036_v59  ;;  %2074 = vmatpush.msrb.mxu1 %v1997_v4  ;;  %v2159_v59 = vld [vmem:[#allocation19 + $0x80] sm:$0xff]  ;;  %v2158_v4 = vld [vmem:[#allocation19 + $0x78] sm:$0xff] }
 0x27f   :  { %2124 = vmatpush.msrb.mxu3 %v2115_v10  ;;  %2053 = vmatpush.msrb.mxu0 %v1982_v60  ;;  %v2187_v10 = vld [vmem:[#allocation20 + $0x60] sm:$0xff]  ;;  %v2290_v60 = vld [vmem:[#allocation22 + $0x78] sm:$0xff] }
 0x280   :  { %2203 = vmatpush.msra.mxu2 %v2189_v1  ;;  %2075 = vmatpush.msrb.mxu1 %v1996_v5  ;;  %v2284_v5 = vld [vmem:[#allocation22 + $0x48] sm:$0xff] }
 0x281   :  { %2125 = vmatpush.msrb.mxu3 %v2114_v13  ;;  %2054 = vmatpush.msrb.mxu0 %v1981_v61  ;;  %v2186_v13 = vld [vmem:[#allocation20 + $0x58] sm:$0xff]  ;;  %v2288_v61 = vld [vmem:[#allocation22 + $0x68] sm:$0xff] }
 0x282   :  { %2204 = vmatpush.msra.mxu2 %v2187_v10  ;;  %v2156_v1 = vld [vmem:[#allocation19 + $0x68] sm:$0xff]  ;;  %v2154_v10 = vld [vmem:[#allocation19 + $0x58] sm:$0xff] }
 0x283   :  { %2126 = vmatpush.msrb.mxu3 %v2113_v16  ;;  %2055 = vmatpush.msrb.mxu0 %v1980_v3  ;;  %v2184_v16 = vld [vmem:[#allocation20 + $0x48] sm:$0xff]  ;;  %v2157_v3 = vld [vmem:[#allocation19 + $0x70] sm:$0xff] }
 0x284   :  { %2205 = vmatpush.msra.mxu2 %v2185_v12  ;;  %v2604_v12 = vld [vmem:[#allocation13] ss:$0 sm:$0xff] }
 0x285   :  { %2127 = vmatpush.msrb.mxu3 %v2112_v20  ;;  %v1694_v20 = vadd.f32 %v1693_v18, %v1674_v14  ;;  %v2149_v14 = vld [vmem:[#allocation19 + $0x30] sm:$0xff] }
 0x286   :  { %2206 = vmatpush.msra.mxu2 %v2183_v15  ;;  %v2150_v15 = vld [vmem:[#allocation19 + $0x38] sm:$0xff] }
 0x287   :  { %2128 = vmatpush.msrb.mxu3 %v2111_v25  ;;  %v2180_v25 = vld [vmem:[#allocation20 + $0x28] sm:$0xff] }
 0x288   :  { %2207 = vmatpush.msra.mxu2 %v2181_v17  ;;  %v2147_v17 = vld [vmem:[#allocation19 + $0x20] sm:$0xff] }
 0x289   :  { %2129 = vmatpush.msrb.mxu3 %v2110_v6 }
 0x28a   :  { %2208 = vmatpush.msra.mxu2 %v2179_v23  ;;  %v2145_v23 = vld [vmem:[#allocation19 + $0x10] sm:$0xff] }
 0x28b   :  { %2130 = vmatpush.msrb.mxu3 %v2109_v32  ;;  %v1753_v24 = vpop.f32.mrf.mxu0 }
 0x28c   :  { %v1754_v6 = vadd.f32 %v1753_v24, %v1653_v21  ;;  %2209 = vmatpush.msra.mxu2 %v2177_v29  ;;  %v1773_v36 = vpop.f32.mrf.mxu1  ;;  %v2280_v21 = vld [vmem:[#allocation22 + $0x28] sm:$0xff]  ;;  %v2146_v24 = vld [vmem:[#allocation19 + $0x18] sm:$0xff] }
 0x28d   :  { %2131 = vmatpush.msrb.mxu3 %v2108_v38  ;;  %v2278_v29 = vld [vmem:[#allocation22 + $0x18] sm:$0xff] }
 0x28e   :  { %2210 = vmatpush.msra.mxu2 %v2175_v30  ;;  %v1774_v40 = vadd.f32 %v1773_v36, %v1754_v6  ;;  %v2275_v6 = vld [vmem:[#allocation22] sm:$0xff]  ;;  %v2350_v30 = vld [vmem:[#allocation23 + $0x70] sm:$0xff] }
 0x28f   :  { %2132 = vmatpush.msrb.mxu3 %v2107_v43  ;;  %v2172_v43 = vld [vmem:[#allocation19 + $0xe8] sm:$0xff]  ;;  %v2348_v36 = vld [vmem:[#allocation23 + $0x60] sm:$0xff] }
 0x290   :  { %2235 = vmatpush.msrb.mxu2 %v2173_v34  ;;  %v2412_v34 = vld [vmem:[#allocation25 + $0x78] sm:$0xff] }
 0x291   :  { %2133 = vmatpush.msrb.mxu3 %v2106_v54  ;;  %v2170_v54 = vld [vmem:[#allocation19 + $0xd8] sm:$0xff] }
 0x292   :  { %2236 = vmatpush.msrb.mxu2 %v2171_v41  ;;  %v2346_v41 = vld [vmem:[#allocation23 + $0x50] sm:$0xff] }
 0x293   :  { %2134 = vmatpush.msrb.mxu3 %v2105_v57  ;;  %v1713_v50 = vpop.f32.mrf.mxu2  ;;  %v2168_v57 = vld [vmem:[#allocation19 + $0xc8] sm:$0xff] }
 0x294   :  { %v1714_v27 = vadd.f32 %v1713_v50, %v1694_v20  ;;  %2237 = vmatpush.msrb.mxu2 %v2169_v53  ;;  %v2281_v50 = vld [vmem:[#allocation22 + $0x30] sm:$0xff]  ;;  %v2279_v20 = vld [vmem:[#allocation22 + $0x20] sm:$0xff]  ;;  %v2408_v53 = vld [vmem:[#allocation25 + $0x58] sm:$0xff] }
 0x295   :  { %2135 = vmatpush.msrb.mxu3 %v2104_v28  ;;  %v2166_v28 = vld [vmem:[#allocation19 + $0xb8] sm:$0xff] }
 0x296   :  { %2238 = vmatpush.msrb.mxu2 %v2167_v37  ;;  %v2406_v37 = vld [vmem:[#allocation25 + $0x48] sm:$0xff] }
 0x297   :  { %2136 = vmatpush.msrb.mxu3 %v2103_v51  ;;  %v2164_v51 = vld [vmem:[#allocation19 + $0xa8] sm:$0xff] }
 0x298   :  { %2239 = vmatpush.msrb.mxu2 %v2165_v46  ;;  %v2403_v46 = vld [vmem:[#allocation25 + $0x30] sm:$0xff] }
 0x299   :  { %2137 = vmatpush.msrb.mxu3 %v2102_v63  ;;  %v2286_v63 = vld [vmem:[#allocation22 + $0x58] sm:$0xff] }
 0x29a   :  { %2138 = vmatmul.f32.vlgmr.msrb.gmra.mxu3 %v2101_v2  ;;  %2240 = vmatpush.msrb.mxu2 %v2163_v26  ;;  %v2035_v2 = vld.sshfl [vmem:[#allocation1 + $0x8] sm:$0xff pattern:$0x73625140]  ;;  %v2341_v26 = vld [vmem:[#allocation23 + $0x28] sm:$0xff] }
 0x29b   :  { %2223 = vmatpush.msra.mxu3 %v2190_v9  ;;  %v1793_v38 = vpop.f32.mrf.mxu2  ;;  %v2153_v9 = vld [vmem:[#allocation19 + $0x50] sm:$0xff] }
 0x29c   :  { %v1794_v52 = vadd.f32 %v1793_v38, %v1774_v40  ;;  %2241 = vmatpush.msrb.mxu2 %v2161_v62  ;;  %v2349_v38 = vld [vmem:[#allocation23 + $0x68] sm:$0xff]  ;;  %v2338_v62 = vld [vmem:[#allocation23 + $0x10] sm:$0xff] }
 0x29d   :  { %2224 = vmatpush.msra.mxu3 %v2188_v42  ;;  %v2152_v42 = vld [vmem:[#allocation19 + $0x48] sm:$0xff] }
 0x29e   :  { %2242 = vmatpush.msrb.mxu2 %v2159_v59  ;;  %v2410_v40 = vld [vmem:[#allocation25 + $0x68] sm:$0xff]  ;;  %v2399_v59 = vld [vmem:[#allocation25 + $0x10] sm:$0xff] }
 0x29f   :  { %2225 = vmatpush.msra.mxu3 %v2186_v13 }
 0x2a0   :  { %2243 = vmatpush.msrb.mxu2 %v2157_v3  ;;  %v2336_v3 = vld [vmem:[#allocation23] sm:$0xff] }
 0x2a1   :  { %2226 = vmatpush.msra.mxu3 %v2184_v16  ;;  %v2282_v16 = vld [vmem:[#allocation22 + $0x38] sm:$0xff] }
 0x2a2   :  { %2244 = vmatpush.msrb.mxu2 %v2155_v8  ;;  %v2398_v8 = vld [vmem:[#allocation25 + $0x8] sm:$0xff] }
 0x2a3   :  { %2227 = vmatpush.msra.mxu3 %v2182_v19  ;;  %v2148_v19 = vld [vmem:[#allocation19 + $0x28] sm:$0xff] }
 0x2a4   :  { %2245 = vmatpush.msrb.mxu2 %v2153_v9  ;;  %v2483_v9 = vld [vmem:[%s3862_s12 + $0x78] sm:$0xff] }
 0x2a5   :  { %2228 = vmatpush.msra.mxu3 %v2180_v25 }
 0x2a6   :  { %2246 = vmatpush.msrb.mxu2 %v2151_v11  ;;  %v2482_v11 = vld [vmem:[%s3862_s12 + $0x70] sm:$0xff] }
 0x2a7   :  { %2229 = vmatpush.msra.mxu3 %v2178_v47  ;;  %v2144_v47 = vld [vmem:[#allocation19 + $0x8] sm:$0xff] }
 0x2a8   :  { %2247 = vmatpush.msrb.mxu2 %v2149_v14 }
 0x2a9   :  { %2230 = vmatpush.msra.mxu3 %v2176_v31  ;;  %v2351_v31 = vld [vmem:[#allocation23 + $0x78] sm:$0xff] }
 0x2aa   :  { %2248 = vmatpush.msrb.mxu2 %v2147_v17 }
 0x2ab   :  { %2255 = vmatpush.msrb.mxu3 %v2174_v35  ;;  %v2605_v35 = vld [vmem:[#allocation14] ss:$0 sm:$0xff] }
 0x2ac   :  { %2249 = vmatpush.msrb.mxu2 %v2145_v23 }
 0x2ad   :  { %2256 = vmatpush.msrb.mxu3 %v2172_v43 }
 0x2af   :  { %2257 = vmatpush.msrb.mxu3 %v2170_v54 }
 0x2b1   :  { %2258 = vmatpush.msrb.mxu3 %v2168_v57 }
 0x2b3   :  { %2259 = vmatpush.msrb.mxu3 %v2166_v28  ;;  %v2404_v28 = vld [vmem:[#allocation25 + $0x38] sm:$0xff] }
 0x2b5   :  { %2260 = vmatpush.msrb.mxu3 %v2164_v51  ;;  %v2401_v51 = vld [vmem:[#allocation25 + $0x20] sm:$0xff] }
 0x2b7   :  { %2261 = vmatpush.msrb.mxu3 %v2162_v33  ;;  %v2339_v33 = vld [vmem:[#allocation23 + $0x18] sm:$0xff] }
 0x2b9   :  { %2262 = vmatpush.msrb.mxu3 %v2160_v45  ;;  %v2400_v45 = vld [vmem:[#allocation25 + $0x18] sm:$0xff] }
 0x2bb   :  { %2263 = vmatpush.msrb.mxu3 %v2158_v4  ;;  %v2337_v4 = vld [vmem:[#allocation23 + $0x8] sm:$0xff] }
 0x2bd   :  { %2264 = vmatpush.msrb.mxu3 %v2156_v1 }
 0x2bf   :  { %2265 = vmatpush.msrb.mxu3 %v2154_v10  ;;  %v2499_v10 = vld [vmem:[%s3862_s12 + $0xf8] sm:$0xff] }
 0x2c1   :  { %2266 = vmatpush.msrb.mxu3 %v2152_v42  ;;  %v2498_v42 = vld [vmem:[%s3862_s12 + $0xf0] sm:$0xff] }
 0x2c3   :  { %2267 = vmatpush.msrb.mxu3 %v2150_v15  ;;  %v2603_v15 = vld [vmem:[#allocation11] ss:$0 sm:$0xff] }
 0x2c5   :  { %2268 = vmatpush.msrb.mxu3 %v2148_v19 }
 0x2c7   :  { %2269 = vmatpush.msrb.mxu3 %v2146_v24 }
 0x2c9   :  { %2270 = vmatpush.msrb.mxu3 %v2144_v47  ;;  %v2496_v47 = vld [vmem:[%s3862_s12 + $0xe0] sm:$0xff] }
 0x2d8   :  { %v1933_v13 = vpop.f32.mrf.mxu2 }
 0x2d9   :  { %v1934_v18 = vadd.f32 %v2604_v12, %v1933_v13  ;;  %v2481_v12 = vld [vmem:[%s3862_s12 + $0x68] sm:$0xff] }
 0x2da   :  { %v2497_v13 = vld [vmem:[%s3862_s12 + $0xe8] sm:$0xff] }
 0x2db   :  { %v1936_v25 = vmax.f32 %v1934_v18, 0.0  ;;  %v2606_v18 = vld [vmem:[#allocation16] ss:$0 sm:$0xff] }
 0x2dd   :  { %v1733_v0 = vpop.f32.mrf.mxu3  ;;  %2571 = vmatmul.msk.f32.vlgmr.msra.gmra.mxu2 %vm2191_vm0, %v1936_v25  ;;  %2572 = vmatmul.msk.f32.vlgmr.msra.gmra.mxu3 %vm2191_vm0, %v1936_v25 }
 0x2de   :  { %v1734_v7 = vadd.f32 %v1733_v0, %v1714_v27  ;;  %v2277_v27 = vld [vmem:[#allocation22 + $0x10] sm:$0xff]  ;;  %v2143_v0 = vld [vmem:[#allocation19] sm:$0xff]  ;;  %2444 = vmatpush.msra.mxu3 %v2412_v34 }
 0x2df   :  { %2250 = vmatpush.msrb.mxu2 %v2143_v0  ;;  %v2480_v0 = vld [vmem:[%s3862_s12 + $0x60] sm:$0xff]  ;;  %v2493_v34 = vld [vmem:[%s3862_s12 + $0xc8] sm:$0xff] }
 0x2e0   :  { %v1816_v32 = vmax.f32 %v1734_v7, 0.0  ;;  %v2276_v7 = vld [vmem:[#allocation22 + $0x8] sm:$0xff]  ;;  %2445 = vmatpush.msra.mxu3 %v2410_v40  ;;  %v2474_v40 = vld [vmem:[%s3862_s12 + $0x30] sm:$0xff] }
 0x2e2   :  { %1870 = vmatmul.f32.vlgmr.msra.gmra.mxu0 %v1816_v32  ;;  %v2411_v32 = vld [vmem:[#allocation25 + $0x70] sm:$0xff]  ;;  %2446 = vmatpush.msra.mxu3 %v2408_v53  ;;  %v2488_v53 = vld [vmem:[%s3862_s12 + $0xa0] sm:$0xff] }
 0x2e3   :  { %2302 = vmatpush.msra.mxu0 %v2289_v39  ;;  %2424 = vmatpush.msra.mxu2 %v2411_v32  ;;  %v2409_v39 = vld [vmem:[#allocation25 + $0x60] sm:$0xff]  ;;  %v2477_v32 = vld [vmem:[%s3862_s12 + $0x48] sm:$0xff] }
 0x2e4   :  { %2447 = vmatpush.msra.mxu3 %v2406_v37  ;;  %v2469_v37 = vld [vmem:[%s3862_s12 + $0x8] sm:$0xff] }
 0x2e5   :  { %v1813_v55 = vpop.f32.mrf.mxu3  ;;  %2303 = vmatpush.msra.mxu0 %v2287_v44  ;;  %v2347_v44 = vld [vmem:[#allocation23 + $0x58] sm:$0xff]  ;;  %2425 = vmatpush.msra.mxu2 %v2409_v39  ;;  %v2491_v39 = vld [vmem:[%s3862_s12 + $0xb8] sm:$0xff] }
 0x2e6   :  { %v1814_v48 = vadd.f32 %v1813_v55, %v1794_v52  ;;  %v2407_v52 = vld [vmem:[#allocation25 + $0x50] sm:$0xff]  ;;  %v2344_v55 = vld [vmem:[#allocation23 + $0x40] sm:$0xff]  ;;  %2448 = vmatpush.msra.mxu3 %v2404_v28 }
 0x2e7   :  { %2304 = vmatpush.msra.mxu0 %v2285_v56  ;;  %v2345_v56 = vld [vmem:[#allocation23 + $0x48] sm:$0xff]  ;;  %2426 = vmatpush.msra.mxu2 %v2407_v52 }
 0x2e8   :  { %v1817_v58 = vmax.f32 %v1814_v48, 0.0  ;;  %v2405_v48 = vld [vmem:[#allocation25 + $0x40] sm:$0xff]  ;;  %v2472_v52 = vld [vmem:[%s3862_s12 + $0x20] sm:$0xff] }
 0x2e9   :  { %2305 = vmatpush.msra.mxu0 %v2283_v49  ;;  %2427 = vmatpush.msra.mxu2 %v2405_v48  ;;  %v2340_v49 = vld [vmem:[#allocation23 + $0x20] sm:$0xff]  ;;  %v2486_v48 = vld [vmem:[%s3862_s12 + $0x90] sm:$0xff] }
 0x2ea   :  { %1890 = vmatmul.f32.vlgmr.msra.gmra.mxu1 %v1817_v58  ;;  %2056 = vmatmul.f32.vlgmr.msrb.gmra.mxu0 %v2034_v22  ;;  %v2342_v22 = vld [vmem:[#allocation23 + $0x30] sm:$0xff]  ;;  %v2343_v58 = vld [vmem:[#allocation23 + $0x38] sm:$0xff] }
 0x2eb   :  { %2322 = vmatpush.msra.mxu1 %v2290_v60  ;;  %2306 = vmatpush.msra.mxu0 %v2281_v50  ;;  %v2607_v60 = vld [vmem:[#allocation17] ss:$0 sm:$0xff] }
 0x2ec   :  { %2428 = vmatpush.msra.mxu2 %v2403_v46 }
 0x2ed   :  { %2323 = vmatpush.msra.mxu1 %v2288_v61  ;;  %2307 = vmatpush.msra.mxu0 %v2279_v20  ;;  %v2402_v61 = vld [vmem:[#allocation25 + $0x28] sm:$0xff] }
 0x2ee   :  { %2429 = vmatpush.msra.mxu2 %v2401_v51  ;;  %2449 = vmatpush.msra.mxu3 %v2402_v61 }
 0x2ef   :  { %2324 = vmatpush.msra.mxu1 %v2286_v63  ;;  %2308 = vmatpush.msra.mxu0 %v2277_v27 }
 0x2f0   :  { %2430 = vmatpush.msra.mxu2 %v2399_v59  ;;  %2450 = vmatpush.msra.mxu3 %v2400_v45 }
 0x2f1   :  { %2325 = vmatpush.msra.mxu1 %v2284_v5  ;;  %2309 = vmatpush.msra.mxu0 %v2275_v6  ;;  %v2397_v5 = vld [vmem:[#allocation25] sm:$0xff] }
 0x2f2   :  { %2076 = vmatmul.f32.vlgmr.msrb.gmra.mxu1 %v2035_v2  ;;  %2431 = vmatpush.msra.mxu2 %v2397_v5  ;;  %v2479_v6 = vld [vmem:[%s3862_s12 + $0x58] sm:$0xff] }
 0x2f3   :  { %2326 = vmatpush.msra.mxu1 %v2282_v16  ;;  %2363 = vmatpush.msrb.mxu0 %v2350_v30  ;;  %v2478_v30 = vld [vmem:[%s3862_s12 + $0x50] sm:$0xff] }
 0x2f4   :  { %2451 = vmatpush.msra.mxu3 %v2398_v8 }
 0x2f5   :  { %2327 = vmatpush.msra.mxu1 %v2280_v21  ;;  %2364 = vmatpush.msrb.mxu0 %v2348_v36  ;;  %v2492_v36 = vld [vmem:[%s3862_s12 + $0xc0] sm:$0xff] }
 0x2f7   :  { %2328 = vmatpush.msra.mxu1 %v2278_v29  ;;  %2365 = vmatpush.msrb.mxu0 %v2346_v41  ;;  %v2490_v41 = vld [vmem:[%s3862_s12 + $0xb0] sm:$0xff] }
 0x2f9   :  { %2329 = vmatpush.msra.mxu1 %v2276_v7  ;;  %2366 = vmatpush.msrb.mxu0 %v2344_v55  ;;  %v2495_v7 = vld [vmem:[%s3862_s12 + $0xd8] sm:$0xff] }
 0x2fa   :  { %v2487_v55 = vld [vmem:[%s3862_s12 + $0x98] sm:$0xff] }
 0x2fb   :  { %2383 = vmatpush.msrb.mxu1 %v2351_v31  ;;  %2367 = vmatpush.msrb.mxu0 %v2342_v22  ;;  %v2494_v31 = vld [vmem:[%s3862_s12 + $0xd0] sm:$0xff]  ;;  %v2468_v22 = vld [vmem:[%s3862_s12] sm:$0xff] }
 0x2fd   :  { %v1975_v43 = vpop.f32.mrf.mxu3  ;;  %2384 = vmatpush.msrb.mxu1 %v2349_v38  ;;  %2368 = vmatpush.msrb.mxu0 %v2340_v49  ;;  %v2475_v38 = vld [vmem:[%s3862_s12 + $0x38] sm:$0xff] }
 0x2fe   :  { %v1976_v54 = vadd.f32 %v2605_v35, %v1975_v43  ;;  %v2476_v35 = vld [vmem:[%s3862_s12 + $0x40] sm:$0xff]  ;;  %v2473_v43 = vld [vmem:[%s3862_s12 + $0x28] sm:$0xff] }
 0x2ff   :  { %2385 = vmatpush.msrb.mxu1 %v2347_v44  ;;  %2369 = vmatpush.msrb.mxu0 %v2338_v62  ;;  %v2489_v44 = vld [vmem:[%s3862_s12 + $0xa8] sm:$0xff] }
 0x300   :  { %v1978_v57 = vmax.f32 %v1976_v54, 0.0  ;;  %v2471_v54 = vld [vmem:[%s3862_s12 + $0x18] sm:$0xff] }
 0x301   :  { %2386 = vmatpush.msrb.mxu1 %v2345_v56  ;;  %2370 = vmatpush.msrb.mxu0 %v2336_v3  ;;  %v2097_v24 = vpop.f32.mrf.mxu2  ;;  %v2470_v56 = vld [vmem:[%s3862_s12 + $0x10] sm:$0xff] }
 0x302   :  { %2573 = vmatmul.msk.f32.vlgmr.msra.gmra.mxu0 %vm2191_vm0, %v1978_v57  ;;  %2574 = vmatmul.msk.f32.vlgmr.msra.gmra.mxu1 %vm2191_vm0, %v1978_v57  ;;  %v2485_v57 = vld [vmem:[%s3862_s12 + $0x88] sm:$0xff] }
 0x303   :  { %2387 = vmatpush.msrb.mxu1 %v2343_v58  ;;  %2504 = vmatpush.msra.mxu0 %v2483_v9  ;;  %v2484_v58 = vld [vmem:[%s3862_s12 + $0x80] sm:$0xff]  ;;  %s3088_s12 = smov [#allocation29]  }
 0x304   :  { %s2551_s22 = sshll.u32 %s3088_s12, 4  ;;  %s2552_s22 = int_to_ptr.vmem [resolvable:$true] %s2551_s22 }
 0x305   :  { %2388 = vmatpush.msrb.mxu1 %v2341_v26  ;;  %2505 = vmatpush.msra.mxu0 %v2482_v11 }
 0x307   :  { %2389 = vmatpush.msrb.mxu1 %v2339_v33  ;;  %2506 = vmatpush.msra.mxu0 %v2481_v12 }
 0x309   :  { %2390 = vmatpush.msrb.mxu1 %v2337_v4  ;;  %2507 = vmatpush.msra.mxu0 %v2480_v0 }
 0x30b   :  { %2524 = vmatpush.msra.mxu1 %v2499_v10  ;;  %2508 = vmatpush.msra.mxu0 %v2479_v6 }
 0x30d   :  { %2525 = vmatpush.msra.mxu1 %v2498_v42  ;;  %2509 = vmatpush.msra.mxu0 %v2478_v30 }
 0x30f   :  { %2526 = vmatpush.msra.mxu1 %v2497_v13  ;;  %2510 = vmatpush.msra.mxu0 %v2477_v32 }
 0x311   :  { %2527 = vmatpush.msra.mxu1 %v2496_v47  ;;  %2511 = vmatpush.msra.mxu0 %v2476_v35 }
 0x313   :  { %2528 = vmatpush.msra.mxu1 %v2495_v7  ;;  %2512 = vmatpush.msra.mxu0 %v2475_v38 }
 0x315   :  { %2529 = vmatpush.msra.mxu1 %v2494_v31  ;;  %2513 = vmatpush.msra.mxu0 %v2474_v40 }
 0x317   :  { %2530 = vmatpush.msra.mxu1 %v2493_v34  ;;  %2514 = vmatpush.msra.mxu0 %v2473_v43 }
 0x319   :  { %2531 = vmatpush.msra.mxu1 %v2492_v36  ;;  %2515 = vmatpush.msra.mxu0 %v2472_v52 }
 0x31b   :  { %2532 = vmatpush.msra.mxu1 %v2491_v39  ;;  %2516 = vmatpush.msra.mxu0 %v2471_v54 }
 0x31d   :  { %v2139_v63 = vpop.f32.mrf.mxu3  ;;  %2533 = vmatpush.msra.mxu1 %v2490_v41  ;;  %2517 = vmatpush.msra.mxu0 %v2470_v56 }
 0x31e   :  { %v2140_v2 = vadd.f32 %v2607_v60, %v2139_v63 }
 0x31f   :  { %2534 = vmatpush.msra.mxu1 %v2489_v44  ;;  %2518 = vmatpush.msra.mxu0 %v2469_v37 }
 0x320   :  { %v2142_v1 = vmax.f32 %v2140_v2, 0.0  ;;  %v2458_v2 = vld [vmem:[#allocation26] sm:$0x3] }
 0x321   :  { %2535 = vmatpush.msra.mxu1 %v2488_v53  ;;  %2519 = vmatpush.msra.mxu0 %v2468_v22  ;;  %v2460_v5 = vperm.slane %v2458_v2, 0  ;;  %v2461_v8 = vperm.slane %v2458_v2, 1 }
 0x322   :  { %2575 = vmatmul.msk.f32.vlgmr.msrb.gmra.mxu0 %vm2191_vm0, %v2142_v1  ;;  %2576 = vmatmul.msk.f32.vlgmr.msrb.gmra.mxu1 %vm2191_vm0, %v2142_v1 }
 0x323   :  { %2536 = vmatpush.msra.mxu1 %v2487_v55 }
 0x325   :  { %2537 = vmatpush.msra.mxu1 %v2486_v48 }
 0x327   :  { %2538 = vmatpush.msra.mxu1 %v2485_v57 }
 0x329   :  { %2539 = vmatpush.msra.mxu1 %v2484_v58 }
 0x35f   :  { %v1871_v14 = vpop.f32.mrf.mxu0 }
 0x360   :  { %v1872_v50 = vadd.f32 %v2603_v15, %v1871_v14  ;;  %v2212_v46 = vpop.f32.mrf.mxu2  ;;  %v2232_v28 = vpop.f32.mrf.mxu3  ;;  %v2608_v15 = vld [vmem:[#allocation28] ss:$0 sm:$0xff] }
 0x367   :  { %v1891_v16 = vpop.f32.mrf.mxu1  ;;  %v2057_v19 = vpop.f32.mrf.mxu0 }
 0x368   :  { %v1892_v17 = vadd.f32 %v1891_v16, %v1872_v50  ;;  %v2058_v21 = vadd.f32 %v2606_v18, %v2057_v19 }
 0x36a   :  { %v1894_v20 = vmax.f32 %v1892_v17, 0.0 }
 0x36c   :  { %2251 = vmatmul.f32.vlgmr.msrb.gmra.mxu2 %v1894_v20  ;;  %2271 = vmatmul.f32.vlgmr.msrb.gmra.mxu3 %v1894_v20 }
 0x36f   :  { %v2077_v23 = vpop.f32.mrf.mxu1 }
 0x370   :  { %v2078_v25 = vadd.f32 %v2077_v23, %v2058_v21 }
 0x372   :  { %v2098_v27 = vadd.f32 %v2097_v24, %v2078_v25 }
 0x374   :  { %v2100_v29 = vmax.f32 %v2098_v27, 0.0 }
 0x376   :  { %2577 = vmatmul.msk.f32.vlgmr.msra.gmra.mxu2 %vm2191_vm0, %v2100_v29  ;;  %2578 = vmatmul.msk.f32.vlgmr.msra.gmra.mxu3 %vm2191_vm0, %v2100_v29 }
 0x37f   :  { %v2311_v60 = vpop.f32.mrf.mxu0  ;;  %v2331_v49 = vpop.f32.mrf.mxu1 }
 0x39f   :  { %v2372_v59 = vpop.f32.mrf.mxu0  ;;  %v2392_v45 = vpop.f32.mrf.mxu1 }
 0x3ef   :  { %v2252_v26 = vpop.f32.mrf.mxu2  ;;  %v2272_v51 = vpop.f32.mrf.mxu3 }
 0x3f0   :  { %v2253_v61 = vadd.f32 %v2252_v26, %v2212_v46  ;;  %v2273_v62 = vadd.f32 %v2272_v51, %v2232_v28 }
 0x3f2   :  { %v2334_v33 = vadd.f32 %v2311_v60, %v2253_v61  ;;  %v2335_v63 = vadd.f32 %v2331_v49, %v2273_v62 }
 0x3f4   :  { %v2395_v3 = vadd.f32 %v2372_v59, %v2334_v33  ;;  %v2396_v4 = vadd.f32 %v2392_v45, %v2335_v63 }
 0x3f9   :  { %v2433_v1 = vpop.f32.mrf.mxu2  ;;  %v2453_v9 = vpop.f32.mrf.mxu3 }
 0x3fa   :  { %v2456_v10 = vadd.f32 %v2433_v1, %v2395_v3  ;;  %v2457_v11 = vadd.f32 %v2453_v9, %v2396_v4 }
 0x3fc   :  { %v2464_v42 = vadd.f32 %v2460_v5, %v2456_v10  ;;  %v2465_v12 = vadd.f32 %v2461_v8, %v2457_v11 }
 0x3fe   :  { %v2466_v13 = vmax.f32 %v2464_v42, 0.0  ;;  %v2467_v14 = vmax.f32 %v2465_v12, 0.0 }
 0x400   :  { %2520 = vmatmul.f32.vlgmr.msra.gmra.mxu0 %v2466_v13  ;;  %2540 = vmatmul.f32.vlgmr.msra.gmra.mxu1 %v2467_v14 }
 0x47d   :  { %v2521_v50 = vpop.f32.mrf.mxu0  ;;  %v2541_v17 = vpop.f32.mrf.mxu1 }
 0x47e   :  { %v2522_v16 = vadd.f32 %v2608_v15, %v2521_v50 }
 0x480   :  { %v2542_v18 = vadd.f32 %v2541_v17, %v2522_v16 }
 0x482   :  { %2545 = vst.msk [vmem:[#allocation29] sm:$0x3] %vm2544_vm1, %v2542_v18 }
 0x483   :  { %2556 = dma.vmem_to_hbm [thread:$0]  %s2552_s22, 32, %s2554_s19, [#allocation4]  }
 0x484   :  { %3063 = dma.done.wait [#allocation4], 32  }
 0x485   :  { %3064 = vsyncadd [#allocation4], 4294967264 }
 0x486   :  { %2561 = vsyncpa [#allocation3], 1 }
 0x487   :  { %2562 = vsyncpa [#allocation6], 1 }
 0x488   :  { %2563 = vsyncpa [#allocation9], 1 }
 0x489   :  { %2564 = vsyncpa [#allocation12], 1 }
 0x48a   :  { %2565 = vsyncpa [#allocation15], 1 }
 0x48b   :  { %2566 = vsyncpa [#allocation18], 1 }
 0x48c   :  { %2567 = vsyncpa [#allocation21], 1 }
 0x48d   :  { %2568 = vsyncpa [#allocation24], 1 }
 0x48e   :  { %2569 = vsyncpa [#allocation27], 1 }
 0x48f   :  { %2570 = vsyncpa [#allocation4], 1 }

</bundles_post_ra>
